<compile_context>
chip_gen: v7x
topology: tpu7x:2x2x1
jax: 0.10.0
libtpu: 0.0.40
codegen_flags: <defaults>
</compile_context>

<pallas_src>
import jax
import jax.numpy as jnp
from jax.experimental import pallas as pl
from jax.experimental.pallas import tpu as pltpu
import numpy as np

HIDDEN_SIZE = 50
INPUT_SIZE = 1
NUM_LAYERS = 2
OUTPUT_SIZE = 1
GP = 128                      # padded per-gate lane width (H=50 -> 128 lanes)


def lstm_kernel(x_ref, wih0_ref, b0_ref, w_fused_ref, b1_ref, wfc_ref, bfc_ref,
                out_ref, xw0_scr, hcat_scr):
    T, B, _ = x_ref.shape
    gp = GP

    # --- off-chain precompute: layer-0 input projection + bias, all steps ---
    wih0 = wih0_ref[...]                       # (1, 4*GP), tiny -> load once
    b0 = b0_ref[...]                           # (1, 4*GP)
    for t in range(T):
        xw0_scr[t] = x_ref[t] * wih0 + b0      # (B,1)*(1,4GP)+(1,4GP) -> (B,4GP)

    # Hoist the bias broadcast out of the recurrence (JAX doesn't CSE it).
    b1_b = jnp.broadcast_to(b1_ref[...], (B, 4 * gp))

    def sig(v):                                # one EUP tanh + VPU fma
        return 0.5 * jnp.tanh(0.5 * v) + 0.5

    def act(gates, c):
        # PyTorch gate order (i, f, g, o); each gate in its own 128-lane block.
        i = sig(gates[:, 0 * gp:1 * gp])
        f = sig(gates[:, 1 * gp:2 * gp])
        g = jnp.tanh(gates[:, 2 * gp:3 * gp])
        o = sig(gates[:, 3 * gp:4 * gp])
        c_new = f * c + i * g
        h_new = o * jnp.tanh(c_new)
        return h_new, c_new

    # Zero initial state (h == c == 0, as in the module); padded lanes stay 0.
    c0 = jnp.zeros((B, gp), jnp.float32)
    c1 = jnp.zeros((B, gp), jnp.float32)
    h1 = jnp.zeros((B, gp), jnp.float32)
    rec0 = jnp.zeros((B, 4 * gp), jnp.float32)      # h0(t-1) @ Whh0
    hcat_scr[...] = jnp.zeros((B, 2 * gp), jnp.bfloat16)

    # --- fully unrolled recurrence: ONE fused matmul per step ---
    for t in range(T):
        gates0 = xw0_scr[t] if t == 0 else xw0_scr[t] + rec0
        h0, c0 = act(gates0, c0)
        # h0(t) -> lanes [0:GP] of the persistent matmul LHS (bf16).
        hcat_scr[:, 0:gp] = h0.astype(jnp.bfloat16)
        # Fused matmul: cols [0:4GP] -> layer-1 gates(t), cols [4GP:8GP] ->
        # layer-0 recurrent term for step t+1.  bf16 x bf16 -> f32 accumulate.
        y = jnp.dot(hcat_scr[...], w_fused_ref[...],
                    preferred_element_type=jnp.float32)
        gates1 = y[:, 0:4 * gp] + b1_b
        rec0 = y[:, 4 * gp:8 * gp]
        h1, c1 = act(gates1, c1)
        if t + 1 < T:
            # h1(t) -> lanes [GP:2GP] for the next step's fused matmul.
            hcat_scr[:, gp:2 * gp] = h1.astype(jnp.bfloat16)

    # --- fc on the last timestep's top-layer hidden: VPU mul + lane reduce ---
    out_ref[...] = (jnp.sum(h1 * wfc_ref[...], axis=-1, keepdims=True)
                    + bfc_ref[...])


def _pad_gate_cols(w, h=HIDDEN_SIZE, gp=GP):
    """(in_dim, 4*h) -> (in_dim, 4*gp); gate k lands in lanes [k*gp, k*gp+h)."""
    out = jnp.zeros((w.shape[0], 4 * gp), w.dtype)
    for k in range(4):
        out = out.at[:, k * gp:k * gp + h].set(w[:, k * h:(k + 1) * h])
    return out


def prepare_params(params):
    """One-time prep (OUTSIDE the per-call jit): pad to 128-lane gate blocks,
    assemble the fused per-step weight, cast matmul weights to bf16."""
    (wih0, whh0, b0, wih1, whh1, b1, wfc, bfc) = params
    H, gp = HIDDEN_SIZE, GP
    assert OUTPUT_SIZE == 1  # fc is done as a lane reduction

    wih0_p = _pad_gate_cols(wih0)                                # (1, 4*GP) f32
    b0_p = _pad_gate_cols(b0)                                    # (1, 4*GP) f32
    b1_p = _pad_gate_cols(b1)                                    # (1, 4*GP) f32

    # Fused per-step weight (2*GP, 8*GP):
    #   rows [0:GP]    <- h0 lanes, rows [GP:2GP] <- h1 lanes
    #   cols [0:4GP]   = [Wih1 ; Whh1]  (layer-1 gates, drained first)
    #   cols [4GP:8GP] = [Whh0 ; 0   ]  (next step's layer-0 recurrent term)
    w_fused = jnp.zeros((2 * gp, 8 * gp), jnp.float32)
    w_fused = w_fused.at[:H, 0:4 * gp].set(_pad_gate_cols(wih1))
    w_fused = w_fused.at[gp:gp + H, 0:4 * gp].set(_pad_gate_cols(whh1))
    w_fused = w_fused.at[:H, 4 * gp:8 * gp].set(_pad_gate_cols(whh0))
    w_fused = w_fused.astype(jnp.bfloat16)

    # fc weight as a zero-padded lane row (fc = VPU mul + lane reduction).
    wfc_row = jnp.zeros((1, gp), jnp.float32).at[0, :H].set(wfc[:, 0])
    return (wih0_p, b0_p, w_fused, b1_p, wfc_row, bfc)


@jax.jit
def lstm_model(x, prepared):
    """x: (B, T, INPUT_SIZE) float32, batch_first (PyTorch convention)."""
    B, T, _ = x.shape
    x_tbi = jnp.transpose(x, (1, 0, 2))        # time-major for the kernel
    wih0_p, b0_p, w_fused, b1_p, wfc_row, bfc = prepared

    vmem = pl.BlockSpec(memory_space=pltpu.MemorySpace.VMEM)
    return pl.pallas_call(
        lstm_kernel,
        out_shape=jax.ShapeDtypeStruct((B, OUTPUT_SIZE), jnp.float32),
        in_specs=[vmem] * 7,
        out_specs=vmem,
        scratch_shapes=[
            pltpu.VMEM((T, B, 4 * GP), jnp.float32),   # precomputed x-projection
            pltpu.VMEM((B, 2 * GP), jnp.bfloat16),     # persistent [h0 | h1] LHS
        ],
    )(x_tbi, wih0_p, b0_p, w_fused, b1_p, wfc_row, bfc)


def init_params(key):
    """Deterministic init; shapes follow nn.LSTM / nn.Linear, weights
    pre-transposed to (in_dim, out_dim) for the kernel (unpadded/logical)."""
    H = HIDDEN_SIZE
    k = 1.0 / np.sqrt(H)
    keys = jax.random.split(key, 12)

    def u(kk, shape):
        return jax.random.uniform(kk, shape, jnp.float32, minval=-k, maxval=k)

    # layer 0: W_ih (4H, I) -> (I, 4H); W_hh (4H, H) -> (H, 4H)
    wih0 = u(keys[0], (INPUT_SIZE, 4 * H))
    whh0 = u(keys[1], (H, 4 * H))
    b0 = u(keys[2], (1, 4 * H)) + u(keys[3], (1, 4 * H))        # b_ih + b_hh
    # layer 1: input is layer-0 hidden state (H)
    wih1 = u(keys[4], (H, 4 * H))
    whh1 = u(keys[5], (H, 4 * H))
    b1 = u(keys[6], (1, 4 * H)) + u(keys[7], (1, 4 * H))
    # fc: (OUTPUT_SIZE, H) -> (H, OUTPUT_SIZE)
    kf = 1.0 / np.sqrt(H)
    wfc = jax.random.uniform(keys[8], (H, OUTPUT_SIZE), jnp.float32, -kf, kf)
    bfc = jax.random.uniform(keys[9], (1, OUTPUT_SIZE), jnp.float32, -kf, kf)
    return (wih0, whh0, b0, wih1, whh1, b1, wfc, bfc)


def lstm_model_ref(x, params):
    """Pure-JAX reference of the same forward pass, for verification."""
    (wih0, whh0, b0, wih1, whh1, b1, wfc, bfc) = params
    B, T, _ = x.shape
    H = HIDDEN_SIZE

    def cell(x_t, h, c, wih, whh, b):
        g = x_t @ wih + h @ whh + b
        i = jax.nn.sigmoid(g[:, 0 * H:1 * H])
        f = jax.nn.sigmoid(g[:, 1 * H:2 * H])
        gg = jnp.tanh(g[:, 2 * H:3 * H])
        o = jax.nn.sigmoid(g[:, 3 * H:4 * H])
        c = f * c + i * gg
        h = o * jnp.tanh(c)
        return h, c

    h0 = c0 = h1 = c1 = jnp.zeros((B, H), jnp.float32)
    for t in range(T):
        x_t = x[:, t, :]
        h0, c0 = cell(x_t, h0, c0, wih0, whh0, b0)
        h1, c1 = cell(h0, h1, c1, wih1, whh1, b1)
    return h1 @ wfc + bfc


if __name__ == "__main__":
    key = jax.random.PRNGKey(0)
    k_x, k_p = jax.random.split(key)

    B, T = 2, 8
    x = jax.random.normal(k_x, (B, T, INPUT_SIZE), jnp.float32)
    params = init_params(k_p)
    prepared = prepare_params(params)      # one-time pad / fuse / bf16 cast

    out = lstm_model(x, prepared)
    out = jax.block_until_ready(out)

    ref = lstm_model_ref(x, params)
    np.testing.assert_allclose(np.asarray(out), np.asarray(ref),
                               rtol=2e-3, atol=2e-3)

    print("KERNEL_OK")
</pallas_src>

<mosaic_0001>
module attributes {stable_mosaic.version = 11 : i64} {
  func.func @lstm_kernel(%arg0: memref<8x2x1xf32, #tpu.memory_space<vmem>>, %arg1: memref<1x512xf32, #tpu.memory_space<vmem>>, %arg2: memref<1x512xf32, #tpu.memory_space<vmem>>, %arg3: memref<256x1024xbf16, #tpu.memory_space<vmem>>, %arg4: memref<1x512xf32, #tpu.memory_space<vmem>>, %arg5: memref<1x128xf32, #tpu.memory_space<vmem>>, %arg6: memref<1x1xf32, #tpu.memory_space<vmem>>, %arg7: memref<2x1xf32, #tpu.memory_space<vmem>>, %arg8: memref<8x2x512xf32, #tpu.memory_space<vmem>>, %arg9: memref<2x256xbf16, #tpu.memory_space<vmem>>) attributes {dimension_semantics = [], scalar_prefetch = 0 : i64, scratch_operands = 2 : i64, tpu.core_type = #tpu.core_type<tc>} {
    %c0 = arith.constant 0 : index
    %c0_0 = arith.constant 0 : index
    %0 = vector.load %arg1[%c0, %c0_0] : memref<1x512xf32, #tpu.memory_space<vmem>>, vector<1x512xf32>
    %c0_1 = arith.constant 0 : index
    %c0_2 = arith.constant 0 : index
    %1 = vector.load %arg2[%c0_1, %c0_2] : memref<1x512xf32, #tpu.memory_space<vmem>>, vector<1x512xf32>
    %c0_3 = arith.constant 0 : index
    %c0_4 = arith.constant 0 : index
    %c0_5 = arith.constant 0 : index
    %2 = vector.load %arg0[%c0_3, %c0_4, %c0_5] : memref<8x2x1xf32, #tpu.memory_space<vmem>>, vector<1x2x1xf32>
    %3 = vector.shape_cast %2 : vector<1x2x1xf32> to vector<2x1xf32>
    %4 = vector.broadcast %3 : vector<2x1xf32> to vector<2x512xf32>
    %5 = vector.broadcast %0 : vector<1x512xf32> to vector<2x512xf32>
    %6 = arith.mulf %4, %5 : vector<2x512xf32>
    %7 = vector.broadcast %1 : vector<1x512xf32> to vector<2x512xf32>
    %8 = arith.addf %6, %7 : vector<2x512xf32>
    %c0_6 = arith.constant 0 : index
    %c0_7 = arith.constant 0 : index
    %c0_8 = arith.constant 0 : index
    %9 = vector.load %arg8[%c0_6, %c0_7, %c0_8] : memref<8x2x512xf32, #tpu.memory_space<vmem>>, vector<1x2x512xf32>
    %10 = vector.shape_cast %9 : vector<1x2x512xf32> to vector<2x512xf32>
    %11 = vector.shape_cast %8 : vector<2x512xf32> to vector<1x2x512xf32>
    tpu.vector_store %arg8[%c0_6, %c0_7, %c0_8], %11 {strides = array<i32>} : memref<8x2x512xf32, #tpu.memory_space<vmem>>, vector<1x2x512xf32>,
    %c1 = arith.constant 1 : index
    %c0_9 = arith.constant 0 : index
    %c0_10 = arith.constant 0 : index
    %12 = vector.load %arg0[%c1, %c0_9, %c0_10] : memref<8x2x1xf32, #tpu.memory_space<vmem>>, vector<1x2x1xf32>
    %13 = vector.shape_cast %12 : vector<1x2x1xf32> to vector<2x1xf32>
    %14 = vector.broadcast %13 : vector<2x1xf32> to vector<2x512xf32>
    %15 = vector.broadcast %0 : vector<1x512xf32> to vector<2x512xf32>
    %16 = arith.mulf %14, %15 : vector<2x512xf32>
    %17 = vector.broadcast %1 : vector<1x512xf32> to vector<2x512xf32>
    %18 = arith.addf %16, %17 : vector<2x512xf32>
    %c1_11 = arith.constant 1 : index
    %c0_12 = arith.constant 0 : index
    %c0_13 = arith.constant 0 : index
    %19 = vector.load %arg8[%c1_11, %c0_12, %c0_13] : memref<8x2x512xf32, #tpu.memory_space<vmem>>, vector<1x2x512xf32>
    %20 = vector.shape_cast %19 : vector<1x2x512xf32> to vector<2x512xf32>
    %21 = vector.shape_cast %18 : vector<2x512xf32> to vector<1x2x512xf32>
    tpu.vector_store %arg8[%c1_11, %c0_12, %c0_13], %21 {strides = array<i32>} : memref<8x2x512xf32, #tpu.memory_space<vmem>>, vector<1x2x512xf32>,
    %c2 = arith.constant 2 : index
    %c0_14 = arith.constant 0 : index
    %c0_15 = arith.constant 0 : index
    %22 = vector.load %arg0[%c2, %c0_14, %c0_15] : memref<8x2x1xf32, #tpu.memory_space<vmem>>, vector<1x2x1xf32>
    %23 = vector.shape_cast %22 : vector<1x2x1xf32> to vector<2x1xf32>
    %24 = vector.broadcast %23 : vector<2x1xf32> to vector<2x512xf32>
    %25 = vector.broadcast %0 : vector<1x512xf32> to vector<2x512xf32>
    %26 = arith.mulf %24, %25 : vector<2x512xf32>
    %27 = vector.broadcast %1 : vector<1x512xf32> to vector<2x512xf32>
    %28 = arith.addf %26, %27 : vector<2x512xf32>
    %c2_16 = arith.constant 2 : index
    %c0_17 = arith.constant 0 : index
    %c0_18 = arith.constant 0 : index
    %29 = vector.load %arg8[%c2_16, %c0_17, %c0_18] : memref<8x2x512xf32, #tpu.memory_space<vmem>>, vector<1x2x512xf32>
    %30 = vector.shape_cast %29 : vector<1x2x512xf32> to vector<2x512xf32>
    %31 = vector.shape_cast %28 : vector<2x512xf32> to vector<1x2x512xf32>
    tpu.vector_store %arg8[%c2_16, %c0_17, %c0_18], %31 {strides = array<i32>} : memref<8x2x512xf32, #tpu.memory_space<vmem>>, vector<1x2x512xf32>,
    %c3 = arith.constant 3 : index
    %c0_19 = arith.constant 0 : index
    %c0_20 = arith.constant 0 : index
    %32 = vector.load %arg0[%c3, %c0_19, %c0_20] : memref<8x2x1xf32, #tpu.memory_space<vmem>>, vector<1x2x1xf32>
    %33 = vector.shape_cast %32 : vector<1x2x1xf32> to vector<2x1xf32>
    %34 = vector.broadcast %33 : vector<2x1xf32> to vector<2x512xf32>
    %35 = vector.broadcast %0 : vector<1x512xf32> to vector<2x512xf32>
    %36 = arith.mulf %34, %35 : vector<2x512xf32>
    %37 = vector.broadcast %1 : vector<1x512xf32> to vector<2x512xf32>
    %38 = arith.addf %36, %37 : vector<2x512xf32>
    %c3_21 = arith.constant 3 : index
    %c0_22 = arith.constant 0 : index
    %c0_23 = arith.constant 0 : index
    %39 = vector.load %arg8[%c3_21, %c0_22, %c0_23] : memref<8x2x512xf32, #tpu.memory_space<vmem>>, vector<1x2x512xf32>
    %40 = vector.shape_cast %39 : vector<1x2x512xf32> to vector<2x512xf32>
    %41 = vector.shape_cast %38 : vector<2x512xf32> to vector<1x2x512xf32>
    tpu.vector_store %arg8[%c3_21, %c0_22, %c0_23], %41 {strides = array<i32>} : memref<8x2x512xf32, #tpu.memory_space<vmem>>, vector<1x2x512xf32>,
    %c4 = arith.constant 4 : index
    %c0_24 = arith.constant 0 : index
    %c0_25 = arith.constant 0 : index
    %42 = vector.load %arg0[%c4, %c0_24, %c0_25] : memref<8x2x1xf32, #tpu.memory_space<vmem>>, vector<1x2x1xf32>
    %43 = vector.shape_cast %42 : vector<1x2x1xf32> to vector<2x1xf32>
    %44 = vector.broadcast %43 : vector<2x1xf32> to vector<2x512xf32>
    %45 = vector.broadcast %0 : vector<1x512xf32> to vector<2x512xf32>
    %46 = arith.mulf %44, %45 : vector<2x512xf32>
    %47 = vector.broadcast %1 : vector<1x512xf32> to vector<2x512xf32>
    %48 = arith.addf %46, %47 : vector<2x512xf32>
    %c4_26 = arith.constant 4 : index
    %c0_27 = arith.constant 0 : index
    %c0_28 = arith.constant 0 : index
    %49 = vector.load %arg8[%c4_26, %c0_27, %c0_28] : memref<8x2x512xf32, #tpu.memory_space<vmem>>, vector<1x2x512xf32>
    %50 = vector.shape_cast %49 : vector<1x2x512xf32> to vector<2x512xf32>
    %51 = vector.shape_cast %48 : vector<2x512xf32> to vector<1x2x512xf32>
    tpu.vector_store %arg8[%c4_26, %c0_27, %c0_28], %51 {strides = array<i32>} : memref<8x2x512xf32, #tpu.memory_space<vmem>>, vector<1x2x512xf32>,
    %c5 = arith.constant 5 : index
    %c0_29 = arith.constant 0 : index
    %c0_30 = arith.constant 0 : index
    %52 = vector.load %arg0[%c5, %c0_29, %c0_30] : memref<8x2x1xf32, #tpu.memory_space<vmem>>, vector<1x2x1xf32>
    %53 = vector.shape_cast %52 : vector<1x2x1xf32> to vector<2x1xf32>
    %54 = vector.broadcast %53 : vector<2x1xf32> to vector<2x512xf32>
    %55 = vector.broadcast %0 : vector<1x512xf32> to vector<2x512xf32>
    %56 = arith.mulf %54, %55 : vector<2x512xf32>
    %57 = vector.broadcast %1 : vector<1x512xf32> to vector<2x512xf32>
    %58 = arith.addf %56, %57 : vector<2x512xf32>
    %c5_31 = arith.constant 5 : index
    %c0_32 = arith.constant 0 : index
    %c0_33 = arith.constant 0 : index
    %59 = vector.load %arg8[%c5_31, %c0_32, %c0_33] : memref<8x2x512xf32, #tpu.memory_space<vmem>>, vector<1x2x512xf32>
    %60 = vector.shape_cast %59 : vector<1x2x512xf32> to vector<2x512xf32>
    %61 = vector.shape_cast %58 : vector<2x512xf32> to vector<1x2x512xf32>
    tpu.vector_store %arg8[%c5_31, %c0_32, %c0_33], %61 {strides = array<i32>} : memref<8x2x512xf32, #tpu.memory_space<vmem>>, vector<1x2x512xf32>,
    %c6 = arith.constant 6 : index
    %c0_34 = arith.constant 0 : index
    %c0_35 = arith.constant 0 : index
    %62 = vector.load %arg0[%c6, %c0_34, %c0_35] : memref<8x2x1xf32, #tpu.memory_space<vmem>>, vector<1x2x1xf32>
    %63 = vector.shape_cast %62 : vector<1x2x1xf32> to vector<2x1xf32>
    %64 = vector.broadcast %63 : vector<2x1xf32> to vector<2x512xf32>
    %65 = vector.broadcast %0 : vector<1x512xf32> to vector<2x512xf32>
    %66 = arith.mulf %64, %65 : vector<2x512xf32>
    %67 = vector.broadcast %1 : vector<1x512xf32> to vector<2x512xf32>
    %68 = arith.addf %66, %67 : vector<2x512xf32>
    %c6_36 = arith.constant 6 : index
    %c0_37 = arith.constant 0 : index
    %c0_38 = arith.constant 0 : index
    %69 = vector.load %arg8[%c6_36, %c0_37, %c0_38] : memref<8x2x512xf32, #tpu.memory_space<vmem>>, vector<1x2x512xf32>
    %70 = vector.shape_cast %69 : vector<1x2x512xf32> to vector<2x512xf32>
    %71 = vector.shape_cast %68 : vector<2x512xf32> to vector<1x2x512xf32>
    tpu.vector_store %arg8[%c6_36, %c0_37, %c0_38], %71 {strides = array<i32>} : memref<8x2x512xf32, #tpu.memory_space<vmem>>, vector<1x2x512xf32>,
    %c7 = arith.constant 7 : index
    %c0_39 = arith.constant 0 : index
    %c0_40 = arith.constant 0 : index
    %72 = vector.load %arg0[%c7, %c0_39, %c0_40] : memref<8x2x1xf32, #tpu.memory_space<vmem>>, vector<1x2x1xf32>
    %73 = vector.shape_cast %72 : vector<1x2x1xf32> to vector<2x1xf32>
    %74 = vector.broadcast %73 : vector<2x1xf32> to vector<2x512xf32>
    %75 = vector.broadcast %0 : vector<1x512xf32> to vector<2x512xf32>
    %76 = arith.mulf %74, %75 : vector<2x512xf32>
    %77 = vector.broadcast %1 : vector<1x512xf32> to vector<2x512xf32>
    %78 = arith.addf %76, %77 : vector<2x512xf32>
    %c7_41 = arith.constant 7 : index
    %c0_42 = arith.constant 0 : index
    %c0_43 = arith.constant 0 : index
    %79 = vector.load %arg8[%c7_41, %c0_42, %c0_43] : memref<8x2x512xf32, #tpu.memory_space<vmem>>, vector<1x2x512xf32>
    %80 = vector.shape_cast %79 : vector<1x2x512xf32> to vector<2x512xf32>
    %81 = vector.shape_cast %78 : vector<2x512xf32> to vector<1x2x512xf32>
    tpu.vector_store %arg8[%c7_41, %c0_42, %c0_43], %81 {strides = array<i32>} : memref<8x2x512xf32, #tpu.memory_space<vmem>>, vector<1x2x512xf32>,
    %c0_44 = arith.constant 0 : index
    %c0_45 = arith.constant 0 : index
    %82 = vector.load %arg4[%c0_44, %c0_45] : memref<1x512xf32, #tpu.memory_space<vmem>>, vector<1x512xf32>
    %83 = vector.shape_cast %82 : vector<1x512xf32> to vector<1x512xf32>
    %84 = vector.broadcast %83 : vector<1x512xf32> to vector<2x512xf32>
    %cst = arith.constant 0.000000e+00 : f32
    %85 = vector.broadcast %cst : f32 to vector<2x128xf32>
    %cst_46 = arith.constant 0.000000e+00 : f32
    %86 = vector.broadcast %cst_46 : f32 to vector<2x128xf32>
    %cst_47 = arith.constant 0.000000e+00 : bf16
    %87 = vector.broadcast %cst_47 : bf16 to vector<2x256xbf16>
    %c0_48 = arith.constant 0 : index
    %c0_49 = arith.constant 0 : index
    %88 = vector.load %arg9[%c0_48, %c0_49] : memref<2x256xbf16, #tpu.memory_space<vmem>>, vector<2x256xbf16>
    tpu.vector_store %arg9[%c0_48, %c0_49], %87 {strides = array<i32>} : memref<2x256xbf16, #tpu.memory_space<vmem>>, vector<2x256xbf16>,
    %c0_50 = arith.constant 0 : index
    %c0_51 = arith.constant 0 : index
    %c0_52 = arith.constant 0 : index
    %89 = vector.load %arg8[%c0_50, %c0_51, %c0_52] : memref<8x2x512xf32, #tpu.memory_space<vmem>>, vector<1x2x512xf32>
    %90 = vector.shape_cast %89 : vector<1x2x512xf32> to vector<2x512xf32>
    %91 = vector.extract_strided_slice %90 {offsets = [0, 0], sizes = [2, 128], strides = [1, 1]} : vector<2x512xf32> to vector<2x128xf32>
    %cst_53 = arith.constant 5.000000e-01 : f32
    %92 = vector.broadcast %cst_53 : f32 to vector<2x128xf32>
    %93 = arith.mulf %92, %91 : vector<2x128xf32>
    %94 = math.tanh %93 : vector<2x128xf32>
    %cst_54 = arith.constant 5.000000e-01 : f32
    %95 = vector.broadcast %cst_54 : f32 to vector<2x128xf32>
    %96 = arith.mulf %95, %94 : vector<2x128xf32>
    %cst_55 = arith.constant 5.000000e-01 : f32
    %97 = vector.broadcast %cst_55 : f32 to vector<2x128xf32>
    %98 = arith.addf %96, %97 : vector<2x128xf32>
    %99 = vector.extract_strided_slice %90 {offsets = [0, 128], sizes = [2, 128], strides = [1, 1]} : vector<2x512xf32> to vector<2x128xf32>
    %cst_56 = arith.constant 5.000000e-01 : f32
    %100 = vector.broadcast %cst_56 : f32 to vector<2x128xf32>
    %101 = arith.mulf %100, %99 : vector<2x128xf32>
    %102 = math.tanh %101 : vector<2x128xf32>
    %cst_57 = arith.constant 5.000000e-01 : f32
    %103 = vector.broadcast %cst_57 : f32 to vector<2x128xf32>
    %104 = arith.mulf %103, %102 : vector<2x128xf32>
    %cst_58 = arith.constant 5.000000e-01 : f32
    %105 = vector.broadcast %cst_58 : f32 to vector<2x128xf32>
    %106 = arith.addf %104, %105 : vector<2x128xf32>
    %107 = vector.extract_strided_slice %90 {offsets = [0, 256], sizes = [2, 128], strides = [1, 1]} : vector<2x512xf32> to vector<2x128xf32>
    %108 = math.tanh %107 : vector<2x128xf32>
    %109 = vector.extract_strided_slice %90 {offsets = [0, 384], sizes = [2, 128], strides = [1, 1]} : vector<2x512xf32> to vector<2x128xf32>
    %cst_59 = arith.constant 5.000000e-01 : f32
    %110 = vector.broadcast %cst_59 : f32 to vector<2x128xf32>
    %111 = arith.mulf %110, %109 : vector<2x128xf32>
    %112 = math.tanh %111 : vector<2x128xf32>
    %cst_60 = arith.constant 5.000000e-01 : f32
    %113 = vector.broadcast %cst_60 : f32 to vector<2x128xf32>
    %114 = arith.mulf %113, %112 : vector<2x128xf32>
    %cst_61 = arith.constant 5.000000e-01 : f32
    %115 = vector.broadcast %cst_61 : f32 to vector<2x128xf32>
    %116 = arith.addf %114, %115 : vector<2x128xf32>
    %117 = arith.mulf %106, %85 : vector<2x128xf32>
    %118 = arith.mulf %98, %108 : vector<2x128xf32>
    %119 = arith.addf %117, %118 : vector<2x128xf32>
    %120 = math.tanh %119 : vector<2x128xf32>
    %121 = arith.mulf %116, %120 : vector<2x128xf32>
    %122 = arith.truncf %121 : vector<2x128xf32> to vector<2x128xbf16>
    %c0_62 = arith.constant 0 : index
    %c0_63 = arith.constant 0 : index
    %123 = vector.load %arg9[%c0_62, %c0_63] : memref<2x256xbf16, #tpu.memory_space<vmem>>, vector<2x128xbf16>
    tpu.vector_store %arg9[%c0_62, %c0_63], %122 {strides = array<i32>} : memref<2x256xbf16, #tpu.memory_space<vmem>>, vector<2x128xbf16>,
    %c0_64 = arith.constant 0 : index
    %c0_65 = arith.constant 0 : index
    %124 = vector.load %arg9[%c0_64, %c0_65] : memref<2x256xbf16, #tpu.memory_space<vmem>>, vector<2x256xbf16>
    %c0_66 = arith.constant 0 : index
    %c0_67 = arith.constant 0 : index
    %125 = vector.load %arg3[%c0_66, %c0_67] : memref<256x1024xbf16, #tpu.memory_space<vmem>>, vector<256x1024xbf16>
    %cst_68 = arith.constant dense<0.000000e+00> : vector<2x1024xf32>
    %126 = tpu.matmul %124, %125, %cst_68 {dimension_numbers = #tpu.dot_dimension_numbers<[1], [0], [0], [1], [0, 0, 1, 1], [], []>} : vector<2x256xbf16>, vector<256x1024xbf16>, vector<2x1024xf32> -> vector<2x1024xf32>
    %127 = vector.extract_strided_slice %126 {offsets = [0, 0], sizes = [2, 512], strides = [1, 1]} : vector<2x1024xf32> to vector<2x512xf32>
    %128 = arith.addf %127, %84 : vector<2x512xf32>
    %129 = vector.extract_strided_slice %126 {offsets = [0, 512], sizes = [2, 512], strides = [1, 1]} : vector<2x1024xf32> to vector<2x512xf32>
    %130 = vector.extract_strided_slice %128 {offsets = [0, 0], sizes = [2, 128], strides = [1, 1]} : vector<2x512xf32> to vector<2x128xf32>
    %cst_69 = arith.constant 5.000000e-01 : f32
    %131 = vector.broadcast %cst_69 : f32 to vector<2x128xf32>
    %132 = arith.mulf %131, %130 : vector<2x128xf32>
    %133 = math.tanh %132 : vector<2x128xf32>
    %cst_70 = arith.constant 5.000000e-01 : f32
    %134 = vector.broadcast %cst_70 : f32 to vector<2x128xf32>
    %135 = arith.mulf %134, %133 : vector<2x128xf32>
    %cst_71 = arith.constant 5.000000e-01 : f32
    %136 = vector.broadcast %cst_71 : f32 to vector<2x128xf32>
    %137 = arith.addf %135, %136 : vector<2x128xf32>
    %138 = vector.extract_strided_slice %128 {offsets = [0, 128], sizes = [2, 128], strides = [1, 1]} : vector<2x512xf32> to vector<2x128xf32>
    %cst_72 = arith.constant 5.000000e-01 : f32
    %139 = vector.broadcast %cst_72 : f32 to vector<2x128xf32>
    %140 = arith.mulf %139, %138 : vector<2x128xf32>
    %141 = math.tanh %140 : vector<2x128xf32>
    %cst_73 = arith.constant 5.000000e-01 : f32
    %142 = vector.broadcast %cst_73 : f32 to vector<2x128xf32>
    %143 = arith.mulf %142, %141 : vector<2x128xf32>
    %cst_74 = arith.constant 5.000000e-01 : f32
    %144 = vector.broadcast %cst_74 : f32 to vector<2x128xf32>
    %145 = arith.addf %143, %144 : vector<2x128xf32>
    %146 = vector.extract_strided_slice %128 {offsets = [0, 256], sizes = [2, 128], strides = [1, 1]} : vector<2x512xf32> to vector<2x128xf32>
    %147 = math.tanh %146 : vector<2x128xf32>
    %148 = vector.extract_strided_slice %128 {offsets = [0, 384], sizes = [2, 128], strides = [1, 1]} : vector<2x512xf32> to vector<2x128xf32>
    %cst_75 = arith.constant 5.000000e-01 : f32
    %149 = vector.broadcast %cst_75 : f32 to vector<2x128xf32>
    %150 = arith.mulf %149, %148 : vector<2x128xf32>
    %151 = math.tanh %150 : vector<2x128xf32>
    %cst_76 = arith.constant 5.000000e-01 : f32
    %152 = vector.broadcast %cst_76 : f32 to vector<2x128xf32>
    %153 = arith.mulf %152, %151 : vector<2x128xf32>
    %cst_77 = arith.constant 5.000000e-01 : f32
    %154 = vector.broadcast %cst_77 : f32 to vector<2x128xf32>
    %155 = arith.addf %153, %154 : vector<2x128xf32>
    %156 = arith.mulf %145, %86 : vector<2x128xf32>
    %157 = arith.mulf %137, %147 : vector<2x128xf32>
    %158 = arith.addf %156, %157 : vector<2x128xf32>
    %159 = math.tanh %158 : vector<2x128xf32>
    %160 = arith.mulf %155, %159 : vector<2x128xf32>
    %161 = arith.truncf %160 : vector<2x128xf32> to vector<2x128xbf16>
    %c0_78 = arith.constant 0 : index
    %c128 = arith.constant 128 : index
    %162 = vector.load %arg9[%c0_78, %c128] : memref<2x256xbf16, #tpu.memory_space<vmem>>, vector<2x128xbf16>
    tpu.vector_store %arg9[%c0_78, %c128], %161 {strides = array<i32>} : memref<2x256xbf16, #tpu.memory_space<vmem>>, vector<2x128xbf16>,
    %c1_79 = arith.constant 1 : index
    %c0_80 = arith.constant 0 : index
    %c0_81 = arith.constant 0 : index
    %163 = vector.load %arg8[%c1_79, %c0_80, %c0_81] : memref<8x2x512xf32, #tpu.memory_space<vmem>>, vector<1x2x512xf32>
    %164 = vector.shape_cast %163 : vector<1x2x512xf32> to vector<2x512xf32>
    %165 = arith.addf %164, %129 : vector<2x512xf32>
    %166 = vector.extract_strided_slice %165 {offsets = [0, 0], sizes = [2, 128], strides = [1, 1]} : vector<2x512xf32> to vector<2x128xf32>
    %cst_82 = arith.constant 5.000000e-01 : f32
    %167 = vector.broadcast %cst_82 : f32 to vector<2x128xf32>
    %168 = arith.mulf %167, %166 : vector<2x128xf32>
    %169 = math.tanh %168 : vector<2x128xf32>
    %cst_83 = arith.constant 5.000000e-01 : f32
    %170 = vector.broadcast %cst_83 : f32 to vector<2x128xf32>
    %171 = arith.mulf %170, %169 : vector<2x128xf32>
    %cst_84 = arith.constant 5.000000e-01 : f32
    %172 = vector.broadcast %cst_84 : f32 to vector<2x128xf32>
    %173 = arith.addf %171, %172 : vector<2x128xf32>
    %174 = vector.extract_strided_slice %165 {offsets = [0, 128], sizes = [2, 128], strides = [1, 1]} : vector<2x512xf32> to vector<2x128xf32>
    %cst_85 = arith.constant 5.000000e-01 : f32
    %175 = vector.broadcast %cst_85 : f32 to vector<2x128xf32>
    %176 = arith.mulf %175, %174 : vector<2x128xf32>
    %177 = math.tanh %176 : vector<2x128xf32>
    %cst_86 = arith.constant 5.000000e-01 : f32
    %178 = vector.broadcast %cst_86 : f32 to vector<2x128xf32>
    %179 = arith.mulf %178, %177 : vector<2x128xf32>
    %cst_87 = arith.constant 5.000000e-01 : f32
    %180 = vector.broadcast %cst_87 : f32 to vector<2x128xf32>
    %181 = arith.addf %179, %180 : vector<2x128xf32>
    %182 = vector.extract_strided_slice %165 {offsets = [0, 256], sizes = [2, 128], strides = [1, 1]} : vector<2x512xf32> to vector<2x128xf32>
    %183 = math.tanh %182 : vector<2x128xf32>
    %184 = vector.extract_strided_slice %165 {offsets = [0, 384], sizes = [2, 128], strides = [1, 1]} : vector<2x512xf32> to vector<2x128xf32>
    %cst_88 = arith.constant 5.000000e-01 : f32
    %185 = vector.broadcast %cst_88 : f32 to vector<2x128xf32>
    %186 = arith.mulf %185, %184 : vector<2x128xf32>
    %187 = math.tanh %186 : vector<2x128xf32>
    %cst_89 = arith.constant 5.000000e-01 : f32
    %188 = vector.broadcast %cst_89 : f32 to vector<2x128xf32>
    %189 = arith.mulf %188, %187 : vector<2x128xf32>
    %cst_90 = arith.constant 5.000000e-01 : f32
    %190 = vector.broadcast %cst_90 : f32 to vector<2x128xf32>
    %191 = arith.addf %189, %190 : vector<2x128xf32>
    %192 = arith.mulf %181, %119 : vector<2x128xf32>
    %193 = arith.mulf %173, %183 : vector<2x128xf32>
    %194 = arith.addf %192, %193 : vector<2x128xf32>
    %195 = math.tanh %194 : vector<2x128xf32>
    %196 = arith.mulf %191, %195 : vector<2x128xf32>
    %197 = arith.truncf %196 : vector<2x128xf32> to vector<2x128xbf16>
    %c0_91 = arith.constant 0 : index
    %c0_92 = arith.constant 0 : index
    %198 = vector.load %arg9[%c0_91, %c0_92] : memref<2x256xbf16, #tpu.memory_space<vmem>>, vector<2x128xbf16>
    tpu.vector_store %arg9[%c0_91, %c0_92], %197 {strides = array<i32>} : memref<2x256xbf16, #tpu.memory_space<vmem>>, vector<2x128xbf16>,
    %c0_93 = arith.constant 0 : index
    %c0_94 = arith.constant 0 : index
    %199 = vector.load %arg9[%c0_93, %c0_94] : memref<2x256xbf16, #tpu.memory_space<vmem>>, vector<2x256xbf16>
    %c0_95 = arith.constant 0 : index
    %c0_96 = arith.constant 0 : index
    %200 = vector.load %arg3[%c0_95, %c0_96] : memref<256x1024xbf16, #tpu.memory_space<vmem>>, vector<256x1024xbf16>
    %cst_97 = arith.constant dense<0.000000e+00> : vector<2x1024xf32>
    %201 = tpu.matmul %199, %200, %cst_97 {dimension_numbers = #tpu.dot_dimension_numbers<[1], [0], [0], [1], [0, 0, 1, 1], [], []>} : vector<2x256xbf16>, vector<256x1024xbf16>, vector<2x1024xf32> -> vector<2x1024xf32>
    %202 = vector.extract_strided_slice %201 {offsets = [0, 0], sizes = [2, 512], strides = [1, 1]} : vector<2x1024xf32> to vector<2x512xf32>
    %203 = arith.addf %202, %84 : vector<2x512xf32>
    %204 = vector.extract_strided_slice %201 {offsets = [0, 512], sizes = [2, 512], strides = [1, 1]} : vector<2x1024xf32> to vector<2x512xf32>
    %205 = vector.extract_strided_slice %203 {offsets = [0, 0], sizes = [2, 128], strides = [1, 1]} : vector<2x512xf32> to vector<2x128xf32>
    %cst_98 = arith.constant 5.000000e-01 : f32
    %206 = vector.broadcast %cst_98 : f32 to vector<2x128xf32>
    %207 = arith.mulf %206, %205 : vector<2x128xf32>
    %208 = math.tanh %207 : vector<2x128xf32>
    %cst_99 = arith.constant 5.000000e-01 : f32
    %209 = vector.broadcast %cst_99 : f32 to vector<2x128xf32>
    %210 = arith.mulf %209, %208 : vector<2x128xf32>
    %cst_100 = arith.constant 5.000000e-01 : f32
    %211 = vector.broadcast %cst_100 : f32 to vector<2x128xf32>
    %212 = arith.addf %210, %211 : vector<2x128xf32>
    %213 = vector.extract_strided_slice %203 {offsets = [0, 128], sizes = [2, 128], strides = [1, 1]} : vector<2x512xf32> to vector<2x128xf32>
    %cst_101 = arith.constant 5.000000e-01 : f32
    %214 = vector.broadcast %cst_101 : f32 to vector<2x128xf32>
    %215 = arith.mulf %214, %213 : vector<2x128xf32>
    %216 = math.tanh %215 : vector<2x128xf32>
    %cst_102 = arith.constant 5.000000e-01 : f32
    %217 = vector.broadcast %cst_102 : f32 to vector<2x128xf32>
    %218 = arith.mulf %217, %216 : vector<2x128xf32>
    %cst_103 = arith.constant 5.000000e-01 : f32
    %219 = vector.broadcast %cst_103 : f32 to vector<2x128xf32>
    %220 = arith.addf %218, %219 : vector<2x128xf32>
    %221 = vector.extract_strided_slice %203 {offsets = [0, 256], sizes = [2, 128], strides = [1, 1]} : vector<2x512xf32> to vector<2x128xf32>
    %222 = math.tanh %221 : vector<2x128xf32>
    %223 = vector.extract_strided_slice %203 {offsets = [0, 384], sizes = [2, 128], strides = [1, 1]} : vector<2x512xf32> to vector<2x128xf32>
    %cst_104 = arith.constant 5.000000e-01 : f32
    %224 = vector.broadcast %cst_104 : f32 to vector<2x128xf32>
    %225 = arith.mulf %224, %223 : vector<2x128xf32>
    %226 = math.tanh %225 : vector<2x128xf32>
    %cst_105 = arith.constant 5.000000e-01 : f32
    %227 = vector.broadcast %cst_105 : f32 to vector<2x128xf32>
    %228 = arith.mulf %227, %226 : vector<2x128xf32>
    %cst_106 = arith.constant 5.000000e-01 : f32
    %229 = vector.broadcast %cst_106 : f32 to vector<2x128xf32>
    %230 = arith.addf %228, %229 : vector<2x128xf32>
    %231 = arith.mulf %220, %158 : vector<2x128xf32>
    %232 = arith.mulf %212, %222 : vector<2x128xf32>
    %233 = arith.addf %231, %232 : vector<2x128xf32>
    %234 = math.tanh %233 : vector<2x128xf32>
    %235 = arith.mulf %230, %234 : vector<2x128xf32>
    %236 = arith.truncf %235 : vector<2x128xf32> to vector<2x128xbf16>
    %c0_107 = arith.constant 0 : index
    %c128_108 = arith.constant 128 : index
    %237 = vector.load %arg9[%c0_107, %c128_108] : memref<2x256xbf16, #tpu.memory_space<vmem>>, vector<2x128xbf16>
    tpu.vector_store %arg9[%c0_107, %c128_108], %236 {strides = array<i32>} : memref<2x256xbf16, #tpu.memory_space<vmem>>, vector<2x128xbf16>,
    %c2_109 = arith.constant 2 : index
    %c0_110 = arith.constant 0 : index
    %c0_111 = arith.constant 0 : index
    %238 = vector.load %arg8[%c2_109, %c0_110, %c0_111] : memref<8x2x512xf32, #tpu.memory_space<vmem>>, vector<1x2x512xf32>
    %239 = vector.shape_cast %238 : vector<1x2x512xf32> to vector<2x512xf32>
    %240 = arith.addf %239, %204 : vector<2x512xf32>
    %241 = vector.extract_strided_slice %240 {offsets = [0, 0], sizes = [2, 128], strides = [1, 1]} : vector<2x512xf32> to vector<2x128xf32>
    %cst_112 = arith.constant 5.000000e-01 : f32
    %242 = vector.broadcast %cst_112 : f32 to vector<2x128xf32>
    %243 = arith.mulf %242, %241 : vector<2x128xf32>
    %244 = math.tanh %243 : vector<2x128xf32>
    %cst_113 = arith.constant 5.000000e-01 : f32
    %245 = vector.broadcast %cst_113 : f32 to vector<2x128xf32>
    %246 = arith.mulf %245, %244 : vector<2x128xf32>
    %cst_114 = arith.constant 5.000000e-01 : f32
    %247 = vector.broadcast %cst_114 : f32 to vector<2x128xf32>
    %248 = arith.addf %246, %247 : vector<2x128xf32>
    %249 = vector.extract_strided_slice %240 {offsets = [0, 128], sizes = [2, 128], strides = [1, 1]} : vector<2x512xf32> to vector<2x128xf32>
    %cst_115 = arith.constant 5.000000e-01 : f32
    %250 = vector.broadcast %cst_115 : f32 to vector<2x128xf32>
    %251 = arith.mulf %250, %249 : vector<2x128xf32>
    %252 = math.tanh %251 : vector<2x128xf32>
    %cst_116 = arith.constant 5.000000e-01 : f32
    %253 = vector.broadcast %cst_116 : f32 to vector<2x128xf32>
    %254 = arith.mulf %253, %252 : vector<2x128xf32>
    %cst_117 = arith.constant 5.000000e-01 : f32
    %255 = vector.broadcast %cst_117 : f32 to vector<2x128xf32>
    %256 = arith.addf %254, %255 : vector<2x128xf32>
    %257 = vector.extract_strided_slice %240 {offsets = [0, 256], sizes = [2, 128], strides = [1, 1]} : vector<2x512xf32> to vector<2x128xf32>
    %258 = math.tanh %257 : vector<2x128xf32>
    %259 = vector.extract_strided_slice %240 {offsets = [0, 384], sizes = [2, 128], strides = [1, 1]} : vector<2x512xf32> to vector<2x128xf32>
    %cst_118 = arith.constant 5.000000e-01 : f32
    %260 = vector.broadcast %cst_118 : f32 to vector<2x128xf32>
    %261 = arith.mulf %260, %259 : vector<2x128xf32>
    %262 = math.tanh %261 : vector<2x128xf32>
    %cst_119 = arith.constant 5.000000e-01 : f32
    %263 = vector.broadcast %cst_119 : f32 to vector<2x128xf32>
    %264 = arith.mulf %263, %262 : vector<2x128xf32>
    %cst_120 = arith.constant 5.000000e-01 : f32
    %265 = vector.broadcast %cst_120 : f32 to vector<2x128xf32>
    %266 = arith.addf %264, %265 : vector<2x128xf32>
    %267 = arith.mulf %256, %194 : vector<2x128xf32>
    %268 = arith.mulf %248, %258 : vector<2x128xf32>
    %269 = arith.addf %267, %268 : vector<2x128xf32>
    %270 = math.tanh %269 : vector<2x128xf32>
    %271 = arith.mulf %266, %270 : vector<2x128xf32>
    %272 = arith.truncf %271 : vector<2x128xf32> to vector<2x128xbf16>
    %c0_121 = arith.constant 0 : index
    %c0_122 = arith.constant 0 : index
    %273 = vector.load %arg9[%c0_121, %c0_122] : memref<2x256xbf16, #tpu.memory_space<vmem>>, vector<2x128xbf16>
    tpu.vector_store %arg9[%c0_121, %c0_122], %272 {strides = array<i32>} : memref<2x256xbf16, #tpu.memory_space<vmem>>, vector<2x128xbf16>,
    %c0_123 = arith.constant 0 : index
    %c0_124 = arith.constant 0 : index
    %274 = vector.load %arg9[%c0_123, %c0_124] : memref<2x256xbf16, #tpu.memory_space<vmem>>, vector<2x256xbf16>
    %c0_125 = arith.constant 0 : index
    %c0_126 = arith.constant 0 : index
    %275 = vector.load %arg3[%c0_125, %c0_126] : memref<256x1024xbf16, #tpu.memory_space<vmem>>, vector<256x1024xbf16>
    %cst_127 = arith.constant dense<0.000000e+00> : vector<2x1024xf32>
    %276 = tpu.matmul %274, %275, %cst_127 {dimension_numbers = #tpu.dot_dimension_numbers<[1], [0], [0], [1], [0, 0, 1, 1], [], []>} : vector<2x256xbf16>, vector<256x1024xbf16>, vector<2x1024xf32> -> vector<2x1024xf32>
    %277 = vector.extract_strided_slice %276 {offsets = [0, 0], sizes = [2, 512], strides = [1, 1]} : vector<2x1024xf32> to vector<2x512xf32>
    %278 = arith.addf %277, %84 : vector<2x512xf32>
    %279 = vector.extract_strided_slice %276 {offsets = [0, 512], sizes = [2, 512], strides = [1, 1]} : vector<2x1024xf32> to vector<2x512xf32>
    %280 = vector.extract_strided_slice %278 {offsets = [0, 0], sizes = [2, 128], strides = [1, 1]} : vector<2x512xf32> to vector<2x128xf32>
    %cst_128 = arith.constant 5.000000e-01 : f32
    %281 = vector.broadcast %cst_128 : f32 to vector<2x128xf32>
    %282 = arith.mulf %281, %280 : vector<2x128xf32>
    %283 = math.tanh %282 : vector<2x128xf32>
    %cst_129 = arith.constant 5.000000e-01 : f32
    %284 = vector.broadcast %cst_129 : f32 to vector<2x128xf32>
    %285 = arith.mulf %284, %283 : vector<2x128xf32>
    %cst_130 = arith.constant 5.000000e-01 : f32
    %286 = vector.broadcast %cst_130 : f32 to vector<2x128xf32>
    %287 = arith.addf %285, %286 : vector<2x128xf32>
    %288 = vector.extract_strided_slice %278 {offsets = [0, 128], sizes = [2, 128], strides = [1, 1]} : vector<2x512xf32> to vector<2x128xf32>
    %cst_131 = arith.constant 5.000000e-01 : f32
    %289 = vector.broadcast %cst_131 : f32 to vector<2x128xf32>
    %290 = arith.mulf %289, %288 : vector<2x128xf32>
    %291 = math.tanh %290 : vector<2x128xf32>
    %cst_132 = arith.constant 5.000000e-01 : f32
    %292 = vector.broadcast %cst_132 : f32 to vector<2x128xf32>
    %293 = arith.mulf %292, %291 : vector<2x128xf32>
    %cst_133 = arith.constant 5.000000e-01 : f32
    %294 = vector.broadcast %cst_133 : f32 to vector<2x128xf32>
    %295 = arith.addf %293, %294 : vector<2x128xf32>
    %296 = vector.extract_strided_slice %278 {offsets = [0, 256], sizes = [2, 128], strides = [1, 1]} : vector<2x512xf32> to vector<2x128xf32>
    %297 = math.tanh %296 : vector<2x128xf32>
    %298 = vector.extract_strided_slice %278 {offsets = [0, 384], sizes = [2, 128], strides = [1, 1]} : vector<2x512xf32> to vector<2x128xf32>
    %cst_134 = arith.constant 5.000000e-01 : f32
    %299 = vector.broadcast %cst_134 : f32 to vector<2x128xf32>
    %300 = arith.mulf %299, %298 : vector<2x128xf32>
    %301 = math.tanh %300 : vector<2x128xf32>
    %cst_135 = arith.constant 5.000000e-01 : f32
    %302 = vector.broadcast %cst_135 : f32 to vector<2x128xf32>
    %303 = arith.mulf %302, %301 : vector<2x128xf32>
    %cst_136 = arith.constant 5.000000e-01 : f32
    %304 = vector.broadcast %cst_136 : f32 to vector<2x128xf32>
    %305 = arith.addf %303, %304 : vector<2x128xf32>
    %306 = arith.mulf %295, %233 : vector<2x128xf32>
    %307 = arith.mulf %287, %297 : vector<2x128xf32>
    %308 = arith.addf %306, %307 : vector<2x128xf32>
    %309 = math.tanh %308 : vector<2x128xf32>
    %310 = arith.mulf %305, %309 : vector<2x128xf32>
    %311 = arith.truncf %310 : vector<2x128xf32> to vector<2x128xbf16>
    %c0_137 = arith.constant 0 : index
    %c128_138 = arith.constant 128 : index
    %312 = vector.load %arg9[%c0_137, %c128_138] : memref<2x256xbf16, #tpu.memory_space<vmem>>, vector<2x128xbf16>
    tpu.vector_store %arg9[%c0_137, %c128_138], %311 {strides = array<i32>} : memref<2x256xbf16, #tpu.memory_space<vmem>>, vector<2x128xbf16>,
    %c3_139 = arith.constant 3 : index
    %c0_140 = arith.constant 0 : index
    %c0_141 = arith.constant 0 : index
    %313 = vector.load %arg8[%c3_139, %c0_140, %c0_141] : memref<8x2x512xf32, #tpu.memory_space<vmem>>, vector<1x2x512xf32>
    %314 = vector.shape_cast %313 : vector<1x2x512xf32> to vector<2x512xf32>
    %315 = arith.addf %314, %279 : vector<2x512xf32>
    %316 = vector.extract_strided_slice %315 {offsets = [0, 0], sizes = [2, 128], strides = [1, 1]} : vector<2x512xf32> to vector<2x128xf32>
    %cst_142 = arith.constant 5.000000e-01 : f32
    %317 = vector.broadcast %cst_142 : f32 to vector<2x128xf32>
    %318 = arith.mulf %317, %316 : vector<2x128xf32>
    %319 = math.tanh %318 : vector<2x128xf32>
    %cst_143 = arith.constant 5.000000e-01 : f32
    %320 = vector.broadcast %cst_143 : f32 to vector<2x128xf32>
    %321 = arith.mulf %320, %319 : vector<2x128xf32>
    %cst_144 = arith.constant 5.000000e-01 : f32
    %322 = vector.broadcast %cst_144 : f32 to vector<2x128xf32>
    %323 = arith.addf %321, %322 : vector<2x128xf32>
    %324 = vector.extract_strided_slice %315 {offsets = [0, 128], sizes = [2, 128], strides = [1, 1]} : vector<2x512xf32> to vector<2x128xf32>
    %cst_145 = arith.constant 5.000000e-01 : f32
    %325 = vector.broadcast %cst_145 : f32 to vector<2x128xf32>
    %326 = arith.mulf %325, %324 : vector<2x128xf32>
    %327 = math.tanh %326 : vector<2x128xf32>
    %cst_146 = arith.constant 5.000000e-01 : f32
    %328 = vector.broadcast %cst_146 : f32 to vector<2x128xf32>
    %329 = arith.mulf %328, %327 : vector<2x128xf32>
    %cst_147 = arith.constant 5.000000e-01 : f32
    %330 = vector.broadcast %cst_147 : f32 to vector<2x128xf32>
    %331 = arith.addf %329, %330 : vector<2x128xf32>
    %332 = vector.extract_strided_slice %315 {offsets = [0, 256], sizes = [2, 128], strides = [1, 1]} : vector<2x512xf32> to vector<2x128xf32>
    %333 = math.tanh %332 : vector<2x128xf32>
    %334 = vector.extract_strided_slice %315 {offsets = [0, 384], sizes = [2, 128], strides = [1, 1]} : vector<2x512xf32> to vector<2x128xf32>
    %cst_148 = arith.constant 5.000000e-01 : f32
    %335 = vector.broadcast %cst_148 : f32 to vector<2x128xf32>
    %336 = arith.mulf %335, %334 : vector<2x128xf32>
    %337 = math.tanh %336 : vector<2x128xf32>
    %cst_149 = arith.constant 5.000000e-01 : f32
    %338 = vector.broadcast %cst_149 : f32 to vector<2x128xf32>
    %339 = arith.mulf %338, %337 : vector<2x128xf32>
    %cst_150 = arith.constant 5.000000e-01 : f32
    %340 = vector.broadcast %cst_150 : f32 to vector<2x128xf32>
    %341 = arith.addf %339, %340 : vector<2x128xf32>
    %342 = arith.mulf %331, %269 : vector<2x128xf32>
    %343 = arith.mulf %323, %333 : vector<2x128xf32>
    %344 = arith.addf %342, %343 : vector<2x128xf32>
    %345 = math.tanh %344 : vector<2x128xf32>
    %346 = arith.mulf %341, %345 : vector<2x128xf32>
    %347 = arith.truncf %346 : vector<2x128xf32> to vector<2x128xbf16>
    %c0_151 = arith.constant 0 : index
    %c0_152 = arith.constant 0 : index
    %348 = vector.load %arg9[%c0_151, %c0_152] : memref<2x256xbf16, #tpu.memory_space<vmem>>, vector<2x128xbf16>
    tpu.vector_store %arg9[%c0_151, %c0_152], %347 {strides = array<i32>} : memref<2x256xbf16, #tpu.memory_space<vmem>>, vector<2x128xbf16>,
    %c0_153 = arith.constant 0 : index
    %c0_154 = arith.constant 0 : index
    %349 = vector.load %arg9[%c0_153, %c0_154] : memref<2x256xbf16, #tpu.memory_space<vmem>>, vector<2x256xbf16>
    %c0_155 = arith.constant 0 : index
    %c0_156 = arith.constant 0 : index
    %350 = vector.load %arg3[%c0_155, %c0_156] : memref<256x1024xbf16, #tpu.memory_space<vmem>>, vector<256x1024xbf16>
    %cst_157 = arith.constant dense<0.000000e+00> : vector<2x1024xf32>
    %351 = tpu.matmul %349, %350, %cst_157 {dimension_numbers = #tpu.dot_dimension_numbers<[1], [0], [0], [1], [0, 0, 1, 1], [], []>} : vector<2x256xbf16>, vector<256x1024xbf16>, vector<2x1024xf32> -> vector<2x1024xf32>
    %352 = vector.extract_strided_slice %351 {offsets = [0, 0], sizes = [2, 512], strides = [1, 1]} : vector<2x1024xf32> to vector<2x512xf32>
    %353 = arith.addf %352, %84 : vector<2x512xf32>
    %354 = vector.extract_strided_slice %351 {offsets = [0, 512], sizes = [2, 512], strides = [1, 1]} : vector<2x1024xf32> to vector<2x512xf32>
    %355 = vector.extract_strided_slice %353 {offsets = [0, 0], sizes = [2, 128], strides = [1, 1]} : vector<2x512xf32> to vector<2x128xf32>
    %cst_158 = arith.constant 5.000000e-01 : f32
    %356 = vector.broadcast %cst_158 : f32 to vector<2x128xf32>
    %357 = arith.mulf %356, %355 : vector<2x128xf32>
    %358 = math.tanh %357 : vector<2x128xf32>
    %cst_159 = arith.constant 5.000000e-01 : f32
    %359 = vector.broadcast %cst_159 : f32 to vector<2x128xf32>
    %360 = arith.mulf %359, %358 : vector<2x128xf32>
    %cst_160 = arith.constant 5.000000e-01 : f32
    %361 = vector.broadcast %cst_160 : f32 to vector<2x128xf32>
    %362 = arith.addf %360, %361 : vector<2x128xf32>
    %363 = vector.extract_strided_slice %353 {offsets = [0, 128], sizes = [2, 128], strides = [1, 1]} : vector<2x512xf32> to vector<2x128xf32>
    %cst_161 = arith.constant 5.000000e-01 : f32
    %364 = vector.broadcast %cst_161 : f32 to vector<2x128xf32>
    %365 = arith.mulf %364, %363 : vector<2x128xf32>
    %366 = math.tanh %365 : vector<2x128xf32>
    %cst_162 = arith.constant 5.000000e-01 : f32
    %367 = vector.broadcast %cst_162 : f32 to vector<2x128xf32>
    %368 = arith.mulf %367, %366 : vector<2x128xf32>
    %cst_163 = arith.constant 5.000000e-01 : f32
    %369 = vector.broadcast %cst_163 : f32 to vector<2x128xf32>
    %370 = arith.addf %368, %369 : vector<2x128xf32>
    %371 = vector.extract_strided_slice %353 {offsets = [0, 256], sizes = [2, 128], strides = [1, 1]} : vector<2x512xf32> to vector<2x128xf32>
    %372 = math.tanh %371 : vector<2x128xf32>
    %373 = vector.extract_strided_slice %353 {offsets = [0, 384], sizes = [2, 128], strides = [1, 1]} : vector<2x512xf32> to vector<2x128xf32>
    %cst_164 = arith.constant 5.000000e-01 : f32
    %374 = vector.broadcast %cst_164 : f32 to vector<2x128xf32>
    %375 = arith.mulf %374, %373 : vector<2x128xf32>
    %376 = math.tanh %375 : vector<2x128xf32>
    %cst_165 = arith.constant 5.000000e-01 : f32
    %377 = vector.broadcast %cst_165 : f32 to vector<2x128xf32>
    %378 = arith.mulf %377, %376 : vector<2x128xf32>
    %cst_166 = arith.constant 5.000000e-01 : f32
    %379 = vector.broadcast %cst_166 : f32 to vector<2x128xf32>
    %380 = arith.addf %378, %379 : vector<2x128xf32>
    %381 = arith.mulf %370, %308 : vector<2x128xf32>
    %382 = arith.mulf %362, %372 : vector<2x128xf32>
    %383 = arith.addf %381, %382 : vector<2x128xf32>
    %384 = math.tanh %383 : vector<2x128xf32>
    %385 = arith.mulf %380, %384 : vector<2x128xf32>
    %386 = arith.truncf %385 : vector<2x128xf32> to vector<2x128xbf16>
    %c0_167 = arith.constant 0 : index
    %c128_168 = arith.constant 128 : index
    %387 = vector.load %arg9[%c0_167, %c128_168] : memref<2x256xbf16, #tpu.memory_space<vmem>>, vector<2x128xbf16>
    tpu.vector_store %arg9[%c0_167, %c128_168], %386 {strides = array<i32>} : memref<2x256xbf16, #tpu.memory_space<vmem>>, vector<2x128xbf16>,
    %c4_169 = arith.constant 4 : index
    %c0_170 = arith.constant 0 : index
    %c0_171 = arith.constant 0 : index
    %388 = vector.load %arg8[%c4_169, %c0_170, %c0_171] : memref<8x2x512xf32, #tpu.memory_space<vmem>>, vector<1x2x512xf32>
    %389 = vector.shape_cast %388 : vector<1x2x512xf32> to vector<2x512xf32>
    %390 = arith.addf %389, %354 : vector<2x512xf32>
    %391 = vector.extract_strided_slice %390 {offsets = [0, 0], sizes = [2, 128], strides = [1, 1]} : vector<2x512xf32> to vector<2x128xf32>
    %cst_172 = arith.constant 5.000000e-01 : f32
    %392 = vector.broadcast %cst_172 : f32 to vector<2x128xf32>
    %393 = arith.mulf %392, %391 : vector<2x128xf32>
    %394 = math.tanh %393 : vector<2x128xf32>
    %cst_173 = arith.constant 5.000000e-01 : f32
    %395 = vector.broadcast %cst_173 : f32 to vector<2x128xf32>
    %396 = arith.mulf %395, %394 : vector<2x128xf32>
    %cst_174 = arith.constant 5.000000e-01 : f32
    %397 = vector.broadcast %cst_174 : f32 to vector<2x128xf32>
    %398 = arith.addf %396, %397 : vector<2x128xf32>
    %399 = vector.extract_strided_slice %390 {offsets = [0, 128], sizes = [2, 128], strides = [1, 1]} : vector<2x512xf32> to vector<2x128xf32>
    %cst_175 = arith.constant 5.000000e-01 : f32
    %400 = vector.broadcast %cst_175 : f32 to vector<2x128xf32>
    %401 = arith.mulf %400, %399 : vector<2x128xf32>
    %402 = math.tanh %401 : vector<2x128xf32>
    %cst_176 = arith.constant 5.000000e-01 : f32
    %403 = vector.broadcast %cst_176 : f32 to vector<2x128xf32>
    %404 = arith.mulf %403, %402 : vector<2x128xf32>
    %cst_177 = arith.constant 5.000000e-01 : f32
    %405 = vector.broadcast %cst_177 : f32 to vector<2x128xf32>
    %406 = arith.addf %404, %405 : vector<2x128xf32>
    %407 = vector.extract_strided_slice %390 {offsets = [0, 256], sizes = [2, 128], strides = [1, 1]} : vector<2x512xf32> to vector<2x128xf32>
    %408 = math.tanh %407 : vector<2x128xf32>
    %409 = vector.extract_strided_slice %390 {offsets = [0, 384], sizes = [2, 128], strides = [1, 1]} : vector<2x512xf32> to vector<2x128xf32>
    %cst_178 = arith.constant 5.000000e-01 : f32
    %410 = vector.broadcast %cst_178 : f32 to vector<2x128xf32>
    %411 = arith.mulf %410, %409 : vector<2x128xf32>
    %412 = math.tanh %411 : vector<2x128xf32>
    %cst_179 = arith.constant 5.000000e-01 : f32
    %413 = vector.broadcast %cst_179 : f32 to vector<2x128xf32>
    %414 = arith.mulf %413, %412 : vector<2x128xf32>
    %cst_180 = arith.constant 5.000000e-01 : f32
    %415 = vector.broadcast %cst_180 : f32 to vector<2x128xf32>
    %416 = arith.addf %414, %415 : vector<2x128xf32>
    %417 = arith.mulf %406, %344 : vector<2x128xf32>
    %418 = arith.mulf %398, %408 : vector<2x128xf32>
    %419 = arith.addf %417, %418 : vector<2x128xf32>
    %420 = math.tanh %419 : vector<2x128xf32>
    %421 = arith.mulf %416, %420 : vector<2x128xf32>
    %422 = arith.truncf %421 : vector<2x128xf32> to vector<2x128xbf16>
    %c0_181 = arith.constant 0 : index
    %c0_182 = arith.constant 0 : index
    %423 = vector.load %arg9[%c0_181, %c0_182] : memref<2x256xbf16, #tpu.memory_space<vmem>>, vector<2x128xbf16>
    tpu.vector_store %arg9[%c0_181, %c0_182], %422 {strides = array<i32>} : memref<2x256xbf16, #tpu.memory_space<vmem>>, vector<2x128xbf16>,
    %c0_183 = arith.constant 0 : index
    %c0_184 = arith.constant 0 : index
    %424 = vector.load %arg9[%c0_183, %c0_184] : memref<2x256xbf16, #tpu.memory_space<vmem>>, vector<2x256xbf16>
    %c0_185 = arith.constant 0 : index
    %c0_186 = arith.constant 0 : index
    %425 = vector.load %arg3[%c0_185, %c0_186] : memref<256x1024xbf16, #tpu.memory_space<vmem>>, vector<256x1024xbf16>
    %cst_187 = arith.constant dense<0.000000e+00> : vector<2x1024xf32>
    %426 = tpu.matmul %424, %425, %cst_187 {dimension_numbers = #tpu.dot_dimension_numbers<[1], [0], [0], [1], [0, 0, 1, 1], [], []>} : vector<2x256xbf16>, vector<256x1024xbf16>, vector<2x1024xf32> -> vector<2x1024xf32>
    %427 = vector.extract_strided_slice %426 {offsets = [0, 0], sizes = [2, 512], strides = [1, 1]} : vector<2x1024xf32> to vector<2x512xf32>
    %428 = arith.addf %427, %84 : vector<2x512xf32>
    %429 = vector.extract_strided_slice %426 {offsets = [0, 512], sizes = [2, 512], strides = [1, 1]} : vector<2x1024xf32> to vector<2x512xf32>
    %430 = vector.extract_strided_slice %428 {offsets = [0, 0], sizes = [2, 128], strides = [1, 1]} : vector<2x512xf32> to vector<2x128xf32>
    %cst_188 = arith.constant 5.000000e-01 : f32
    %431 = vector.broadcast %cst_188 : f32 to vector<2x128xf32>
    %432 = arith.mulf %431, %430 : vector<2x128xf32>
    %433 = math.tanh %432 : vector<2x128xf32>
    %cst_189 = arith.constant 5.000000e-01 : f32
    %434 = vector.broadcast %cst_189 : f32 to vector<2x128xf32>
    %435 = arith.mulf %434, %433 : vector<2x128xf32>
    %cst_190 = arith.constant 5.000000e-01 : f32
    %436 = vector.broadcast %cst_190 : f32 to vector<2x128xf32>
    %437 = arith.addf %435, %436 : vector<2x128xf32>
    %438 = vector.extract_strided_slice %428 {offsets = [0, 128], sizes = [2, 128], strides = [1, 1]} : vector<2x512xf32> to vector<2x128xf32>
    %cst_191 = arith.constant 5.000000e-01 : f32
    %439 = vector.broadcast %cst_191 : f32 to vector<2x128xf32>
    %440 = arith.mulf %439, %438 : vector<2x128xf32>
    %441 = math.tanh %440 : vector<2x128xf32>
    %cst_192 = arith.constant 5.000000e-01 : f32
    %442 = vector.broadcast %cst_192 : f32 to vector<2x128xf32>
    %443 = arith.mulf %442, %441 : vector<2x128xf32>
    %cst_193 = arith.constant 5.000000e-01 : f32
    %444 = vector.broadcast %cst_193 : f32 to vector<2x128xf32>
    %445 = arith.addf %443, %444 : vector<2x128xf32>
    %446 = vector.extract_strided_slice %428 {offsets = [0, 256], sizes = [2, 128], strides = [1, 1]} : vector<2x512xf32> to vector<2x128xf32>
    %447 = math.tanh %446 : vector<2x128xf32>
    %448 = vector.extract_strided_slice %428 {offsets = [0, 384], sizes = [2, 128], strides = [1, 1]} : vector<2x512xf32> to vector<2x128xf32>
    %cst_194 = arith.constant 5.000000e-01 : f32
    %449 = vector.broadcast %cst_194 : f32 to vector<2x128xf32>
    %450 = arith.mulf %449, %448 : vector<2x128xf32>
    %451 = math.tanh %450 : vector<2x128xf32>
    %cst_195 = arith.constant 5.000000e-01 : f32
    %452 = vector.broadcast %cst_195 : f32 to vector<2x128xf32>
    %453 = arith.mulf %452, %451 : vector<2x128xf32>
    %cst_196 = arith.constant 5.000000e-01 : f32
    %454 = vector.broadcast %cst_196 : f32 to vector<2x128xf32>
    %455 = arith.addf %453, %454 : vector<2x128xf32>
    %456 = arith.mulf %445, %383 : vector<2x128xf32>
    %457 = arith.mulf %437, %447 : vector<2x128xf32>
    %458 = arith.addf %456, %457 : vector<2x128xf32>
    %459 = math.tanh %458 : vector<2x128xf32>
    %460 = arith.mulf %455, %459 : vector<2x128xf32>
    %461 = arith.truncf %460 : vector<2x128xf32> to vector<2x128xbf16>
    %c0_197 = arith.constant 0 : index
    %c128_198 = arith.constant 128 : index
    %462 = vector.load %arg9[%c0_197, %c128_198] : memref<2x256xbf16, #tpu.memory_space<vmem>>, vector<2x128xbf16>
    tpu.vector_store %arg9[%c0_197, %c128_198], %461 {strides = array<i32>} : memref<2x256xbf16, #tpu.memory_space<vmem>>, vector<2x128xbf16>,
    %c5_199 = arith.constant 5 : index
    %c0_200 = arith.constant 0 : index
    %c0_201 = arith.constant 0 : index
    %463 = vector.load %arg8[%c5_199, %c0_200, %c0_201] : memref<8x2x512xf32, #tpu.memory_space<vmem>>, vector<1x2x512xf32>
    %464 = vector.shape_cast %463 : vector<1x2x512xf32> to vector<2x512xf32>
    %465 = arith.addf %464, %429 : vector<2x512xf32>
    %466 = vector.extract_strided_slice %465 {offsets = [0, 0], sizes = [2, 128], strides = [1, 1]} : vector<2x512xf32> to vector<2x128xf32>
    %cst_202 = arith.constant 5.000000e-01 : f32
    %467 = vector.broadcast %cst_202 : f32 to vector<2x128xf32>
    %468 = arith.mulf %467, %466 : vector<2x128xf32>
    %469 = math.tanh %468 : vector<2x128xf32>
    %cst_203 = arith.constant 5.000000e-01 : f32
    %470 = vector.broadcast %cst_203 : f32 to vector<2x128xf32>
    %471 = arith.mulf %470, %469 : vector<2x128xf32>
    %cst_204 = arith.constant 5.000000e-01 : f32
    %472 = vector.broadcast %cst_204 : f32 to vector<2x128xf32>
    %473 = arith.addf %471, %472 : vector<2x128xf32>
    %474 = vector.extract_strided_slice %465 {offsets = [0, 128], sizes = [2, 128], strides = [1, 1]} : vector<2x512xf32> to vector<2x128xf32>
    %cst_205 = arith.constant 5.000000e-01 : f32
    %475 = vector.broadcast %cst_205 : f32 to vector<2x128xf32>
    %476 = arith.mulf %475, %474 : vector<2x128xf32>
    %477 = math.tanh %476 : vector<2x128xf32>
    %cst_206 = arith.constant 5.000000e-01 : f32
    %478 = vector.broadcast %cst_206 : f32 to vector<2x128xf32>
    %479 = arith.mulf %478, %477 : vector<2x128xf32>
    %cst_207 = arith.constant 5.000000e-01 : f32
    %480 = vector.broadcast %cst_207 : f32 to vector<2x128xf32>
    %481 = arith.addf %479, %480 : vector<2x128xf32>
    %482 = vector.extract_strided_slice %465 {offsets = [0, 256], sizes = [2, 128], strides = [1, 1]} : vector<2x512xf32> to vector<2x128xf32>
    %483 = math.tanh %482 : vector<2x128xf32>
    %484 = vector.extract_strided_slice %465 {offsets = [0, 384], sizes = [2, 128], strides = [1, 1]} : vector<2x512xf32> to vector<2x128xf32>
    %cst_208 = arith.constant 5.000000e-01 : f32
    %485 = vector.broadcast %cst_208 : f32 to vector<2x128xf32>
    %486 = arith.mulf %485, %484 : vector<2x128xf32>
    %487 = math.tanh %486 : vector<2x128xf32>
    %cst_209 = arith.constant 5.000000e-01 : f32
    %488 = vector.broadcast %cst_209 : f32 to vector<2x128xf32>
    %489 = arith.mulf %488, %487 : vector<2x128xf32>
    %cst_210 = arith.constant 5.000000e-01 : f32
    %490 = vector.broadcast %cst_210 : f32 to vector<2x128xf32>
    %491 = arith.addf %489, %490 : vector<2x128xf32>
    %492 = arith.mulf %481, %419 : vector<2x128xf32>
    %493 = arith.mulf %473, %483 : vector<2x128xf32>
    %494 = arith.addf %492, %493 : vector<2x128xf32>
    %495 = math.tanh %494 : vector<2x128xf32>
    %496 = arith.mulf %491, %495 : vector<2x128xf32>
    %497 = arith.truncf %496 : vector<2x128xf32> to vector<2x128xbf16>
    %c0_211 = arith.constant 0 : index
    %c0_212 = arith.constant 0 : index
    %498 = vector.load %arg9[%c0_211, %c0_212] : memref<2x256xbf16, #tpu.memory_space<vmem>>, vector<2x128xbf16>
    tpu.vector_store %arg9[%c0_211, %c0_212], %497 {strides = array<i32>} : memref<2x256xbf16, #tpu.memory_space<vmem>>, vector<2x128xbf16>,
    %c0_213 = arith.constant 0 : index
    %c0_214 = arith.constant 0 : index
    %499 = vector.load %arg9[%c0_213, %c0_214] : memref<2x256xbf16, #tpu.memory_space<vmem>>, vector<2x256xbf16>
    %c0_215 = arith.constant 0 : index
    %c0_216 = arith.constant 0 : index
    %500 = vector.load %arg3[%c0_215, %c0_216] : memref<256x1024xbf16, #tpu.memory_space<vmem>>, vector<256x1024xbf16>
    %cst_217 = arith.constant dense<0.000000e+00> : vector<2x1024xf32>
    %501 = tpu.matmul %499, %500, %cst_217 {dimension_numbers = #tpu.dot_dimension_numbers<[1], [0], [0], [1], [0, 0, 1, 1], [], []>} : vector<2x256xbf16>, vector<256x1024xbf16>, vector<2x1024xf32> -> vector<2x1024xf32>
    %502 = vector.extract_strided_slice %501 {offsets = [0, 0], sizes = [2, 512], strides = [1, 1]} : vector<2x1024xf32> to vector<2x512xf32>
    %503 = arith.addf %502, %84 : vector<2x512xf32>
    %504 = vector.extract_strided_slice %501 {offsets = [0, 512], sizes = [2, 512], strides = [1, 1]} : vector<2x1024xf32> to vector<2x512xf32>
    %505 = vector.extract_strided_slice %503 {offsets = [0, 0], sizes = [2, 128], strides = [1, 1]} : vector<2x512xf32> to vector<2x128xf32>
    %cst_218 = arith.constant 5.000000e-01 : f32
    %506 = vector.broadcast %cst_218 : f32 to vector<2x128xf32>
    %507 = arith.mulf %506, %505 : vector<2x128xf32>
    %508 = math.tanh %507 : vector<2x128xf32>
    %cst_219 = arith.constant 5.000000e-01 : f32
    %509 = vector.broadcast %cst_219 : f32 to vector<2x128xf32>
    %510 = arith.mulf %509, %508 : vector<2x128xf32>
    %cst_220 = arith.constant 5.000000e-01 : f32
    %511 = vector.broadcast %cst_220 : f32 to vector<2x128xf32>
    %512 = arith.addf %510, %511 : vector<2x128xf32>
    %513 = vector.extract_strided_slice %503 {offsets = [0, 128], sizes = [2, 128], strides = [1, 1]} : vector<2x512xf32> to vector<2x128xf32>
    %cst_221 = arith.constant 5.000000e-01 : f32
    %514 = vector.broadcast %cst_221 : f32 to vector<2x128xf32>
    %515 = arith.mulf %514, %513 : vector<2x128xf32>
    %516 = math.tanh %515 : vector<2x128xf32>
    %cst_222 = arith.constant 5.000000e-01 : f32
    %517 = vector.broadcast %cst_222 : f32 to vector<2x128xf32>
    %518 = arith.mulf %517, %516 : vector<2x128xf32>
    %cst_223 = arith.constant 5.000000e-01 : f32
    %519 = vector.broadcast %cst_223 : f32 to vector<2x128xf32>
    %520 = arith.addf %518, %519 : vector<2x128xf32>
    %521 = vector.extract_strided_slice %503 {offsets = [0, 256], sizes = [2, 128], strides = [1, 1]} : vector<2x512xf32> to vector<2x128xf32>
    %522 = math.tanh %521 : vector<2x128xf32>
    %523 = vector.extract_strided_slice %503 {offsets = [0, 384], sizes = [2, 128], strides = [1, 1]} : vector<2x512xf32> to vector<2x128xf32>
    %cst_224 = arith.constant 5.000000e-01 : f32
    %524 = vector.broadcast %cst_224 : f32 to vector<2x128xf32>
    %525 = arith.mulf %524, %523 : vector<2x128xf32>
    %526 = math.tanh %525 : vector<2x128xf32>
    %cst_225 = arith.constant 5.000000e-01 : f32
    %527 = vector.broadcast %cst_225 : f32 to vector<2x128xf32>
    %528 = arith.mulf %527, %526 : vector<2x128xf32>
    %cst_226 = arith.constant 5.000000e-01 : f32
    %529 = vector.broadcast %cst_226 : f32 to vector<2x128xf32>
    %530 = arith.addf %528, %529 : vector<2x128xf32>
    %531 = arith.mulf %520, %458 : vector<2x128xf32>
    %532 = arith.mulf %512, %522 : vector<2x128xf32>
    %533 = arith.addf %531, %532 : vector<2x128xf32>
    %534 = math.tanh %533 : vector<2x128xf32>
    %535 = arith.mulf %530, %534 : vector<2x128xf32>
    %536 = arith.truncf %535 : vector<2x128xf32> to vector<2x128xbf16>
    %c0_227 = arith.constant 0 : index
    %c128_228 = arith.constant 128 : index
    %537 = vector.load %arg9[%c0_227, %c128_228] : memref<2x256xbf16, #tpu.memory_space<vmem>>, vector<2x128xbf16>
    tpu.vector_store %arg9[%c0_227, %c128_228], %536 {strides = array<i32>} : memref<2x256xbf16, #tpu.memory_space<vmem>>, vector<2x128xbf16>,
    %c6_229 = arith.constant 6 : index
    %c0_230 = arith.constant 0 : index
    %c0_231 = arith.constant 0 : index
    %538 = vector.load %arg8[%c6_229, %c0_230, %c0_231] : memref<8x2x512xf32, #tpu.memory_space<vmem>>, vector<1x2x512xf32>
    %539 = vector.shape_cast %538 : vector<1x2x512xf32> to vector<2x512xf32>
    %540 = arith.addf %539, %504 : vector<2x512xf32>
    %541 = vector.extract_strided_slice %540 {offsets = [0, 0], sizes = [2, 128], strides = [1, 1]} : vector<2x512xf32> to vector<2x128xf32>
    %cst_232 = arith.constant 5.000000e-01 : f32
    %542 = vector.broadcast %cst_232 : f32 to vector<2x128xf32>
    %543 = arith.mulf %542, %541 : vector<2x128xf32>
    %544 = math.tanh %543 : vector<2x128xf32>
    %cst_233 = arith.constant 5.000000e-01 : f32
    %545 = vector.broadcast %cst_233 : f32 to vector<2x128xf32>
    %546 = arith.mulf %545, %544 : vector<2x128xf32>
    %cst_234 = arith.constant 5.000000e-01 : f32
    %547 = vector.broadcast %cst_234 : f32 to vector<2x128xf32>
    %548 = arith.addf %546, %547 : vector<2x128xf32>
    %549 = vector.extract_strided_slice %540 {offsets = [0, 128], sizes = [2, 128], strides = [1, 1]} : vector<2x512xf32> to vector<2x128xf32>
    %cst_235 = arith.constant 5.000000e-01 : f32
    %550 = vector.broadcast %cst_235 : f32 to vector<2x128xf32>
    %551 = arith.mulf %550, %549 : vector<2x128xf32>
    %552 = math.tanh %551 : vector<2x128xf32>
    %cst_236 = arith.constant 5.000000e-01 : f32
    %553 = vector.broadcast %cst_236 : f32 to vector<2x128xf32>
    %554 = arith.mulf %553, %552 : vector<2x128xf32>
    %cst_237 = arith.constant 5.000000e-01 : f32
    %555 = vector.broadcast %cst_237 : f32 to vector<2x128xf32>
    %556 = arith.addf %554, %555 : vector<2x128xf32>
    %557 = vector.extract_strided_slice %540 {offsets = [0, 256], sizes = [2, 128], strides = [1, 1]} : vector<2x512xf32> to vector<2x128xf32>
    %558 = math.tanh %557 : vector<2x128xf32>
    %559 = vector.extract_strided_slice %540 {offsets = [0, 384], sizes = [2, 128], strides = [1, 1]} : vector<2x512xf32> to vector<2x128xf32>
    %cst_238 = arith.constant 5.000000e-01 : f32
    %560 = vector.broadcast %cst_238 : f32 to vector<2x128xf32>
    %561 = arith.mulf %560, %559 : vector<2x128xf32>
    %562 = math.tanh %561 : vector<2x128xf32>
    %cst_239 = arith.constant 5.000000e-01 : f32
    %563 = vector.broadcast %cst_239 : f32 to vector<2x128xf32>
    %564 = arith.mulf %563, %562 : vector<2x128xf32>
    %cst_240 = arith.constant 5.000000e-01 : f32
    %565 = vector.broadcast %cst_240 : f32 to vector<2x128xf32>
    %566 = arith.addf %564, %565 : vector<2x128xf32>
    %567 = arith.mulf %556, %494 : vector<2x128xf32>
    %568 = arith.mulf %548, %558 : vector<2x128xf32>
    %569 = arith.addf %567, %568 : vector<2x128xf32>
    %570 = math.tanh %569 : vector<2x128xf32>
    %571 = arith.mulf %566, %570 : vector<2x128xf32>
    %572 = arith.truncf %571 : vector<2x128xf32> to vector<2x128xbf16>
    %c0_241 = arith.constant 0 : index
    %c0_242 = arith.constant 0 : index
    %573 = vector.load %arg9[%c0_241, %c0_242] : memref<2x256xbf16, #tpu.memory_space<vmem>>, vector<2x128xbf16>
    tpu.vector_store %arg9[%c0_241, %c0_242], %572 {strides = array<i32>} : memref<2x256xbf16, #tpu.memory_space<vmem>>, vector<2x128xbf16>,
    %c0_243 = arith.constant 0 : index
    %c0_244 = arith.constant 0 : index
    %574 = vector.load %arg9[%c0_243, %c0_244] : memref<2x256xbf16, #tpu.memory_space<vmem>>, vector<2x256xbf16>
    %c0_245 = arith.constant 0 : index
    %c0_246 = arith.constant 0 : index
    %575 = vector.load %arg3[%c0_245, %c0_246] : memref<256x1024xbf16, #tpu.memory_space<vmem>>, vector<256x1024xbf16>
    %cst_247 = arith.constant dense<0.000000e+00> : vector<2x1024xf32>
    %576 = tpu.matmul %574, %575, %cst_247 {dimension_numbers = #tpu.dot_dimension_numbers<[1], [0], [0], [1], [0, 0, 1, 1], [], []>} : vector<2x256xbf16>, vector<256x1024xbf16>, vector<2x1024xf32> -> vector<2x1024xf32>
    %577 = vector.extract_strided_slice %576 {offsets = [0, 0], sizes = [2, 512], strides = [1, 1]} : vector<2x1024xf32> to vector<2x512xf32>
    %578 = arith.addf %577, %84 : vector<2x512xf32>
    %579 = vector.extract_strided_slice %576 {offsets = [0, 512], sizes = [2, 512], strides = [1, 1]} : vector<2x1024xf32> to vector<2x512xf32>
    %580 = vector.extract_strided_slice %578 {offsets = [0, 0], sizes = [2, 128], strides = [1, 1]} : vector<2x512xf32> to vector<2x128xf32>
    %cst_248 = arith.constant 5.000000e-01 : f32
    %581 = vector.broadcast %cst_248 : f32 to vector<2x128xf32>
    %582 = arith.mulf %581, %580 : vector<2x128xf32>
    %583 = math.tanh %582 : vector<2x128xf32>
    %cst_249 = arith.constant 5.000000e-01 : f32
    %584 = vector.broadcast %cst_249 : f32 to vector<2x128xf32>
    %585 = arith.mulf %584, %583 : vector<2x128xf32>
    %cst_250 = arith.constant 5.000000e-01 : f32
    %586 = vector.broadcast %cst_250 : f32 to vector<2x128xf32>
    %587 = arith.addf %585, %586 : vector<2x128xf32>
    %588 = vector.extract_strided_slice %578 {offsets = [0, 128], sizes = [2, 128], strides = [1, 1]} : vector<2x512xf32> to vector<2x128xf32>
    %cst_251 = arith.constant 5.000000e-01 : f32
    %589 = vector.broadcast %cst_251 : f32 to vector<2x128xf32>
    %590 = arith.mulf %589, %588 : vector<2x128xf32>
    %591 = math.tanh %590 : vector<2x128xf32>
    %cst_252 = arith.constant 5.000000e-01 : f32
    %592 = vector.broadcast %cst_252 : f32 to vector<2x128xf32>
    %593 = arith.mulf %592, %591 : vector<2x128xf32>
    %cst_253 = arith.constant 5.000000e-01 : f32
    %594 = vector.broadcast %cst_253 : f32 to vector<2x128xf32>
    %595 = arith.addf %593, %594 : vector<2x128xf32>
    %596 = vector.extract_strided_slice %578 {offsets = [0, 256], sizes = [2, 128], strides = [1, 1]} : vector<2x512xf32> to vector<2x128xf32>
    %597 = math.tanh %596 : vector<2x128xf32>
    %598 = vector.extract_strided_slice %578 {offsets = [0, 384], sizes = [2, 128], strides = [1, 1]} : vector<2x512xf32> to vector<2x128xf32>
    %cst_254 = arith.constant 5.000000e-01 : f32
    %599 = vector.broadcast %cst_254 : f32 to vector<2x128xf32>
    %600 = arith.mulf %599, %598 : vector<2x128xf32>
    %601 = math.tanh %600 : vector<2x128xf32>
    %cst_255 = arith.constant 5.000000e-01 : f32
    %602 = vector.broadcast %cst_255 : f32 to vector<2x128xf32>
    %603 = arith.mulf %602, %601 : vector<2x128xf32>
    %cst_256 = arith.constant 5.000000e-01 : f32
    %604 = vector.broadcast %cst_256 : f32 to vector<2x128xf32>
    %605 = arith.addf %603, %604 : vector<2x128xf32>
    %606 = arith.mulf %595, %533 : vector<2x128xf32>
    %607 = arith.mulf %587, %597 : vector<2x128xf32>
    %608 = arith.addf %606, %607 : vector<2x128xf32>
    %609 = math.tanh %608 : vector<2x128xf32>
    %610 = arith.mulf %605, %609 : vector<2x128xf32>
    %611 = arith.truncf %610 : vector<2x128xf32> to vector<2x128xbf16>
    %c0_257 = arith.constant 0 : index
    %c128_258 = arith.constant 128 : index
    %612 = vector.load %arg9[%c0_257, %c128_258] : memref<2x256xbf16, #tpu.memory_space<vmem>>, vector<2x128xbf16>
    tpu.vector_store %arg9[%c0_257, %c128_258], %611 {strides = array<i32>} : memref<2x256xbf16, #tpu.memory_space<vmem>>, vector<2x128xbf16>,
    %c7_259 = arith.constant 7 : index
    %c0_260 = arith.constant 0 : index
    %c0_261 = arith.constant 0 : index
    %613 = vector.load %arg8[%c7_259, %c0_260, %c0_261] : memref<8x2x512xf32, #tpu.memory_space<vmem>>, vector<1x2x512xf32>
    %614 = vector.shape_cast %613 : vector<1x2x512xf32> to vector<2x512xf32>
    %615 = arith.addf %614, %579 : vector<2x512xf32>
    %616 = vector.extract_strided_slice %615 {offsets = [0, 0], sizes = [2, 128], strides = [1, 1]} : vector<2x512xf32> to vector<2x128xf32>
    %cst_262 = arith.constant 5.000000e-01 : f32
    %617 = vector.broadcast %cst_262 : f32 to vector<2x128xf32>
    %618 = arith.mulf %617, %616 : vector<2x128xf32>
    %619 = math.tanh %618 : vector<2x128xf32>
    %cst_263 = arith.constant 5.000000e-01 : f32
    %620 = vector.broadcast %cst_263 : f32 to vector<2x128xf32>
    %621 = arith.mulf %620, %619 : vector<2x128xf32>
    %cst_264 = arith.constant 5.000000e-01 : f32
    %622 = vector.broadcast %cst_264 : f32 to vector<2x128xf32>
    %623 = arith.addf %621, %622 : vector<2x128xf32>
    %624 = vector.extract_strided_slice %615 {offsets = [0, 128], sizes = [2, 128], strides = [1, 1]} : vector<2x512xf32> to vector<2x128xf32>
    %cst_265 = arith.constant 5.000000e-01 : f32
    %625 = vector.broadcast %cst_265 : f32 to vector<2x128xf32>
    %626 = arith.mulf %625, %624 : vector<2x128xf32>
    %627 = math.tanh %626 : vector<2x128xf32>
    %cst_266 = arith.constant 5.000000e-01 : f32
    %628 = vector.broadcast %cst_266 : f32 to vector<2x128xf32>
    %629 = arith.mulf %628, %627 : vector<2x128xf32>
    %cst_267 = arith.constant 5.000000e-01 : f32
    %630 = vector.broadcast %cst_267 : f32 to vector<2x128xf32>
    %631 = arith.addf %629, %630 : vector<2x128xf32>
    %632 = vector.extract_strided_slice %615 {offsets = [0, 256], sizes = [2, 128], strides = [1, 1]} : vector<2x512xf32> to vector<2x128xf32>
    %633 = math.tanh %632 : vector<2x128xf32>
    %634 = vector.extract_strided_slice %615 {offsets = [0, 384], sizes = [2, 128], strides = [1, 1]} : vector<2x512xf32> to vector<2x128xf32>
    %cst_268 = arith.constant 5.000000e-01 : f32
    %635 = vector.broadcast %cst_268 : f32 to vector<2x128xf32>
    %636 = arith.mulf %635, %634 : vector<2x128xf32>
    %637 = math.tanh %636 : vector<2x128xf32>
    %cst_269 = arith.constant 5.000000e-01 : f32
    %638 = vector.broadcast %cst_269 : f32 to vector<2x128xf32>
    %639 = arith.mulf %638, %637 : vector<2x128xf32>
    %cst_270 = arith.constant 5.000000e-01 : f32
    %640 = vector.broadcast %cst_270 : f32 to vector<2x128xf32>
    %641 = arith.addf %639, %640 : vector<2x128xf32>
    %642 = arith.mulf %631, %569 : vector<2x128xf32>
    %643 = arith.mulf %623, %633 : vector<2x128xf32>
    %644 = arith.addf %642, %643 : vector<2x128xf32>
    %645 = math.tanh %644 : vector<2x128xf32>
    %646 = arith.mulf %641, %645 : vector<2x128xf32>
    %647 = arith.truncf %646 : vector<2x128xf32> to vector<2x128xbf16>
    %c0_271 = arith.constant 0 : index
    %c0_272 = arith.constant 0 : index
    %648 = vector.load %arg9[%c0_271, %c0_272] : memref<2x256xbf16, #tpu.memory_space<vmem>>, vector<2x128xbf16>
    tpu.vector_store %arg9[%c0_271, %c0_272], %647 {strides = array<i32>} : memref<2x256xbf16, #tpu.memory_space<vmem>>, vector<2x128xbf16>,
    %c0_273 = arith.constant 0 : index
    %c0_274 = arith.constant 0 : index
    %649 = vector.load %arg9[%c0_273, %c0_274] : memref<2x256xbf16, #tpu.memory_space<vmem>>, vector<2x256xbf16>
    %c0_275 = arith.constant 0 : index
    %c0_276 = arith.constant 0 : index
    %650 = vector.load %arg3[%c0_275, %c0_276] : memref<256x1024xbf16, #tpu.memory_space<vmem>>, vector<256x1024xbf16>
    %cst_277 = arith.constant dense<0.000000e+00> : vector<2x1024xf32>
    %651 = tpu.matmul %649, %650, %cst_277 {dimension_numbers = #tpu.dot_dimension_numbers<[1], [0], [0], [1], [0, 0, 1, 1], [], []>} : vector<2x256xbf16>, vector<256x1024xbf16>, vector<2x1024xf32> -> vector<2x1024xf32>
    %652 = vector.extract_strided_slice %651 {offsets = [0, 0], sizes = [2, 512], strides = [1, 1]} : vector<2x1024xf32> to vector<2x512xf32>
    %653 = arith.addf %652, %84 : vector<2x512xf32>
    %654 = vector.extract_strided_slice %653 {offsets = [0, 0], sizes = [2, 128], strides = [1, 1]} : vector<2x512xf32> to vector<2x128xf32>
    %cst_278 = arith.constant 5.000000e-01 : f32
    %655 = vector.broadcast %cst_278 : f32 to vector<2x128xf32>
    %656 = arith.mulf %655, %654 : vector<2x128xf32>
    %657 = math.tanh %656 : vector<2x128xf32>
    %cst_279 = arith.constant 5.000000e-01 : f32
    %658 = vector.broadcast %cst_279 : f32 to vector<2x128xf32>
    %659 = arith.mulf %658, %657 : vector<2x128xf32>
    %cst_280 = arith.constant 5.000000e-01 : f32
    %660 = vector.broadcast %cst_280 : f32 to vector<2x128xf32>
    %661 = arith.addf %659, %660 : vector<2x128xf32>
    %662 = vector.extract_strided_slice %653 {offsets = [0, 128], sizes = [2, 128], strides = [1, 1]} : vector<2x512xf32> to vector<2x128xf32>
    %cst_281 = arith.constant 5.000000e-01 : f32
    %663 = vector.broadcast %cst_281 : f32 to vector<2x128xf32>
    %664 = arith.mulf %663, %662 : vector<2x128xf32>
    %665 = math.tanh %664 : vector<2x128xf32>
    %cst_282 = arith.constant 5.000000e-01 : f32
    %666 = vector.broadcast %cst_282 : f32 to vector<2x128xf32>
    %667 = arith.mulf %666, %665 : vector<2x128xf32>
    %cst_283 = arith.constant 5.000000e-01 : f32
    %668 = vector.broadcast %cst_283 : f32 to vector<2x128xf32>
    %669 = arith.addf %667, %668 : vector<2x128xf32>
    %670 = vector.extract_strided_slice %653 {offsets = [0, 256], sizes = [2, 128], strides = [1, 1]} : vector<2x512xf32> to vector<2x128xf32>
    %671 = math.tanh %670 : vector<2x128xf32>
    %672 = vector.extract_strided_slice %653 {offsets = [0, 384], sizes = [2, 128], strides = [1, 1]} : vector<2x512xf32> to vector<2x128xf32>
    %cst_284 = arith.constant 5.000000e-01 : f32
    %673 = vector.broadcast %cst_284 : f32 to vector<2x128xf32>
    %674 = arith.mulf %673, %672 : vector<2x128xf32>
    %675 = math.tanh %674 : vector<2x128xf32>
    %cst_285 = arith.constant 5.000000e-01 : f32
    %676 = vector.broadcast %cst_285 : f32 to vector<2x128xf32>
    %677 = arith.mulf %676, %675 : vector<2x128xf32>
    %cst_286 = arith.constant 5.000000e-01 : f32
    %678 = vector.broadcast %cst_286 : f32 to vector<2x128xf32>
    %679 = arith.addf %677, %678 : vector<2x128xf32>
    %680 = arith.mulf %669, %608 : vector<2x128xf32>
    %681 = arith.mulf %661, %671 : vector<2x128xf32>
    %682 = arith.addf %680, %681 : vector<2x128xf32>
    %683 = math.tanh %682 : vector<2x128xf32>
    %684 = arith.mulf %679, %683 : vector<2x128xf32>
    %c0_287 = arith.constant 0 : index
    %c0_288 = arith.constant 0 : index
    %685 = vector.load %arg5[%c0_287, %c0_288] : memref<1x128xf32, #tpu.memory_space<vmem>>, vector<1x128xf32>
    %686 = vector.broadcast %685 : vector<1x128xf32> to vector<2x128xf32>
    %687 = arith.mulf %684, %686 : vector<2x128xf32>
    %cst_289 = arith.constant dense<0.000000e+00> : vector<2xf32>
    %688 = vector.multi_reduction <add>, %687, %cst_289 [1] : vector<2x128xf32> to vector<2xf32>
    %689 = vector.shape_cast %688 : vector<2xf32> to vector<2x1xf32>
    %c0_290 = arith.constant 0 : index
    %c0_291 = arith.constant 0 : index
    %690 = vector.load %arg6[%c0_290, %c0_291] : memref<1x1xf32, #tpu.memory_space<vmem>>, vector<1x1xf32>
    %691 = vector.broadcast %690 : vector<1x1xf32> to vector<2x1xf32>
    %692 = arith.addf %689, %691 : vector<2x1xf32>
    %c0_292 = arith.constant 0 : index
    %c0_293 = arith.constant 0 : index
    %693 = vector.load %arg7[%c0_292, %c0_293] : memref<2x1xf32, #tpu.memory_space<vmem>>, vector<2x1xf32>
    tpu.vector_store %arg7[%c0_292, %c0_293], %692 {strides = array<i32>} : memref<2x1xf32, #tpu.memory_space<vmem>>, vector<2x1xf32>,
    return
  }
}

</mosaic_0001>

<bundles_post_ra>
// kernel: lstm_model.1
= control target key start
LH: loop header
LB: loop body
LE: loop exit
PB: predicated region body
PF: predicated region fallthrough
CT: control target
= control target key end

     0   :  { %s11583_s0 = inlined_call_operand.vmem [shape: f32[8,2,1], index: 0, kind: input, shape index: {}]   ;;  %s11584_s1 = inlined_call_operand.vmem [shape: f32[1,512], index: 1, kind: input, shape index: {}]   ;;  %s11585_s2 = inlined_call_operand.vmem [shape: f32[1,512], index: 2, kind: input, shape index: {}]   ;;  %s11586_s3 = inlined_call_operand.hbm [shape: bf16[256,1024], index: 3, kind: input, shape index: {}]   ;;  %s11587_s4 = inlined_call_operand.vmem [shape: f32[1,512], index: 4, kind: input, shape index: {}]   ;;  %s11588_s5 = inlined_call_operand.vmem [shape: f32[1,128], index: 5, kind: input, shape index: {}]   ;;  %s11589_s6 = inlined_call_operand.<no memory space> [shape: f32[1,1], index: 6, kind: input, shape index: {}]   ;;  %s11590_s7 = inlined_call_operand.vmem [shape: f32[2,1], index: 7, kind: output, shape index: {}]  }
   0x1   :  { %v12_v0 = vstv %s11589_s6 }
   0x2   :  { %13 = vst [vmem:[#allocation4] sm:$0x1] %v12_v0 }
   0x3   :  { %14 = vsyncpa [#allocation6], 0  ;;  %s9389_s26 = smov [#allocation5]   ;;  %s9365_s30 = scalar_lea.hbm %s11586_s3, 16384 }
   0x4   :  { %s26_s27 = sshll.u32 %s9389_s26, 4  ;;  %p9366_p0 = scmp.ne.s32.totalorder %s11586_s3, %s9365_s30  ;;  %s27_s27 = int_to_ptr.vmem [resolvable:$true] %s26_s27 }
   0x5   :  { %p9369_p1 = scmp.lt.u32.totalorder %s9365_s30, %s11586_s3 }
   0x7   :  { %p9371_p2 = pnand %p9369_p1, %p9366_p0 }
   0x9   :  { %9374 = shalt.err (!%p9371_p2)
}
   0xa   :  { %s9375_s6 = scalar_lea.vmem %s27_s27, 16384  ;;  %p9380_p4 = scmp.lt.s32.totalorder %s27_s27, %s27_s27 }
   0xb   :  { %p9376_p3 = scmp.ne.s32.totalorder %s27_s27, %s9375_s6  ;;  %p9381_p5 = scmp.lt.s32.totalorder %s9375_s6, %s9375_s6 }
   0xd   :  { %p9382_p6 = por %p9381_p5, %p9380_p4 }
   0xf   :  { %p9383_p7 = pnand %p9382_p6, %p9376_p3 }
  0x11   :  { %9386 = shalt.err (!%p9383_p7)
}
  0x12   :  { %s9390_s12 = smov 512   ;;  %s9391_s13 = smov 32  }
  0x13   :  { %32 = dma.hbm_to_vmem [thread:$0]  %s11586_s3, 16384, %s27_s27, [#allocation6], %s9390_s12, %s9390_s12, %s9391_s13  }
  0x14   :  { %9387 = dma.done.wait [#allocation6], 16384  }
  0x15   :  { %9388 = vsyncadd [#allocation6], 4294950912  ;;  %v9392_v1 = vmov 0   ;;  %v45_v2 = vld [vmem:[%s11583_s0] sm:$0x3]  ;;  %v449_v3 = vld [vmem:[#allocation5] sm:$0xff] }
  0x16   :  { %9203 = vset.pattern.permute.xlu0 %v9392_v1  ;;  %419 = vst [vmem:[#allocation3] sm:$0x3] %v9392_v1  ;;  %9204 = vset.pattern.permute.xlu1 %v9392_v1  ;;  %v453_v4 = vld [vmem:[#allocation5 + $0x20] sm:$0xff]  ;;  %v450_v7 = vld [vmem:[#allocation5 + $0x8] sm:$0xff]  ;;  %vm8201_vm0 = vcmask 1041408   ;;  %vm8213_vm1 = vcmask 1024  }
  0x17   :  { %48 = vperm.xlu0 %9203, %v45_v2   ;;  %v8220_v5 = vld [vmem:[%s11583_s0 + $0x2] sm:$0x3]  ;;  %v8229_v6 = vcombine.high %v449_v3, %v453_v4  ;;  %v454_v8 = vld [vmem:[#allocation5 + $0x28] sm:$0xff]  ;;  %v8228_v9 = vcombine.low %v449_v3, %v453_v4  ;;  %v8223_v21 = vld [vmem:[%s11583_s0 + $0x8] sm:$0x3] }
  0x18   :  { %v8231_v10 = vcombine.high %v450_v7, %v454_v8  ;;  %v8230_v11 = vcombine.low %v450_v7, %v454_v8  ;;  %v457_v12 = vld [vmem:[#allocation5 + $0x40] sm:$0xff]  ;;  %v458_v14 = vld [vmem:[#allocation5 + $0x48] sm:$0xff] }
  0x19   :  { %v461_v13 = vld [vmem:[#allocation5 + $0x60] sm:$0xff]  ;;  %1242 = vmatprep.subr.bf16.mxu0 %v8229_v6  ;;  %v462_v15 = vld [vmem:[#allocation5 + $0x68] sm:$0xff] }
  0x1a   :  { %v465_v16 = vld [vmem:[#allocation5 + $0x80] sm:$0xff]  ;;  %1283 = vmatprep.subr.bf16.mxu1 %v8231_v10  ;;  %v9456_v17 = vcombine.high %v457_v12, %v461_v13  ;;  %v466_v19 = vld [vmem:[#allocation5 + $0x88] sm:$0xff]  ;;  %1243 = vmatpush1.bf16.msra.mxu0 %v8228_v9  ;;  %v9461_v22 = vcombine.high %v458_v14, %v462_v15  ;;  %v9463_v23 = vcombine.low %v457_v12, %v461_v13 }
  0x1b   :  { %128 = vperm.xlu0 %9203, %v8220_v5   ;;  %v469_v18 = vld [vmem:[#allocation5 + $0xa0] sm:$0xff]  ;;  %v470_v20 = vld [vmem:[#allocation5 + $0xa8] sm:$0xff]  ;;  %1284 = vmatpush1.bf16.msra.mxu1 %v8230_v11  ;;  %v9465_v24 = vcombine.low %v458_v14, %v462_v15 }
  0x1c   :  { %1244 = vmatprep.subr.bf16.mxu0 %v9456_v17  ;;  %v9468_v25 = vcombine.high %v465_v16, %v469_v18  ;;  %v9470_v26 = vcombine.high %v466_v19, %v470_v20  ;;  %v473_v27 = vld [vmem:[#allocation5 + $0xc0] sm:$0xff]  ;;  %1285 = vmatprep.subr.bf16.mxu1 %v9461_v22  ;;  %v474_v29 = vld [vmem:[#allocation5 + $0xc8] sm:$0xff]  ;;  %v9478_v32 = vcombine.low %v465_v16, %v469_v18 }
  0x1d   :  { %v477_v28 = vld [vmem:[#allocation5 + $0xe0] sm:$0xff]  ;;  %v478_v30 = vld [vmem:[#allocation5 + $0xe8] sm:$0xff]  ;;  %v9480_v33 = vcombine.low %v466_v19, %v470_v20 }
  0x1e   :  { %v8225_v31 = vld [vmem:[%s11583_s0 + $0xc] sm:$0x3]  ;;  %1245 = vmatpush1.bf16.msra.mxu0 %v9463_v23  ;;  %v9484_v34 = vcombine.high %v473_v27, %v477_v28  ;;  %v9486_v35 = vcombine.high %v474_v29, %v478_v30  ;;  %v481_v36 = vld [vmem:[#allocation5 + $0x100] sm:$0xff]  ;;  %v9490_v40 = vcombine.low %v473_v27, %v477_v28  ;;  %v9492_v41 = vcombine.low %v474_v29, %v478_v30 }
  0x1f   :  { %245 = vperm.xlu0 %9203, %v8223_v21   ;;  %1286 = vmatpush1.bf16.msra.mxu1 %v9465_v24  ;;  %v485_v37 = vld [vmem:[#allocation5 + $0x120] sm:$0xff]  ;;  %v482_v38 = vld [vmem:[#allocation5 + $0x108] sm:$0xff] }
  0x20   :  { %1246 = vmatprep.subr.bf16.mxu0 %v9468_v25  ;;  %1287 = vmatprep.subr.bf16.mxu1 %v9470_v26  ;;  %v486_v39 = vld [vmem:[#allocation5 + $0x128] sm:$0xff]  ;;  %v9496_v42 = vcombine.high %v481_v36, %v485_v37  ;;  %v489_v44 = vld [vmem:[#allocation5 + $0x140] sm:$0xff]  ;;  %v9502_v48 = vcombine.low %v481_v36, %v485_v37 }
  0x21   :  { %v9498_v43 = vcombine.high %v482_v38, %v486_v39  ;;  %v493_v45 = vld [vmem:[#allocation5 + $0x160] sm:$0xff]  ;;  %v490_v46 = vld [vmem:[#allocation5 + $0x148] sm:$0xff]  ;;  %v9504_v49 = vcombine.low %v482_v38, %v486_v39 }
  0x22   :  { %1247 = vmatpush1.bf16.msra.mxu0 %v9478_v32  ;;  %v494_v47 = vld [vmem:[#allocation5 + $0x168] sm:$0xff]  ;;  %v9508_v50 = vcombine.high %v489_v44, %v493_v45  ;;  %v497_v52 = vld [vmem:[#allocation5 + $0x180] sm:$0xff]  ;;  %v9514_v56 = vcombine.low %v489_v44, %v493_v45 }
  0x23   :  { %323 = vperm.xlu0 %9203, %v8225_v31   ;;  %1288 = vmatpush1.bf16.msra.mxu1 %v9480_v33  ;;  %v9510_v51 = vcombine.high %v490_v46, %v494_v47  ;;  %v501_v53 = vld [vmem:[#allocation5 + $0x1a0] sm:$0xff]  ;;  %v498_v54 = vld [vmem:[#allocation5 + $0x188] sm:$0xff]  ;;  %v9516_v57 = vcombine.low %v490_v46, %v494_v47 }
  0x24   :  { %1248 = vmatprep.subr.bf16.mxu0 %v9484_v34  ;;  %1289 = vmatprep.subr.bf16.mxu1 %v9486_v35  ;;  %v502_v55 = vld [vmem:[#allocation5 + $0x1a8] sm:$0xff]  ;;  %v9520_v58 = vcombine.high %v497_v52, %v501_v53  ;;  %v505_v60 = vld [vmem:[#allocation5 + $0x1c0] sm:$0xff]  ;;  %v9526_v0 = vcombine.low %v497_v52, %v501_v53 }
  0x25   :  { %v9522_v59 = vcombine.high %v498_v54, %v502_v55  ;;  %v509_v61 = vld [vmem:[#allocation5 + $0x1e0] sm:$0xff]  ;;  %v506_v62 = vld [vmem:[#allocation5 + $0x1c8] sm:$0xff]  ;;  %v9528_v1 = vcombine.low %v498_v54, %v502_v55 }
  0x26   :  { %1249 = vmatpush1.bf16.msra.mxu0 %v9490_v40  ;;  %v510_v63 = vld [vmem:[#allocation5 + $0x1e8] sm:$0xff]  ;;  %v9532_v2 = vcombine.high %v505_v60, %v509_v61  ;;  %v513_v4 = vld [vmem:[#allocation5 + $0x200] sm:$0xff]  ;;  %v9538_v8 = vcombine.low %v505_v60, %v509_v61 }
  0x27   :  { %1290 = vmatpush1.bf16.msra.mxu1 %v9492_v41  ;;  %1250 = vmatprep.subr.bf16.mxu0 %v9496_v42  ;;  %v9534_v3 = vcombine.high %v506_v62, %v510_v63  ;;  %v517_v5 = vld [vmem:[#allocation5 + $0x220] sm:$0xff]  ;;  %v514_v6 = vld [vmem:[#allocation5 + $0x208] sm:$0xff]  ;;  %v9540_v9 = vcombine.low %v506_v62, %v510_v63 }
  0x28   :  { %1291 = vmatprep.subr.bf16.mxu1 %v9498_v43  ;;  %v518_v7 = vld [vmem:[#allocation5 + $0x228] sm:$0xff]  ;;  %v9544_v10 = vcombine.high %v513_v4, %v517_v5  ;;  %v521_v12 = vld [vmem:[#allocation5 + $0x240] sm:$0xff]  ;;  %v9550_v16 = vcombine.low %v513_v4, %v517_v5 }
  0x29   :  { %v9546_v11 = vcombine.high %v514_v6, %v518_v7  ;;  %v525_v13 = vld [vmem:[#allocation5 + $0x260] sm:$0xff]  ;;  %v522_v14 = vld [vmem:[#allocation5 + $0x248] sm:$0xff]  ;;  %v9552_v18 = vcombine.low %v514_v6, %v518_v7 }
  0x2a   :  { %1251 = vmatpush1.bf16.msra.mxu0 %v9502_v48  ;;  %v526_v15 = vld [vmem:[#allocation5 + $0x268] sm:$0xff]  ;;  %v9556_v19 = vcombine.high %v521_v12, %v525_v13  ;;  %v529_v21 = vld [vmem:[#allocation5 + $0x280] sm:$0xff]  ;;  %v9562_v30 = vcombine.low %v521_v12, %v525_v13 }
  0x2b   :  { %1292 = vmatpush1.bf16.msra.mxu1 %v9504_v49  ;;  %1252 = vmatprep.subr.bf16.mxu0 %v9508_v50  ;;  %v9558_v20 = vcombine.high %v522_v14, %v526_v15  ;;  %v533_v27 = vld [vmem:[#allocation5 + $0x2a0] sm:$0xff]  ;;  %v530_v28 = vld [vmem:[#allocation5 + $0x288] sm:$0xff]  ;;  %v9564_v31 = vcombine.low %v522_v14, %v526_v15 }
  0x2c   :  { %1293 = vmatprep.subr.bf16.mxu1 %v9510_v51  ;;  %v534_v29 = vld [vmem:[#allocation5 + $0x2a8] sm:$0xff]  ;;  %v9568_v36 = vcombine.high %v529_v21, %v533_v27  ;;  %v537_v38 = vld [vmem:[#allocation5 + $0x2c0] sm:$0xff]  ;;  %v9574_v46 = vcombine.low %v529_v21, %v533_v27 }
  0x2d   :  { %v9570_v37 = vcombine.high %v530_v28, %v534_v29  ;;  %v541_v39 = vld [vmem:[#allocation5 + $0x2e0] sm:$0xff]  ;;  %v538_v44 = vld [vmem:[#allocation5 + $0x2c8] sm:$0xff]  ;;  %v9576_v47 = vcombine.low %v530_v28, %v534_v29 }
  0x2e   :  { %1253 = vmatpush1.bf16.msra.mxu0 %v9514_v56  ;;  %v542_v45 = vld [vmem:[#allocation5 + $0x2e8] sm:$0xff]  ;;  %v9580_v52 = vcombine.high %v537_v38, %v541_v39  ;;  %v545_v54 = vld [vmem:[#allocation5 + $0x300] sm:$0xff]  ;;  %v9586_v62 = vcombine.low %v537_v38, %v541_v39 }
  0x2f   :  { %1294 = vmatpush1.bf16.msra.mxu1 %v9516_v57  ;;  %1254 = vmatprep.subr.bf16.mxu0 %v9520_v58  ;;  %11893 = vst [vmem:[#allocation8_spill] sm:$0xff] %v9576_v47  ;;  %v9582_v53 = vcombine.high %v538_v44, %v542_v45  ;;  %v549_v55 = vld [vmem:[#allocation5 + $0x320] sm:$0xff]  ;;  %v546_v60 = vld [vmem:[#allocation5 + $0x308] sm:$0xff]  ;;  %v9588_v63 = vcombine.low %v538_v44, %v542_v45 }
  0x30   :  { %1295 = vmatprep.subr.bf16.mxu1 %v9522_v59  ;;  %11894 = vst [vmem:[#allocation9_spill] sm:$0xff] %v9580_v52  ;;  %v550_v61 = vld [vmem:[#allocation5 + $0x328] sm:$0xff]  ;;  %11896 = vst [vmem:[#allocation11_spill] sm:$0xff] %v9586_v62  ;;  %v9592_v4 = vcombine.high %v545_v54, %v549_v55  ;;  %v553_v6 = vld [vmem:[#allocation5 + $0x340] sm:$0xff]  ;;  %v9598_v14 = vcombine.low %v545_v54, %v549_v55 }
  0x31   :  { %11895 = vst [vmem:[#allocation10_spill] sm:$0xff] %v9582_v53  ;;  %11897 = vst [vmem:[#allocation12_spill] sm:$0xff] %v9588_v63  ;;  %v9594_v5 = vcombine.high %v546_v60, %v550_v61  ;;  %v557_v7 = vld [vmem:[#allocation5 + $0x360] sm:$0xff]  ;;  %v554_v12 = vld [vmem:[#allocation5 + $0x348] sm:$0xff]  ;;  %v9600_v15 = vcombine.low %v546_v60, %v550_v61 }
  0x32   :  { %1255 = vmatpush1.bf16.msra.mxu0 %v9526_v0  ;;  %11898 = vst [vmem:[#allocation13_spill] sm:$0xff] %v9592_v4  ;;  %v558_v13 = vld [vmem:[#allocation5 + $0x368] sm:$0xff]  ;;  %11900 = vst [vmem:[#allocation15_spill] sm:$0xff] %v9598_v14  ;;  %v9604_v21 = vcombine.high %v553_v6, %v557_v7  ;;  %v561_v28 = vld [vmem:[#allocation5 + $0x380] sm:$0xff]  ;;  %v9610_v44 = vcombine.low %v553_v6, %v557_v7 }
  0x33   :  { %1296 = vmatpush1.bf16.msra.mxu1 %v9528_v1  ;;  %1256 = vmatprep.subr.bf16.mxu0 %v9532_v2  ;;  %11899 = vst [vmem:[#allocation14_spill] sm:$0xff] %v9594_v5  ;;  %11901 = vst [vmem:[#allocation16_spill] sm:$0xff] %v9600_v15  ;;  %v9606_v27 = vcombine.high %v554_v12, %v558_v13  ;;  %v565_v29 = vld [vmem:[#allocation5 + $0x3a0] sm:$0xff]  ;;  %v562_v38 = vld [vmem:[#allocation5 + $0x388] sm:$0xff]  ;;  %v9612_v45 = vcombine.low %v554_v12, %v558_v13 }
  0x34   :  { %1297 = vmatprep.subr.bf16.mxu1 %v9534_v3  ;;  %11902 = vst [vmem:[#allocation17_spill] sm:$0xff] %v9604_v21  ;;  %v566_v39 = vld [vmem:[#allocation5 + $0x3a8] sm:$0xff]  ;;  %11904 = vst [vmem:[#allocation19_spill] sm:$0xff] %v9610_v44  ;;  %v9616_v54 = vcombine.high %v561_v28, %v565_v29  ;;  %v569_v60 = vld [vmem:[#allocation5 + $0x3c0] sm:$0xff]  ;;  %v9622_v6 = vcombine.low %v561_v28, %v565_v29 }
  0x35   :  { %11903 = vst [vmem:[#allocation18_spill] sm:$0xff] %v9606_v27  ;;  %11905 = vst [vmem:[#allocation20_spill] sm:$0xff] %v9612_v45  ;;  %v9618_v55 = vcombine.high %v562_v38, %v566_v39  ;;  %v573_v61 = vld [vmem:[#allocation5 + $0x3e0] sm:$0xff]  ;;  %v9624_v7 = vcombine.low %v562_v38, %v566_v39 }
  0x36   :  { %1257 = vmatpush1.bf16.msra.mxu0 %v9538_v8  ;;  %11906 = vst [vmem:[#allocation21_spill] sm:$0xff] %v9616_v54  ;;  %11908 = vst [vmem:[#allocation23_spill] sm:$0xff] %v9622_v6  ;;  %v9628_v12 = vcombine.high %v569_v60, %v573_v61  ;;  %v9636_v28 = vcombine.low %v569_v60, %v573_v61 }
  0x37   :  { %1298 = vmatpush1.bf16.msra.mxu1 %v9540_v9  ;;  %1258 = vmatprep.subr.bf16.mxu0 %v9544_v10  ;;  %11907 = vst [vmem:[#allocation22_spill] sm:$0xff] %v9618_v55  ;;  %11909 = vst [vmem:[#allocation24_spill] sm:$0xff] %v9624_v7 }
  0x38   :  { %1299 = vmatprep.subr.bf16.mxu1 %v9546_v11  ;;  %11910 = vst [vmem:[#allocation25_spill] sm:$0xff] %v9628_v12  ;;  %11913 = vst [vmem:[#allocation28_spill] sm:$0xff] %v9636_v28 }
  0x3a   :  { %1259 = vmatpush1.bf16.msra.mxu0 %v9550_v16 }
  0x3b   :  { %1300 = vmatpush1.bf16.msra.mxu1 %v9552_v18  ;;  %1260 = vmatprep.subr.bf16.mxu0 %v9556_v19 }
  0x3c   :  { %1301 = vmatprep.subr.bf16.mxu1 %v9558_v20 }
  0x3e   :  { %1261 = vmatpush1.bf16.msra.mxu0 %v9562_v30 }
  0x3f   :  { %1302 = vmatpush1.bf16.msra.mxu1 %v9564_v31  ;;  %1262 = vmatprep.subr.bf16.mxu0 %v9568_v36 }
  0x40   :  { %1303 = vmatprep.subr.bf16.mxu1 %v9570_v37 }
  0x42   :  { %1263 = vmatpush1.bf16.msra.mxu0 %v9574_v46 }
  0x43   :  { %1304 = vmatpush1.bf16.msra.mxu1 %v9576_v47  ;;  %1264 = vmatprep.subr.bf16.mxu0 %v9580_v52 }
  0x44   :  { %1305 = vmatprep.subr.bf16.mxu1 %v9582_v53 }
  0x46   :  { %1265 = vmatpush1.bf16.msra.mxu0 %v9586_v62 }
  0x47   :  { %1306 = vmatpush1.bf16.msra.mxu1 %v9588_v63  ;;  %1266 = vmatprep.subr.bf16.mxu0 %v9592_v4  ;;  %v574_v4 = vld [vmem:[#allocation5 + $0x3e8] sm:$0xff] }
  0x48   :  { %1307 = vmatprep.subr.bf16.mxu1 %v9594_v5  ;;  %v570_v5 = vld [vmem:[#allocation5 + $0x3c8] sm:$0xff] }
  0x49   :  { %v9630_v13 = vcombine.high %v570_v5, %v574_v4  ;;  %v9638_v29 = vcombine.low %v570_v5, %v574_v4  ;;  %v52_v4 = vlaneseq }
  0x4a   :  { %1267 = vmatpush1.bf16.msra.mxu0 %v9598_v14 }
  0x4b   :  { %1308 = vmatpush1.bf16.msra.mxu1 %v9600_v15  ;;  %1268 = vmatprep.subr.bf16.mxu0 %v9604_v21  ;;  %11911 = vst [vmem:[#allocation26_spill] sm:$0xff] %v9630_v13  ;;  %v455_v21 = vld [vmem:[#allocation5 + $0x30] sm:$0xff]  ;;  %v452_v15 = vld [vmem:[#allocation5 + $0x18] sm:$0xff]  ;;  %11914 = vst [vmem:[#allocation29_spill] sm:$0xff] %v9638_v29  ;;  %v9652_v5 = vshrl.u32 %v52_v4, 7 }
  0x4c   :  { %1309 = vmatprep.subr.bf16.mxu1 %v9606_v27  ;;  %v451_v27 = vld [vmem:[#allocation5 + $0x10] sm:$0xff]  ;;  %v44_v4 = vld [vmem:[%s11585_s2] sm:$0xf] }
  0x4d   :  { %v9632_v14 = vcombine.low %v451_v27, %v455_v21  ;;  %v9644_v39 = vcombine.high %v451_v27, %v455_v21  ;;  %v9655_v60 = vsub.s32 0, %v9652_v5  ;;  %v9658_v61 = vsub.s32 1, %v9652_v5 }
  0x4e   :  { %1269 = vmatpush1.bf16.msra.mxu0 %v9610_v44  ;;  %v456_v44 = vld [vmem:[#allocation5 + $0x38] sm:$0xff]  ;;  %v9664_v21 = vsub.s32 3, %v9652_v5  ;;  %v9393_v27 = vmov 1983009808  }
  0x4f   :  { %1310 = vmatpush1.bf16.msra.mxu1 %v9612_v45  ;;  %1270 = vmatprep.subr.bf16.mxu0 %v9616_v54  ;;  %11912 = vst [vmem:[#allocation27_spill] sm:$0xff] %v9632_v14  ;;  %v9640_v38 = vcombine.low %v452_v15, %v456_v44  ;;  %11916 = vst [vmem:[#allocation31_spill] sm:$0xff] %v9644_v39 }
  0x50   :  { %1311 = vmatprep.subr.bf16.mxu1 %v9618_v55  ;;  %v9646_v55 = vcombine.high %v452_v15, %v456_v44  ;;  %11918 = vst [vmem:[#allocation33_spill] sm:$0xff] %v9655_v60  ;;  %11919 = vst [vmem:[#allocation34_spill] sm:$0xff] %v9658_v61  ;;  %v9661_v15 = vsub.s32 2, %v9652_v5  ;;  %v108_v44 = vunpack.c.l.s4 %v9393_v27  ;;  %v9694_v54 = vrot.slane %v44_v4, %v9664_v21 }
  0x51   :  { %11915 = vst [vmem:[#allocation30_spill] sm:$0xff] %v9640_v38  ;;  %11921 = vst [vmem:[#allocation36_spill] sm:$0xff] %v9664_v21 }
  0x52   :  { %1271 = vmatpush1.bf16.msra.mxu0 %v9622_v6  ;;  %11917 = vst [vmem:[#allocation32_spill] sm:$0xff] %v9646_v55  ;;  %11920 = vst [vmem:[#allocation35_spill] sm:$0xff] %v9661_v15  ;;  %v109_v27 = vunpack.c.0.s8 %v108_v44  ;;  %v9691_v6 = vrot.slane %v44_v4, %v9661_v15 }
  0x53   :  { %1312 = vmatpush1.bf16.msra.mxu1 %v9624_v7  ;;  %1272 = vmatprep.subr.bf16.mxu0 %v9628_v12  ;;  %v9685_v12 = vrot.slane %v44_v4, %v9655_v60  ;;  %v9688_v7 = vrot.slane %v44_v4, %v9658_v61  ;;  %11929 = vst [vmem:[#allocation44_spill] sm:$0xff] %v9694_v54 }
  0x54   :  { %1313 = vmatprep.subr.bf16.mxu1 %v9630_v13  ;;  %11928 = vst [vmem:[#allocation43_spill] sm:$0xff] %v9691_v6 }
  0x55   :  { %11926 = vst [vmem:[#allocation41_spill] sm:$0xff] %v9685_v12  ;;  %11927 = vst [vmem:[#allocation42_spill] sm:$0xff] %v9688_v7 }
  0x56   :  { %1273 = vmatpush1.bf16.msra.mxu0 %v9636_v28 }
  0x57   :  { %1314 = vmatpush1.bf16.msra.mxu1 %v9638_v29  ;;  %1324 = vmatprep.subr.bf16.mxu0 %v9644_v39 }
  0x58   :  { %1365 = vmatprep.subr.bf16.mxu1 %v9646_v55  ;;  %v43_v55 = vld [vmem:[%s11584_s1] sm:$0xf] }
  0x59   :  { %v9673_v39 = vrot.slane %v43_v55, %v9655_v60  ;;  %v9676_v29 = vrot.slane %v43_v55, %v9658_v61  ;;  %v9679_v28 = vrot.slane %v43_v55, %v9661_v15  ;;  %v9682_v13 = vrot.slane %v43_v55, %v9664_v21 }
  0x5a   :  { %v9701_v60 = vsub.s32 %v109_v27, %v9652_v5 }
  0x5b   :  { %11922 = vst [vmem:[#allocation37_spill] sm:$0xff] %v9673_v39  ;;  %11923 = vst [vmem:[#allocation38_spill] sm:$0xff] %v9676_v29 }
  0x5c   :  { %11924 = vst [vmem:[#allocation39_spill] sm:$0xff] %v9679_v28  ;;  %11925 = vst [vmem:[#allocation40_spill] sm:$0xff] %v9682_v13 }
  0x96   :  { %v49_v45 = vpop.permute.xlu0 %48 }
  0x97   :  { %v72_v63 = vmul.f32 %v9673_v39, %v49_v45  ;;  %v73_v62 = vmul.f32 %v9676_v29, %v49_v45  ;;  %v74_v55 = vmul.f32 %v9679_v28, %v49_v45  ;;  %v75_v44 = vmul.f32 %v9682_v13, %v49_v45 }
  0x99   :  { %v97_v61 = vadd.f32 %v9685_v12, %v72_v63  ;;  %v98_v15 = vadd.f32 %v9688_v7, %v73_v62  ;;  %v99_v53 = vadd.f32 %v9691_v6, %v74_v55  ;;  %v100_v4 = vadd.f32 %v9694_v54, %v75_v44 }
  0x9b   :  { %v105_v21 = vcombine.low %v97_v61, %v98_v15  ;;  %v106_v52 = vcombine.low %v99_v53, %v100_v4 }
  0x9d   :  { %v113_v39 = vrot.slane %v105_v21, %v9701_v60  ;;  %v120_v29 = vrot.slane %v106_v52, %v9701_v60 }
  0x9f   :  { %v121_v28 = vcombine.low %v113_v39, %v120_v29 }
  0xa1   :  { %v421_v47 = vmul.f32 0.5, %v121_v28  ;;  %v426_v45 = vrot.slane %v121_v28, 2  ;;  %v432_v13 = vrot.slane %v121_v28, 4  ;;  %v435_v63 = vrot.slane %v121_v28, 6 }
  0xa3   :  { %9205 = vtanh.f32 %v421_v47  ;;  %v428_v27 = vmul.f32 0.5, %v426_v45  ;;  %v437_v62 = vmul.f32 0.5, %v435_v63 }
  0xa5   :  { %9207 = vtanh.f32 %v428_v27  ;;  %v9394_v27 = vmov 1966171168  }
  0xa6   :  { %9209 = vtanh.f32 %v432_v13 }
  0xa7   :  { %9211 = vtanh.f32 %v437_v62 }
  0xad   :  { %v9206_v7 = vpop.eup %9205 }
  0xae   :  { %v423_v55 = vmul.f32 0.5, %v9206_v7  ;;  %v587_v7 = vunpack.c.l.s4 %v9394_v27 }
  0xaf   :  { %v9208_v6 = vpop.eup %9207 }
  0xb0   :  { %v424_v44 = vadd.f32 0.5, %v423_v55  ;;  %v430_v61 = vmul.f32 0.5, %v9208_v6  ;;  %v9210_v15 = vpop.eup %9209  ;;  %v588_v63 = vunpack.c.0.s8 %v587_v7 }
  0xb1   :  { %v9212_v47 = vpop.eup %9211 }
  0xb2   :  { %v431_v53 = vadd.f32 0.5, %v430_v61  ;;  %v442_v52 = vmul.f32 %v9210_v15, %v424_v44  ;;  %v439_v39 = vmul.f32 0.5, %v9212_v47  ;;  %v9713_v6 = vsub.s32 %v588_v63, %v9652_v5  ;;  %v459_v44 = vld [vmem:[#allocation5 + $0x50] sm:$0xff]  ;;  %v464_v15 = vld [vmem:[#allocation5 + $0x78] sm:$0xff] }
  0xb3   :  { %v463_v61 = vld [vmem:[#allocation5 + $0x70] sm:$0xff] }
  0xb4   :  { %v441_v21 = vmul.f32 0.0, %v431_v53  ;;  %v440_v4 = vadd.f32 0.5, %v439_v39  ;;  %11930 = vst [vmem:[#allocation45_spill] sm:$0xff] %v9713_v6  ;;  %v460_v53 = vld [vmem:[#allocation5 + $0x58] sm:$0xff]  ;;  %v467_v47 = vld [vmem:[#allocation5 + $0x90] sm:$0xff]  ;;  %v9719_v39 = vcombine.high %v459_v44, %v463_v61 }
  0xb5   :  { %v471_v5 = vld [vmem:[#allocation5 + $0xb0] sm:$0xff]  ;;  %v9729_v27 = vcombine.low %v460_v53, %v464_v15 }
  0xb6   :  { %v9709_v29 = vadd.f32 %v442_v52, %v441_v21  ;;  %11931 = vst [vmem:[#allocation46_spill] sm:$0xff] %v9719_v39  ;;  %v9731_v7 = vcombine.high %v467_v47, %v471_v5 }
  0xb7   :  { %11934 = vst [vmem:[#allocation49_spill] sm:$0xff] %v9729_v27 }
  0xb8   :  { %9213 = vtanh.f32 %v9709_v29  ;;  %11935 = vst [vmem:[#allocation50_spill] sm:$0xff] %v9731_v7 }
  0xc2   :  { %v9214_v28 = vpop.eup %9213 }
  0xc3   :  { %v445_v13 = vmul.f32 %v9214_v28, %v440_v4  ;;  %v9721_v4 = vcombine.high %v460_v53, %v464_v15  ;;  %v468_v28 = vld [vmem:[#allocation5 + $0x98] sm:$0xff] }
  0xc5   :  { %v446_v45 = vpack.c.bf16 %v445_v13, %v445_v13  ;;  %11932 = vst [vmem:[#allocation47_spill] sm:$0xff] %v9721_v4  ;;  %v472_v13 = vld [vmem:[#allocation5 + $0xb8] sm:$0xff] }
  0xc6   :  { %v9733_v63 = vcombine.high %v468_v28, %v472_v13 }
  0xc7   :  { %447 = vst [vmem:[#allocation3] sm:$0x1] %v446_v45  ;;  %v9727_v45 = vcombine.low %v459_v44, %v463_v61  ;;  %v9739_v44 = vcombine.low %v467_v47, %v471_v5  ;;  %v9741_v61 = vcombine.low %v468_v28, %v472_v13 }
  0xc8   :  { %11936 = vst [vmem:[#allocation51_spill] sm:$0xff] %v9733_v63 }
  0xc9   :  { %11933 = vst [vmem:[#allocation48_spill] sm:$0xff] %v9727_v45  ;;  %11937 = vst [vmem:[#allocation52_spill] sm:$0xff] %v9739_v44 }
  0xca   :  { %11938 = vst [vmem:[#allocation53_spill] sm:$0xff] %v9741_v61 }
  0xce   :  { %v8227_v62 = vld.sshfl [vmem:[#allocation3] sm:$0x11 pattern:$0x75316420] }
  0xcf   :  { %v585_v55 = vcombine.high %v8227_v62, %v8227_v62  ;;  %v9717_v52 = vrot.slane %v8227_v62, %v9713_v6  ;;  %v475_v62 = vld [vmem:[#allocation5 + $0xd0] sm:$0xff] }
  0xd1   :  { %v599_v21 = vrot.slane %v585_v55, %v9713_v6  ;;  %v479_v55 = vld [vmem:[#allocation5 + $0xf0] sm:$0xff]  ;;  %v476_v6 = vld [vmem:[#allocation5 + $0xd8] sm:$0xff] }
  0xd2   :  { %v9745_v53 = vcombine.high %v475_v62, %v479_v55  ;;  %v9751_v47 = vcombine.low %v475_v62, %v479_v55 }
  0xd3   :  { %1274 = vmatprep.mubr.bf16.mxu0 %v599_v21  ;;  %1315 = vmatprep.mubr.bf16.mxu1 %v599_v21 }
  0xd4   :  { %1275 = vmatmul.mubr.bf16.vlgmr.msra.gmra.mrb[0].mxu0 %v9717_v52  ;;  %1316 = vmatmul.mubr.bf16.vlgmr.msra.gmra.mrb[0].mxu1 %v9717_v52  ;;  %11939 = vst [vmem:[#allocation54_spill] sm:$0xff] %v9745_v53  ;;  %11941 = vst [vmem:[#allocation56_spill] sm:$0xff] %v9751_v47 }
  0xd5   :  { %1325 = vmatpush1.bf16.msra.mxu0 %v9632_v14  ;;  %1366 = vmatpush1.bf16.msra.mxu1 %v9640_v38  ;;  %v480_v14 = vld [vmem:[#allocation5 + $0xf8] sm:$0xff] }
  0xd6   :  { %1356 = vmatprep.mubr.bf16.mxu0 %v599_v21  ;;  %1397 = vmatprep.mubr.bf16.mxu1 %v599_v21  ;;  %v9747_v15 = vcombine.high %v476_v6, %v480_v14  ;;  %v483_v21 = vld [vmem:[#allocation5 + $0x110] sm:$0xff]  ;;  %v488_v38 = vld [vmem:[#allocation5 + $0x138] sm:$0xff]  ;;  %v9753_v5 = vcombine.low %v476_v6, %v480_v14 }
  0xd7   :  { %1326 = vmatprep.subr.bf16.mxu0 %v9719_v39  ;;  %1367 = vmatprep.subr.bf16.mxu1 %v9721_v4  ;;  %v487_v4 = vld [vmem:[#allocation5 + $0x130] sm:$0xff]  ;;  %v484_v39 = vld [vmem:[#allocation5 + $0x118] sm:$0xff] }
  0xd8   :  { %11940 = vst [vmem:[#allocation55_spill] sm:$0xff] %v9747_v15  ;;  %11942 = vst [vmem:[#allocation57_spill] sm:$0xff] %v9753_v5  ;;  %v9757_v28 = vcombine.high %v483_v21, %v487_v4  ;;  %v9759_v13 = vcombine.high %v484_v39, %v488_v38  ;;  %v9763_v62 = vcombine.low %v483_v21, %v487_v4 }
  0xd9   :  { %1327 = vmatpush1.bf16.msra.mxu0 %v9727_v45  ;;  %1368 = vmatpush1.bf16.msra.mxu1 %v9729_v27  ;;  %v492_v27 = vld [vmem:[#allocation5 + $0x158] sm:$0xff]  ;;  %v9765_v14 = vcombine.low %v484_v39, %v488_v38 }
  0xda   :  { %1328 = vmatprep.subr.bf16.mxu0 %v9731_v7  ;;  %1369 = vmatprep.subr.bf16.mxu1 %v9733_v63  ;;  %11943 = vst [vmem:[#allocation58_spill] sm:$0xff] %v9757_v28  ;;  %11944 = vst [vmem:[#allocation59_spill] sm:$0xff] %v9759_v13  ;;  %v491_v63 = vld [vmem:[#allocation5 + $0x150] sm:$0xff]  ;;  %v496_v45 = vld [vmem:[#allocation5 + $0x178] sm:$0xff] }
  0xdb   :  { %v495_v7 = vld [vmem:[#allocation5 + $0x170] sm:$0xff]  ;;  %11945 = vst [vmem:[#allocation60_spill] sm:$0xff] %v9763_v62  ;;  %11946 = vst [vmem:[#allocation61_spill] sm:$0xff] %v9765_v14  ;;  %v9771_v55 = vcombine.high %v492_v27, %v496_v45  ;;  %v9777_v38 = vcombine.low %v492_v27, %v496_v45 }
  0xdc   :  { %v9769_v6 = vcombine.high %v491_v63, %v495_v7  ;;  %v9775_v4 = vcombine.low %v491_v63, %v495_v7 }
  0xdd   :  { %1329 = vmatpush1.bf16.msra.mxu0 %v9739_v44  ;;  %1370 = vmatpush1.bf16.msra.mxu1 %v9741_v61  ;;  %11948 = vst [vmem:[#allocation63_spill] sm:$0xff] %v9771_v55  ;;  %v500_v61 = vld [vmem:[#allocation5 + $0x198] sm:$0xff]  ;;  %11950 = vst [vmem:[#allocation65_spill] sm:$0xff] %v9777_v38 }
  0xde   :  { %1330 = vmatprep.subr.bf16.mxu0 %v9745_v53  ;;  %1371 = vmatprep.subr.bf16.mxu1 %v9747_v15  ;;  %11947 = vst [vmem:[#allocation62_spill] sm:$0xff] %v9769_v6  ;;  %v499_v15 = vld [vmem:[#allocation5 + $0x190] sm:$0xff]  ;;  %v504_v44 = vld [vmem:[#allocation5 + $0x1b8] sm:$0xff]  ;;  %11949 = vst [vmem:[#allocation64_spill] sm:$0xff] %v9775_v4 }
  0xdf   :  { %v503_v53 = vld [vmem:[#allocation5 + $0x1b0] sm:$0xff]  ;;  %v9783_v21 = vcombine.high %v500_v61, %v504_v44  ;;  %v9789_v45 = vcombine.low %v500_v61, %v504_v44 }
  0xe0   :  { %v9781_v39 = vcombine.high %v499_v15, %v503_v53  ;;  %v9787_v7 = vcombine.low %v499_v15, %v503_v53 }
  0xe1   :  { %1331 = vmatpush1.bf16.msra.mxu0 %v9751_v47  ;;  %1372 = vmatpush1.bf16.msra.mxu1 %v9753_v5  ;;  %11952 = vst [vmem:[#allocation67_spill] sm:$0xff] %v9783_v21  ;;  %v508_v5 = vld [vmem:[#allocation5 + $0x1d8] sm:$0xff]  ;;  %11954 = vst [vmem:[#allocation69_spill] sm:$0xff] %v9789_v45 }
  0xe2   :  { %1332 = vmatprep.subr.bf16.mxu0 %v9757_v28  ;;  %1373 = vmatprep.subr.bf16.mxu1 %v9759_v13  ;;  %11951 = vst [vmem:[#allocation66_spill] sm:$0xff] %v9781_v39  ;;  %v507_v13 = vld [vmem:[#allocation5 + $0x1d0] sm:$0xff]  ;;  %v512_v47 = vld [vmem:[#allocation5 + $0x1f8] sm:$0xff]  ;;  %11953 = vst [vmem:[#allocation68_spill] sm:$0xff] %v9787_v7 }
  0xe3   :  { %v511_v28 = vld [vmem:[#allocation5 + $0x1f0] sm:$0xff]  ;;  %v9795_v63 = vcombine.high %v508_v5, %v512_v47  ;;  %v9801_v44 = vcombine.low %v508_v5, %v512_v47 }
  0xe4   :  { %v9793_v27 = vcombine.high %v507_v13, %v511_v28  ;;  %v9799_v53 = vcombine.low %v507_v13, %v511_v28 }
  0xe5   :  { %1333 = vmatpush1.bf16.msra.mxu0 %v9763_v62  ;;  %1374 = vmatpush1.bf16.msra.mxu1 %v9765_v14  ;;  %11956 = vst [vmem:[#allocation71_spill] sm:$0xff] %v9795_v63  ;;  %v516_v14 = vld [vmem:[#allocation5 + $0x218] sm:$0xff]  ;;  %11958 = vst [vmem:[#allocation73_spill] sm:$0xff] %v9801_v44 }
  0xe6   :  { %1334 = vmatprep.subr.bf16.mxu0 %v9769_v6  ;;  %1375 = vmatprep.subr.bf16.mxu1 %v9771_v55  ;;  %11955 = vst [vmem:[#allocation70_spill] sm:$0xff] %v9793_v27  ;;  %v515_v55 = vld [vmem:[#allocation5 + $0x210] sm:$0xff]  ;;  %v520_v62 = vld [vmem:[#allocation5 + $0x238] sm:$0xff]  ;;  %11957 = vst [vmem:[#allocation72_spill] sm:$0xff] %v9799_v53 }
  0xe7   :  { %v519_v6 = vld [vmem:[#allocation5 + $0x230] sm:$0xff]  ;;  %v9807_v15 = vcombine.high %v516_v14, %v520_v62  ;;  %v9813_v47 = vcombine.low %v516_v14, %v520_v62 }
  0xe8   :  { %v9805_v61 = vcombine.high %v515_v55, %v519_v6  ;;  %v9811_v28 = vcombine.low %v515_v55, %v519_v6 }
  0xe9   :  { %1335 = vmatpush1.bf16.msra.mxu0 %v9775_v4  ;;  %1376 = vmatpush1.bf16.msra.mxu1 %v9777_v38  ;;  %11960 = vst [vmem:[#allocation75_spill] sm:$0xff] %v9807_v15  ;;  %v524_v38 = vld [vmem:[#allocation5 + $0x258] sm:$0xff]  ;;  %11962 = vst [vmem:[#allocation77_spill] sm:$0xff] %v9813_v47 }
  0xea   :  { %1336 = vmatprep.subr.bf16.mxu0 %v9781_v39  ;;  %1377 = vmatprep.subr.bf16.mxu1 %v9783_v21  ;;  %11959 = vst [vmem:[#allocation74_spill] sm:$0xff] %v9805_v61  ;;  %v523_v21 = vld [vmem:[#allocation5 + $0x250] sm:$0xff]  ;;  %v528_v4 = vld [vmem:[#allocation5 + $0x278] sm:$0xff]  ;;  %11961 = vst [vmem:[#allocation76_spill] sm:$0xff] %v9811_v28 }
  0xeb   :  { %v527_v39 = vld [vmem:[#allocation5 + $0x270] sm:$0xff]  ;;  %v9819_v13 = vcombine.high %v524_v38, %v528_v4  ;;  %v9825_v62 = vcombine.low %v524_v38, %v528_v4 }
  0xec   :  { %v9817_v5 = vcombine.high %v523_v21, %v527_v39  ;;  %v9823_v6 = vcombine.low %v523_v21, %v527_v39 }
  0xed   :  { %1337 = vmatpush1.bf16.msra.mxu0 %v9787_v7  ;;  %1378 = vmatpush1.bf16.msra.mxu1 %v9789_v45  ;;  %11964 = vst [vmem:[#allocation79_spill] sm:$0xff] %v9819_v13  ;;  %v532_v45 = vld [vmem:[#allocation5 + $0x298] sm:$0xff]  ;;  %11966 = vst [vmem:[#allocation81_spill] sm:$0xff] %v9825_v62 }
  0xee   :  { %1338 = vmatprep.subr.bf16.mxu0 %v9793_v27  ;;  %1379 = vmatprep.subr.bf16.mxu1 %v9795_v63  ;;  %11963 = vst [vmem:[#allocation78_spill] sm:$0xff] %v9817_v5  ;;  %v531_v63 = vld [vmem:[#allocation5 + $0x290] sm:$0xff]  ;;  %v536_v7 = vld [vmem:[#allocation5 + $0x2b8] sm:$0xff]  ;;  %11965 = vst [vmem:[#allocation80_spill] sm:$0xff] %v9823_v6 }
  0xef   :  { %v535_v27 = vld [vmem:[#allocation5 + $0x2b0] sm:$0xff]  ;;  %v9831_v55 = vcombine.high %v532_v45, %v536_v7  ;;  %v9837_v4 = vcombine.low %v532_v45, %v536_v7 }
  0xf0   :  { %v9829_v14 = vcombine.high %v531_v63, %v535_v27  ;;  %v9835_v39 = vcombine.low %v531_v63, %v535_v27 }
  0xf1   :  { %1339 = vmatpush1.bf16.msra.mxu0 %v9799_v53  ;;  %1380 = vmatpush1.bf16.msra.mxu1 %v9801_v44  ;;  %11968 = vst [vmem:[#allocation83_spill] sm:$0xff] %v9831_v55  ;;  %v540_v44 = vld [vmem:[#allocation5 + $0x2d8] sm:$0xff]  ;;  %11970 = vst [vmem:[#allocation85_spill] sm:$0xff] %v9837_v4 }
  0xf2   :  { %1340 = vmatprep.subr.bf16.mxu0 %v9805_v61  ;;  %1381 = vmatprep.subr.bf16.mxu1 %v9807_v15  ;;  %11967 = vst [vmem:[#allocation82_spill] sm:$0xff] %v9829_v14  ;;  %v539_v15 = vld [vmem:[#allocation5 + $0x2d0] sm:$0xff]  ;;  %v544_v53 = vld [vmem:[#allocation5 + $0x2f8] sm:$0xff]  ;;  %11969 = vst [vmem:[#allocation84_spill] sm:$0xff] %v9835_v39 }
  0xf3   :  { %v543_v61 = vld [vmem:[#allocation5 + $0x2f0] sm:$0xff]  ;;  %v9843_v21 = vcombine.high %v540_v44, %v544_v53  ;;  %v9849_v7 = vcombine.low %v540_v44, %v544_v53 }
  0xf4   :  { %v9841_v38 = vcombine.high %v539_v15, %v543_v61  ;;  %v9847_v27 = vcombine.low %v539_v15, %v543_v61 }
  0xf5   :  { %1341 = vmatpush1.bf16.msra.mxu0 %v9811_v28  ;;  %1382 = vmatpush1.bf16.msra.mxu1 %v9813_v47  ;;  %11972 = vst [vmem:[#allocation87_spill] sm:$0xff] %v9843_v21  ;;  %v548_v47 = vld [vmem:[#allocation5 + $0x318] sm:$0xff]  ;;  %11974 = vst [vmem:[#allocation89_spill] sm:$0xff] %v9849_v7 }
  0xf6   :  { %1342 = vmatprep.subr.bf16.mxu0 %v9817_v5  ;;  %1383 = vmatprep.subr.bf16.mxu1 %v9819_v13  ;;  %11971 = vst [vmem:[#allocation86_spill] sm:$0xff] %v9841_v38  ;;  %v547_v13 = vld [vmem:[#allocation5 + $0x310] sm:$0xff]  ;;  %v552_v28 = vld [vmem:[#allocation5 + $0x338] sm:$0xff]  ;;  %11973 = vst [vmem:[#allocation88_spill] sm:$0xff] %v9847_v27 }
  0xf7   :  { %v551_v5 = vld [vmem:[#allocation5 + $0x330] sm:$0xff]  ;;  %v9855_v63 = vcombine.high %v548_v47, %v552_v28  ;;  %v9861_v53 = vcombine.low %v548_v47, %v552_v28 }
  0xf8   :  { %v9853_v45 = vcombine.high %v547_v13, %v551_v5  ;;  %v9859_v61 = vcombine.low %v547_v13, %v551_v5 }
  0xf9   :  { %1343 = vmatpush1.bf16.msra.mxu0 %v9823_v6  ;;  %1384 = vmatpush1.bf16.msra.mxu1 %v9825_v62  ;;  %11976 = vst [vmem:[#allocation91_spill] sm:$0xff] %v9855_v63  ;;  %v556_v62 = vld [vmem:[#allocation5 + $0x358] sm:$0xff] }
  0xfa   :  { %1344 = vmatprep.subr.bf16.mxu0 %v9829_v14  ;;  %1385 = vmatprep.subr.bf16.mxu1 %v9831_v55  ;;  %11975 = vst [vmem:[#allocation90_spill] sm:$0xff] %v9853_v45  ;;  %v555_v55 = vld [vmem:[#allocation5 + $0x350] sm:$0xff]  ;;  %v560_v6 = vld [vmem:[#allocation5 + $0x378] sm:$0xff] }
  0xfb   :  { %v559_v14 = vld [vmem:[#allocation5 + $0x370] sm:$0xff]  ;;  %v9867_v15 = vcombine.high %v556_v62, %v560_v6  ;;  %v9873_v28 = vcombine.low %v556_v62, %v560_v6 }
  0xfc   :  { %v9865_v44 = vcombine.high %v555_v55, %v559_v14  ;;  %v9871_v5 = vcombine.low %v555_v55, %v559_v14 }
  0xfd   :  { %1345 = vmatpush1.bf16.msra.mxu0 %v9835_v39  ;;  %1386 = vmatpush1.bf16.msra.mxu1 %v9837_v4  ;;  %11977 = vst [vmem:[#allocation92_spill] sm:$0xff] %v9867_v15  ;;  %v564_v4 = vld [vmem:[#allocation5 + $0x398] sm:$0xff] }
  0xfe   :  { %1346 = vmatprep.subr.bf16.mxu0 %v9841_v38  ;;  %1387 = vmatprep.subr.bf16.mxu1 %v9843_v21  ;;  %v563_v21 = vld [vmem:[#allocation5 + $0x390] sm:$0xff]  ;;  %v568_v39 = vld [vmem:[#allocation5 + $0x3b8] sm:$0xff]  ;;  %11978 = vst [vmem:[#allocation93_spill] sm:$0xff] %v9871_v5 }
  0xff   :  { %v567_v38 = vld [vmem:[#allocation5 + $0x3b0] sm:$0xff]  ;;  %v9879_v13 = vcombine.high %v564_v4, %v568_v39  ;;  %v9885_v6 = vcombine.low %v564_v4, %v568_v39  ;;  %v1482_v39 = vld [vmem:[#allocation5] sm:$0xff] }
 0x100   :  { %v9877_v47 = vcombine.high %v563_v21, %v567_v38  ;;  %v9883_v14 = vcombine.low %v563_v21, %v567_v38  ;;  %v1486_v4 = vld [vmem:[#allocation5 + $0x20] sm:$0xff]  ;;  %v1483_v38 = vld [vmem:[#allocation5 + $0x8] sm:$0xff] }
 0x101   :  { %1347 = vmatpush1.bf16.msra.mxu0 %v9847_v27  ;;  %1388 = vmatpush1.bf16.msra.mxu1 %v9849_v7  ;;  %v572_v7 = vld [vmem:[#allocation5 + $0x3d8] sm:$0xff]  ;;  %v9905_v21 = vcombine.low %v1482_v39, %v1486_v4 }
 0x102   :  { %1348 = vmatprep.subr.bf16.mxu0 %v9853_v45  ;;  %1389 = vmatprep.subr.bf16.mxu1 %v9855_v63  ;;  %v571_v63 = vld [vmem:[#allocation5 + $0x3d0] sm:$0xff]  ;;  %v576_v27 = vld [vmem:[#allocation5 + $0x3f8] sm:$0xff] }
 0x103   :  { %v575_v45 = vld [vmem:[#allocation5 + $0x3f0] sm:$0xff]  ;;  %v9891_v55 = vcombine.high %v572_v7, %v576_v27 }
 0x104   :  { %v9889_v62 = vcombine.high %v571_v63, %v575_v45 }
 0x105   :  { %1349 = vmatpush1.bf16.msra.mxu0 %v9859_v61  ;;  %1390 = vmatpush1.bf16.msra.mxu1 %v9861_v53 }
 0x106   :  { %1350 = vmatprep.subr.bf16.mxu0 %v9865_v44  ;;  %1391 = vmatprep.subr.bf16.mxu1 %v9867_v15  ;;  %v9895_v15 = vcombine.low %v571_v63, %v575_v45  ;;  %v9907_v45 = vcombine.high %v1482_v39, %v1486_v4 }
 0x109   :  { %1351 = vmatpush1.bf16.msra.mxu0 %v9871_v5  ;;  %1392 = vmatpush1.bf16.msra.mxu1 %v9873_v28  ;;  %v9897_v5 = vcombine.low %v572_v7, %v576_v27  ;;  %v1487_v27 = vld [vmem:[#allocation5 + $0x28] sm:$0xff] }
 0x10a   :  { %1352 = vmatprep.subr.bf16.mxu0 %v9877_v47  ;;  %1393 = vmatprep.subr.bf16.mxu1 %v9879_v13  ;;  %v9909_v7 = vcombine.low %v1483_v38, %v1487_v27  ;;  %v9911_v63 = vcombine.high %v1483_v38, %v1487_v27  ;;  %v12006_v27 = vld [vmem:[#allocation36_spill] sm:$0xff] }
 0x10d   :  { %1353 = vmatpush1.bf16.msra.mxu0 %v9883_v14  ;;  %1394 = vmatpush1.bf16.msra.mxu1 %v9885_v6 }
 0x10e   :  { %1354 = vmatprep.subr.bf16.mxu0 %v9889_v62  ;;  %1395 = vmatprep.subr.bf16.mxu1 %v9891_v55 }
 0x111   :  { %1355 = vmatpush1.bf16.msra.mxu0 %v9895_v15  ;;  %1396 = vmatpush1.bf16.msra.mxu1 %v9897_v5 }
 0x112   :  { %2275 = vmatprep.subr.bf16.mxu0 %v9907_v45  ;;  %2316 = vmatprep.subr.bf16.mxu1 %v9911_v63 }
 0x114   :  { %1357 = vmatmul.mubr.bf16.vlgmr.msra.gmra.mrb[4].mxu0 %v9717_v52  ;;  %1398 = vmatmul.mubr.bf16.vlgmr.msra.gmra.mrb[4].mxu1 %v9717_v52 }
 0x115   :  { %2276 = vmatpush1.bf16.msra.mxu0 %v9905_v21  ;;  %2317 = vmatpush1.bf16.msra.mxu1 %v9909_v7 }
 0x116   :  { %2277 = vmatprep.subr.bf16.mxu0 %v9456_v17  ;;  %2318 = vmatprep.subr.bf16.mxu1 %v9461_v22  ;;  %v11979_v17 = vld [vmem:[#allocation8_spill] sm:$0xff]  ;;  %v11980_v22 = vld [vmem:[#allocation9_spill] sm:$0xff] }
 0x119   :  { %2278 = vmatpush1.bf16.msra.mxu0 %v9463_v23  ;;  %2319 = vmatpush1.bf16.msra.mxu1 %v9465_v24  ;;  %v11981_v23 = vld [vmem:[#allocation10_spill] sm:$0xff]  ;;  %v11982_v24 = vld [vmem:[#allocation11_spill] sm:$0xff] }
 0x11a   :  { %2279 = vmatprep.subr.bf16.mxu0 %v9468_v25  ;;  %2320 = vmatprep.subr.bf16.mxu1 %v9470_v26  ;;  %v11983_v25 = vld [vmem:[#allocation12_spill] sm:$0xff]  ;;  %v11984_v26 = vld [vmem:[#allocation13_spill] sm:$0xff] }
 0x11d   :  { %2280 = vmatpush1.bf16.msra.mxu0 %v9478_v32  ;;  %2321 = vmatpush1.bf16.msra.mxu1 %v9480_v33  ;;  %v11985_v32 = vld [vmem:[#allocation14_spill] sm:$0xff]  ;;  %v11986_v33 = vld [vmem:[#allocation15_spill] sm:$0xff] }
 0x11e   :  { %2281 = vmatprep.subr.bf16.mxu0 %v9484_v34  ;;  %2322 = vmatprep.subr.bf16.mxu1 %v9486_v35  ;;  %v11987_v34 = vld [vmem:[#allocation16_spill] sm:$0xff]  ;;  %v11988_v35 = vld [vmem:[#allocation17_spill] sm:$0xff] }
 0x121   :  { %2282 = vmatpush1.bf16.msra.mxu0 %v9490_v40  ;;  %2323 = vmatpush1.bf16.msra.mxu1 %v9492_v41  ;;  %v11989_v40 = vld [vmem:[#allocation18_spill] sm:$0xff]  ;;  %v11990_v41 = vld [vmem:[#allocation19_spill] sm:$0xff] }
 0x122   :  { %2283 = vmatprep.subr.bf16.mxu0 %v9496_v42  ;;  %2324 = vmatprep.subr.bf16.mxu1 %v9498_v43  ;;  %v11991_v42 = vld [vmem:[#allocation20_spill] sm:$0xff]  ;;  %v11992_v43 = vld [vmem:[#allocation21_spill] sm:$0xff] }
 0x125   :  { %2284 = vmatpush1.bf16.msra.mxu0 %v9502_v48  ;;  %2325 = vmatpush1.bf16.msra.mxu1 %v9504_v49  ;;  %v11993_v48 = vld [vmem:[#allocation22_spill] sm:$0xff]  ;;  %v11994_v49 = vld [vmem:[#allocation23_spill] sm:$0xff] }
 0x126   :  { %2285 = vmatprep.subr.bf16.mxu0 %v9508_v50  ;;  %2326 = vmatprep.subr.bf16.mxu1 %v9510_v51  ;;  %v11995_v50 = vld [vmem:[#allocation24_spill] sm:$0xff]  ;;  %v11996_v51 = vld [vmem:[#allocation25_spill] sm:$0xff] }
 0x129   :  { %2286 = vmatpush1.bf16.msra.mxu0 %v9514_v56  ;;  %2327 = vmatpush1.bf16.msra.mxu1 %v9516_v57  ;;  %v11997_v56 = vld [vmem:[#allocation26_spill] sm:$0xff]  ;;  %v11998_v57 = vld [vmem:[#allocation28_spill] sm:$0xff] }
 0x12a   :  { %2287 = vmatprep.subr.bf16.mxu0 %v9520_v58  ;;  %2328 = vmatprep.subr.bf16.mxu1 %v9522_v59  ;;  %v11999_v58 = vld [vmem:[#allocation29_spill] sm:$0xff]  ;;  %v12000_v59 = vld [vmem:[#allocation31_spill] sm:$0xff] }
 0x12d   :  { %2288 = vmatpush1.bf16.msra.mxu0 %v9526_v0  ;;  %2329 = vmatpush1.bf16.msra.mxu1 %v9528_v1  ;;  %v12001_v0 = vld [vmem:[#allocation32_spill] sm:$0xff] }
 0x12e   :  { %2289 = vmatprep.subr.bf16.mxu0 %v9532_v2  ;;  %2330 = vmatprep.subr.bf16.mxu1 %v9534_v3  ;;  %v397_v1 = vld [vmem:[%s11587_s4] sm:$0xf]  ;;  %v12002_v2 = vld [vmem:[#allocation33_spill] sm:$0xff] }
 0x12f   :  { %v9983_v3 = vrot.slane %v397_v1, %v12002_v2  ;;  %v12009_v2 = vld [vmem:[#allocation39_spill] sm:$0xff] }
 0x131   :  { %2290 = vmatpush1.bf16.msra.mxu0 %v9538_v8  ;;  %2331 = vmatpush1.bf16.msra.mxu1 %v9540_v9  ;;  %12003 = vst [vmem:[#allocation8_spill] sm:$0xff] %v9983_v3  ;;  %v12004_v8 = vld [vmem:[#allocation34_spill] sm:$0xff] }
 0x132   :  { %2291 = vmatprep.subr.bf16.mxu0 %v9544_v10  ;;  %2332 = vmatprep.subr.bf16.mxu1 %v9546_v11  ;;  %v9986_v9 = vrot.slane %v397_v1, %v12004_v8 }
 0x135   :  { %2292 = vmatpush1.bf16.msra.mxu0 %v9550_v16  ;;  %2333 = vmatpush1.bf16.msra.mxu1 %v9552_v18  ;;  %v12005_v18 = vld [vmem:[#allocation35_spill] sm:$0xff] }
 0x136   :  { %2293 = vmatprep.subr.bf16.mxu0 %v9556_v19  ;;  %2334 = vmatprep.subr.bf16.mxu1 %v9558_v20  ;;  %v9990_v19 = vrot.slane %v397_v1, %v12005_v18  ;;  %v12011_v18 = vld [vmem:[#allocation42_spill] sm:$0xff] }
 0x139   :  { %2294 = vmatpush1.bf16.msra.mxu0 %v9562_v30  ;;  %2335 = vmatpush1.bf16.msra.mxu1 %v9564_v31 }
 0x13a   :  { %2295 = vmatprep.subr.bf16.mxu0 %v9568_v36  ;;  %2336 = vmatprep.subr.bf16.mxu1 %v9570_v37 }
 0x13d   :  { %2296 = vmatpush1.bf16.msra.mxu0 %v9574_v46  ;;  %2337 = vmatpush1.bf16.msra.mxu1 %v11979_v17  ;;  %v9995_v17 = vrot.slane %v397_v1, %v12006_v27 }
 0x13e   :  { %2297 = vmatprep.subr.bf16.mxu0 %v11980_v22  ;;  %2338 = vmatprep.subr.bf16.mxu1 %v11981_v23 }
 0x141   :  { %2298 = vmatpush1.bf16.msra.mxu0 %v11982_v24  ;;  %2339 = vmatpush1.bf16.msra.mxu1 %v11983_v25 }
 0x142   :  { %2299 = vmatprep.subr.bf16.mxu0 %v11984_v26  ;;  %2340 = vmatprep.subr.bf16.mxu1 %v11985_v32 }
 0x145   :  { %2300 = vmatpush1.bf16.msra.mxu0 %v11986_v33  ;;  %2341 = vmatpush1.bf16.msra.mxu1 %v11987_v34 }
 0x146   :  { %2301 = vmatprep.subr.bf16.mxu0 %v11988_v35  ;;  %2342 = vmatprep.subr.bf16.mxu1 %v11989_v40 }
 0x149   :  { %2302 = vmatpush1.bf16.msra.mxu0 %v11990_v41  ;;  %2343 = vmatpush1.bf16.msra.mxu1 %v11991_v42 }
 0x14a   :  { %2303 = vmatprep.subr.bf16.mxu0 %v11992_v43  ;;  %2344 = vmatprep.subr.bf16.mxu1 %v11993_v48 }
 0x14d   :  { %2304 = vmatpush1.bf16.msra.mxu0 %v11994_v49  ;;  %2345 = vmatpush1.bf16.msra.mxu1 %v11995_v50 }
 0x14e   :  { %2305 = vmatprep.subr.bf16.mxu0 %v11996_v51  ;;  %2346 = vmatprep.subr.bf16.mxu1 %v11997_v56 }
 0x151   :  { %2306 = vmatpush1.bf16.msra.mxu0 %v11998_v57  ;;  %2347 = vmatpush1.bf16.msra.mxu1 %v11999_v58  ;;  %v129_v57 = vpop.permute.xlu0 %128  ;;  %v12007_v58 = vld [vmem:[#allocation37_spill] sm:$0xff] }
 0x152   :  { %2357 = vmatprep.subr.bf16.mxu0 %v12000_v59  ;;  %2398 = vmatprep.subr.bf16.mxu1 %v12001_v0  ;;  %v131_v59 = vmul.f32 %v129_v57, %v12007_v58  ;;  %v12008_v0 = vld [vmem:[#allocation38_spill] sm:$0xff]  ;;  %v133_v8 = vmul.f32 %v129_v57, %v12009_v2 }
 0x153   :  { %v132_v1 = vmul.f32 %v129_v57, %v12008_v0 }
 0x1a7   :  { %v1276_v10 = vpop.f32.mrb[0].mxu0  ;;  %v1317_v11 = vpop.f32.mrb[0].mxu1 }
 0x1a8   :  { %v1406_v16 = vadd.f32 %v1276_v10, %v9983_v3  ;;  %v1278_v20 = vpop.f32.mrb[1].mxu0  ;;  %v1319_v30 = vpop.f32.mrb[1].mxu1  ;;  %v1408_v38 = vadd.f32 %v1317_v11, %v9990_v19  ;;  %v12010_v10 = vld [vmem:[#allocation40_spill] sm:$0xff] }
 0x1a9   :  { %v1407_v31 = vadd.f32 %v1278_v20, %v9986_v9  ;;  %v1280_v36 = vpop.f32.mrb[2].mxu0  ;;  %v1321_v37 = vpop.f32.mrb[2].mxu1  ;;  %v1409_v22 = vadd.f32 %v1319_v30, %v9995_v17  ;;  %v134_v11 = vmul.f32 %v129_v57, %v12010_v10  ;;  %v136_v20 = vadd.f32 %v132_v1, %v12011_v18  ;;  %v12012_v30 = vld [vmem:[#allocation43_spill] sm:$0xff] }
 0x1aa   :  { %v1410_v46 = vmul.f32 0.5, %v1406_v16  ;;  %v1281_v52 = vpop.f32.mrb[3].mxu0  ;;  %v1322_v39 = vpop.f32.mrb[3].mxu1  ;;  %v135_v16 = vadd.f32 %v131_v59, %v9685_v12  ;;  %v8221_v37 = vld [vmem:[%s11583_s0 + $0x4] sm:$0x3] }
 0x1ab   :  { %v1414_v4 = vmul.f32 0.5, %v1407_v31  ;;  %v1419_v23 = vmul.f32 0.5, %v1409_v22  ;;  %v137_v31 = vadd.f32 %v133_v8, %v12012_v30  ;;  %v138_v36 = vadd.f32 %v134_v11, %v9694_v54  ;;  %167 = vperm.xlu1 %9204, %v8221_v37   ;;  %v8222_v39 = vld [vmem:[%s11583_s0 + $0x6] sm:$0x3] }
 0x1ac   :  { %9215 = vtanh.f32 %v1410_v46  ;;  %v143_v46 = vcombine.low %v135_v16, %v136_v20 }
 0x1ad   :  { %9217 = vtanh.f32 %v1414_v4  ;;  %v144_v52 = vcombine.low %v137_v31, %v138_v36 }
 0x1ae   :  { %9219 = vtanh.f32 %v1408_v38 }
 0x1af   :  { %9221 = vtanh.f32 %v1419_v23  ;;  %206 = vperm.xlu1 %9204, %v8222_v39  }
 0x1b6   :  { %v9216_v24 = vpop.eup %9215 }
 0x1b7   :  { %v9218_v25 = vpop.eup %9217  ;;  %v1412_v26 = vmul.f32 0.5, %v9216_v24  ;;  %v151_v24 = vrot.slane %v143_v46, %v9701_v60 }
 0x1b8   :  { %v1416_v32 = vmul.f32 0.5, %v9218_v25  ;;  %v9220_v34 = vpop.eup %9219  ;;  %v158_v25 = vrot.slane %v144_v52, %v9701_v60 }
 0x1b9   :  { %v1413_v33 = vadd.f32 0.5, %v1412_v26  ;;  %v9222_v43 = vpop.eup %9221 }
 0x1ba   :  { %v1417_v35 = vadd.f32 0.5, %v1416_v32  ;;  %v1421_v48 = vmul.f32 0.5, %v9222_v43 }
 0x1bb   :  { %v1424_v40 = vmul.f32 %v9220_v34, %v1413_v33 }
 0x1bc   :  { %v1423_v41 = vmul.f32 0.0, %v1417_v35  ;;  %v1422_v49 = vadd.f32 0.5, %v1421_v48  ;;  %v159_v48 = vcombine.low %v151_v24, %v158_v25 }
 0x1be   :  { %v9998_v42 = vadd.f32 %v1424_v40, %v1423_v41  ;;  %v8224_v40 = vld [vmem:[%s11583_s0 + $0xa] sm:$0x3] }
 0x1bf   :  { %284 = vperm.xlu1 %9204, %v8224_v40  }
 0x1c0   :  { %9223 = vtanh.f32 %v9998_v42 }
 0x1ca   :  { %v9224_v50 = vpop.eup %9223 }
 0x1cb   :  { %v1427_v51 = vmul.f32 %v9224_v50, %v1422_v49  ;;  %v8226_v50 = vld [vmem:[%s11583_s0 + $0xe] sm:$0x3] }
 0x1cc   :  { %362 = vperm.xlu1 %9204, %v8226_v50   ;;  %v12019_v50 = vld [vmem:[#allocation49_spill] sm:$0xff] }
 0x1cd   :  { %v1428_v56 = vpack.c.bf16 %v1427_v51, %v1427_v51 }
 0x1cf   :  { %1429 = vst [vmem:[#allocation3 + $0x1] sm:$0x1] %v1428_v56 }
 0x1e7   :  { %v1358_v4 = vpop.f32.mrb[4].mxu0  ;;  %v1399_v38 = vpop.f32.mrb[4].mxu1 }
 0x1e8   :  { %v1360_v27 = vpop.f32.mrb[5].mxu0  ;;  %v1401_v22 = vpop.f32.mrb[5].mxu1 }
 0x1e9   :  { %v1435_v23 = vcombine.low %v1358_v4, %v1360_v27  ;;  %v1436_v26 = vcombine.low %v1399_v38, %v1401_v22  ;;  %v1362_v32 = vpop.f32.mrb[6].mxu0  ;;  %v1403_v33 = vpop.f32.mrb[6].mxu1 }
 0x1ea   :  { %v1363_v34 = vpop.f32.mrb[7].mxu0  ;;  %v1404_v35 = vpop.f32.mrb[7].mxu1 }
 0x1eb   :  { %v1443_v41 = vrot.slane %v1435_v23, %v9701_v60  ;;  %v1450_v43 = vrot.slane %v1436_v26, %v9701_v60  ;;  %v12013_v34 = vld [vmem:[#allocation45_spill] sm:$0xff] }
 0x1ed   :  { %v1451_v49 = vcombine.low %v1443_v41, %v1450_v43  ;;  %v12015_v41 = vld [vmem:[#allocation30_spill] sm:$0xff] }
 0x1ee   :  { %v12016_v43 = vld [vmem:[#allocation46_spill] sm:$0xff] }
 0x1ef   :  { %v1453_v51 = vadd.f32 %v1451_v49, %v159_v48  ;;  %v12017_v48 = vld [vmem:[#allocation47_spill] sm:$0xff]  ;;  %v12018_v49 = vld [vmem:[#allocation48_spill] sm:$0xff] }
 0x1f1   :  { %v1454_v56 = vmul.f32 0.5, %v1453_v51  ;;  %v1459_v57 = vrot.slane %v1453_v51, 2  ;;  %v1465_v1 = vrot.slane %v1453_v51, 4  ;;  %v1468_v8 = vrot.slane %v1453_v51, 6  ;;  %v12020_v51 = vld [vmem:[#allocation50_spill] sm:$0xff] }
 0x1f3   :  { %9225 = vtanh.f32 %v1454_v56  ;;  %v1461_v59 = vmul.f32 0.5, %v1459_v57  ;;  %v1470_v11 = vmul.f32 0.5, %v1468_v8  ;;  %v12021_v56 = vld [vmem:[#allocation51_spill] sm:$0xff]  ;;  %v12022_v57 = vld [vmem:[#allocation52_spill] sm:$0xff] }
 0x1f4   :  { %v12025_v8 = vld [vmem:[#allocation55_spill] sm:$0xff] }
 0x1f5   :  { %9227 = vtanh.f32 %v1461_v59  ;;  %v12023_v59 = vld [vmem:[#allocation53_spill] sm:$0xff] }
 0x1f6   :  { %9229 = vtanh.f32 %v1465_v1  ;;  %v12024_v1 = vld [vmem:[#allocation54_spill] sm:$0xff] }
 0x1f7   :  { %9231 = vtanh.f32 %v1470_v11  ;;  %v12026_v11 = vld [vmem:[#allocation56_spill] sm:$0xff] }
 0x1fd   :  { %v9226_v16 = vpop.eup %9225 }
 0x1fe   :  { %v1456_v20 = vmul.f32 0.5, %v9226_v16  ;;  %v12027_v16 = vld [vmem:[#allocation57_spill] sm:$0xff] }
 0x1ff   :  { %v9228_v31 = vpop.eup %9227 }
 0x200   :  { %v1457_v36 = vadd.f32 0.5, %v1456_v20  ;;  %v1463_v37 = vmul.f32 0.5, %v9228_v31  ;;  %v9230_v52 = vpop.eup %9229  ;;  %v12028_v20 = vld [vmem:[#allocation58_spill] sm:$0xff]  ;;  %v12029_v31 = vld [vmem:[#allocation59_spill] sm:$0xff] }
 0x201   :  { %v9232_v27 = vpop.eup %9231 }
 0x202   :  { %v1464_v46 = vadd.f32 0.5, %v1463_v37  ;;  %v1475_v4 = vmul.f32 %v9230_v52, %v1457_v36  ;;  %v1472_v22 = vmul.f32 0.5, %v9232_v27  ;;  %v12030_v36 = vld [vmem:[#allocation60_spill] sm:$0xff]  ;;  %v12031_v37 = vld [vmem:[#allocation61_spill] sm:$0xff]  ;;  %v12033_v52 = vld [vmem:[#allocation63_spill] sm:$0xff] }
 0x203   :  { %v12036_v27 = vld [vmem:[#allocation66_spill] sm:$0xff] }
 0x204   :  { %v1474_v39 = vmul.f32 %v1464_v46, %v9709_v29  ;;  %v1473_v23 = vadd.f32 0.5, %v1472_v22  ;;  %v12014_v29 = vld [vmem:[#allocation27_spill] sm:$0xff]  ;;  %v12032_v46 = vld [vmem:[#allocation62_spill] sm:$0xff] }
 0x205   :  { %v12037_v22 = vld [vmem:[#allocation67_spill] sm:$0xff] }
 0x206   :  { %v10026_v38 = vadd.f32 %v1475_v4, %v1474_v39  ;;  %v12034_v39 = vld [vmem:[#allocation64_spill] sm:$0xff]  ;;  %v12035_v4 = vld [vmem:[#allocation65_spill] sm:$0xff] }
 0x208   :  { %9233 = vtanh.f32 %v10026_v38 }
 0x212   :  { %v9234_v24 = vpop.eup %9233 }
 0x213   :  { %v1478_v25 = vmul.f32 %v9234_v24, %v1473_v23  ;;  %v12038_v23 = vld [vmem:[#allocation68_spill] sm:$0xff]  ;;  %v12039_v24 = vld [vmem:[#allocation69_spill] sm:$0xff] }
 0x215   :  { %v1479_v26 = vpack.c.bf16 %v1478_v25, %v1478_v25  ;;  %v12040_v25 = vld [vmem:[#allocation70_spill] sm:$0xff] }
 0x217   :  { %1480 = vst [vmem:[#allocation3] sm:$0x1] %v1479_v26  ;;  %v12041_v26 = vld [vmem:[#allocation71_spill] sm:$0xff] }
 0x21e   :  { %v8356_v32 = vld.sshfl [vmem:[#allocation3] sm:$0x11 pattern:$0x75316420] }
 0x21f   :  { %v1618_v33 = vcombine.high %v8356_v32, %v8356_v32  ;;  %v10031_v40 = vrot.slane %v8356_v32, %v12013_v34  ;;  %v12042_v32 = vld [vmem:[#allocation72_spill] sm:$0xff] }
 0x221   :  { %v1632_v35 = vrot.slane %v1618_v33, %v12013_v34  ;;  %v12043_v33 = vld [vmem:[#allocation73_spill] sm:$0xff] }
 0x223   :  { %2307 = vmatprep.mubr.bf16.mxu0 %v1632_v35  ;;  %2348 = vmatprep.mubr.bf16.mxu1 %v1632_v35 }
 0x224   :  { %2308 = vmatmul.mubr.bf16.vlgmr.msra.gmra.mrb[8].mxu0 %v10031_v40  ;;  %2349 = vmatmul.mubr.bf16.vlgmr.msra.gmra.mrb[8].mxu1 %v10031_v40 }
 0x225   :  { %2358 = vmatpush1.bf16.msra.mxu0 %v12014_v29  ;;  %2399 = vmatpush1.bf16.msra.mxu1 %v12015_v41  ;;  %v12045_v29 = vld [vmem:[#allocation75_spill] sm:$0xff]  ;;  %v12046_v41 = vld [vmem:[#allocation76_spill] sm:$0xff] }
 0x226   :  { %2389 = vmatprep.mubr.bf16.mxu0 %v1632_v35  ;;  %2430 = vmatprep.mubr.bf16.mxu1 %v1632_v35  ;;  %v12044_v35 = vld [vmem:[#allocation74_spill] sm:$0xff] }
 0x227   :  { %2359 = vmatprep.subr.bf16.mxu0 %v12016_v43  ;;  %2400 = vmatprep.subr.bf16.mxu1 %v12017_v48  ;;  %v12047_v43 = vld [vmem:[#allocation77_spill] sm:$0xff]  ;;  %v12048_v48 = vld [vmem:[#allocation78_spill] sm:$0xff] }
 0x229   :  { %2360 = vmatpush1.bf16.msra.mxu0 %v12018_v49  ;;  %2401 = vmatpush1.bf16.msra.mxu1 %v12019_v50  ;;  %v12049_v49 = vld [vmem:[#allocation79_spill] sm:$0xff]  ;;  %v12050_v50 = vld [vmem:[#allocation80_spill] sm:$0xff] }
 0x22a   :  { %2361 = vmatprep.subr.bf16.mxu0 %v12020_v51  ;;  %2402 = vmatprep.subr.bf16.mxu1 %v12021_v56  ;;  %v12051_v51 = vld [vmem:[#allocation81_spill] sm:$0xff]  ;;  %v12052_v56 = vld [vmem:[#allocation82_spill] sm:$0xff] }
 0x22d   :  { %2362 = vmatpush1.bf16.msra.mxu0 %v12022_v57  ;;  %2403 = vmatpush1.bf16.msra.mxu1 %v12023_v59  ;;  %v12053_v57 = vld [vmem:[#allocation83_spill] sm:$0xff]  ;;  %v12054_v59 = vld [vmem:[#allocation84_spill] sm:$0xff] }
 0x22e   :  { %2363 = vmatprep.subr.bf16.mxu0 %v12024_v1  ;;  %2404 = vmatprep.subr.bf16.mxu1 %v12025_v8  ;;  %v12055_v1 = vld [vmem:[#allocation85_spill] sm:$0xff]  ;;  %v12056_v8 = vld [vmem:[#allocation86_spill] sm:$0xff] }
 0x231   :  { %2364 = vmatpush1.bf16.msra.mxu0 %v12026_v11  ;;  %2405 = vmatpush1.bf16.msra.mxu1 %v12027_v16  ;;  %v12057_v11 = vld [vmem:[#allocation87_spill] sm:$0xff]  ;;  %v12058_v16 = vld [vmem:[#allocation88_spill] sm:$0xff] }
 0x232   :  { %2365 = vmatprep.subr.bf16.mxu0 %v12028_v20  ;;  %2406 = vmatprep.subr.bf16.mxu1 %v12029_v31  ;;  %v12059_v20 = vld [vmem:[#allocation89_spill] sm:$0xff]  ;;  %v12060_v31 = vld [vmem:[#allocation90_spill] sm:$0xff] }
 0x235   :  { %2366 = vmatpush1.bf16.msra.mxu0 %v12030_v36  ;;  %2407 = vmatpush1.bf16.msra.mxu1 %v12031_v37  ;;  %v12061_v36 = vld [vmem:[#allocation91_spill] sm:$0xff]  ;;  %v12062_v37 = vld [vmem:[#allocation92_spill] sm:$0xff] }
 0x236   :  { %2367 = vmatprep.subr.bf16.mxu0 %v12032_v46  ;;  %2408 = vmatprep.subr.bf16.mxu1 %v12033_v52  ;;  %v12063_v46 = vld [vmem:[#allocation93_spill] sm:$0xff]  ;;  %v2543_v52 = vld [vmem:[#allocation5 + $0xe0] sm:$0xff] }
 0x239   :  { %2368 = vmatpush1.bf16.msra.mxu0 %v12034_v39  ;;  %2409 = vmatpush1.bf16.msra.mxu1 %v12035_v4  ;;  %v2540_v39 = vld [vmem:[#allocation5 + $0xc8] sm:$0xff] }
 0x23a   :  { %2369 = vmatprep.subr.bf16.mxu0 %v12036_v27  ;;  %2410 = vmatprep.subr.bf16.mxu1 %v12037_v22  ;;  %v2544_v27 = vld [vmem:[#allocation5 + $0xe8] sm:$0xff] }
 0x23d   :  { %2370 = vmatpush1.bf16.msra.mxu0 %v12038_v23  ;;  %2411 = vmatpush1.bf16.msra.mxu1 %v12039_v24  ;;  %v10131_v23 = vcombine.low %v2540_v39, %v2544_v27  ;;  %v10133_v24 = vcombine.high %v2540_v39, %v2544_v27  ;;  %v2580_v39 = vld [vmem:[#allocation5 + $0x208] sm:$0xff] }
 0x23e   :  { %2371 = vmatprep.subr.bf16.mxu0 %v12040_v25  ;;  %2412 = vmatprep.subr.bf16.mxu1 %v12041_v26  ;;  %v2547_v25 = vld [vmem:[#allocation5 + $0x100] sm:$0xff] }
 0x23f   :  { %v2551_v26 = vld [vmem:[#allocation5 + $0x120] sm:$0xff] }
 0x241   :  { %2372 = vmatpush1.bf16.msra.mxu0 %v12042_v32  ;;  %2413 = vmatpush1.bf16.msra.mxu1 %v12043_v33  ;;  %v2548_v32 = vld [vmem:[#allocation5 + $0x108] sm:$0xff]  ;;  %v10139_v33 = vcombine.high %v2547_v25, %v2551_v26 }
 0x242   :  { %2373 = vmatprep.subr.bf16.mxu0 %v12044_v35  ;;  %2414 = vmatprep.subr.bf16.mxu1 %v12045_v29  ;;  %v2552_v35 = vld [vmem:[#allocation5 + $0x128] sm:$0xff]  ;;  %v10141_v29 = vcombine.low %v2547_v25, %v2551_v26 }
 0x243   :  { %v2584_v25 = vld [vmem:[#allocation5 + $0x228] sm:$0xff] }
 0x245   :  { %2374 = vmatpush1.bf16.msra.mxu0 %v12046_v41  ;;  %2415 = vmatpush1.bf16.msra.mxu1 %v12047_v43  ;;  %v10143_v41 = vcombine.low %v2548_v32, %v2552_v35  ;;  %v10145_v43 = vcombine.high %v2548_v32, %v2552_v35  ;;  %v10191_v32 = vcombine.low %v2580_v39, %v2584_v25 }
 0x246   :  { %2375 = vmatprep.subr.bf16.mxu0 %v12048_v48  ;;  %2416 = vmatprep.subr.bf16.mxu1 %v12049_v49  ;;  %v2555_v48 = vld [vmem:[#allocation5 + $0x140] sm:$0xff]  ;;  %v10193_v35 = vcombine.high %v2580_v39, %v2584_v25 }
 0x247   :  { %v2559_v49 = vld [vmem:[#allocation5 + $0x160] sm:$0xff]  ;;  %12065 = vst [vmem:[#allocation10_spill] sm:$0xff] %v10191_v32 }
 0x248   :  { %12066 = vst [vmem:[#allocation11_spill] sm:$0xff] %v10193_v35 }
 0x249   :  { %2376 = vmatpush1.bf16.msra.mxu0 %v12050_v50  ;;  %2417 = vmatpush1.bf16.msra.mxu1 %v12051_v51  ;;  %v2556_v50 = vld [vmem:[#allocation5 + $0x148] sm:$0xff]  ;;  %v10151_v51 = vcombine.high %v2555_v48, %v2559_v49 }
 0x24a   :  { %2377 = vmatprep.subr.bf16.mxu0 %v12052_v56  ;;  %2418 = vmatprep.subr.bf16.mxu1 %v12053_v57  ;;  %v2560_v56 = vld [vmem:[#allocation5 + $0x168] sm:$0xff]  ;;  %v10153_v57 = vcombine.low %v2555_v48, %v2559_v49  ;;  %v2587_v48 = vld [vmem:[#allocation5 + $0x240] sm:$0xff] }
 0x24b   :  { %v2591_v49 = vld [vmem:[#allocation5 + $0x260] sm:$0xff] }
 0x24d   :  { %2378 = vmatpush1.bf16.msra.mxu0 %v12054_v59  ;;  %2419 = vmatpush1.bf16.msra.mxu1 %v12055_v1  ;;  %v10155_v59 = vcombine.low %v2556_v50, %v2560_v56  ;;  %v10157_v1 = vcombine.high %v2556_v50, %v2560_v56  ;;  %v2588_v50 = vld [vmem:[#allocation5 + $0x248] sm:$0xff]  ;;  %v10199_v56 = vcombine.high %v2587_v48, %v2591_v49 }
 0x24e   :  { %2379 = vmatprep.subr.bf16.mxu0 %v12056_v8  ;;  %2420 = vmatprep.subr.bf16.mxu1 %v12057_v11  ;;  %v2563_v8 = vld [vmem:[#allocation5 + $0x180] sm:$0xff] }
 0x24f   :  { %v2567_v11 = vld [vmem:[#allocation5 + $0x1a0] sm:$0xff]  ;;  %12067 = vst [vmem:[#allocation12_spill] sm:$0xff] %v10199_v56 }
 0x251   :  { %2380 = vmatpush1.bf16.msra.mxu0 %v12058_v16  ;;  %2421 = vmatpush1.bf16.msra.mxu1 %v12059_v20  ;;  %v2564_v16 = vld [vmem:[#allocation5 + $0x188] sm:$0xff]  ;;  %v10163_v20 = vcombine.high %v2563_v8, %v2567_v11 }
 0x252   :  { %2381 = vmatprep.subr.bf16.mxu0 %v12060_v31  ;;  %2422 = vmatprep.subr.bf16.mxu1 %v12061_v36  ;;  %v2568_v31 = vld [vmem:[#allocation5 + $0x1a8] sm:$0xff]  ;;  %v10165_v36 = vcombine.low %v2563_v8, %v2567_v11  ;;  %v10201_v11 = vcombine.low %v2587_v48, %v2591_v49  ;;  %v2603_v48 = vld [vmem:[#allocation5 + $0x2c0] sm:$0xff] }
 0x253   :  { %v2592_v8 = vld [vmem:[#allocation5 + $0x268] sm:$0xff]  ;;  %v2607_v49 = vld [vmem:[#allocation5 + $0x2e0] sm:$0xff] }
 0x254   :  { %12068 = vst [vmem:[#allocation13_spill] sm:$0xff] %v10201_v11 }
 0x255   :  { %2382 = vmatpush1.bf16.msra.mxu0 %v9859_v61  ;;  %2423 = vmatpush1.bf16.msra.mxu1 %v9861_v53  ;;  %v2523_v61 = vld [vmem:[#allocation5 + $0x40] sm:$0xff] }
 0x256   :  { %2383 = vmatprep.subr.bf16.mxu0 %v9865_v44  ;;  %2424 = vmatprep.subr.bf16.mxu1 %v12062_v37  ;;  %v2527_v53 = vld [vmem:[#allocation5 + $0x60] sm:$0xff]  ;;  %v2524_v44 = vld [vmem:[#allocation5 + $0x48] sm:$0xff]  ;;  %v10167_v37 = vcombine.low %v2564_v16, %v2568_v31 }
 0x259   :  { %2384 = vmatpush1.bf16.msra.mxu0 %v12063_v46  ;;  %2425 = vmatpush1.bf16.msra.mxu1 %v9873_v28  ;;  %v10103_v28 = vcombine.low %v2523_v61, %v2527_v53  ;;  %v10169_v46 = vcombine.high %v2564_v16, %v2568_v31  ;;  %v10203_v16 = vcombine.low %v2588_v50, %v2592_v8 }
 0x25a   :  { %2385 = vmatprep.subr.bf16.mxu0 %v9877_v47  ;;  %2426 = vmatprep.subr.bf16.mxu1 %v9879_v13  ;;  %v10205_v31 = vcombine.high %v2588_v50, %v2592_v8  ;;  %v2604_v50 = vld [vmem:[#allocation5 + $0x2c8] sm:$0xff]  ;;  %v10223_v8 = vcombine.high %v2603_v48, %v2607_v49 }
 0x25b   :  { %12069 = vst [vmem:[#allocation14_spill] sm:$0xff] %v10203_v16 }
 0x25c   :  { %12070 = vst [vmem:[#allocation15_spill] sm:$0xff] %v10205_v31  ;;  %12075 = vst [vmem:[#allocation20_spill] sm:$0xff] %v10223_v8 }
 0x25d   :  { %2386 = vmatpush1.bf16.msra.mxu0 %v9883_v14  ;;  %2427 = vmatpush1.bf16.msra.mxu1 %v9885_v6  ;;  %v2531_v14 = vld [vmem:[#allocation5 + $0x80] sm:$0xff] }
 0x25e   :  { %2387 = vmatprep.subr.bf16.mxu0 %v9889_v62  ;;  %2428 = vmatprep.subr.bf16.mxu1 %v9891_v55  ;;  %v2535_v6 = vld [vmem:[#allocation5 + $0xa0] sm:$0xff]  ;;  %v2532_v62 = vld [vmem:[#allocation5 + $0x88] sm:$0xff] }
 0x25f   :  { %v10115_v55 = vcombine.high %v2531_v14, %v2535_v6 }
 0x261   :  { %2388 = vmatpush1.bf16.msra.mxu0 %v9895_v15  ;;  %2429 = vmatpush1.bf16.msra.mxu1 %v9897_v5  ;;  %v10105_v15 = vcombine.high %v2523_v61, %v2527_v53  ;;  %v2528_v5 = vld [vmem:[#allocation5 + $0x68] sm:$0xff]  ;;  %v2571_v61 = vld [vmem:[#allocation5 + $0x1c0] sm:$0xff] }
 0x262   :  { %3308 = vmatprep.subr.bf16.mxu0 %v9907_v45  ;;  %3349 = vmatprep.subr.bf16.mxu1 %v9911_v63  ;;  %v10107_v47 = vcombine.low %v2524_v44, %v2528_v5  ;;  %v10109_v13 = vcombine.high %v2524_v44, %v2528_v5  ;;  %v10117_v45 = vcombine.low %v2531_v14, %v2535_v6  ;;  %v2575_v53 = vld [vmem:[#allocation5 + $0x1e0] sm:$0xff]  ;;  %v2572_v44 = vld [vmem:[#allocation5 + $0x1c8] sm:$0xff] }
 0x263   :  { %v10175_v5 = vcombine.high %v2571_v61, %v2575_v53  ;;  %v2576_v14 = vld [vmem:[#allocation5 + $0x1e8] sm:$0xff]  ;;  %v10177_v6 = vcombine.low %v2571_v61, %v2575_v53  ;;  %v2595_v61 = vld [vmem:[#allocation5 + $0x280] sm:$0xff] }
 0x264   :  { %2390 = vmatmul.mubr.bf16.vlgmr.msra.gmra.mrb[12].mxu0 %v10031_v40  ;;  %2431 = vmatmul.mubr.bf16.vlgmr.msra.gmra.mrb[12].mxu1 %v10031_v40  ;;  %v2539_v40 = vld [vmem:[#allocation5 + $0xc0] sm:$0xff] }
 0x265   :  { %3309 = vmatpush1.bf16.msra.mxu0 %v9905_v21  ;;  %3350 = vmatpush1.bf16.msra.mxu1 %v9909_v7  ;;  %v2536_v21 = vld [vmem:[#allocation5 + $0xa8] sm:$0xff]  ;;  %v10127_v4 = vcombine.high %v2539_v40, %v2543_v52  ;;  %v10129_v22 = vcombine.low %v2539_v40, %v2543_v52  ;;  %v2579_v40 = vld [vmem:[#allocation5 + $0x200] sm:$0xff] }
 0x266   :  { %3310 = vmatprep.subr.bf16.mxu0 %v10105_v15  ;;  %3351 = vmatprep.subr.bf16.mxu1 %v10109_v13  ;;  %v10119_v7 = vcombine.low %v2532_v62, %v2536_v21  ;;  %v10121_v63 = vcombine.high %v2532_v62, %v2536_v21  ;;  %v10179_v62 = vcombine.low %v2572_v44, %v2576_v14  ;;  %v2583_v52 = vld [vmem:[#allocation5 + $0x220] sm:$0xff] }
 0x267   :  { %v10181_v21 = vcombine.high %v2572_v44, %v2576_v14  ;;  %v10187_v27 = vcombine.high %v2579_v40, %v2583_v52  ;;  %v10189_v26 = vcombine.low %v2579_v40, %v2583_v52  ;;  %v2599_v53 = vld [vmem:[#allocation5 + $0x2a0] sm:$0xff]  ;;  %v2596_v44 = vld [vmem:[#allocation5 + $0x288] sm:$0xff] }
 0x268   :  { %v10211_v14 = vcombine.high %v2595_v61, %v2599_v53  ;;  %v2600_v40 = vld [vmem:[#allocation5 + $0x2a8] sm:$0xff]  ;;  %v10213_v52 = vcombine.low %v2595_v61, %v2599_v53  ;;  %v10225_v61 = vcombine.low %v2603_v48, %v2607_v49 }
 0x269   :  { %3311 = vmatpush1.bf16.msra.mxu0 %v10103_v28  ;;  %3352 = vmatpush1.bf16.msra.mxu1 %v10107_v47  ;;  %12064 = vst [vmem:[#allocation9_spill] sm:$0xff] %v10189_v26  ;;  %v10215_v39 = vcombine.low %v2596_v44, %v2600_v40  ;;  %v10217_v25 = vcombine.high %v2596_v44, %v2600_v40  ;;  %v2611_v40 = vld [vmem:[#allocation5 + $0x300] sm:$0xff] }
 0x26a   :  { %3312 = vmatprep.subr.bf16.mxu0 %v10115_v55  ;;  %3353 = vmatprep.subr.bf16.mxu1 %v10121_v63  ;;  %12071 = vst [vmem:[#allocation16_spill] sm:$0xff] %v10211_v14  ;;  %12072 = vst [vmem:[#allocation17_spill] sm:$0xff] %v10213_v52 }
 0x26b   :  { %12073 = vst [vmem:[#allocation18_spill] sm:$0xff] %v10215_v39  ;;  %12074 = vst [vmem:[#allocation19_spill] sm:$0xff] %v10217_v25 }
 0x26c   :  { %12076 = vst [vmem:[#allocation21_spill] sm:$0xff] %v10225_v61 }
 0x26d   :  { %3313 = vmatpush1.bf16.msra.mxu0 %v10117_v45  ;;  %3354 = vmatpush1.bf16.msra.mxu1 %v10119_v7 }
 0x26e   :  { %3314 = vmatprep.subr.bf16.mxu0 %v10127_v4  ;;  %3355 = vmatprep.subr.bf16.mxu1 %v10133_v24 }
 0x271   :  { %3315 = vmatpush1.bf16.msra.mxu0 %v10129_v22  ;;  %3356 = vmatpush1.bf16.msra.mxu1 %v10131_v23 }
 0x272   :  { %3316 = vmatprep.subr.bf16.mxu0 %v10139_v33  ;;  %3357 = vmatprep.subr.bf16.mxu1 %v10145_v43 }
 0x275   :  { %3317 = vmatpush1.bf16.msra.mxu0 %v10141_v29  ;;  %3358 = vmatpush1.bf16.msra.mxu1 %v10143_v41 }
 0x276   :  { %3318 = vmatprep.subr.bf16.mxu0 %v10151_v51  ;;  %3359 = vmatprep.subr.bf16.mxu1 %v10157_v1 }
 0x279   :  { %3319 = vmatpush1.bf16.msra.mxu0 %v10153_v57  ;;  %3360 = vmatpush1.bf16.msra.mxu1 %v10155_v59 }
 0x27a   :  { %3320 = vmatprep.subr.bf16.mxu0 %v10163_v20  ;;  %3361 = vmatprep.subr.bf16.mxu1 %v10169_v46 }
 0x27d   :  { %3321 = vmatpush1.bf16.msra.mxu0 %v10165_v36  ;;  %3362 = vmatpush1.bf16.msra.mxu1 %v10167_v37 }
 0x27e   :  { %3322 = vmatprep.subr.bf16.mxu0 %v10175_v5  ;;  %3363 = vmatprep.subr.bf16.mxu1 %v10181_v21 }
 0x281   :  { %3323 = vmatpush1.bf16.msra.mxu0 %v10177_v6  ;;  %3364 = vmatpush1.bf16.msra.mxu1 %v10179_v62 }
 0x282   :  { %3324 = vmatprep.subr.bf16.mxu0 %v10187_v27  ;;  %3365 = vmatprep.subr.bf16.mxu1 %v10193_v35 }
 0x285   :  { %3325 = vmatpush1.bf16.msra.mxu0 %v10189_v26  ;;  %3366 = vmatpush1.bf16.msra.mxu1 %v10191_v32  ;;  %v2636_v32 = vld [vmem:[#allocation5 + $0x3c8] sm:$0xff] }
 0x286   :  { %3326 = vmatprep.subr.bf16.mxu0 %v10199_v56  ;;  %3367 = vmatprep.subr.bf16.mxu1 %v10205_v31  ;;  %v2635_v31 = vld [vmem:[#allocation5 + $0x3c0] sm:$0xff] }
 0x289   :  { %3327 = vmatpush1.bf16.msra.mxu0 %v10201_v11  ;;  %3368 = vmatpush1.bf16.msra.mxu1 %v10203_v16  ;;  %v2608_v16 = vld [vmem:[#allocation5 + $0x2e8] sm:$0xff]  ;;  %v2631_v11 = vld [vmem:[#allocation5 + $0x3a0] sm:$0xff] }
 0x28a   :  { %3328 = vmatprep.subr.bf16.mxu0 %v10211_v14  ;;  %3369 = vmatprep.subr.bf16.mxu1 %v10217_v25  ;;  %v10227_v53 = vcombine.low %v2604_v50, %v2608_v16  ;;  %v10229_v44 = vcombine.high %v2604_v50, %v2608_v16  ;;  %v2612_v25 = vld [vmem:[#allocation5 + $0x308] sm:$0xff]  ;;  %v2619_v50 = vld [vmem:[#allocation5 + $0x340] sm:$0xff] }
 0x28b   :  { %v2616_v14 = vld [vmem:[#allocation5 + $0x328] sm:$0xff] }
 0x28c   :  { %12077 = vst [vmem:[#allocation22_spill] sm:$0xff] %v10227_v53  ;;  %12078 = vst [vmem:[#allocation23_spill] sm:$0xff] %v10229_v44  ;;  %v10239_v49 = vcombine.low %v2612_v25, %v2616_v14  ;;  %v10241_v16 = vcombine.high %v2612_v25, %v2616_v14 }
 0x28d   :  { %3329 = vmatpush1.bf16.msra.mxu0 %v10213_v52  ;;  %3370 = vmatpush1.bf16.msra.mxu1 %v10215_v39  ;;  %v2615_v52 = vld [vmem:[#allocation5 + $0x320] sm:$0xff] }
 0x28e   :  { %3330 = vmatprep.subr.bf16.mxu0 %v10223_v8  ;;  %3371 = vmatprep.subr.bf16.mxu1 %v10229_v44  ;;  %v10235_v39 = vcombine.high %v2611_v40, %v2615_v52  ;;  %v10237_v48 = vcombine.low %v2611_v40, %v2615_v52  ;;  %12081 = vst [vmem:[#allocation26_spill] sm:$0xff] %v10239_v49  ;;  %12082 = vst [vmem:[#allocation28_spill] sm:$0xff] %v10241_v16  ;;  %v2620_v44 = vld [vmem:[#allocation5 + $0x348] sm:$0xff]  ;;  %v2627_v40 = vld [vmem:[#allocation5 + $0x380] sm:$0xff] }
 0x28f   :  { %v2624_v52 = vld [vmem:[#allocation5 + $0x368] sm:$0xff] }
 0x290   :  { %12079 = vst [vmem:[#allocation24_spill] sm:$0xff] %v10235_v39  ;;  %12080 = vst [vmem:[#allocation25_spill] sm:$0xff] %v10237_v48  ;;  %v10251_v14 = vcombine.low %v2620_v44, %v2624_v52  ;;  %v10253_v25 = vcombine.high %v2620_v44, %v2624_v52 }
 0x291   :  { %3331 = vmatpush1.bf16.msra.mxu0 %v10225_v61  ;;  %3372 = vmatpush1.bf16.msra.mxu1 %v10227_v53  ;;  %v2623_v61 = vld [vmem:[#allocation5 + $0x360] sm:$0xff] }
 0x292   :  { %3332 = vmatprep.subr.bf16.mxu0 %v10235_v39  ;;  %3373 = vmatprep.subr.bf16.mxu1 %v10241_v16  ;;  %v10247_v53 = vcombine.low %v2619_v50, %v2623_v61  ;;  %v10249_v8 = vcombine.high %v2619_v50, %v2623_v61  ;;  %12085 = vst [vmem:[#allocation32_spill] sm:$0xff] %v10251_v14  ;;  %12086 = vst [vmem:[#allocation33_spill] sm:$0xff] %v10253_v25  ;;  %v2628_v16 = vld [vmem:[#allocation5 + $0x388] sm:$0xff] }
 0x293   :  { %v10255_v39 = vcombine.high %v2627_v40, %v2631_v11  ;;  %v2640_v61 = vld [vmem:[#allocation5 + $0x3e8] sm:$0xff]  ;;  %v10262_v50 = vcombine.low %v2627_v40, %v2631_v11  ;;  %v2518_v40 = vld [vmem:[#allocation5 + $0x18] sm:$0xff] }
 0x294   :  { %12083 = vst [vmem:[#allocation29_spill] sm:$0xff] %v10247_v53  ;;  %12084 = vst [vmem:[#allocation31_spill] sm:$0xff] %v10249_v8  ;;  %v10278_v11 = vcombine.low %v2636_v32, %v2640_v61 }
 0x295   :  { %3333 = vmatpush1.bf16.msra.mxu0 %v10237_v48  ;;  %3374 = vmatpush1.bf16.msra.mxu1 %v10239_v49  ;;  %12087 = vst [vmem:[#allocation34_spill] sm:$0xff] %v10255_v39  ;;  %v2632_v48 = vld [vmem:[#allocation5 + $0x3a8] sm:$0xff]  ;;  %v2639_v49 = vld [vmem:[#allocation5 + $0x3e0] sm:$0xff]  ;;  %12089 = vst [vmem:[#allocation36_spill] sm:$0xff] %v10262_v50 }
 0x296   :  { %3334 = vmatprep.subr.bf16.mxu0 %v10249_v8  ;;  %v10258_v56 = vcombine.high %v2628_v16, %v2632_v48  ;;  %3375 = vmatprep.subr.bf16.mxu1 %v10253_v25  ;;  %v10266_v44 = vcombine.low %v2628_v16, %v2632_v48  ;;  %v10268_v52 = vcombine.high %v2635_v31, %v2639_v49  ;;  %v2517_v48 = vld [vmem:[#allocation5 + $0x10] sm:$0xff] }
 0x297   :  { %v10271_v8 = vcombine.high %v2636_v32, %v2640_v61  ;;  %v10274_v26 = vcombine.low %v2635_v31, %v2639_v49  ;;  %12094 = vst [vmem:[#allocation27_spill] sm:$0xff] %v10278_v11  ;;  %v2521_v16 = vld [vmem:[#allocation5 + $0x30] sm:$0xff]  ;;  %v2522_v31 = vld [vmem:[#allocation5 + $0x38] sm:$0xff] }
 0x298   :  { %12088 = vst [vmem:[#allocation35_spill] sm:$0xff] %v10258_v56  ;;  %12090 = vst [vmem:[#allocation37_spill] sm:$0xff] %v10266_v44  ;;  %v10287_v49 = vcombine.low %v2518_v40, %v2522_v31 }
 0x299   :  { %3335 = vmatpush1.bf16.msra.mxu0 %v10247_v53  ;;  %3376 = vmatpush1.bf16.msra.mxu1 %v10251_v14  ;;  %12091 = vst [vmem:[#allocation38_spill] sm:$0xff] %v10268_v52  ;;  %12092 = vst [vmem:[#allocation39_spill] sm:$0xff] %v10271_v8 }
 0x29a   :  { %3336 = vmatprep.subr.bf16.mxu0 %v10255_v39  ;;  %3377 = vmatprep.subr.bf16.mxu1 %v10258_v56  ;;  %12093 = vst [vmem:[#allocation42_spill] sm:$0xff] %v10274_v26  ;;  %v10283_v56 = vcombine.low %v2517_v48, %v2521_v16 }
 0x29d   :  { %3337 = vmatpush1.bf16.msra.mxu0 %v10262_v50  ;;  %3378 = vmatpush1.bf16.msra.mxu1 %v10266_v44  ;;  %v10285_v50 = vcombine.high %v2517_v48, %v2521_v16  ;;  %v10289_v44 = vcombine.high %v2518_v40, %v2522_v31 }
 0x29e   :  { %3338 = vmatprep.subr.bf16.mxu0 %v10268_v52  ;;  %3379 = vmatprep.subr.bf16.mxu1 %v10271_v8 }
 0x29f   :  { %12095 = vst [vmem:[#allocation30_spill] sm:$0xff] %v10285_v50  ;;  %12096 = vst [vmem:[#allocation46_spill] sm:$0xff] %v10289_v44 }
 0x2a1   :  { %3339 = vmatpush1.bf16.msra.mxu0 %v10274_v26  ;;  %3380 = vmatpush1.bf16.msra.mxu1 %v10278_v11 }
 0x2a2   :  { %3390 = vmatprep.subr.bf16.mxu0 %v10285_v50  ;;  %3431 = vmatprep.subr.bf16.mxu1 %v10289_v44 }
 0x2f7   :  { %v2309_v32 = vpop.f32.mrb[8].mxu0  ;;  %v2350_v61 = vpop.f32.mrb[8].mxu1 }
 0x2f8   :  { %v2439_v26 = vadd.f32 %v2309_v32, %v9983_v3  ;;  %v2311_v8 = vpop.f32.mrb[9].mxu0  ;;  %v2352_v52 = vpop.f32.mrb[9].mxu1  ;;  %v2441_v40 = vadd.f32 %v2350_v61, %v9990_v19 }
 0x2f9   :  { %v2440_v11 = vadd.f32 %v2311_v8, %v9986_v9  ;;  %v2313_v39 = vpop.f32.mrb[10].mxu0  ;;  %v2354_v48 = vpop.f32.mrb[10].mxu1  ;;  %v2442_v31 = vadd.f32 %v2352_v52, %v9995_v17 }
 0x2fa   :  { %v2443_v16 = vmul.f32 0.5, %v2439_v26  ;;  %v2314_v14 = vpop.f32.mrb[11].mxu0  ;;  %v2355_v53 = vpop.f32.mrb[11].mxu1 }
 0x2fb   :  { %v2447_v25 = vmul.f32 0.5, %v2440_v11  ;;  %v2452_v44 = vmul.f32 0.5, %v2442_v31 }
 0x2fc   :  { %9235 = vtanh.f32 %v2443_v16 }
 0x2fd   :  { %9237 = vtanh.f32 %v2447_v25 }
 0x2fe   :  { %9239 = vtanh.f32 %v2441_v40 }
 0x2ff   :  { %9241 = vtanh.f32 %v2452_v44 }
 0x306   :  { %v9236_v50 = vpop.eup %9235 }
 0x307   :  { %v9238_v32 = vpop.eup %9237  ;;  %v2445_v3 = vmul.f32 0.5, %v9236_v50  ;;  %v168_v50 = vpop.permute.xlu1 %167 }
 0x308   :  { %v2449_v35 = vmul.f32 0.5, %v9238_v32  ;;  %v9240_v39 = vpop.eup %9239  ;;  %v170_v44 = vmul.f32 %v168_v50, %v12007_v58 }
 0x309   :  { %v2446_v8 = vadd.f32 0.5, %v2445_v3  ;;  %v9242_v25 = vpop.eup %9241  ;;  %v171_v3 = vmul.f32 %v168_v50, %v12008_v0 }
 0x30a   :  { %v2450_v48 = vadd.f32 0.5, %v2449_v35  ;;  %v2454_v11 = vmul.f32 0.5, %v9242_v25  ;;  %v172_v35 = vmul.f32 %v168_v50, %v12009_v2  ;;  %v174_v31 = vadd.f32 %v170_v44, %v9685_v12 }
 0x30b   :  { %v2457_v26 = vmul.f32 %v9240_v39, %v2446_v8  ;;  %v175_v32 = vadd.f32 %v171_v3, %v12011_v18 }
 0x30c   :  { %v2456_v53 = vmul.f32 %v2450_v48, %v9998_v42  ;;  %v2455_v61 = vadd.f32 0.5, %v2454_v11  ;;  %v173_v42 = vmul.f32 %v168_v50, %v12010_v10  ;;  %v176_v8 = vadd.f32 %v172_v35, %v12012_v30 }
 0x30d   :  { %v182_v48 = vcombine.low %v174_v31, %v175_v32 }
 0x30e   :  { %v10298_v14 = vadd.f32 %v2457_v26, %v2456_v53  ;;  %v177_v39 = vadd.f32 %v173_v42, %v9694_v54 }
 0x30f   :  { %v190_v11 = vrot.slane %v182_v48, %v9701_v60 }
 0x310   :  { %9243 = vtanh.f32 %v10298_v14  ;;  %v183_v26 = vcombine.low %v176_v8, %v177_v39 }
 0x31a   :  { %v9244_v52 = vpop.eup %9243 }
 0x31b   :  { %v2460_v16 = vmul.f32 %v9244_v52, %v2455_v61  ;;  %v197_v61 = vrot.slane %v183_v26, %v9701_v60 }
 0x31d   :  { %v2461_v40 = vpack.c.bf16 %v2460_v16, %v2460_v16  ;;  %v198_v30 = vcombine.low %v190_v11, %v197_v61 }
 0x31f   :  { %2462 = vst [vmem:[#allocation3 + $0x1] sm:$0x1] %v2461_v40 }
 0x337   :  { %v2391_v53 = vpop.f32.mrb[12].mxu0  ;;  %v2432_v25 = vpop.f32.mrb[12].mxu1 }
 0x338   :  { %v2393_v52 = vpop.f32.mrb[13].mxu0  ;;  %v2434_v16 = vpop.f32.mrb[13].mxu1 }
 0x339   :  { %v2468_v40 = vcombine.low %v2391_v53, %v2393_v52  ;;  %v2469_v50 = vcombine.low %v2432_v25, %v2434_v16  ;;  %v2395_v10 = vpop.f32.mrb[14].mxu0  ;;  %v2436_v44 = vpop.f32.mrb[14].mxu1 }
 0x33a   :  { %v2396_v12 = vpop.f32.mrb[15].mxu0  ;;  %v2437_v3 = vpop.f32.mrb[15].mxu1 }
 0x33b   :  { %v2476_v35 = vrot.slane %v2468_v40, %v9701_v60  ;;  %v2483_v42 = vrot.slane %v2469_v50, %v9701_v60 }
 0x33d   :  { %v2484_v31 = vcombine.low %v2476_v35, %v2483_v42 }
 0x33f   :  { %v2486_v32 = vadd.f32 %v2484_v31, %v198_v30 }
 0x341   :  { %v2487_v8 = vmul.f32 0.5, %v2486_v32  ;;  %v2492_v39 = vrot.slane %v2486_v32, 2  ;;  %v2498_v26 = vrot.slane %v2486_v32, 4  ;;  %v2501_v54 = vrot.slane %v2486_v32, 6 }
 0x343   :  { %9245 = vtanh.f32 %v2487_v8  ;;  %v2494_v48 = vmul.f32 0.5, %v2492_v39  ;;  %v2503_v53 = vmul.f32 0.5, %v2501_v54  ;;  %v2525_v39 = vld [vmem:[#allocation5 + $0x50] sm:$0xff] }
 0x345   :  { %9247 = vtanh.f32 %v2494_v48  ;;  %v2529_v48 = vld [vmem:[#allocation5 + $0x70] sm:$0xff] }
 0x346   :  { %9249 = vtanh.f32 %v2498_v26  ;;  %v2526_v26 = vld [vmem:[#allocation5 + $0x58] sm:$0xff] }
 0x347   :  { %9251 = vtanh.f32 %v2503_v53  ;;  %v2530_v53 = vld [vmem:[#allocation5 + $0x78] sm:$0xff] }
 0x34d   :  { %v9246_v10 = vpop.eup %9245 }
 0x34e   :  { %v2489_v25 = vmul.f32 0.5, %v9246_v10 }
 0x34f   :  { %v9248_v12 = vpop.eup %9247 }
 0x350   :  { %v2490_v52 = vadd.f32 0.5, %v2489_v25  ;;  %v2496_v16 = vmul.f32 0.5, %v9248_v12  ;;  %v9250_v61 = vpop.eup %9249  ;;  %v2533_v25 = vld [vmem:[#allocation5 + $0x90] sm:$0xff]  ;;  %v10321_v12 = vcombine.high %v2525_v39, %v2529_v48 }
 0x351   :  { %v9252_v44 = vpop.eup %9251 }
 0x352   :  { %v2497_v11 = vadd.f32 0.5, %v2496_v16  ;;  %v2508_v30 = vmul.f32 %v9250_v61, %v2490_v52  ;;  %v2505_v3 = vmul.f32 0.5, %v9252_v44  ;;  %v10323_v52 = vcombine.high %v2526_v26, %v2530_v53  ;;  %v2537_v16 = vld [vmem:[#allocation5 + $0xb0] sm:$0xff]  ;;  %v2538_v61 = vld [vmem:[#allocation5 + $0xb8] sm:$0xff] }
 0x353   :  { %v10333_v44 = vcombine.high %v2533_v25, %v2537_v16 }
 0x354   :  { %v2507_v40 = vmul.f32 %v2497_v11, %v10026_v38  ;;  %v2506_v35 = vadd.f32 0.5, %v2505_v3  ;;  %12097 = vst [vmem:[#allocation47_spill] sm:$0xff] %v10323_v52  ;;  %v2534_v11 = vld [vmem:[#allocation5 + $0x98] sm:$0xff] }
 0x355   :  { %12100 = vst [vmem:[#allocation50_spill] sm:$0xff] %v10333_v44  ;;  %v10335_v3 = vcombine.high %v2534_v11, %v2538_v61 }
 0x356   :  { %v10314_v50 = vadd.f32 %v2508_v30, %v2507_v40  ;;  %v10329_v40 = vcombine.low %v2525_v39, %v2529_v48  ;;  %v10331_v30 = vcombine.low %v2526_v26, %v2530_v53  ;;  %v2549_v26 = vld [vmem:[#allocation5 + $0x110] sm:$0xff] }
 0x357   :  { %12101 = vst [vmem:[#allocation51_spill] sm:$0xff] %v10335_v3  ;;  %v2553_v53 = vld [vmem:[#allocation5 + $0x130] sm:$0xff] }
 0x358   :  { %9253 = vtanh.f32 %v10314_v50  ;;  %12098 = vst [vmem:[#allocation48_spill] sm:$0xff] %v10329_v40  ;;  %12099 = vst [vmem:[#allocation49_spill] sm:$0xff] %v10331_v30 }
 0x362   :  { %v9254_v42 = vpop.eup %9253 }
 0x363   :  { %v2511_v54 = vmul.f32 %v9254_v42, %v2506_v35  ;;  %v2541_v35 = vld [vmem:[#allocation5 + $0xd0] sm:$0xff] }
 0x364   :  { %v2545_v42 = vld [vmem:[#allocation5 + $0xf0] sm:$0xff] }
 0x365   :  { %v2512_v31 = vpack.c.bf16 %v2511_v54, %v2511_v54  ;;  %v2542_v54 = vld [vmem:[#allocation5 + $0xd8] sm:$0xff]  ;;  %v10347_v39 = vcombine.high %v2541_v35, %v2545_v42 }
 0x367   :  { %2513 = vst [vmem:[#allocation3] sm:$0x1] %v2512_v31  ;;  %v2546_v31 = vld [vmem:[#allocation5 + $0xf8] sm:$0xff]  ;;  %12104 = vst [vmem:[#allocation54_spill] sm:$0xff] %v10347_v39 }
 0x368   :  { %v10349_v48 = vcombine.high %v2542_v54, %v2546_v31 }
 0x36a   :  { %12105 = vst [vmem:[#allocation55_spill] sm:$0xff] %v10349_v48 }
 0x36e   :  { %v8485_v32 = vld.sshfl [vmem:[#allocation3] sm:$0x11 pattern:$0x75316420] }
 0x36f   :  { %v2651_v8 = vcombine.high %v8485_v32, %v8485_v32  ;;  %v10319_v10 = vrot.slane %v8485_v32, %v12013_v34  ;;  %v10341_v32 = vcombine.low %v2533_v25, %v2537_v16  ;;  %v10353_v25 = vcombine.low %v2541_v35, %v2545_v42 }
 0x370   :  { %v10355_v16 = vcombine.low %v2542_v54, %v2546_v31  ;;  %v10365_v35 = vcombine.low %v2549_v26, %v2553_v53 }
 0x371   :  { %v2665_v38 = vrot.slane %v2651_v8, %v12013_v34  ;;  %12102 = vst [vmem:[#allocation52_spill] sm:$0xff] %v10341_v32  ;;  %v10343_v8 = vcombine.low %v2534_v11, %v2538_v61  ;;  %12106 = vst [vmem:[#allocation56_spill] sm:$0xff] %v10353_v25  ;;  %v10359_v11 = vcombine.high %v2549_v26, %v2553_v53 }
 0x372   :  { %12107 = vst [vmem:[#allocation57_spill] sm:$0xff] %v10355_v16  ;;  %12110 = vst [vmem:[#allocation60_spill] sm:$0xff] %v10365_v35 }
 0x373   :  { %3340 = vmatprep.mubr.bf16.mxu0 %v2665_v38  ;;  %3381 = vmatprep.mubr.bf16.mxu1 %v2665_v38  ;;  %12103 = vst [vmem:[#allocation53_spill] sm:$0xff] %v10343_v8  ;;  %12108 = vst [vmem:[#allocation58_spill] sm:$0xff] %v10359_v11 }
 0x374   :  { %3341 = vmatmul.mubr.bf16.vlgmr.msra.gmra.mrb[16].mxu0 %v10319_v10  ;;  %3382 = vmatmul.mubr.bf16.vlgmr.msra.gmra.mrb[16].mxu1 %v10319_v10 }
 0x375   :  { %3391 = vmatpush1.bf16.msra.mxu0 %v10283_v56  ;;  %3432 = vmatpush1.bf16.msra.mxu1 %v10287_v49 }
 0x376   :  { %3422 = vmatprep.mubr.bf16.mxu0 %v2665_v38  ;;  %3463 = vmatprep.mubr.bf16.mxu1 %v2665_v38  ;;  %v2550_v38 = vld [vmem:[#allocation5 + $0x118] sm:$0xff] }
 0x377   :  { %3392 = vmatprep.subr.bf16.mxu0 %v10321_v12  ;;  %3433 = vmatprep.subr.bf16.mxu1 %v10323_v52  ;;  %v2554_v52 = vld [vmem:[#allocation5 + $0x138] sm:$0xff] }
 0x378   :  { %v10361_v61 = vcombine.high %v2550_v38, %v2554_v52  ;;  %v10367_v42 = vcombine.low %v2550_v38, %v2554_v52 }
 0x379   :  { %3393 = vmatpush1.bf16.msra.mxu0 %v10329_v40  ;;  %3434 = vmatpush1.bf16.msra.mxu1 %v10331_v30  ;;  %v2558_v30 = vld [vmem:[#allocation5 + $0x158] sm:$0xff] }
 0x37a   :  { %3394 = vmatprep.subr.bf16.mxu0 %v10333_v44  ;;  %3435 = vmatprep.subr.bf16.mxu1 %v10335_v3  ;;  %12109 = vst [vmem:[#allocation59_spill] sm:$0xff] %v10361_v61  ;;  %v2557_v3 = vld [vmem:[#allocation5 + $0x150] sm:$0xff]  ;;  %v2562_v40 = vld [vmem:[#allocation5 + $0x178] sm:$0xff]  ;;  %12111 = vst [vmem:[#allocation61_spill] sm:$0xff] %v10367_v42 }
 0x37b   :  { %v2561_v44 = vld [vmem:[#allocation5 + $0x170] sm:$0xff]  ;;  %v10373_v31 = vcombine.high %v2558_v30, %v2562_v40  ;;  %v10379_v52 = vcombine.low %v2558_v30, %v2562_v40 }
 0x37c   :  { %v10371_v54 = vcombine.high %v2557_v3, %v2561_v44  ;;  %v10377_v26 = vcombine.low %v2557_v3, %v2561_v44 }
 0x37d   :  { %3395 = vmatpush1.bf16.msra.mxu0 %v10341_v32  ;;  %3436 = vmatpush1.bf16.msra.mxu1 %v10343_v8  ;;  %12113 = vst [vmem:[#allocation63_spill] sm:$0xff] %v10373_v31  ;;  %v2566_v8 = vld [vmem:[#allocation5 + $0x198] sm:$0xff]  ;;  %12115 = vst [vmem:[#allocation65_spill] sm:$0xff] %v10379_v52 }
 0x37e   :  { %3396 = vmatprep.subr.bf16.mxu0 %v10347_v39  ;;  %3437 = vmatprep.subr.bf16.mxu1 %v10349_v48  ;;  %12112 = vst [vmem:[#allocation62_spill] sm:$0xff] %v10371_v54  ;;  %v2565_v48 = vld [vmem:[#allocation5 + $0x190] sm:$0xff]  ;;  %v2570_v32 = vld [vmem:[#allocation5 + $0x1b8] sm:$0xff]  ;;  %12114 = vst [vmem:[#allocation64_spill] sm:$0xff] %v10377_v26 }
 0x37f   :  { %v2569_v39 = vld [vmem:[#allocation5 + $0x1b0] sm:$0xff]  ;;  %v10385_v38 = vcombine.high %v2566_v8, %v2570_v32  ;;  %v10391_v40 = vcombine.low %v2566_v8, %v2570_v32 }
 0x380   :  { %v10383_v53 = vcombine.high %v2565_v48, %v2569_v39  ;;  %v10389_v44 = vcombine.low %v2565_v48, %v2569_v39 }
 0x381   :  { %3397 = vmatpush1.bf16.msra.mxu0 %v10353_v25  ;;  %3438 = vmatpush1.bf16.msra.mxu1 %v10355_v16  ;;  %12117 = vst [vmem:[#allocation67_spill] sm:$0xff] %v10385_v38  ;;  %v2574_v16 = vld [vmem:[#allocation5 + $0x1d8] sm:$0xff]  ;;  %12119 = vst [vmem:[#allocation69_spill] sm:$0xff] %v10391_v40 }
 0x382   :  { %3398 = vmatprep.subr.bf16.mxu0 %v10359_v11  ;;  %3439 = vmatprep.subr.bf16.mxu1 %v10361_v61  ;;  %12116 = vst [vmem:[#allocation66_spill] sm:$0xff] %v10383_v53  ;;  %v2573_v61 = vld [vmem:[#allocation5 + $0x1d0] sm:$0xff]  ;;  %v2578_v25 = vld [vmem:[#allocation5 + $0x1f8] sm:$0xff]  ;;  %12118 = vst [vmem:[#allocation68_spill] sm:$0xff] %v10389_v44 }
 0x383   :  { %v2577_v11 = vld [vmem:[#allocation5 + $0x1f0] sm:$0xff]  ;;  %v10397_v3 = vcombine.high %v2574_v16, %v2578_v25  ;;  %v10403_v32 = vcombine.low %v2574_v16, %v2578_v25 }
 0x384   :  { %v10395_v30 = vcombine.high %v2573_v61, %v2577_v11  ;;  %v10401_v39 = vcombine.low %v2573_v61, %v2577_v11 }
 0x385   :  { %3399 = vmatpush1.bf16.msra.mxu0 %v10365_v35  ;;  %3440 = vmatpush1.bf16.msra.mxu1 %v10367_v42  ;;  %12121 = vst [vmem:[#allocation71_spill] sm:$0xff] %v10397_v3  ;;  %v2582_v42 = vld [vmem:[#allocation5 + $0x218] sm:$0xff]  ;;  %12123 = vst [vmem:[#allocation73_spill] sm:$0xff] %v10403_v32 }
 0x386   :  { %3400 = vmatprep.subr.bf16.mxu0 %v10371_v54  ;;  %3441 = vmatprep.subr.bf16.mxu1 %v10373_v31  ;;  %12120 = vst [vmem:[#allocation70_spill] sm:$0xff] %v10395_v30  ;;  %v2581_v31 = vld [vmem:[#allocation5 + $0x210] sm:$0xff]  ;;  %v2586_v35 = vld [vmem:[#allocation5 + $0x238] sm:$0xff]  ;;  %12122 = vst [vmem:[#allocation72_spill] sm:$0xff] %v10401_v39 }
 0x387   :  { %v2585_v54 = vld [vmem:[#allocation5 + $0x230] sm:$0xff]  ;;  %v10409_v48 = vcombine.high %v2582_v42, %v2586_v35  ;;  %v10415_v25 = vcombine.low %v2582_v42, %v2586_v35 }
 0x388   :  { %v10407_v8 = vcombine.high %v2581_v31, %v2585_v54  ;;  %v10413_v11 = vcombine.low %v2581_v31, %v2585_v54 }
 0x389   :  { %3401 = vmatpush1.bf16.msra.mxu0 %v10377_v26  ;;  %3442 = vmatpush1.bf16.msra.mxu1 %v10379_v52  ;;  %12125 = vst [vmem:[#allocation75_spill] sm:$0xff] %v10409_v48  ;;  %v2590_v52 = vld [vmem:[#allocation5 + $0x258] sm:$0xff]  ;;  %12127 = vst [vmem:[#allocation77_spill] sm:$0xff] %v10415_v25 }
 0x38a   :  { %3402 = vmatprep.subr.bf16.mxu0 %v10383_v53  ;;  %3443 = vmatprep.subr.bf16.mxu1 %v10385_v38  ;;  %12124 = vst [vmem:[#allocation74_spill] sm:$0xff] %v10407_v8  ;;  %v2589_v38 = vld [vmem:[#allocation5 + $0x250] sm:$0xff]  ;;  %v2594_v26 = vld [vmem:[#allocation5 + $0x278] sm:$0xff]  ;;  %12126 = vst [vmem:[#allocation76_spill] sm:$0xff] %v10413_v11 }
 0x38b   :  { %v2593_v53 = vld [vmem:[#allocation5 + $0x270] sm:$0xff]  ;;  %v10421_v61 = vcombine.high %v2590_v52, %v2594_v26  ;;  %v10427_v35 = vcombine.low %v2590_v52, %v2594_v26 }
 0x38c   :  { %v10419_v16 = vcombine.high %v2589_v38, %v2593_v53  ;;  %v10425_v54 = vcombine.low %v2589_v38, %v2593_v53 }
 0x38d   :  { %3403 = vmatpush1.bf16.msra.mxu0 %v10389_v44  ;;  %3444 = vmatpush1.bf16.msra.mxu1 %v10391_v40  ;;  %12129 = vst [vmem:[#allocation79_spill] sm:$0xff] %v10421_v61  ;;  %v2598_v40 = vld [vmem:[#allocation5 + $0x298] sm:$0xff]  ;;  %12131 = vst [vmem:[#allocation81_spill] sm:$0xff] %v10427_v35 }
 0x38e   :  { %3404 = vmatprep.subr.bf16.mxu0 %v10395_v30  ;;  %3445 = vmatprep.subr.bf16.mxu1 %v10397_v3  ;;  %12128 = vst [vmem:[#allocation78_spill] sm:$0xff] %v10419_v16  ;;  %v2597_v3 = vld [vmem:[#allocation5 + $0x290] sm:$0xff]  ;;  %v2602_v44 = vld [vmem:[#allocation5 + $0x2b8] sm:$0xff]  ;;  %12130 = vst [vmem:[#allocation80_spill] sm:$0xff] %v10425_v54 }
 0x38f   :  { %v2601_v30 = vld [vmem:[#allocation5 + $0x2b0] sm:$0xff]  ;;  %v10433_v31 = vcombine.high %v2598_v40, %v2602_v44  ;;  %v10439_v26 = vcombine.low %v2598_v40, %v2602_v44 }
 0x390   :  { %v10431_v42 = vcombine.high %v2597_v3, %v2601_v30  ;;  %v10437_v53 = vcombine.low %v2597_v3, %v2601_v30 }
 0x391   :  { %3405 = vmatpush1.bf16.msra.mxu0 %v10401_v39  ;;  %3446 = vmatpush1.bf16.msra.mxu1 %v10403_v32  ;;  %12133 = vst [vmem:[#allocation83_spill] sm:$0xff] %v10433_v31  ;;  %v2606_v32 = vld [vmem:[#allocation5 + $0x2d8] sm:$0xff]  ;;  %12135 = vst [vmem:[#allocation85_spill] sm:$0xff] %v10439_v26 }
 0x392   :  { %3406 = vmatprep.subr.bf16.mxu0 %v10407_v8  ;;  %3447 = vmatprep.subr.bf16.mxu1 %v10409_v48  ;;  %12132 = vst [vmem:[#allocation82_spill] sm:$0xff] %v10431_v42  ;;  %v2605_v48 = vld [vmem:[#allocation5 + $0x2d0] sm:$0xff]  ;;  %v2610_v39 = vld [vmem:[#allocation5 + $0x2f8] sm:$0xff]  ;;  %12134 = vst [vmem:[#allocation84_spill] sm:$0xff] %v10437_v53 }
 0x393   :  { %v2609_v8 = vld [vmem:[#allocation5 + $0x2f0] sm:$0xff]  ;;  %v10445_v38 = vcombine.high %v2606_v32, %v2610_v39  ;;  %v10451_v44 = vcombine.low %v2606_v32, %v2610_v39 }
 0x394   :  { %v10443_v52 = vcombine.high %v2605_v48, %v2609_v8  ;;  %v10449_v30 = vcombine.low %v2605_v48, %v2609_v8 }
 0x395   :  { %3407 = vmatpush1.bf16.msra.mxu0 %v10413_v11  ;;  %3448 = vmatpush1.bf16.msra.mxu1 %v10415_v25  ;;  %12137 = vst [vmem:[#allocation87_spill] sm:$0xff] %v10445_v38  ;;  %v2614_v25 = vld [vmem:[#allocation5 + $0x318] sm:$0xff]  ;;  %12139 = vst [vmem:[#allocation89_spill] sm:$0xff] %v10451_v44 }
 0x396   :  { %3408 = vmatprep.subr.bf16.mxu0 %v10419_v16  ;;  %3449 = vmatprep.subr.bf16.mxu1 %v10421_v61  ;;  %12136 = vst [vmem:[#allocation86_spill] sm:$0xff] %v10443_v52  ;;  %v2613_v61 = vld [vmem:[#allocation5 + $0x310] sm:$0xff]  ;;  %v2618_v11 = vld [vmem:[#allocation5 + $0x338] sm:$0xff]  ;;  %12138 = vst [vmem:[#allocation88_spill] sm:$0xff] %v10449_v30 }
 0x397   :  { %v2617_v16 = vld [vmem:[#allocation5 + $0x330] sm:$0xff]  ;;  %v10457_v3 = vcombine.high %v2614_v25, %v2618_v11  ;;  %v10463_v39 = vcombine.low %v2614_v25, %v2618_v11 }
 0x398   :  { %v10455_v40 = vcombine.high %v2613_v61, %v2617_v16  ;;  %v10461_v8 = vcombine.low %v2613_v61, %v2617_v16 }
 0x399   :  { %3409 = vmatpush1.bf16.msra.mxu0 %v10425_v54  ;;  %3450 = vmatpush1.bf16.msra.mxu1 %v10427_v35  ;;  %12141 = vst [vmem:[#allocation91_spill] sm:$0xff] %v10457_v3  ;;  %v2622_v35 = vld [vmem:[#allocation5 + $0x358] sm:$0xff] }
 0x39a   :  { %3410 = vmatprep.subr.bf16.mxu0 %v10431_v42  ;;  %3451 = vmatprep.subr.bf16.mxu1 %v10433_v31  ;;  %12140 = vst [vmem:[#allocation90_spill] sm:$0xff] %v10455_v40  ;;  %v2621_v31 = vld [vmem:[#allocation5 + $0x350] sm:$0xff]  ;;  %v2626_v54 = vld [vmem:[#allocation5 + $0x378] sm:$0xff] }
 0x39b   :  { %v2625_v42 = vld [vmem:[#allocation5 + $0x370] sm:$0xff]  ;;  %v10469_v48 = vcombine.high %v2622_v35, %v2626_v54  ;;  %v10475_v11 = vcombine.low %v2622_v35, %v2626_v54 }
 0x39c   :  { %v10467_v32 = vcombine.high %v2621_v31, %v2625_v42  ;;  %v10473_v16 = vcombine.low %v2621_v31, %v2625_v42 }
 0x39d   :  { %3411 = vmatpush1.bf16.msra.mxu0 %v10437_v53  ;;  %3452 = vmatpush1.bf16.msra.mxu1 %v10439_v26  ;;  %12142 = vst [vmem:[#allocation92_spill] sm:$0xff] %v10469_v48  ;;  %v2630_v26 = vld [vmem:[#allocation5 + $0x398] sm:$0xff] }
 0x39e   :  { %3412 = vmatprep.subr.bf16.mxu0 %v10443_v52  ;;  %3453 = vmatprep.subr.bf16.mxu1 %v10445_v38  ;;  %v2629_v38 = vld [vmem:[#allocation5 + $0x390] sm:$0xff]  ;;  %v2634_v53 = vld [vmem:[#allocation5 + $0x3b8] sm:$0xff]  ;;  %12143 = vst [vmem:[#allocation93_spill] sm:$0xff] %v10473_v16 }
 0x39f   :  { %v2633_v52 = vld [vmem:[#allocation5 + $0x3b0] sm:$0xff]  ;;  %v10481_v61 = vcombine.high %v2630_v26, %v2634_v53  ;;  %v10487_v54 = vcombine.low %v2630_v26, %v2634_v53  ;;  %v3548_v53 = vld [vmem:[#allocation5] sm:$0xff] }
 0x3a0   :  { %v10479_v25 = vcombine.high %v2629_v38, %v2633_v52  ;;  %v10485_v42 = vcombine.low %v2629_v38, %v2633_v52  ;;  %v3552_v26 = vld [vmem:[#allocation5 + $0x20] sm:$0xff]  ;;  %v3549_v52 = vld [vmem:[#allocation5 + $0x8] sm:$0xff] }
 0x3a1   :  { %3413 = vmatpush1.bf16.msra.mxu0 %v10449_v30  ;;  %3454 = vmatpush1.bf16.msra.mxu1 %v10451_v44  ;;  %v2638_v44 = vld [vmem:[#allocation5 + $0x3d8] sm:$0xff]  ;;  %v10507_v38 = vcombine.low %v3548_v53, %v3552_v26 }
 0x3a2   :  { %3414 = vmatprep.subr.bf16.mxu0 %v10455_v40  ;;  %3455 = vmatprep.subr.bf16.mxu1 %v10457_v3  ;;  %v2637_v3 = vld [vmem:[#allocation5 + $0x3d0] sm:$0xff]  ;;  %v2642_v30 = vld [vmem:[#allocation5 + $0x3f8] sm:$0xff] }
 0x3a3   :  { %v2641_v40 = vld [vmem:[#allocation5 + $0x3f0] sm:$0xff]  ;;  %v10493_v31 = vcombine.high %v2638_v44, %v2642_v30 }
 0x3a4   :  { %v10491_v35 = vcombine.high %v2637_v3, %v2641_v40 }
 0x3a5   :  { %3415 = vmatpush1.bf16.msra.mxu0 %v10461_v8  ;;  %3456 = vmatpush1.bf16.msra.mxu1 %v10463_v39 }
 0x3a6   :  { %3416 = vmatprep.subr.bf16.mxu0 %v10467_v32  ;;  %3457 = vmatprep.subr.bf16.mxu1 %v10469_v48  ;;  %v10497_v48 = vcombine.low %v2637_v3, %v2641_v40  ;;  %v10509_v40 = vcombine.high %v3548_v53, %v3552_v26  ;;  %v12174_v53 = vld [vmem:[#allocation27_spill] sm:$0xff]  ;;  %v12175_v26 = vld [vmem:[#allocation30_spill] sm:$0xff] }
 0x3a9   :  { %3417 = vmatpush1.bf16.msra.mxu0 %v10473_v16  ;;  %3458 = vmatpush1.bf16.msra.mxu1 %v10475_v11  ;;  %v10499_v16 = vcombine.low %v2638_v44, %v2642_v30  ;;  %v3553_v30 = vld [vmem:[#allocation5 + $0x28] sm:$0xff] }
 0x3aa   :  { %3418 = vmatprep.subr.bf16.mxu0 %v10479_v25  ;;  %3459 = vmatprep.subr.bf16.mxu1 %v10481_v61  ;;  %v10511_v44 = vcombine.low %v3549_v52, %v3553_v30  ;;  %v10513_v3 = vcombine.high %v3549_v52, %v3553_v30  ;;  %v12176_v52 = vld [vmem:[#allocation46_spill] sm:$0xff] }
 0x3ad   :  { %3419 = vmatpush1.bf16.msra.mxu0 %v10485_v42  ;;  %3460 = vmatpush1.bf16.msra.mxu1 %v10487_v54 }
 0x3ae   :  { %3420 = vmatprep.subr.bf16.mxu0 %v10491_v35  ;;  %3461 = vmatprep.subr.bf16.mxu1 %v10493_v31 }
 0x3b1   :  { %3421 = vmatpush1.bf16.msra.mxu0 %v10497_v48  ;;  %3462 = vmatpush1.bf16.msra.mxu1 %v10499_v16 }
 0x3b2   :  { %4341 = vmatprep.subr.bf16.mxu0 %v10509_v40  ;;  %4382 = vmatprep.subr.bf16.mxu1 %v10513_v3 }
 0x3b4   :  { %3423 = vmatmul.mubr.bf16.vlgmr.msra.gmra.mrb[20].mxu0 %v10319_v10  ;;  %3464 = vmatmul.mubr.bf16.vlgmr.msra.gmra.mrb[20].mxu1 %v10319_v10  ;;  %v12173_v10 = vld [vmem:[#allocation42_spill] sm:$0xff] }
 0x3b5   :  { %4342 = vmatpush1.bf16.msra.mxu0 %v10507_v38  ;;  %4383 = vmatpush1.bf16.msra.mxu1 %v10511_v44 }
 0x3b6   :  { %4343 = vmatprep.subr.bf16.mxu0 %v10105_v15  ;;  %4384 = vmatprep.subr.bf16.mxu1 %v10109_v13  ;;  %v12145_v15 = vld [vmem:[#allocation9_spill] sm:$0xff]  ;;  %v12147_v13 = vld [vmem:[#allocation12_spill] sm:$0xff] }
 0x3b9   :  { %4344 = vmatpush1.bf16.msra.mxu0 %v10103_v28  ;;  %4385 = vmatpush1.bf16.msra.mxu1 %v10107_v47  ;;  %v12144_v28 = vld [vmem:[#allocation11_spill] sm:$0xff]  ;;  %v12146_v47 = vld [vmem:[#allocation10_spill] sm:$0xff] }
 0x3ba   :  { %4345 = vmatprep.subr.bf16.mxu0 %v10115_v55  ;;  %4386 = vmatprep.subr.bf16.mxu1 %v10121_v63  ;;  %v12148_v55 = vld [vmem:[#allocation15_spill] sm:$0xff]  ;;  %v12151_v63 = vld [vmem:[#allocation16_spill] sm:$0xff] }
 0x3bd   :  { %4346 = vmatpush1.bf16.msra.mxu0 %v10117_v45  ;;  %4387 = vmatpush1.bf16.msra.mxu1 %v10119_v7  ;;  %v12149_v45 = vld [vmem:[#allocation13_spill] sm:$0xff]  ;;  %v12150_v7 = vld [vmem:[#allocation14_spill] sm:$0xff] }
 0x3be   :  { %4347 = vmatprep.subr.bf16.mxu0 %v10127_v4  ;;  %4388 = vmatprep.subr.bf16.mxu1 %v10133_v24  ;;  %v12152_v4 = vld [vmem:[#allocation19_spill] sm:$0xff]  ;;  %v12155_v24 = vld [vmem:[#allocation20_spill] sm:$0xff] }
 0x3c1   :  { %4348 = vmatpush1.bf16.msra.mxu0 %v10129_v22  ;;  %4389 = vmatpush1.bf16.msra.mxu1 %v10131_v23  ;;  %v12153_v22 = vld [vmem:[#allocation17_spill] sm:$0xff]  ;;  %v12154_v23 = vld [vmem:[#allocation18_spill] sm:$0xff] }
 0x3c2   :  { %4349 = vmatprep.subr.bf16.mxu0 %v10139_v33  ;;  %4390 = vmatprep.subr.bf16.mxu1 %v10145_v43  ;;  %v12156_v33 = vld [vmem:[#allocation23_spill] sm:$0xff]  ;;  %v12159_v43 = vld [vmem:[#allocation24_spill] sm:$0xff] }
 0x3c5   :  { %4350 = vmatpush1.bf16.msra.mxu0 %v10141_v29  ;;  %4391 = vmatpush1.bf16.msra.mxu1 %v10143_v41  ;;  %v12157_v29 = vld [vmem:[#allocation21_spill] sm:$0xff]  ;;  %v12158_v41 = vld [vmem:[#allocation22_spill] sm:$0xff] }
 0x3c6   :  { %4351 = vmatprep.subr.bf16.mxu0 %v10151_v51  ;;  %4392 = vmatprep.subr.bf16.mxu1 %v10157_v1  ;;  %v12160_v51 = vld [vmem:[#allocation28_spill] sm:$0xff]  ;;  %v12163_v1 = vld [vmem:[#allocation31_spill] sm:$0xff] }
 0x3c9   :  { %4352 = vmatpush1.bf16.msra.mxu0 %v10153_v57  ;;  %4393 = vmatpush1.bf16.msra.mxu1 %v10155_v59  ;;  %v12161_v57 = vld [vmem:[#allocation25_spill] sm:$0xff]  ;;  %v12162_v59 = vld [vmem:[#allocation26_spill] sm:$0xff] }
 0x3ca   :  { %4353 = vmatprep.subr.bf16.mxu0 %v10163_v20  ;;  %4394 = vmatprep.subr.bf16.mxu1 %v10169_v46  ;;  %v12164_v20 = vld [vmem:[#allocation33_spill] sm:$0xff]  ;;  %v12167_v46 = vld [vmem:[#allocation34_spill] sm:$0xff] }
 0x3cd   :  { %4354 = vmatpush1.bf16.msra.mxu0 %v10165_v36  ;;  %4395 = vmatpush1.bf16.msra.mxu1 %v10167_v37  ;;  %v12165_v36 = vld [vmem:[#allocation29_spill] sm:$0xff]  ;;  %v12166_v37 = vld [vmem:[#allocation32_spill] sm:$0xff] }
 0x3ce   :  { %4355 = vmatprep.subr.bf16.mxu0 %v10175_v5  ;;  %4396 = vmatprep.subr.bf16.mxu1 %v10181_v21  ;;  %v12168_v5 = vld [vmem:[#allocation35_spill] sm:$0xff]  ;;  %v12171_v21 = vld [vmem:[#allocation38_spill] sm:$0xff] }
 0x3d1   :  { %4356 = vmatpush1.bf16.msra.mxu0 %v10177_v6  ;;  %4397 = vmatpush1.bf16.msra.mxu1 %v10179_v62  ;;  %v12169_v6 = vld [vmem:[#allocation36_spill] sm:$0xff]  ;;  %v12170_v62 = vld [vmem:[#allocation37_spill] sm:$0xff] }
 0x3d2   :  { %4357 = vmatprep.subr.bf16.mxu0 %v10187_v27  ;;  %4398 = vmatprep.subr.bf16.mxu1 %v12144_v28  ;;  %v12172_v27 = vld [vmem:[#allocation39_spill] sm:$0xff] }
 0x3d5   :  { %4358 = vmatpush1.bf16.msra.mxu0 %v12145_v15  ;;  %4399 = vmatpush1.bf16.msra.mxu1 %v12146_v47  ;;  %v12177_v15 = vld [vmem:[#allocation8_spill] sm:$0xff] }
 0x3d6   :  { %4359 = vmatprep.subr.bf16.mxu0 %v12147_v13  ;;  %4400 = vmatprep.subr.bf16.mxu1 %v12148_v55 }
 0x3d9   :  { %4360 = vmatpush1.bf16.msra.mxu0 %v12149_v45  ;;  %4401 = vmatpush1.bf16.msra.mxu1 %v12150_v7 }
 0x3da   :  { %4361 = vmatprep.subr.bf16.mxu0 %v12151_v63  ;;  %4402 = vmatprep.subr.bf16.mxu1 %v12152_v4 }
 0x3dd   :  { %4362 = vmatpush1.bf16.msra.mxu0 %v12153_v22  ;;  %4403 = vmatpush1.bf16.msra.mxu1 %v12154_v23 }
 0x3de   :  { %4363 = vmatprep.subr.bf16.mxu0 %v12155_v24  ;;  %4404 = vmatprep.subr.bf16.mxu1 %v12156_v33 }
 0x3e1   :  { %4364 = vmatpush1.bf16.msra.mxu0 %v12157_v29  ;;  %4405 = vmatpush1.bf16.msra.mxu1 %v12158_v41 }
 0x3e2   :  { %4365 = vmatprep.subr.bf16.mxu0 %v12159_v43  ;;  %4406 = vmatprep.subr.bf16.mxu1 %v12160_v51 }
 0x3e5   :  { %4366 = vmatpush1.bf16.msra.mxu0 %v12161_v57  ;;  %4407 = vmatpush1.bf16.msra.mxu1 %v12162_v59 }
 0x3e6   :  { %4367 = vmatprep.subr.bf16.mxu0 %v12163_v1  ;;  %4408 = vmatprep.subr.bf16.mxu1 %v12164_v20 }
 0x3e9   :  { %4368 = vmatpush1.bf16.msra.mxu0 %v12165_v36  ;;  %4409 = vmatpush1.bf16.msra.mxu1 %v12166_v37 }
 0x3ea   :  { %4369 = vmatprep.subr.bf16.mxu0 %v12167_v46  ;;  %4410 = vmatprep.subr.bf16.mxu1 %v12168_v5 }
 0x3ed   :  { %4370 = vmatpush1.bf16.msra.mxu0 %v12169_v6  ;;  %4411 = vmatpush1.bf16.msra.mxu1 %v12170_v62 }
 0x3ee   :  { %4371 = vmatprep.subr.bf16.mxu0 %v12171_v21  ;;  %4412 = vmatprep.subr.bf16.mxu1 %v12172_v27 }
 0x3f1   :  { %4372 = vmatpush1.bf16.msra.mxu0 %v12173_v10  ;;  %4413 = vmatpush1.bf16.msra.mxu1 %v12174_v53 }
 0x3f2   :  { %4423 = vmatprep.subr.bf16.mxu0 %v12175_v26  ;;  %4464 = vmatprep.subr.bf16.mxu1 %v12176_v52  ;;  %v207_v26 = vpop.permute.xlu1 %206 }
 0x3f3   :  { %v209_v52 = vmul.f32 %v207_v26, %v12007_v58 }
 0x447   :  { %v3342_v30 = vpop.f32.mrb[16].mxu0  ;;  %v3383_v28 = vpop.f32.mrb[16].mxu1 }
 0x448   :  { %v3472_v47 = vadd.f32 %v3342_v30, %v12177_v15  ;;  %v3344_v13 = vpop.f32.mrb[17].mxu0  ;;  %v3385_v55 = vpop.f32.mrb[17].mxu1  ;;  %v3474_v33 = vadd.f32 %v3383_v28, %v9990_v19  ;;  %v210_v30 = vmul.f32 %v207_v26, %v12008_v0  ;;  %v211_v28 = vmul.f32 %v207_v26, %v12009_v2 }
 0x449   :  { %v3473_v45 = vadd.f32 %v3344_v13, %v9986_v9  ;;  %v3346_v7 = vpop.f32.mrb[18].mxu0  ;;  %v3387_v63 = vpop.f32.mrb[18].mxu1  ;;  %v3475_v29 = vadd.f32 %v3385_v55, %v9995_v17  ;;  %v12179_v13 = vld [vmem:[#allocation41_spill] sm:$0xff] }
 0x44a   :  { %v3476_v4 = vmul.f32 0.5, %v3472_v47  ;;  %v3347_v22 = vpop.f32.mrb[19].mxu0  ;;  %v3388_v23 = vpop.f32.mrb[19].mxu1  ;;  %v12178_v47 = vld [vmem:[#allocation40_spill] sm:$0xff]  ;;  %v213_v55 = vadd.f32 %v209_v52, %v12179_v13  ;;  %v12180_v7 = vld [vmem:[#allocation43_spill] sm:$0xff] }
 0x44b   :  { %v3480_v24 = vmul.f32 0.5, %v3473_v45  ;;  %v3485_v41 = vmul.f32 0.5, %v3475_v29  ;;  %v214_v45 = vadd.f32 %v210_v30, %v12011_v18  ;;  %v215_v63 = vadd.f32 %v211_v28, %v12180_v7 }
 0x44c   :  { %9255 = vtanh.f32 %v3476_v4  ;;  %v12181_v4 = vld [vmem:[#allocation44_spill] sm:$0xff] }
 0x44d   :  { %9257 = vtanh.f32 %v3480_v24  ;;  %v221_v23 = vcombine.low %v213_v55, %v214_v45 }
 0x44e   :  { %9259 = vtanh.f32 %v3474_v33 }
 0x44f   :  { %9261 = vtanh.f32 %v3485_v41 }
 0x456   :  { %v9256_v43 = vpop.eup %9255 }
 0x457   :  { %v9258_v51 = vpop.eup %9257  ;;  %v3478_v57 = vmul.f32 0.5, %v9256_v43 }
 0x458   :  { %v3482_v59 = vmul.f32 0.5, %v9258_v51  ;;  %v9260_v20 = vpop.eup %9259 }
 0x459   :  { %v3479_v1 = vadd.f32 0.5, %v3478_v57  ;;  %v9262_v6 = vpop.eup %9261  ;;  %v229_v57 = vrot.slane %v221_v23, %v9701_v60 }
 0x45a   :  { %v3483_v36 = vadd.f32 0.5, %v3482_v59  ;;  %v3487_v62 = vmul.f32 0.5, %v9262_v6 }
 0x45b   :  { %v3490_v37 = vmul.f32 %v9260_v20, %v3479_v1 }
 0x45c   :  { %v3489_v46 = vmul.f32 %v3483_v36, %v10298_v14  ;;  %v3488_v21 = vadd.f32 0.5, %v3487_v62  ;;  %v212_v14 = vmul.f32 %v207_v26, %v12178_v47 }
 0x45e   :  { %v10586_v5 = vadd.f32 %v3490_v37, %v3489_v46  ;;  %v216_v22 = vadd.f32 %v212_v14, %v12181_v4 }
 0x460   :  { %9263 = vtanh.f32 %v10586_v5  ;;  %v222_v24 = vcombine.low %v215_v63, %v216_v22 }
 0x462   :  { %v236_v59 = vrot.slane %v222_v24, %v9701_v60 }
 0x46a   :  { %v9264_v27 = vpop.eup %9263 }
 0x46b   :  { %v3493_v10 = vmul.f32 %v9264_v27, %v3488_v21  ;;  %v237_v21 = vcombine.low %v229_v57, %v236_v59 }
 0x46d   :  { %v3494_v53 = vpack.c.bf16 %v3493_v10, %v3493_v10 }
 0x46f   :  { %3495 = vst [vmem:[#allocation3 + $0x1] sm:$0x1] %v3494_v53 }
 0x487   :  { %v3424_v33 = vpop.f32.mrb[20].mxu0  ;;  %v3465_v29 = vpop.f32.mrb[20].mxu1 }
 0x488   :  { %v3426_v41 = vpop.f32.mrb[21].mxu0  ;;  %v3467_v43 = vpop.f32.mrb[21].mxu1 }
 0x489   :  { %v3501_v51 = vcombine.low %v3424_v33, %v3426_v41  ;;  %v3502_v1 = vcombine.low %v3465_v29, %v3467_v43  ;;  %v3428_v20 = vpop.f32.mrb[22].mxu0  ;;  %v3469_v36 = vpop.f32.mrb[22].mxu1 }
 0x48a   :  { %v3429_v37 = vpop.f32.mrb[23].mxu0  ;;  %v3470_v46 = vpop.f32.mrb[23].mxu1 }
 0x48b   :  { %v3509_v6 = vrot.slane %v3501_v51, %v9701_v60  ;;  %v3516_v62 = vrot.slane %v3502_v1, %v9701_v60 }
 0x48d   :  { %v3517_v27 = vcombine.low %v3509_v6, %v3516_v62 }
 0x48f   :  { %v3519_v10 = vadd.f32 %v3517_v27, %v237_v21  ;;  %v12183_v21 = vld [vmem:[#allocation48_spill] sm:$0xff]  ;;  %v12184_v27 = vld [vmem:[#allocation49_spill] sm:$0xff] }
 0x491   :  { %v3520_v53 = vmul.f32 0.5, %v3519_v10  ;;  %v3525_v26 = vrot.slane %v3519_v10, 2  ;;  %v3531_v30 = vrot.slane %v3519_v10, 4  ;;  %v3534_v28 = vrot.slane %v3519_v10, 6  ;;  %v12185_v10 = vld [vmem:[#allocation50_spill] sm:$0xff] }
 0x493   :  { %9265 = vtanh.f32 %v3520_v53  ;;  %v3527_v52 = vmul.f32 0.5, %v3525_v26  ;;  %v3536_v14 = vmul.f32 0.5, %v3534_v28  ;;  %v12186_v53 = vld [vmem:[#allocation51_spill] sm:$0xff]  ;;  %v12187_v26 = vld [vmem:[#allocation52_spill] sm:$0xff]  ;;  %v12193_v28 = vld [vmem:[#allocation58_spill] sm:$0xff] }
 0x495   :  { %9267 = vtanh.f32 %v3527_v52  ;;  %v12188_v52 = vld [vmem:[#allocation53_spill] sm:$0xff] }
 0x496   :  { %9269 = vtanh.f32 %v3531_v30  ;;  %v12191_v30 = vld [vmem:[#allocation56_spill] sm:$0xff] }
 0x497   :  { %9271 = vtanh.f32 %v3536_v14  ;;  %v12194_v14 = vld [vmem:[#allocation59_spill] sm:$0xff] }
 0x49d   :  { %v9266_v55 = vpop.eup %9265 }
 0x49e   :  { %v3522_v45 = vmul.f32 0.5, %v9266_v55  ;;  %v12195_v55 = vld [vmem:[#allocation60_spill] sm:$0xff] }
 0x49f   :  { %v9268_v63 = vpop.eup %9267 }
 0x4a0   :  { %v3523_v22 = vadd.f32 0.5, %v3522_v45  ;;  %v3529_v23 = vmul.f32 0.5, %v9268_v63  ;;  %v9270_v33 = vpop.eup %9269  ;;  %v12196_v45 = vld [vmem:[#allocation61_spill] sm:$0xff]  ;;  %v12197_v63 = vld [vmem:[#allocation62_spill] sm:$0xff] }
 0x4a1   :  { %v9272_v51 = vpop.eup %9271 }
 0x4a2   :  { %v3530_v24 = vadd.f32 0.5, %v3529_v23  ;;  %v3541_v41 = vmul.f32 %v9270_v33, %v3523_v22  ;;  %v3538_v57 = vmul.f32 0.5, %v9272_v51  ;;  %v12198_v22 = vld [vmem:[#allocation63_spill] sm:$0xff]  ;;  %v12199_v23 = vld [vmem:[#allocation64_spill] sm:$0xff]  ;;  %v12201_v33 = vld [vmem:[#allocation66_spill] sm:$0xff] }
 0x4a3   :  { %v12204_v51 = vld [vmem:[#allocation69_spill] sm:$0xff] }
 0x4a4   :  { %v3540_v29 = vmul.f32 %v3530_v24, %v10314_v50  ;;  %v3539_v59 = vadd.f32 0.5, %v3538_v57  ;;  %v12182_v50 = vld [vmem:[#allocation47_spill] sm:$0xff]  ;;  %v12200_v24 = vld [vmem:[#allocation65_spill] sm:$0xff]  ;;  %v12205_v57 = vld [vmem:[#allocation70_spill] sm:$0xff] }
 0x4a6   :  { %v10602_v43 = vadd.f32 %v3541_v41, %v3540_v29  ;;  %v12202_v29 = vld [vmem:[#allocation67_spill] sm:$0xff]  ;;  %v12203_v41 = vld [vmem:[#allocation68_spill] sm:$0xff] }
 0x4a8   :  { %9273 = vtanh.f32 %v10602_v43 }
 0x4b2   :  { %v9274_v1 = vpop.eup %9273 }
 0x4b3   :  { %v3544_v20 = vmul.f32 %v9274_v1, %v3539_v59  ;;  %v12206_v59 = vld [vmem:[#allocation71_spill] sm:$0xff]  ;;  %v12207_v1 = vld [vmem:[#allocation72_spill] sm:$0xff] }
 0x4b5   :  { %v3545_v36 = vpack.c.bf16 %v3544_v20, %v3544_v20  ;;  %v12208_v20 = vld [vmem:[#allocation73_spill] sm:$0xff] }
 0x4b7   :  { %3546 = vst [vmem:[#allocation3] sm:$0x1] %v3545_v36  ;;  %v12209_v36 = vld [vmem:[#allocation74_spill] sm:$0xff] }
 0x4be   :  { %v8614_v37 = vld.sshfl [vmem:[#allocation3] sm:$0x11 pattern:$0x75316420] }
 0x4bf   :  { %v3684_v46 = vcombine.high %v8614_v37, %v8614_v37  ;;  %v10607_v62 = vrot.slane %v8614_v37, %v12013_v34  ;;  %v12210_v37 = vld [vmem:[#allocation75_spill] sm:$0xff] }
 0x4c1   :  { %v3698_v6 = vrot.slane %v3684_v46, %v12013_v34  ;;  %v12211_v46 = vld [vmem:[#allocation76_spill] sm:$0xff] }
 0x4c3   :  { %4373 = vmatprep.mubr.bf16.mxu0 %v3698_v6  ;;  %4414 = vmatprep.mubr.bf16.mxu1 %v3698_v6 }
 0x4c4   :  { %4374 = vmatmul.mubr.bf16.vlgmr.msra.gmra.mrb[24].mxu0 %v10607_v62  ;;  %4415 = vmatmul.mubr.bf16.vlgmr.msra.gmra.mrb[24].mxu1 %v10607_v62 }
 0x4c5   :  { %4424 = vmatpush1.bf16.msra.mxu0 %v10283_v56  ;;  %4465 = vmatpush1.bf16.msra.mxu1 %v10287_v49  ;;  %v12189_v56 = vld [vmem:[#allocation54_spill] sm:$0xff]  ;;  %v12190_v49 = vld [vmem:[#allocation55_spill] sm:$0xff] }
 0x4c6   :  { %4455 = vmatprep.mubr.bf16.mxu0 %v3698_v6  ;;  %4496 = vmatprep.mubr.bf16.mxu1 %v3698_v6  ;;  %v12212_v6 = vld [vmem:[#allocation77_spill] sm:$0xff] }
 0x4c7   :  { %4425 = vmatprep.subr.bf16.mxu0 %v10321_v12  ;;  %4466 = vmatprep.subr.bf16.mxu1 %v12182_v50  ;;  %v12192_v12 = vld [vmem:[#allocation57_spill] sm:$0xff]  ;;  %v12213_v50 = vld [vmem:[#allocation78_spill] sm:$0xff] }
 0x4c9   :  { %4426 = vmatpush1.bf16.msra.mxu0 %v12183_v21  ;;  %4467 = vmatpush1.bf16.msra.mxu1 %v12184_v27  ;;  %v12214_v21 = vld [vmem:[#allocation79_spill] sm:$0xff]  ;;  %v12215_v27 = vld [vmem:[#allocation80_spill] sm:$0xff] }
 0x4ca   :  { %4427 = vmatprep.subr.bf16.mxu0 %v12185_v10  ;;  %4468 = vmatprep.subr.bf16.mxu1 %v12186_v53  ;;  %v12216_v10 = vld [vmem:[#allocation81_spill] sm:$0xff]  ;;  %v12217_v53 = vld [vmem:[#allocation82_spill] sm:$0xff] }
 0x4cd   :  { %4428 = vmatpush1.bf16.msra.mxu0 %v12187_v26  ;;  %4469 = vmatpush1.bf16.msra.mxu1 %v12188_v52  ;;  %v12218_v26 = vld [vmem:[#allocation83_spill] sm:$0xff]  ;;  %v12219_v52 = vld [vmem:[#allocation84_spill] sm:$0xff] }
 0x4ce   :  { %4429 = vmatprep.subr.bf16.mxu0 %v12189_v56  ;;  %4470 = vmatprep.subr.bf16.mxu1 %v12190_v49  ;;  %v12220_v56 = vld [vmem:[#allocation85_spill] sm:$0xff]  ;;  %v12221_v49 = vld [vmem:[#allocation86_spill] sm:$0xff] }
 0x4d1   :  { %4430 = vmatpush1.bf16.msra.mxu0 %v12191_v30  ;;  %4471 = vmatpush1.bf16.msra.mxu1 %v12192_v12  ;;  %v12222_v30 = vld [vmem:[#allocation87_spill] sm:$0xff]  ;;  %v12223_v12 = vld [vmem:[#allocation88_spill] sm:$0xff] }
 0x4d2   :  { %4431 = vmatprep.subr.bf16.mxu0 %v12193_v28  ;;  %4472 = vmatprep.subr.bf16.mxu1 %v12194_v14  ;;  %v12224_v28 = vld [vmem:[#allocation89_spill] sm:$0xff]  ;;  %v12225_v14 = vld [vmem:[#allocation90_spill] sm:$0xff] }
 0x4d5   :  { %4432 = vmatpush1.bf16.msra.mxu0 %v12195_v55  ;;  %4473 = vmatpush1.bf16.msra.mxu1 %v12196_v45  ;;  %v12226_v55 = vld [vmem:[#allocation91_spill] sm:$0xff]  ;;  %v12227_v45 = vld [vmem:[#allocation92_spill] sm:$0xff] }
 0x4d6   :  { %4433 = vmatprep.subr.bf16.mxu0 %v12197_v63  ;;  %4474 = vmatprep.subr.bf16.mxu1 %v12198_v22  ;;  %v12228_v63 = vld [vmem:[#allocation93_spill] sm:$0xff]  ;;  %v4609_v22 = vld [vmem:[#allocation5 + $0xe0] sm:$0xff] }
 0x4d9   :  { %4434 = vmatpush1.bf16.msra.mxu0 %v12199_v23  ;;  %4475 = vmatpush1.bf16.msra.mxu1 %v12200_v24  ;;  %v4606_v23 = vld [vmem:[#allocation5 + $0xc8] sm:$0xff] }
 0x4da   :  { %4435 = vmatprep.subr.bf16.mxu0 %v12201_v33  ;;  %4476 = vmatprep.subr.bf16.mxu1 %v12202_v29  ;;  %v4610_v33 = vld [vmem:[#allocation5 + $0xe8] sm:$0xff] }
 0x4dd   :  { %4436 = vmatpush1.bf16.msra.mxu0 %v12203_v41  ;;  %4477 = vmatpush1.bf16.msra.mxu1 %v12204_v51  ;;  %v10707_v41 = vcombine.low %v4606_v23, %v4610_v33  ;;  %v10709_v51 = vcombine.high %v4606_v23, %v4610_v33  ;;  %v4646_v23 = vld [vmem:[#allocation5 + $0x208] sm:$0xff] }
 0x4de   :  { %4437 = vmatprep.subr.bf16.mxu0 %v12205_v57  ;;  %4478 = vmatprep.subr.bf16.mxu1 %v12206_v59  ;;  %v4613_v57 = vld [vmem:[#allocation5 + $0x100] sm:$0xff] }
 0x4df   :  { %v4617_v59 = vld [vmem:[#allocation5 + $0x120] sm:$0xff] }
 0x4e1   :  { %4438 = vmatpush1.bf16.msra.mxu0 %v12207_v1  ;;  %4479 = vmatpush1.bf16.msra.mxu1 %v12208_v20  ;;  %v4614_v1 = vld [vmem:[#allocation5 + $0x108] sm:$0xff]  ;;  %v10715_v20 = vcombine.high %v4613_v57, %v4617_v59 }
 0x4e2   :  { %4439 = vmatprep.subr.bf16.mxu0 %v12209_v36  ;;  %4480 = vmatprep.subr.bf16.mxu1 %v12210_v37  ;;  %v4618_v36 = vld [vmem:[#allocation5 + $0x128] sm:$0xff]  ;;  %v10717_v37 = vcombine.low %v4613_v57, %v4617_v59 }
 0x4e3   :  { %v4650_v57 = vld [vmem:[#allocation5 + $0x228] sm:$0xff] }
 0x4e5   :  { %4440 = vmatpush1.bf16.msra.mxu0 %v12211_v46  ;;  %4481 = vmatpush1.bf16.msra.mxu1 %v12212_v6  ;;  %v10719_v46 = vcombine.low %v4614_v1, %v4618_v36  ;;  %v10721_v6 = vcombine.high %v4614_v1, %v4618_v36  ;;  %v10767_v1 = vcombine.low %v4646_v23, %v4650_v57 }
 0x4e6   :  { %4441 = vmatprep.subr.bf16.mxu0 %v12213_v50  ;;  %4482 = vmatprep.subr.bf16.mxu1 %v12214_v21  ;;  %v4621_v50 = vld [vmem:[#allocation5 + $0x140] sm:$0xff]  ;;  %v10769_v36 = vcombine.high %v4646_v23, %v4650_v57 }
 0x4e7   :  { %v4625_v21 = vld [vmem:[#allocation5 + $0x160] sm:$0xff]  ;;  %12230 = vst [vmem:[#allocation9_spill] sm:$0xff] %v10767_v1 }
 0x4e8   :  { %12231 = vst [vmem:[#allocation10_spill] sm:$0xff] %v10769_v36 }
 0x4e9   :  { %4442 = vmatpush1.bf16.msra.mxu0 %v12215_v27  ;;  %4483 = vmatpush1.bf16.msra.mxu1 %v12216_v10  ;;  %v4622_v27 = vld [vmem:[#allocation5 + $0x148] sm:$0xff]  ;;  %v10727_v10 = vcombine.high %v4621_v50, %v4625_v21 }
 0x4ea   :  { %4443 = vmatprep.subr.bf16.mxu0 %v12217_v53  ;;  %4484 = vmatprep.subr.bf16.mxu1 %v12218_v26  ;;  %v4626_v53 = vld [vmem:[#allocation5 + $0x168] sm:$0xff]  ;;  %v10729_v26 = vcombine.low %v4621_v50, %v4625_v21  ;;  %v4653_v50 = vld [vmem:[#allocation5 + $0x240] sm:$0xff] }
 0x4eb   :  { %v4657_v21 = vld [vmem:[#allocation5 + $0x260] sm:$0xff] }
 0x4ed   :  { %4444 = vmatpush1.bf16.msra.mxu0 %v12219_v52  ;;  %4485 = vmatpush1.bf16.msra.mxu1 %v12220_v56  ;;  %v10731_v52 = vcombine.low %v4622_v27, %v4626_v53  ;;  %v10733_v56 = vcombine.high %v4622_v27, %v4626_v53  ;;  %v4654_v27 = vld [vmem:[#allocation5 + $0x248] sm:$0xff]  ;;  %v10775_v53 = vcombine.high %v4653_v50, %v4657_v21 }
 0x4ee   :  { %4445 = vmatprep.subr.bf16.mxu0 %v12221_v49  ;;  %4486 = vmatprep.subr.bf16.mxu1 %v12222_v30  ;;  %v4629_v49 = vld [vmem:[#allocation5 + $0x180] sm:$0xff] }
 0x4ef   :  { %v4633_v30 = vld [vmem:[#allocation5 + $0x1a0] sm:$0xff]  ;;  %12232 = vst [vmem:[#allocation12_spill] sm:$0xff] %v10775_v53 }
 0x4f1   :  { %4446 = vmatpush1.bf16.msra.mxu0 %v12223_v12  ;;  %4487 = vmatpush1.bf16.msra.mxu1 %v12224_v28  ;;  %v4630_v12 = vld [vmem:[#allocation5 + $0x188] sm:$0xff]  ;;  %v10739_v28 = vcombine.high %v4629_v49, %v4633_v30 }
 0x4f2   :  { %4447 = vmatprep.subr.bf16.mxu0 %v12225_v14  ;;  %4488 = vmatprep.subr.bf16.mxu1 %v12226_v55  ;;  %v4634_v14 = vld [vmem:[#allocation5 + $0x1a8] sm:$0xff]  ;;  %v10741_v55 = vcombine.low %v4629_v49, %v4633_v30  ;;  %v10777_v30 = vcombine.low %v4653_v50, %v4657_v21  ;;  %v4669_v50 = vld [vmem:[#allocation5 + $0x2c0] sm:$0xff] }
 0x4f3   :  { %v4658_v49 = vld [vmem:[#allocation5 + $0x268] sm:$0xff]  ;;  %v4673_v21 = vld [vmem:[#allocation5 + $0x2e0] sm:$0xff] }
 0x4f4   :  { %12233 = vst [vmem:[#allocation15_spill] sm:$0xff] %v10777_v30 }
 0x4f5   :  { %4448 = vmatpush1.bf16.msra.mxu0 %v10461_v8  ;;  %4489 = vmatpush1.bf16.msra.mxu1 %v10463_v39  ;;  %v4589_v8 = vld [vmem:[#allocation5 + $0x40] sm:$0xff] }
 0x4f6   :  { %4449 = vmatprep.subr.bf16.mxu0 %v10467_v32  ;;  %4490 = vmatprep.subr.bf16.mxu1 %v12227_v45  ;;  %v4593_v39 = vld [vmem:[#allocation5 + $0x60] sm:$0xff]  ;;  %v4590_v32 = vld [vmem:[#allocation5 + $0x48] sm:$0xff]  ;;  %v10743_v45 = vcombine.low %v4630_v12, %v4634_v14 }
 0x4f9   :  { %4450 = vmatpush1.bf16.msra.mxu0 %v12228_v63  ;;  %4491 = vmatpush1.bf16.msra.mxu1 %v10475_v11  ;;  %v10679_v11 = vcombine.high %v4589_v8, %v4593_v39  ;;  %v10745_v63 = vcombine.high %v4630_v12, %v4634_v14  ;;  %v10779_v12 = vcombine.low %v4654_v27, %v4658_v49 }
 0x4fa   :  { %4451 = vmatprep.subr.bf16.mxu0 %v10479_v25  ;;  %4492 = vmatprep.subr.bf16.mxu1 %v10481_v61  ;;  %v10681_v25 = vcombine.low %v4589_v8, %v4593_v39  ;;  %v4637_v8 = vld [vmem:[#allocation5 + $0x1c0] sm:$0xff]  ;;  %v10781_v14 = vcombine.high %v4654_v27, %v4658_v49  ;;  %v4670_v27 = vld [vmem:[#allocation5 + $0x2c8] sm:$0xff]  ;;  %v10799_v49 = vcombine.high %v4669_v50, %v4673_v21 }
 0x4fb   :  { %v4641_v39 = vld [vmem:[#allocation5 + $0x1e0] sm:$0xff]  ;;  %12234 = vst [vmem:[#allocation13_spill] sm:$0xff] %v10779_v12 }
 0x4fc   :  { %12235 = vst [vmem:[#allocation14_spill] sm:$0xff] %v10781_v14  ;;  %12240 = vst [vmem:[#allocation20_spill] sm:$0xff] %v10799_v49 }
 0x4fd   :  { %4452 = vmatpush1.bf16.msra.mxu0 %v10485_v42  ;;  %4493 = vmatpush1.bf16.msra.mxu1 %v10487_v54  ;;  %v4597_v42 = vld [vmem:[#allocation5 + $0x80] sm:$0xff] }
 0x4fe   :  { %4453 = vmatprep.subr.bf16.mxu0 %v10491_v35  ;;  %4494 = vmatprep.subr.bf16.mxu1 %v10493_v31  ;;  %v4601_v54 = vld [vmem:[#allocation5 + $0xa0] sm:$0xff]  ;;  %v4598_v35 = vld [vmem:[#allocation5 + $0x88] sm:$0xff] }
 0x4ff   :  { %v10691_v31 = vcombine.high %v4597_v42, %v4601_v54 }
 0x501   :  { %4454 = vmatpush1.bf16.msra.mxu0 %v10497_v48  ;;  %4495 = vmatpush1.bf16.msra.mxu1 %v10499_v16  ;;  %v4594_v48 = vld [vmem:[#allocation5 + $0x68] sm:$0xff] }
 0x502   :  { %5374 = vmatprep.subr.bf16.mxu0 %v10509_v40  ;;  %5415 = vmatprep.subr.bf16.mxu1 %v10513_v3  ;;  %v10683_v16 = vcombine.low %v4590_v32, %v4594_v48  ;;  %v10685_v61 = vcombine.high %v4590_v32, %v4594_v48  ;;  %v10693_v40 = vcombine.low %v4597_v42, %v4601_v54  ;;  %v4638_v32 = vld [vmem:[#allocation5 + $0x1c8] sm:$0xff] }
 0x503   :  { %v10751_v48 = vcombine.high %v4637_v8, %v4641_v39  ;;  %v4642_v42 = vld [vmem:[#allocation5 + $0x1e8] sm:$0xff]  ;;  %v10753_v54 = vcombine.low %v4637_v8, %v4641_v39  ;;  %v4661_v8 = vld [vmem:[#allocation5 + $0x280] sm:$0xff] }
 0x504   :  { %4456 = vmatmul.mubr.bf16.vlgmr.msra.gmra.mrb[28].mxu0 %v10607_v62  ;;  %4497 = vmatmul.mubr.bf16.vlgmr.msra.gmra.mrb[28].mxu1 %v10607_v62  ;;  %v4605_v62 = vld [vmem:[#allocation5 + $0xc0] sm:$0xff] }
 0x505   :  { %5375 = vmatpush1.bf16.msra.mxu0 %v10507_v38  ;;  %5416 = vmatpush1.bf16.msra.mxu1 %v10511_v44  ;;  %v4602_v38 = vld [vmem:[#allocation5 + $0xa8] sm:$0xff]  ;;  %v10703_v24 = vcombine.high %v4605_v62, %v4609_v22  ;;  %v10705_v29 = vcombine.low %v4605_v62, %v4609_v22  ;;  %v4645_v62 = vld [vmem:[#allocation5 + $0x200] sm:$0xff] }
 0x506   :  { %5376 = vmatprep.subr.bf16.mxu0 %v10679_v11  ;;  %5417 = vmatprep.subr.bf16.mxu1 %v10685_v61  ;;  %v10695_v44 = vcombine.low %v4598_v35, %v4602_v38  ;;  %v10697_v3 = vcombine.high %v4598_v35, %v4602_v38  ;;  %v10755_v35 = vcombine.low %v4638_v32, %v4642_v42  ;;  %v4649_v22 = vld [vmem:[#allocation5 + $0x220] sm:$0xff] }
 0x507   :  { %v10757_v38 = vcombine.high %v4638_v32, %v4642_v42  ;;  %v10763_v33 = vcombine.high %v4645_v62, %v4649_v22  ;;  %v10765_v59 = vcombine.low %v4645_v62, %v4649_v22  ;;  %v4665_v39 = vld [vmem:[#allocation5 + $0x2a0] sm:$0xff]  ;;  %v4662_v32 = vld [vmem:[#allocation5 + $0x288] sm:$0xff] }
 0x508   :  { %v10787_v42 = vcombine.high %v4661_v8, %v4665_v39  ;;  %v4666_v62 = vld [vmem:[#allocation5 + $0x2a8] sm:$0xff]  ;;  %v10789_v22 = vcombine.low %v4661_v8, %v4665_v39  ;;  %v10801_v8 = vcombine.low %v4669_v50, %v4673_v21 }
 0x509   :  { %5377 = vmatpush1.bf16.msra.mxu0 %v10681_v25  ;;  %5418 = vmatpush1.bf16.msra.mxu1 %v10683_v16  ;;  %12229 = vst [vmem:[#allocation11_spill] sm:$0xff] %v10765_v59  ;;  %v10791_v23 = vcombine.low %v4662_v32, %v4666_v62  ;;  %v10793_v57 = vcombine.high %v4662_v32, %v4666_v62  ;;  %v4677_v62 = vld [vmem:[#allocation5 + $0x300] sm:$0xff] }
 0x50a   :  { %5378 = vmatprep.subr.bf16.mxu0 %v10691_v31  ;;  %5419 = vmatprep.subr.bf16.mxu1 %v10697_v3  ;;  %12236 = vst [vmem:[#allocation16_spill] sm:$0xff] %v10787_v42  ;;  %12237 = vst [vmem:[#allocation19_spill] sm:$0xff] %v10789_v22 }
 0x50b   :  { %12238 = vst [vmem:[#allocation17_spill] sm:$0xff] %v10791_v23  ;;  %12239 = vst [vmem:[#allocation18_spill] sm:$0xff] %v10793_v57 }
 0x50c   :  { %12241 = vst [vmem:[#allocation23_spill] sm:$0xff] %v10801_v8 }
 0x50d   :  { %5379 = vmatpush1.bf16.msra.mxu0 %v10693_v40  ;;  %5420 = vmatpush1.bf16.msra.mxu1 %v10695_v44 }
 0x50e   :  { %5380 = vmatprep.subr.bf16.mxu0 %v10703_v24  ;;  %5421 = vmatprep.subr.bf16.mxu1 %v10709_v51 }
 0x511   :  { %5381 = vmatpush1.bf16.msra.mxu0 %v10705_v29  ;;  %5422 = vmatpush1.bf16.msra.mxu1 %v10707_v41 }
 0x512   :  { %5382 = vmatprep.subr.bf16.mxu0 %v10715_v20  ;;  %5423 = vmatprep.subr.bf16.mxu1 %v10721_v6 }
 0x515   :  { %5383 = vmatpush1.bf16.msra.mxu0 %v10717_v37  ;;  %5424 = vmatpush1.bf16.msra.mxu1 %v10719_v46 }
 0x516   :  { %5384 = vmatprep.subr.bf16.mxu0 %v10727_v10  ;;  %5425 = vmatprep.subr.bf16.mxu1 %v10733_v56 }
 0x519   :  { %5385 = vmatpush1.bf16.msra.mxu0 %v10729_v26  ;;  %5426 = vmatpush1.bf16.msra.mxu1 %v10731_v52 }
 0x51a   :  { %5386 = vmatprep.subr.bf16.mxu0 %v10739_v28  ;;  %5427 = vmatprep.subr.bf16.mxu1 %v10745_v63 }
 0x51d   :  { %5387 = vmatpush1.bf16.msra.mxu0 %v10741_v55  ;;  %5428 = vmatpush1.bf16.msra.mxu1 %v10743_v45 }
 0x51e   :  { %5388 = vmatprep.subr.bf16.mxu0 %v10751_v48  ;;  %5429 = vmatprep.subr.bf16.mxu1 %v10757_v38 }
 0x521   :  { %5389 = vmatpush1.bf16.msra.mxu0 %v10753_v54  ;;  %5430 = vmatpush1.bf16.msra.mxu1 %v10755_v35 }
 0x522   :  { %5390 = vmatprep.subr.bf16.mxu0 %v10763_v33  ;;  %5431 = vmatprep.subr.bf16.mxu1 %v10769_v36 }
 0x525   :  { %5391 = vmatpush1.bf16.msra.mxu0 %v10765_v59  ;;  %5432 = vmatpush1.bf16.msra.mxu1 %v10767_v1 }
 0x526   :  { %5392 = vmatprep.subr.bf16.mxu0 %v10775_v53  ;;  %5433 = vmatprep.subr.bf16.mxu1 %v10781_v14  ;;  %v4701_v14 = vld [vmem:[#allocation5 + $0x3c0] sm:$0xff] }
 0x527   :  { %v4705_v53 = vld [vmem:[#allocation5 + $0x3e0] sm:$0xff] }
 0x529   :  { %5393 = vmatpush1.bf16.msra.mxu0 %v10777_v30  ;;  %5434 = vmatpush1.bf16.msra.mxu1 %v10779_v12  ;;  %v4674_v12 = vld [vmem:[#allocation5 + $0x2e8] sm:$0xff] }
 0x52a   :  { %5394 = vmatprep.subr.bf16.mxu0 %v10787_v42  ;;  %5435 = vmatprep.subr.bf16.mxu1 %v10793_v57  ;;  %v10803_v39 = vcombine.low %v4670_v27, %v4674_v12  ;;  %v10805_v32 = vcombine.high %v4670_v27, %v4674_v12  ;;  %v4678_v57 = vld [vmem:[#allocation5 + $0x308] sm:$0xff]  ;;  %v4685_v27 = vld [vmem:[#allocation5 + $0x340] sm:$0xff] }
 0x52b   :  { %v4682_v42 = vld [vmem:[#allocation5 + $0x328] sm:$0xff] }
 0x52c   :  { %12242 = vst [vmem:[#allocation21_spill] sm:$0xff] %v10803_v39  ;;  %12243 = vst [vmem:[#allocation22_spill] sm:$0xff] %v10805_v32  ;;  %v10815_v21 = vcombine.low %v4678_v57, %v4682_v42  ;;  %v10817_v12 = vcombine.high %v4678_v57, %v4682_v42  ;;  %v4693_v57 = vld [vmem:[#allocation5 + $0x380] sm:$0xff]  ;;  %v4694_v30 = vld [vmem:[#allocation5 + $0x388] sm:$0xff] }
 0x52d   :  { %5395 = vmatpush1.bf16.msra.mxu0 %v10789_v22  ;;  %5436 = vmatpush1.bf16.msra.mxu1 %v10791_v23  ;;  %v4681_v22 = vld [vmem:[#allocation5 + $0x320] sm:$0xff] }
 0x52e   :  { %5396 = vmatprep.subr.bf16.mxu0 %v10799_v49  ;;  %5437 = vmatprep.subr.bf16.mxu1 %v10805_v32  ;;  %v10811_v23 = vcombine.high %v4677_v62, %v4681_v22  ;;  %v10813_v50 = vcombine.low %v4677_v62, %v4681_v22  ;;  %12246 = vst [vmem:[#allocation25_spill] sm:$0xff] %v10815_v21  ;;  %12247 = vst [vmem:[#allocation26_spill] sm:$0xff] %v10817_v12  ;;  %v4686_v32 = vld [vmem:[#allocation5 + $0x348] sm:$0xff] }
 0x52f   :  { %v4690_v49 = vld [vmem:[#allocation5 + $0x368] sm:$0xff] }
 0x530   :  { %12244 = vst [vmem:[#allocation24_spill] sm:$0xff] %v10811_v23  ;;  %12245 = vst [vmem:[#allocation28_spill] sm:$0xff] %v10813_v50  ;;  %v10827_v62 = vcombine.low %v4686_v32, %v4690_v49  ;;  %v10829_v42 = vcombine.high %v4686_v32, %v4690_v49  ;;  %v4702_v49 = vld [vmem:[#allocation5 + $0x3c8] sm:$0xff] }
 0x531   :  { %5397 = vmatpush1.bf16.msra.mxu0 %v10801_v8  ;;  %5438 = vmatpush1.bf16.msra.mxu1 %v10803_v39  ;;  %v4689_v8 = vld [vmem:[#allocation5 + $0x360] sm:$0xff]  ;;  %v4706_v32 = vld [vmem:[#allocation5 + $0x3e8] sm:$0xff] }
 0x532   :  { %5398 = vmatprep.subr.bf16.mxu0 %v10811_v23  ;;  %5439 = vmatprep.subr.bf16.mxu1 %v10817_v12  ;;  %v10823_v39 = vcombine.high %v4685_v27, %v4689_v8  ;;  %v10825_v22 = vcombine.low %v4685_v27, %v4689_v8  ;;  %12250 = vst [vmem:[#allocation29_spill] sm:$0xff] %v10827_v62  ;;  %12251 = vst [vmem:[#allocation32_spill] sm:$0xff] %v10829_v42  ;;  %v4697_v23 = vld [vmem:[#allocation5 + $0x3a0] sm:$0xff]  ;;  %v4698_v12 = vld [vmem:[#allocation5 + $0x3a8] sm:$0xff] }
 0x533   :  { %v10836_v8 = vcombine.low %v4693_v57, %v4697_v23  ;;  %v10838_v27 = vcombine.high %v4694_v30, %v4698_v12  ;;  %v10847_v1 = vcombine.high %v4702_v49, %v4706_v32 }
 0x534   :  { %12248 = vst [vmem:[#allocation31_spill] sm:$0xff] %v10823_v39  ;;  %12249 = vst [vmem:[#allocation33_spill] sm:$0xff] %v10825_v22 }
 0x535   :  { %5399 = vmatpush1.bf16.msra.mxu0 %v10813_v50  ;;  %5440 = vmatpush1.bf16.msra.mxu1 %v10815_v21  ;;  %v10832_v50 = vcombine.high %v4693_v57, %v4697_v23  ;;  %12253 = vst [vmem:[#allocation35_spill] sm:$0xff] %v10836_v8  ;;  %12254 = vst [vmem:[#allocation36_spill] sm:$0xff] %v10838_v27  ;;  %v10844_v21 = vcombine.high %v4701_v14, %v4705_v53 }
 0x536   :  { %5400 = vmatprep.subr.bf16.mxu0 %v10823_v39  ;;  %5441 = vmatprep.subr.bf16.mxu1 %v10829_v42  ;;  %v10842_v39 = vcombine.low %v4694_v30, %v4698_v12  ;;  %12257 = vst [vmem:[#allocation39_spill] sm:$0xff] %v10847_v1  ;;  %v10850_v23 = vcombine.low %v4701_v14, %v4705_v53  ;;  %v4583_v30 = vld [vmem:[#allocation5 + $0x10] sm:$0xff] }
 0x537   :  { %12252 = vst [vmem:[#allocation34_spill] sm:$0xff] %v10832_v50  ;;  %12256 = vst [vmem:[#allocation38_spill] sm:$0xff] %v10844_v21  ;;  %v10854_v57 = vcombine.low %v4702_v49, %v4706_v32  ;;  %v4587_v12 = vld [vmem:[#allocation5 + $0x30] sm:$0xff] }
 0x538   :  { %12255 = vst [vmem:[#allocation37_spill] sm:$0xff] %v10842_v39  ;;  %12258 = vst [vmem:[#allocation42_spill] sm:$0xff] %v10850_v23  ;;  %v10861_v53 = vcombine.low %v4583_v30, %v4587_v12 }
 0x539   :  { %5401 = vmatpush1.bf16.msra.mxu0 %v10825_v22  ;;  %5442 = vmatpush1.bf16.msra.mxu1 %v10827_v62  ;;  %12259 = vst [vmem:[#allocation27_spill] sm:$0xff] %v10854_v57 }
 0x53a   :  { %5402 = vmatprep.subr.bf16.mxu0 %v10832_v50  ;;  %5443 = vmatprep.subr.bf16.mxu1 %v10838_v27  ;;  %v4584_v50 = vld [vmem:[#allocation5 + $0x18] sm:$0xff]  ;;  %v10859_v27 = vcombine.high %v4583_v30, %v4587_v12 }
 0x53c   :  { %12260 = vst [vmem:[#allocation30_spill] sm:$0xff] %v10859_v27 }
 0x53d   :  { %5403 = vmatpush1.bf16.msra.mxu0 %v10836_v8  ;;  %5444 = vmatpush1.bf16.msra.mxu1 %v10842_v39  ;;  %v4588_v8 = vld [vmem:[#allocation5 + $0x38] sm:$0xff] }
 0x53e   :  { %5404 = vmatprep.subr.bf16.mxu0 %v10844_v21  ;;  %5445 = vmatprep.subr.bf16.mxu1 %v10847_v1  ;;  %v10863_v14 = vcombine.low %v4584_v50, %v4588_v8  ;;  %v10865_v39 = vcombine.high %v4584_v50, %v4588_v8 }
 0x540   :  { %12261 = vst [vmem:[#allocation46_spill] sm:$0xff] %v10865_v39 }
 0x541   :  { %5405 = vmatpush1.bf16.msra.mxu0 %v10850_v23  ;;  %5446 = vmatpush1.bf16.msra.mxu1 %v10854_v57 }
 0x542   :  { %5456 = vmatprep.subr.bf16.mxu0 %v10859_v27  ;;  %5497 = vmatprep.subr.bf16.mxu1 %v10865_v39 }
 0x597   :  { %v4375_v49 = vpop.f32.mrb[24].mxu0  ;;  %v4416_v32 = vpop.f32.mrb[24].mxu1 }
 0x598   :  { %v4505_v23 = vadd.f32 %v4375_v49, %v12177_v15  ;;  %v4377_v1 = vpop.f32.mrb[25].mxu0  ;;  %v4418_v21 = vpop.f32.mrb[25].mxu1  ;;  %v4507_v50 = vadd.f32 %v4416_v32, %v9990_v19 }
 0x599   :  { %v4506_v57 = vadd.f32 %v4377_v1, %v9986_v9  ;;  %v4379_v62 = vpop.f32.mrb[26].mxu0  ;;  %v4420_v22 = vpop.f32.mrb[26].mxu1  ;;  %v4508_v8 = vadd.f32 %v4418_v21, %v9995_v17 }
 0x59a   :  { %v4509_v30 = vmul.f32 0.5, %v4505_v23  ;;  %v4380_v12 = vpop.f32.mrb[27].mxu0  ;;  %v4421_v42 = vpop.f32.mrb[27].mxu1 }
 0x59b   :  { %v4513_v59 = vmul.f32 0.5, %v4506_v57  ;;  %v4518_v39 = vmul.f32 0.5, %v4508_v8 }
 0x59c   :  { %9275 = vtanh.f32 %v4509_v30 }
 0x59d   :  { %9277 = vtanh.f32 %v4513_v59 }
 0x59e   :  { %9279 = vtanh.f32 %v4507_v50 }
 0x59f   :  { %9281 = vtanh.f32 %v4518_v39 }
 0x5a6   :  { %v9276_v27 = vpop.eup %9275 }
 0x5a7   :  { %v9278_v49 = vpop.eup %9277  ;;  %v4511_v15 = vmul.f32 0.5, %v9276_v27  ;;  %v246_v27 = vpop.permute.xlu0 %245 }
 0x5a8   :  { %v4515_v36 = vmul.f32 0.5, %v9278_v49  ;;  %v9280_v62 = vpop.eup %9279  ;;  %v248_v39 = vmul.f32 %v246_v27, %v12007_v58 }
 0x5a9   :  { %v4512_v1 = vadd.f32 0.5, %v4511_v15  ;;  %v9282_v59 = vpop.eup %9281  ;;  %v249_v15 = vmul.f32 %v246_v27, %v12008_v0 }
 0x5aa   :  { %v4516_v22 = vadd.f32 0.5, %v4515_v36  ;;  %v4520_v32 = vmul.f32 0.5, %v9282_v59  ;;  %v250_v36 = vmul.f32 %v246_v27, %v12009_v2  ;;  %v252_v8 = vadd.f32 %v248_v39, %v12179_v13 }
 0x5ab   :  { %v4523_v23 = vmul.f32 %v9280_v62, %v4512_v1  ;;  %v253_v49 = vadd.f32 %v249_v15, %v12011_v18 }
 0x5ac   :  { %v4522_v42 = vmul.f32 %v4516_v22, %v10586_v5  ;;  %v4521_v30 = vadd.f32 0.5, %v4520_v32  ;;  %v251_v5 = vmul.f32 %v246_v27, %v12178_v47  ;;  %v254_v1 = vadd.f32 %v250_v36, %v12180_v7 }
 0x5ad   :  { %v260_v22 = vcombine.low %v252_v8, %v253_v49 }
 0x5ae   :  { %v10874_v57 = vadd.f32 %v4523_v23, %v4522_v42  ;;  %v255_v62 = vadd.f32 %v251_v5, %v12181_v4 }
 0x5b0   :  { %9283 = vtanh.f32 %v10874_v57  ;;  %v261_v23 = vcombine.low %v254_v1, %v255_v62 }
 0x5ba   :  { %v9284_v21 = vpop.eup %9283 }
 0x5bb   :  { %v4526_v12 = vmul.f32 %v9284_v21, %v4521_v30 }
 0x5bd   :  { %v4527_v50 = vpack.c.bf16 %v4526_v12, %v4526_v12  ;;  %v268_v12 = vrot.slane %v260_v22, %v9701_v60 }
 0x5bf   :  { %4528 = vst [vmem:[#allocation3 + $0x1] sm:$0x1] %v4527_v50  ;;  %v275_v50 = vrot.slane %v261_v23, %v9701_v60 }
 0x5c1   :  { %v276_v8 = vcombine.low %v268_v12, %v275_v50 }
 0x5d7   :  { %v4457_v42 = vpop.f32.mrb[28].mxu0  ;;  %v4498_v59 = vpop.f32.mrb[28].mxu1 }
 0x5d8   :  { %v4459_v32 = vpop.f32.mrb[29].mxu0  ;;  %v4500_v30 = vpop.f32.mrb[29].mxu1 }
 0x5d9   :  { %v4534_v21 = vcombine.low %v4457_v42, %v4459_v32  ;;  %v4535_v27 = vcombine.low %v4498_v59, %v4500_v30  ;;  %v4461_v47 = vpop.f32.mrb[30].mxu0  ;;  %v4502_v39 = vpop.f32.mrb[30].mxu1 }
 0x5da   :  { %v4462_v13 = vpop.f32.mrb[31].mxu0  ;;  %v4503_v15 = vpop.f32.mrb[31].mxu1 }
 0x5db   :  { %v4542_v36 = vrot.slane %v4534_v21, %v9701_v60  ;;  %v4549_v5 = vrot.slane %v4535_v27, %v9701_v60 }
 0x5dd   :  { %v4550_v49 = vcombine.low %v4542_v36, %v4549_v5 }
 0x5df   :  { %v4552_v1 = vadd.f32 %v4550_v49, %v276_v8 }
 0x5e1   :  { %v4553_v62 = vmul.f32 0.5, %v4552_v1  ;;  %v4558_v4 = vrot.slane %v4552_v1, 2  ;;  %v4564_v22 = vrot.slane %v4552_v1, 4  ;;  %v4567_v32 = vrot.slane %v4552_v1, 6 }
 0x5e3   :  { %9285 = vtanh.f32 %v4553_v62  ;;  %v4560_v42 = vmul.f32 0.5, %v4558_v4  ;;  %v4569_v23 = vmul.f32 0.5, %v4567_v32  ;;  %v4595_v32 = vld [vmem:[#allocation5 + $0x70] sm:$0xff] }
 0x5e5   :  { %9287 = vtanh.f32 %v4560_v42 }
 0x5e6   :  { %9289 = vtanh.f32 %v4564_v22  ;;  %v4591_v22 = vld [vmem:[#allocation5 + $0x50] sm:$0xff] }
 0x5e7   :  { %9291 = vtanh.f32 %v4569_v23  ;;  %v4592_v23 = vld [vmem:[#allocation5 + $0x58] sm:$0xff] }
 0x5ed   :  { %v9286_v47 = vpop.eup %9285 }
 0x5ee   :  { %v4555_v59 = vmul.f32 0.5, %v9286_v47  ;;  %v4596_v47 = vld [vmem:[#allocation5 + $0x78] sm:$0xff] }
 0x5ef   :  { %v9288_v13 = vpop.eup %9287 }
 0x5f0   :  { %v4556_v30 = vadd.f32 0.5, %v4555_v59  ;;  %v4562_v39 = vmul.f32 0.5, %v9288_v13  ;;  %v9290_v27 = vpop.eup %9289  ;;  %v4599_v13 = vld [vmem:[#allocation5 + $0x90] sm:$0xff] }
 0x5f1   :  { %v9292_v4 = vpop.eup %9291 }
 0x5f2   :  { %v4563_v21 = vadd.f32 0.5, %v4562_v39  ;;  %v4574_v50 = vmul.f32 %v9290_v27, %v4556_v30  ;;  %v4571_v36 = vmul.f32 0.5, %v9292_v4  ;;  %v10897_v30 = vcombine.high %v4591_v22, %v4595_v32  ;;  %v4600_v27 = vld [vmem:[#allocation5 + $0x98] sm:$0xff] }
 0x5f3   :  { %v10899_v39 = vcombine.high %v4592_v23, %v4596_v47  ;;  %v10907_v4 = vcombine.low %v4592_v23, %v4596_v47  ;;  %v4615_v47 = vld [vmem:[#allocation5 + $0x110] sm:$0xff] }
 0x5f4   :  { %v4573_v12 = vmul.f32 %v4563_v21, %v10602_v43  ;;  %v4572_v5 = vadd.f32 0.5, %v4571_v36  ;;  %12262 = vst [vmem:[#allocation43_spill] sm:$0xff] %v10897_v30  ;;  %v4603_v21 = vld [vmem:[#allocation5 + $0xb0] sm:$0xff] }
 0x5f5   :  { %12263 = vst [vmem:[#allocation47_spill] sm:$0xff] %v10899_v39  ;;  %12265 = vst [vmem:[#allocation49_spill] sm:$0xff] %v10907_v4  ;;  %v10909_v36 = vcombine.high %v4599_v13, %v4603_v21 }
 0x5f6   :  { %v10890_v15 = vadd.f32 %v4574_v50, %v4573_v12  ;;  %v4604_v12 = vld [vmem:[#allocation5 + $0xb8] sm:$0xff]  ;;  %v10905_v50 = vcombine.low %v4591_v22, %v4595_v32 }
 0x5f7   :  { %12266 = vst [vmem:[#allocation50_spill] sm:$0xff] %v10909_v36  ;;  %v10919_v22 = vcombine.low %v4600_v27, %v4604_v12 }
 0x5f8   :  { %9293 = vtanh.f32 %v10890_v15  ;;  %12264 = vst [vmem:[#allocation48_spill] sm:$0xff] %v10905_v50 }
 0x5f9   :  { %12269 = vst [vmem:[#allocation53_spill] sm:$0xff] %v10919_v22 }
 0x602   :  { %v9294_v8 = vpop.eup %9293 }
 0x603   :  { %v4577_v49 = vmul.f32 %v9294_v8, %v4572_v5  ;;  %v10911_v5 = vcombine.high %v4600_v27, %v4604_v12  ;;  %v4607_v8 = vld [vmem:[#allocation5 + $0xd0] sm:$0xff] }
 0x605   :  { %v4578_v1 = vpack.c.bf16 %v4577_v49, %v4577_v49  ;;  %12267 = vst [vmem:[#allocation51_spill] sm:$0xff] %v10911_v5  ;;  %v4611_v49 = vld [vmem:[#allocation5 + $0xf0] sm:$0xff] }
 0x606   :  { %v10923_v32 = vcombine.high %v4607_v8, %v4611_v49 }
 0x607   :  { %4579 = vst [vmem:[#allocation3] sm:$0x1] %v4578_v1  ;;  %v4608_v1 = vld [vmem:[#allocation5 + $0xd8] sm:$0xff] }
 0x608   :  { %12270 = vst [vmem:[#allocation54_spill] sm:$0xff] %v10923_v32 }
 0x60e   :  { %v8743_v62 = vld.sshfl [vmem:[#allocation3] sm:$0x11 pattern:$0x75316420] }
 0x60f   :  { %v4717_v42 = vcombine.high %v8743_v62, %v8743_v62  ;;  %v10895_v59 = vrot.slane %v8743_v62, %v12013_v34  ;;  %v4612_v62 = vld [vmem:[#allocation5 + $0xf8] sm:$0xff] }
 0x610   :  { %v10925_v23 = vcombine.high %v4608_v1, %v4612_v62 }
 0x611   :  { %v4731_v43 = vrot.slane %v4717_v42, %v12013_v34  ;;  %v10917_v42 = vcombine.low %v4599_v13, %v4603_v21  ;;  %v10929_v13 = vcombine.low %v4607_v8, %v4611_v49  ;;  %v10931_v21 = vcombine.low %v4608_v1, %v4612_v62 }
 0x612   :  { %12271 = vst [vmem:[#allocation55_spill] sm:$0xff] %v10925_v23 }
 0x613   :  { %5406 = vmatprep.mubr.bf16.mxu0 %v4731_v43  ;;  %5447 = vmatprep.mubr.bf16.mxu1 %v4731_v43  ;;  %12268 = vst [vmem:[#allocation52_spill] sm:$0xff] %v10917_v42  ;;  %12272 = vst [vmem:[#allocation56_spill] sm:$0xff] %v10929_v13 }
 0x614   :  { %5407 = vmatmul.mubr.bf16.vlgmr.msra.gmra.mrb[32].mxu0 %v10895_v59  ;;  %5448 = vmatmul.mubr.bf16.vlgmr.msra.gmra.mrb[32].mxu1 %v10895_v59  ;;  %12273 = vst [vmem:[#allocation57_spill] sm:$0xff] %v10931_v21 }
 0x615   :  { %5457 = vmatpush1.bf16.msra.mxu0 %v10861_v53  ;;  %5498 = vmatpush1.bf16.msra.mxu1 %v10863_v14 }
 0x616   :  { %5488 = vmatprep.mubr.bf16.mxu0 %v4731_v43  ;;  %5529 = vmatprep.mubr.bf16.mxu1 %v4731_v43  ;;  %v4619_v43 = vld [vmem:[#allocation5 + $0x130] sm:$0xff] }
 0x617   :  { %5458 = vmatprep.subr.bf16.mxu0 %v10897_v30  ;;  %5499 = vmatprep.subr.bf16.mxu1 %v10899_v39  ;;  %v4616_v39 = vld [vmem:[#allocation5 + $0x118] sm:$0xff]  ;;  %v10935_v27 = vcombine.high %v4615_v47, %v4619_v43  ;;  %v10941_v8 = vcombine.low %v4615_v47, %v4619_v43 }
 0x618   :  { %v4620_v30 = vld [vmem:[#allocation5 + $0x138] sm:$0xff] }
 0x619   :  { %5459 = vmatpush1.bf16.msra.mxu0 %v10905_v50  ;;  %5500 = vmatpush1.bf16.msra.mxu1 %v10907_v4  ;;  %12274 = vst [vmem:[#allocation58_spill] sm:$0xff] %v10935_v27  ;;  %v10937_v12 = vcombine.high %v4616_v39, %v4620_v30  ;;  %v4624_v4 = vld [vmem:[#allocation5 + $0x158] sm:$0xff]  ;;  %12276 = vst [vmem:[#allocation60_spill] sm:$0xff] %v10941_v8  ;;  %v10943_v49 = vcombine.low %v4616_v39, %v4620_v30 }
 0x61a   :  { %5460 = vmatprep.subr.bf16.mxu0 %v10909_v36  ;;  %5501 = vmatprep.subr.bf16.mxu1 %v10911_v5  ;;  %v4623_v5 = vld [vmem:[#allocation5 + $0x150] sm:$0xff]  ;;  %v4628_v50 = vld [vmem:[#allocation5 + $0x178] sm:$0xff] }
 0x61b   :  { %12275 = vst [vmem:[#allocation59_spill] sm:$0xff] %v10937_v12  ;;  %v4627_v36 = vld [vmem:[#allocation5 + $0x170] sm:$0xff]  ;;  %12277 = vst [vmem:[#allocation61_spill] sm:$0xff] %v10943_v49  ;;  %v10949_v62 = vcombine.high %v4624_v4, %v4628_v50  ;;  %v10955_v30 = vcombine.low %v4624_v4, %v4628_v50 }
 0x61c   :  { %v10947_v1 = vcombine.high %v4623_v5, %v4627_v36  ;;  %v10953_v47 = vcombine.low %v4623_v5, %v4627_v36 }
 0x61d   :  { %5461 = vmatpush1.bf16.msra.mxu0 %v10917_v42  ;;  %5502 = vmatpush1.bf16.msra.mxu1 %v10919_v22  ;;  %12279 = vst [vmem:[#allocation63_spill] sm:$0xff] %v10949_v62  ;;  %v4632_v22 = vld [vmem:[#allocation5 + $0x198] sm:$0xff]  ;;  %12281 = vst [vmem:[#allocation65_spill] sm:$0xff] %v10955_v30 }
 0x61e   :  { %5462 = vmatprep.subr.bf16.mxu0 %v10923_v32  ;;  %5503 = vmatprep.subr.bf16.mxu1 %v10925_v23  ;;  %12278 = vst [vmem:[#allocation62_spill] sm:$0xff] %v10947_v1  ;;  %v4631_v23 = vld [vmem:[#allocation5 + $0x190] sm:$0xff]  ;;  %v4636_v42 = vld [vmem:[#allocation5 + $0x1b8] sm:$0xff]  ;;  %12280 = vst [vmem:[#allocation64_spill] sm:$0xff] %v10953_v47 }
 0x61f   :  { %v4635_v32 = vld [vmem:[#allocation5 + $0x1b0] sm:$0xff]  ;;  %v10961_v43 = vcombine.high %v4632_v22, %v4636_v42  ;;  %v10967_v50 = vcombine.low %v4632_v22, %v4636_v42 }
 0x620   :  { %v10959_v39 = vcombine.high %v4631_v23, %v4635_v32  ;;  %v10965_v36 = vcombine.low %v4631_v23, %v4635_v32 }
 0x621   :  { %5463 = vmatpush1.bf16.msra.mxu0 %v10929_v13  ;;  %5504 = vmatpush1.bf16.msra.mxu1 %v10931_v21  ;;  %12283 = vst [vmem:[#allocation67_spill] sm:$0xff] %v10961_v43  ;;  %v4640_v21 = vld [vmem:[#allocation5 + $0x1d8] sm:$0xff]  ;;  %12285 = vst [vmem:[#allocation69_spill] sm:$0xff] %v10967_v50 }
 0x622   :  { %5464 = vmatprep.subr.bf16.mxu0 %v10935_v27  ;;  %5505 = vmatprep.subr.bf16.mxu1 %v10937_v12  ;;  %12282 = vst [vmem:[#allocation66_spill] sm:$0xff] %v10959_v39  ;;  %v4639_v12 = vld [vmem:[#allocation5 + $0x1d0] sm:$0xff]  ;;  %v4644_v13 = vld [vmem:[#allocation5 + $0x1f8] sm:$0xff]  ;;  %12284 = vst [vmem:[#allocation68_spill] sm:$0xff] %v10965_v36 }
 0x623   :  { %v4643_v27 = vld [vmem:[#allocation5 + $0x1f0] sm:$0xff]  ;;  %v10973_v5 = vcombine.high %v4640_v21, %v4644_v13  ;;  %v10979_v42 = vcombine.low %v4640_v21, %v4644_v13 }
 0x624   :  { %v10971_v4 = vcombine.high %v4639_v12, %v4643_v27  ;;  %v10977_v32 = vcombine.low %v4639_v12, %v4643_v27 }
 0x625   :  { %5465 = vmatpush1.bf16.msra.mxu0 %v10941_v8  ;;  %5506 = vmatpush1.bf16.msra.mxu1 %v10943_v49  ;;  %12287 = vst [vmem:[#allocation71_spill] sm:$0xff] %v10973_v5  ;;  %v4648_v49 = vld [vmem:[#allocation5 + $0x218] sm:$0xff]  ;;  %12289 = vst [vmem:[#allocation73_spill] sm:$0xff] %v10979_v42 }
 0x626   :  { %5466 = vmatprep.subr.bf16.mxu0 %v10947_v1  ;;  %5507 = vmatprep.subr.bf16.mxu1 %v10949_v62  ;;  %12286 = vst [vmem:[#allocation70_spill] sm:$0xff] %v10971_v4  ;;  %v4647_v62 = vld [vmem:[#allocation5 + $0x210] sm:$0xff]  ;;  %v4652_v8 = vld [vmem:[#allocation5 + $0x238] sm:$0xff]  ;;  %12288 = vst [vmem:[#allocation72_spill] sm:$0xff] %v10977_v32 }
 0x627   :  { %v4651_v1 = vld [vmem:[#allocation5 + $0x230] sm:$0xff]  ;;  %v10985_v23 = vcombine.high %v4648_v49, %v4652_v8  ;;  %v10991_v13 = vcombine.low %v4648_v49, %v4652_v8 }
 0x628   :  { %v10983_v22 = vcombine.high %v4647_v62, %v4651_v1  ;;  %v10989_v27 = vcombine.low %v4647_v62, %v4651_v1 }
 0x629   :  { %5467 = vmatpush1.bf16.msra.mxu0 %v10953_v47  ;;  %5508 = vmatpush1.bf16.msra.mxu1 %v10955_v30  ;;  %12291 = vst [vmem:[#allocation75_spill] sm:$0xff] %v10985_v23  ;;  %v4656_v30 = vld [vmem:[#allocation5 + $0x258] sm:$0xff]  ;;  %12293 = vst [vmem:[#allocation77_spill] sm:$0xff] %v10991_v13 }
 0x62a   :  { %5468 = vmatprep.subr.bf16.mxu0 %v10959_v39  ;;  %5509 = vmatprep.subr.bf16.mxu1 %v10961_v43  ;;  %12290 = vst [vmem:[#allocation74_spill] sm:$0xff] %v10983_v22  ;;  %v4655_v43 = vld [vmem:[#allocation5 + $0x250] sm:$0xff]  ;;  %v4660_v47 = vld [vmem:[#allocation5 + $0x278] sm:$0xff]  ;;  %12292 = vst [vmem:[#allocation76_spill] sm:$0xff] %v10989_v27 }
 0x62b   :  { %v4659_v39 = vld [vmem:[#allocation5 + $0x270] sm:$0xff]  ;;  %v10997_v12 = vcombine.high %v4656_v30, %v4660_v47  ;;  %v11003_v8 = vcombine.low %v4656_v30, %v4660_v47 }
 0x62c   :  { %v10995_v21 = vcombine.high %v4655_v43, %v4659_v39  ;;  %v11001_v1 = vcombine.low %v4655_v43, %v4659_v39 }
 0x62d   :  { %5469 = vmatpush1.bf16.msra.mxu0 %v10965_v36  ;;  %5510 = vmatpush1.bf16.msra.mxu1 %v10967_v50  ;;  %12295 = vst [vmem:[#allocation79_spill] sm:$0xff] %v10997_v12  ;;  %v4664_v50 = vld [vmem:[#allocation5 + $0x298] sm:$0xff]  ;;  %12297 = vst [vmem:[#allocation81_spill] sm:$0xff] %v11003_v8 }
 0x62e   :  { %5470 = vmatprep.subr.bf16.mxu0 %v10971_v4  ;;  %5511 = vmatprep.subr.bf16.mxu1 %v10973_v5  ;;  %12294 = vst [vmem:[#allocation78_spill] sm:$0xff] %v10995_v21  ;;  %v4663_v5 = vld [vmem:[#allocation5 + $0x290] sm:$0xff]  ;;  %v4668_v36 = vld [vmem:[#allocation5 + $0x2b8] sm:$0xff]  ;;  %12296 = vst [vmem:[#allocation80_spill] sm:$0xff] %v11001_v1 }
 0x62f   :  { %v4667_v4 = vld [vmem:[#allocation5 + $0x2b0] sm:$0xff]  ;;  %v11009_v62 = vcombine.high %v4664_v50, %v4668_v36  ;;  %v11015_v47 = vcombine.low %v4664_v50, %v4668_v36 }
 0x630   :  { %v11007_v49 = vcombine.high %v4663_v5, %v4667_v4  ;;  %v11013_v39 = vcombine.low %v4663_v5, %v4667_v4 }
 0x631   :  { %5471 = vmatpush1.bf16.msra.mxu0 %v10977_v32  ;;  %5512 = vmatpush1.bf16.msra.mxu1 %v10979_v42  ;;  %12299 = vst [vmem:[#allocation83_spill] sm:$0xff] %v11009_v62  ;;  %v4672_v42 = vld [vmem:[#allocation5 + $0x2d8] sm:$0xff]  ;;  %12301 = vst [vmem:[#allocation85_spill] sm:$0xff] %v11015_v47 }
 0x632   :  { %5472 = vmatprep.subr.bf16.mxu0 %v10983_v22  ;;  %5513 = vmatprep.subr.bf16.mxu1 %v10985_v23  ;;  %12298 = vst [vmem:[#allocation82_spill] sm:$0xff] %v11007_v49  ;;  %v4671_v23 = vld [vmem:[#allocation5 + $0x2d0] sm:$0xff]  ;;  %v4676_v32 = vld [vmem:[#allocation5 + $0x2f8] sm:$0xff]  ;;  %12300 = vst [vmem:[#allocation84_spill] sm:$0xff] %v11013_v39 }
 0x633   :  { %v4675_v22 = vld [vmem:[#allocation5 + $0x2f0] sm:$0xff]  ;;  %v11021_v43 = vcombine.high %v4672_v42, %v4676_v32  ;;  %v11027_v36 = vcombine.low %v4672_v42, %v4676_v32 }
 0x634   :  { %v11019_v30 = vcombine.high %v4671_v23, %v4675_v22  ;;  %v11025_v4 = vcombine.low %v4671_v23, %v4675_v22 }
 0x635   :  { %5473 = vmatpush1.bf16.msra.mxu0 %v10989_v27  ;;  %5514 = vmatpush1.bf16.msra.mxu1 %v10991_v13  ;;  %12303 = vst [vmem:[#allocation87_spill] sm:$0xff] %v11021_v43  ;;  %v4680_v13 = vld [vmem:[#allocation5 + $0x318] sm:$0xff]  ;;  %12305 = vst [vmem:[#allocation89_spill] sm:$0xff] %v11027_v36 }
 0x636   :  { %5474 = vmatprep.subr.bf16.mxu0 %v10995_v21  ;;  %5515 = vmatprep.subr.bf16.mxu1 %v10997_v12  ;;  %12302 = vst [vmem:[#allocation86_spill] sm:$0xff] %v11019_v30  ;;  %v4679_v12 = vld [vmem:[#allocation5 + $0x310] sm:$0xff]  ;;  %v4684_v27 = vld [vmem:[#allocation5 + $0x338] sm:$0xff]  ;;  %12304 = vst [vmem:[#allocation88_spill] sm:$0xff] %v11025_v4 }
 0x637   :  { %v4683_v21 = vld [vmem:[#allocation5 + $0x330] sm:$0xff]  ;;  %v11033_v5 = vcombine.high %v4680_v13, %v4684_v27  ;;  %v11039_v32 = vcombine.low %v4680_v13, %v4684_v27 }
 0x638   :  { %v11031_v50 = vcombine.high %v4679_v12, %v4683_v21  ;;  %v11037_v22 = vcombine.low %v4679_v12, %v4683_v21 }
 0x639   :  { %5475 = vmatpush1.bf16.msra.mxu0 %v11001_v1  ;;  %5516 = vmatpush1.bf16.msra.mxu1 %v11003_v8  ;;  %12307 = vst [vmem:[#allocation91_spill] sm:$0xff] %v11033_v5  ;;  %v4688_v8 = vld [vmem:[#allocation5 + $0x358] sm:$0xff] }
 0x63a   :  { %5476 = vmatprep.subr.bf16.mxu0 %v11007_v49  ;;  %5517 = vmatprep.subr.bf16.mxu1 %v11009_v62  ;;  %12306 = vst [vmem:[#allocation90_spill] sm:$0xff] %v11031_v50  ;;  %v4687_v62 = vld [vmem:[#allocation5 + $0x350] sm:$0xff]  ;;  %v4692_v1 = vld [vmem:[#allocation5 + $0x378] sm:$0xff] }
 0x63b   :  { %v4691_v49 = vld [vmem:[#allocation5 + $0x370] sm:$0xff]  ;;  %v11045_v23 = vcombine.high %v4688_v8, %v4692_v1  ;;  %v11051_v27 = vcombine.low %v4688_v8, %v4692_v1 }
 0x63c   :  { %v11043_v42 = vcombine.high %v4687_v62, %v4691_v49  ;;  %v11049_v21 = vcombine.low %v4687_v62, %v4691_v49 }
 0x63d   :  { %5477 = vmatpush1.bf16.msra.mxu0 %v11013_v39  ;;  %5518 = vmatpush1.bf16.msra.mxu1 %v11015_v47  ;;  %12308 = vst [vmem:[#allocation92_spill] sm:$0xff] %v11045_v23  ;;  %v4696_v47 = vld [vmem:[#allocation5 + $0x398] sm:$0xff] }
 0x63e   :  { %5478 = vmatprep.subr.bf16.mxu0 %v11019_v30  ;;  %5519 = vmatprep.subr.bf16.mxu1 %v11021_v43  ;;  %v4695_v43 = vld [vmem:[#allocation5 + $0x390] sm:$0xff]  ;;  %v4700_v39 = vld [vmem:[#allocation5 + $0x3b8] sm:$0xff]  ;;  %12309 = vst [vmem:[#allocation93_spill] sm:$0xff] %v11049_v21 }
 0x63f   :  { %v4699_v30 = vld [vmem:[#allocation5 + $0x3b0] sm:$0xff]  ;;  %v11057_v12 = vcombine.high %v4696_v47, %v4700_v39  ;;  %v11063_v1 = vcombine.low %v4696_v47, %v4700_v39  ;;  %v5614_v39 = vld [vmem:[#allocation5] sm:$0xff] }
 0x640   :  { %v11055_v13 = vcombine.high %v4695_v43, %v4699_v30  ;;  %v11061_v49 = vcombine.low %v4695_v43, %v4699_v30  ;;  %v5618_v47 = vld [vmem:[#allocation5 + $0x20] sm:$0xff]  ;;  %v5615_v30 = vld [vmem:[#allocation5 + $0x8] sm:$0xff] }
 0x641   :  { %5479 = vmatpush1.bf16.msra.mxu0 %v11025_v4  ;;  %5520 = vmatpush1.bf16.msra.mxu1 %v11027_v36  ;;  %v4704_v36 = vld [vmem:[#allocation5 + $0x3d8] sm:$0xff]  ;;  %v11083_v43 = vcombine.low %v5614_v39, %v5618_v47 }
 0x642   :  { %5480 = vmatprep.subr.bf16.mxu0 %v11031_v50  ;;  %5521 = vmatprep.subr.bf16.mxu1 %v11033_v5  ;;  %v4703_v5 = vld [vmem:[#allocation5 + $0x3d0] sm:$0xff]  ;;  %v4708_v4 = vld [vmem:[#allocation5 + $0x3f8] sm:$0xff] }
 0x643   :  { %v4707_v50 = vld [vmem:[#allocation5 + $0x3f0] sm:$0xff]  ;;  %v11069_v62 = vcombine.high %v4704_v36, %v4708_v4 }
 0x644   :  { %v11067_v8 = vcombine.high %v4703_v5, %v4707_v50 }
 0x645   :  { %5481 = vmatpush1.bf16.msra.mxu0 %v11037_v22  ;;  %5522 = vmatpush1.bf16.msra.mxu1 %v11039_v32 }
 0x646   :  { %5482 = vmatprep.subr.bf16.mxu0 %v11043_v42  ;;  %5523 = vmatprep.subr.bf16.mxu1 %v11045_v23  ;;  %v11073_v23 = vcombine.low %v4703_v5, %v4707_v50  ;;  %v11085_v50 = vcombine.high %v5614_v39, %v5618_v47  ;;  %v12340_v39 = vld [vmem:[#allocation27_spill] sm:$0xff]  ;;  %v12341_v47 = vld [vmem:[#allocation30_spill] sm:$0xff] }
 0x649   :  { %5483 = vmatpush1.bf16.msra.mxu0 %v11049_v21  ;;  %5524 = vmatpush1.bf16.msra.mxu1 %v11051_v27  ;;  %v11075_v21 = vcombine.low %v4704_v36, %v4708_v4  ;;  %v5619_v4 = vld [vmem:[#allocation5 + $0x28] sm:$0xff] }
 0x64a   :  { %5484 = vmatprep.subr.bf16.mxu0 %v11055_v13  ;;  %5525 = vmatprep.subr.bf16.mxu1 %v11057_v12  ;;  %v11087_v36 = vcombine.low %v5615_v30, %v5619_v4  ;;  %v11089_v5 = vcombine.high %v5615_v30, %v5619_v4  ;;  %v12342_v30 = vld [vmem:[#allocation46_spill] sm:$0xff] }
 0x64d   :  { %5485 = vmatpush1.bf16.msra.mxu0 %v11061_v49  ;;  %5526 = vmatpush1.bf16.msra.mxu1 %v11063_v1 }
 0x64e   :  { %5486 = vmatprep.subr.bf16.mxu0 %v11067_v8  ;;  %5527 = vmatprep.subr.bf16.mxu1 %v11069_v62 }
 0x651   :  { %5487 = vmatpush1.bf16.msra.mxu0 %v11073_v23  ;;  %5528 = vmatpush1.bf16.msra.mxu1 %v11075_v21 }
 0x652   :  { %6407 = vmatprep.subr.bf16.mxu0 %v11085_v50  ;;  %6448 = vmatprep.subr.bf16.mxu1 %v11089_v5 }
 0x654   :  { %5489 = vmatmul.mubr.bf16.vlgmr.msra.gmra.mrb[36].mxu0 %v10895_v59  ;;  %5530 = vmatmul.mubr.bf16.vlgmr.msra.gmra.mrb[36].mxu1 %v10895_v59  ;;  %v12339_v59 = vld [vmem:[#allocation42_spill] sm:$0xff] }
 0x655   :  { %6408 = vmatpush1.bf16.msra.mxu0 %v11083_v43  ;;  %6449 = vmatpush1.bf16.msra.mxu1 %v11087_v36 }
 0x656   :  { %6409 = vmatprep.subr.bf16.mxu0 %v10679_v11  ;;  %6450 = vmatprep.subr.bf16.mxu1 %v10685_v61  ;;  %v12310_v11 = vld [vmem:[#allocation10_spill] sm:$0xff]  ;;  %v12313_v61 = vld [vmem:[#allocation12_spill] sm:$0xff] }
 0x659   :  { %6410 = vmatpush1.bf16.msra.mxu0 %v10681_v25  ;;  %6451 = vmatpush1.bf16.msra.mxu1 %v10683_v16  ;;  %v12311_v25 = vld [vmem:[#allocation11_spill] sm:$0xff]  ;;  %v12312_v16 = vld [vmem:[#allocation9_spill] sm:$0xff] }
 0x65a   :  { %6411 = vmatprep.subr.bf16.mxu0 %v10691_v31  ;;  %6452 = vmatprep.subr.bf16.mxu1 %v10697_v3  ;;  %v12314_v31 = vld [vmem:[#allocation14_spill] sm:$0xff]  ;;  %v12317_v3 = vld [vmem:[#allocation16_spill] sm:$0xff] }
 0x65d   :  { %6412 = vmatpush1.bf16.msra.mxu0 %v10693_v40  ;;  %6453 = vmatpush1.bf16.msra.mxu1 %v10695_v44  ;;  %v12315_v40 = vld [vmem:[#allocation15_spill] sm:$0xff]  ;;  %v12316_v44 = vld [vmem:[#allocation13_spill] sm:$0xff] }
 0x65e   :  { %6413 = vmatprep.subr.bf16.mxu0 %v10703_v24  ;;  %6454 = vmatprep.subr.bf16.mxu1 %v10709_v51  ;;  %v12318_v24 = vld [vmem:[#allocation18_spill] sm:$0xff]  ;;  %v12321_v51 = vld [vmem:[#allocation20_spill] sm:$0xff] }
 0x661   :  { %6414 = vmatpush1.bf16.msra.mxu0 %v10705_v29  ;;  %6455 = vmatpush1.bf16.msra.mxu1 %v10707_v41  ;;  %v12319_v29 = vld [vmem:[#allocation19_spill] sm:$0xff]  ;;  %v12320_v41 = vld [vmem:[#allocation17_spill] sm:$0xff] }
 0x662   :  { %6415 = vmatprep.subr.bf16.mxu0 %v10715_v20  ;;  %6456 = vmatprep.subr.bf16.mxu1 %v10721_v6  ;;  %v12322_v20 = vld [vmem:[#allocation22_spill] sm:$0xff]  ;;  %v12325_v6 = vld [vmem:[#allocation24_spill] sm:$0xff] }
 0x665   :  { %6416 = vmatpush1.bf16.msra.mxu0 %v10717_v37  ;;  %6457 = vmatpush1.bf16.msra.mxu1 %v10719_v46  ;;  %v12323_v37 = vld [vmem:[#allocation23_spill] sm:$0xff]  ;;  %v12324_v46 = vld [vmem:[#allocation21_spill] sm:$0xff] }
 0x666   :  { %6417 = vmatprep.subr.bf16.mxu0 %v10727_v10  ;;  %6458 = vmatprep.subr.bf16.mxu1 %v10733_v56  ;;  %v12326_v10 = vld [vmem:[#allocation26_spill] sm:$0xff]  ;;  %v12329_v56 = vld [vmem:[#allocation31_spill] sm:$0xff] }
 0x669   :  { %6418 = vmatpush1.bf16.msra.mxu0 %v10729_v26  ;;  %6459 = vmatpush1.bf16.msra.mxu1 %v10731_v52  ;;  %v12327_v26 = vld [vmem:[#allocation28_spill] sm:$0xff]  ;;  %v12328_v52 = vld [vmem:[#allocation25_spill] sm:$0xff] }
 0x66a   :  { %6419 = vmatprep.subr.bf16.mxu0 %v10739_v28  ;;  %6460 = vmatprep.subr.bf16.mxu1 %v10745_v63  ;;  %v12330_v28 = vld [vmem:[#allocation32_spill] sm:$0xff]  ;;  %v12333_v63 = vld [vmem:[#allocation34_spill] sm:$0xff] }
 0x66d   :  { %6420 = vmatpush1.bf16.msra.mxu0 %v10741_v55  ;;  %6461 = vmatpush1.bf16.msra.mxu1 %v10743_v45  ;;  %v12331_v55 = vld [vmem:[#allocation33_spill] sm:$0xff] }
 0x66e   :  { %6421 = vmatprep.subr.bf16.mxu0 %v10751_v48  ;;  %6462 = vmatprep.subr.bf16.mxu1 %v10757_v38  ;;  %v12332_v45 = vld [vmem:[#allocation29_spill] sm:$0xff]  ;;  %v12334_v48 = vld [vmem:[#allocation36_spill] sm:$0xff]  ;;  %v12337_v38 = vld [vmem:[#allocation38_spill] sm:$0xff] }
 0x671   :  { %6422 = vmatpush1.bf16.msra.mxu0 %v10753_v54  ;;  %6463 = vmatpush1.bf16.msra.mxu1 %v10755_v35  ;;  %v12335_v54 = vld [vmem:[#allocation35_spill] sm:$0xff]  ;;  %v12336_v35 = vld [vmem:[#allocation37_spill] sm:$0xff] }
 0x672   :  { %6423 = vmatprep.subr.bf16.mxu0 %v10763_v33  ;;  %6464 = vmatprep.subr.bf16.mxu1 %v12310_v11  ;;  %v12338_v33 = vld [vmem:[#allocation39_spill] sm:$0xff] }
 0x675   :  { %6424 = vmatpush1.bf16.msra.mxu0 %v12311_v25  ;;  %6465 = vmatpush1.bf16.msra.mxu1 %v12312_v16  ;;  %v12343_v25 = vld [vmem:[#allocation8_spill] sm:$0xff] }
 0x676   :  { %6425 = vmatprep.subr.bf16.mxu0 %v12313_v61  ;;  %6466 = vmatprep.subr.bf16.mxu1 %v12314_v31 }
 0x679   :  { %6426 = vmatpush1.bf16.msra.mxu0 %v12315_v40  ;;  %6467 = vmatpush1.bf16.msra.mxu1 %v12316_v44 }
 0x67a   :  { %6427 = vmatprep.subr.bf16.mxu0 %v12317_v3  ;;  %6468 = vmatprep.subr.bf16.mxu1 %v12318_v24 }
 0x67d   :  { %6428 = vmatpush1.bf16.msra.mxu0 %v12319_v29  ;;  %6469 = vmatpush1.bf16.msra.mxu1 %v12320_v41 }
 0x67e   :  { %6429 = vmatprep.subr.bf16.mxu0 %v12321_v51  ;;  %6470 = vmatprep.subr.bf16.mxu1 %v12322_v20 }
 0x681   :  { %6430 = vmatpush1.bf16.msra.mxu0 %v12323_v37  ;;  %6471 = vmatpush1.bf16.msra.mxu1 %v12324_v46 }
 0x682   :  { %6431 = vmatprep.subr.bf16.mxu0 %v12325_v6  ;;  %6472 = vmatprep.subr.bf16.mxu1 %v12326_v10 }
 0x685   :  { %6432 = vmatpush1.bf16.msra.mxu0 %v12327_v26  ;;  %6473 = vmatpush1.bf16.msra.mxu1 %v12328_v52 }
 0x686   :  { %6433 = vmatprep.subr.bf16.mxu0 %v12329_v56  ;;  %6474 = vmatprep.subr.bf16.mxu1 %v12330_v28 }
 0x689   :  { %6434 = vmatpush1.bf16.msra.mxu0 %v12331_v55  ;;  %6475 = vmatpush1.bf16.msra.mxu1 %v12332_v45 }
 0x68a   :  { %6435 = vmatprep.subr.bf16.mxu0 %v12333_v63  ;;  %6476 = vmatprep.subr.bf16.mxu1 %v12334_v48 }
 0x68d   :  { %6436 = vmatpush1.bf16.msra.mxu0 %v12335_v54  ;;  %6477 = vmatpush1.bf16.msra.mxu1 %v12336_v35 }
 0x68e   :  { %6437 = vmatprep.subr.bf16.mxu0 %v12337_v38  ;;  %6478 = vmatprep.subr.bf16.mxu1 %v12338_v33 }
 0x691   :  { %6438 = vmatpush1.bf16.msra.mxu0 %v12339_v59  ;;  %6479 = vmatpush1.bf16.msra.mxu1 %v12340_v39 }
 0x692   :  { %6489 = vmatprep.subr.bf16.mxu0 %v12341_v47  ;;  %6530 = vmatprep.subr.bf16.mxu1 %v12342_v30  ;;  %v285_v47 = vpop.permute.xlu1 %284 }
 0x693   :  { %v287_v30 = vmul.f32 %v285_v47, %v12007_v58 }
 0x6e7   :  { %v5408_v4 = vpop.f32.mrb[32].mxu0  ;;  %v5449_v11 = vpop.f32.mrb[32].mxu1 }
 0x6e8   :  { %v5538_v16 = vadd.f32 %v5408_v4, %v12343_v25  ;;  %v5410_v61 = vpop.f32.mrb[33].mxu0  ;;  %v5451_v31 = vpop.f32.mrb[33].mxu1  ;;  %v5540_v20 = vadd.f32 %v5449_v11, %v9990_v19  ;;  %v288_v4 = vmul.f32 %v285_v47, %v12008_v0  ;;  %v289_v11 = vmul.f32 %v285_v47, %v12009_v2 }
 0x6e9   :  { %v5539_v40 = vadd.f32 %v5410_v61, %v9986_v9  ;;  %v5412_v44 = vpop.f32.mrb[34].mxu0  ;;  %v5453_v3 = vpop.f32.mrb[34].mxu1  ;;  %v5541_v37 = vadd.f32 %v5451_v31, %v9995_v17  ;;  %v12345_v61 = vld [vmem:[#allocation41_spill] sm:$0xff] }
 0x6ea   :  { %v5542_v24 = vmul.f32 0.5, %v5538_v16  ;;  %v5413_v29 = vpop.f32.mrb[35].mxu0  ;;  %v5454_v41 = vpop.f32.mrb[35].mxu1  ;;  %v12344_v16 = vld [vmem:[#allocation40_spill] sm:$0xff]  ;;  %v291_v31 = vadd.f32 %v287_v30, %v12345_v61  ;;  %v293_v44 = vadd.f32 %v289_v11, %v12180_v7 }
 0x6eb   :  { %v5546_v51 = vmul.f32 0.5, %v5539_v40  ;;  %v5551_v46 = vmul.f32 0.5, %v5541_v37  ;;  %v292_v40 = vadd.f32 %v288_v4, %v12011_v18  ;;  %v12346_v3 = vld [vmem:[#allocation44_spill] sm:$0xff] }
 0x6ec   :  { %9295 = vtanh.f32 %v5542_v24 }
 0x6ed   :  { %9297 = vtanh.f32 %v5546_v51  ;;  %v299_v29 = vcombine.low %v291_v31, %v292_v40 }
 0x6ee   :  { %9299 = vtanh.f32 %v5540_v20 }
 0x6ef   :  { %9301 = vtanh.f32 %v5551_v46 }
 0x6f6   :  { %v9296_v6 = vpop.eup %9295 }
 0x6f7   :  { %v9298_v10 = vpop.eup %9297  ;;  %v5544_v26 = vmul.f32 0.5, %v9296_v6 }
 0x6f8   :  { %v5548_v52 = vmul.f32 0.5, %v9298_v10  ;;  %v9300_v28 = vpop.eup %9299  ;;  %v307_v10 = vrot.slane %v299_v29, %v9701_v60 }
 0x6f9   :  { %v5545_v56 = vadd.f32 0.5, %v5544_v26  ;;  %v9302_v54 = vpop.eup %9301 }
 0x6fa   :  { %v5549_v55 = vadd.f32 0.5, %v5548_v52  ;;  %v5553_v35 = vmul.f32 0.5, %v9302_v54 }
 0x6fb   :  { %v5556_v45 = vmul.f32 %v9300_v28, %v5545_v56 }
 0x6fc   :  { %v5555_v63 = vmul.f32 %v5549_v55, %v10874_v57  ;;  %v5554_v38 = vadd.f32 0.5, %v5553_v35  ;;  %v290_v57 = vmul.f32 %v285_v47, %v12344_v16 }
 0x6fe   :  { %v11162_v48 = vadd.f32 %v5556_v45, %v5555_v63  ;;  %v294_v24 = vadd.f32 %v290_v57, %v12346_v3 }
 0x700   :  { %9303 = vtanh.f32 %v11162_v48  ;;  %v300_v41 = vcombine.low %v293_v44, %v294_v24 }
 0x702   :  { %v314_v26 = vrot.slane %v300_v41, %v9701_v60 }
 0x704   :  { %v315_v35 = vcombine.low %v307_v10, %v314_v26 }
 0x70a   :  { %v9304_v33 = vpop.eup %9303 }
 0x70b   :  { %v5559_v59 = vmul.f32 %v9304_v33, %v5554_v38 }
 0x70d   :  { %v5560_v39 = vpack.c.bf16 %v5559_v59, %v5559_v59 }
 0x70f   :  { %5561 = vst [vmem:[#allocation3 + $0x1] sm:$0x1] %v5560_v39 }
 0x727   :  { %v5490_v51 = vpop.f32.mrb[36].mxu0  ;;  %v5531_v20 = vpop.f32.mrb[36].mxu1 }
 0x728   :  { %v5492_v37 = vpop.f32.mrb[37].mxu0  ;;  %v5533_v46 = vpop.f32.mrb[37].mxu1 }
 0x729   :  { %v5567_v6 = vcombine.low %v5490_v51, %v5492_v37  ;;  %v5568_v52 = vcombine.low %v5531_v20, %v5533_v46  ;;  %v5494_v56 = vpop.f32.mrb[38].mxu0  ;;  %v5535_v28 = vpop.f32.mrb[38].mxu1 }
 0x72a   :  { %v5495_v55 = vpop.f32.mrb[39].mxu0  ;;  %v5536_v45 = vpop.f32.mrb[39].mxu1 }
 0x72b   :  { %v5575_v63 = vrot.slane %v5567_v6, %v9701_v60  ;;  %v5582_v54 = vrot.slane %v5568_v52, %v9701_v60 }
 0x72d   :  { %v5583_v38 = vcombine.low %v5575_v63, %v5582_v54  ;;  %v12348_v54 = vld [vmem:[#allocation47_spill] sm:$0xff] }
 0x72f   :  { %v5585_v33 = vadd.f32 %v5583_v38, %v315_v35  ;;  %v12349_v35 = vld [vmem:[#allocation48_spill] sm:$0xff]  ;;  %v12350_v38 = vld [vmem:[#allocation49_spill] sm:$0xff] }
 0x731   :  { %v5586_v59 = vmul.f32 0.5, %v5585_v33  ;;  %v5591_v39 = vrot.slane %v5585_v33, 2  ;;  %v5597_v30 = vrot.slane %v5585_v33, 4  ;;  %v5600_v4 = vrot.slane %v5585_v33, 6  ;;  %v12351_v33 = vld [vmem:[#allocation50_spill] sm:$0xff] }
 0x733   :  { %9305 = vtanh.f32 %v5586_v59  ;;  %v5593_v47 = vmul.f32 0.5, %v5591_v39  ;;  %v5602_v11 = vmul.f32 0.5, %v5600_v4  ;;  %v12352_v59 = vld [vmem:[#allocation51_spill] sm:$0xff]  ;;  %v12353_v39 = vld [vmem:[#allocation52_spill] sm:$0xff]  ;;  %v12358_v4 = vld [vmem:[#allocation57_spill] sm:$0xff] }
 0x735   :  { %9307 = vtanh.f32 %v5593_v47  ;;  %v12354_v47 = vld [vmem:[#allocation53_spill] sm:$0xff] }
 0x736   :  { %9309 = vtanh.f32 %v5597_v30  ;;  %v12357_v30 = vld [vmem:[#allocation56_spill] sm:$0xff] }
 0x737   :  { %9311 = vtanh.f32 %v5602_v11  ;;  %v12359_v11 = vld [vmem:[#allocation58_spill] sm:$0xff] }
 0x73d   :  { %v9306_v57 = vpop.eup %9305 }
 0x73e   :  { %v5588_v31 = vmul.f32 0.5, %v9306_v57  ;;  %v12360_v57 = vld [vmem:[#allocation59_spill] sm:$0xff] }
 0x73f   :  { %v9308_v40 = vpop.eup %9307 }
 0x740   :  { %v5589_v44 = vadd.f32 0.5, %v5588_v31  ;;  %v5595_v24 = vmul.f32 0.5, %v9308_v40  ;;  %v9310_v41 = vpop.eup %9309  ;;  %v12361_v31 = vld [vmem:[#allocation60_spill] sm:$0xff]  ;;  %v12362_v40 = vld [vmem:[#allocation61_spill] sm:$0xff] }
 0x741   :  { %v9312_v46 = vpop.eup %9311 }
 0x742   :  { %v5596_v29 = vadd.f32 0.5, %v5595_v24  ;;  %v5607_v20 = vmul.f32 %v9310_v41, %v5589_v44  ;;  %v5604_v6 = vmul.f32 0.5, %v9312_v46  ;;  %v12363_v44 = vld [vmem:[#allocation62_spill] sm:$0xff]  ;;  %v12364_v24 = vld [vmem:[#allocation63_spill] sm:$0xff]  ;;  %v12366_v41 = vld [vmem:[#allocation65_spill] sm:$0xff] }
 0x743   :  { %v12369_v46 = vld [vmem:[#allocation68_spill] sm:$0xff] }
 0x744   :  { %v5606_v51 = vmul.f32 %v5596_v29, %v10890_v15  ;;  %v5605_v10 = vadd.f32 0.5, %v5604_v6  ;;  %v12347_v15 = vld [vmem:[#allocation43_spill] sm:$0xff]  ;;  %v12365_v29 = vld [vmem:[#allocation64_spill] sm:$0xff]  ;;  %v12370_v6 = vld [vmem:[#allocation69_spill] sm:$0xff] }
 0x746   :  { %v11178_v37 = vadd.f32 %v5607_v20, %v5606_v51  ;;  %v12367_v51 = vld [vmem:[#allocation66_spill] sm:$0xff]  ;;  %v12368_v20 = vld [vmem:[#allocation67_spill] sm:$0xff] }
 0x748   :  { %9313 = vtanh.f32 %v11178_v37 }
 0x752   :  { %v9314_v26 = vpop.eup %9313 }
 0x753   :  { %v5610_v52 = vmul.f32 %v9314_v26, %v5605_v10  ;;  %v12371_v10 = vld [vmem:[#allocation70_spill] sm:$0xff]  ;;  %v12372_v26 = vld [vmem:[#allocation71_spill] sm:$0xff] }
 0x755   :  { %v5611_v56 = vpack.c.bf16 %v5610_v52, %v5610_v52  ;;  %v12373_v52 = vld [vmem:[#allocation72_spill] sm:$0xff] }
 0x757   :  { %5612 = vst [vmem:[#allocation3] sm:$0x1] %v5611_v56  ;;  %v12374_v56 = vld [vmem:[#allocation73_spill] sm:$0xff] }
 0x75e   :  { %v8872_v28 = vld.sshfl [vmem:[#allocation3] sm:$0x11 pattern:$0x75316420] }
 0x75f   :  { %v5750_v55 = vcombine.high %v8872_v28, %v8872_v28  ;;  %v11183_v63 = vrot.slane %v8872_v28, %v12013_v34  ;;  %v12375_v28 = vld [vmem:[#allocation74_spill] sm:$0xff] }
 0x761   :  { %v5764_v45 = vrot.slane %v5750_v55, %v12013_v34  ;;  %v12376_v55 = vld [vmem:[#allocation75_spill] sm:$0xff] }
 0x763   :  { %6439 = vmatprep.mubr.bf16.mxu0 %v5764_v45  ;;  %6480 = vmatprep.mubr.bf16.mxu1 %v5764_v45 }
 0x764   :  { %6440 = vmatmul.mubr.bf16.vlgmr.msra.gmra.mrb[40].mxu0 %v11183_v63  ;;  %6481 = vmatmul.mubr.bf16.vlgmr.msra.gmra.mrb[40].mxu1 %v11183_v63 }
 0x765   :  { %6490 = vmatpush1.bf16.msra.mxu0 %v10861_v53  ;;  %6531 = vmatpush1.bf16.msra.mxu1 %v10863_v14  ;;  %v12355_v53 = vld [vmem:[#allocation54_spill] sm:$0xff]  ;;  %v12356_v14 = vld [vmem:[#allocation55_spill] sm:$0xff] }
 0x766   :  { %6521 = vmatprep.mubr.bf16.mxu0 %v5764_v45  ;;  %6562 = vmatprep.mubr.bf16.mxu1 %v5764_v45  ;;  %v12377_v45 = vld [vmem:[#allocation76_spill] sm:$0xff] }
 0x767   :  { %6491 = vmatprep.subr.bf16.mxu0 %v12347_v15  ;;  %6532 = vmatprep.subr.bf16.mxu1 %v12348_v54  ;;  %v12378_v15 = vld [vmem:[#allocation77_spill] sm:$0xff]  ;;  %v12379_v54 = vld [vmem:[#allocation78_spill] sm:$0xff] }
 0x769   :  { %6492 = vmatpush1.bf16.msra.mxu0 %v12349_v35  ;;  %6533 = vmatpush1.bf16.msra.mxu1 %v12350_v38  ;;  %v12380_v35 = vld [vmem:[#allocation79_spill] sm:$0xff]  ;;  %v12381_v38 = vld [vmem:[#allocation80_spill] sm:$0xff] }
 0x76a   :  { %6493 = vmatprep.subr.bf16.mxu0 %v12351_v33  ;;  %6534 = vmatprep.subr.bf16.mxu1 %v12352_v59  ;;  %v12382_v33 = vld [vmem:[#allocation81_spill] sm:$0xff]  ;;  %v12383_v59 = vld [vmem:[#allocation82_spill] sm:$0xff] }
 0x76d   :  { %6494 = vmatpush1.bf16.msra.mxu0 %v12353_v39  ;;  %6535 = vmatpush1.bf16.msra.mxu1 %v12354_v47  ;;  %v12384_v39 = vld [vmem:[#allocation83_spill] sm:$0xff]  ;;  %v12385_v47 = vld [vmem:[#allocation84_spill] sm:$0xff] }
 0x76e   :  { %6495 = vmatprep.subr.bf16.mxu0 %v12355_v53  ;;  %6536 = vmatprep.subr.bf16.mxu1 %v12356_v14  ;;  %v12386_v53 = vld [vmem:[#allocation85_spill] sm:$0xff]  ;;  %v12387_v14 = vld [vmem:[#allocation86_spill] sm:$0xff] }
 0x771   :  { %6496 = vmatpush1.bf16.msra.mxu0 %v12357_v30  ;;  %6537 = vmatpush1.bf16.msra.mxu1 %v12358_v4  ;;  %v12388_v30 = vld [vmem:[#allocation87_spill] sm:$0xff]  ;;  %v12389_v4 = vld [vmem:[#allocation88_spill] sm:$0xff] }
 0x772   :  { %6497 = vmatprep.subr.bf16.mxu0 %v12359_v11  ;;  %6538 = vmatprep.subr.bf16.mxu1 %v12360_v57  ;;  %v12390_v11 = vld [vmem:[#allocation89_spill] sm:$0xff]  ;;  %v12391_v57 = vld [vmem:[#allocation90_spill] sm:$0xff] }
 0x775   :  { %6498 = vmatpush1.bf16.msra.mxu0 %v12361_v31  ;;  %6539 = vmatpush1.bf16.msra.mxu1 %v12362_v40  ;;  %v12392_v31 = vld [vmem:[#allocation91_spill] sm:$0xff]  ;;  %v12393_v40 = vld [vmem:[#allocation92_spill] sm:$0xff] }
 0x776   :  { %6499 = vmatprep.subr.bf16.mxu0 %v12363_v44  ;;  %6540 = vmatprep.subr.bf16.mxu1 %v12364_v24  ;;  %v12394_v44 = vld [vmem:[#allocation93_spill] sm:$0xff]  ;;  %v6675_v24 = vld [vmem:[#allocation5 + $0xe0] sm:$0xff] }
 0x779   :  { %6500 = vmatpush1.bf16.msra.mxu0 %v12365_v29  ;;  %6541 = vmatpush1.bf16.msra.mxu1 %v12366_v41  ;;  %v6672_v29 = vld [vmem:[#allocation5 + $0xc8] sm:$0xff] }
 0x77a   :  { %6501 = vmatprep.subr.bf16.mxu0 %v12367_v51  ;;  %6542 = vmatprep.subr.bf16.mxu1 %v12368_v20  ;;  %v6676_v51 = vld [vmem:[#allocation5 + $0xe8] sm:$0xff] }
 0x77d   :  { %6502 = vmatpush1.bf16.msra.mxu0 %v12369_v46  ;;  %6543 = vmatpush1.bf16.msra.mxu1 %v12370_v6  ;;  %v11283_v46 = vcombine.low %v6672_v29, %v6676_v51  ;;  %v11285_v6 = vcombine.high %v6672_v29, %v6676_v51  ;;  %v6712_v29 = vld [vmem:[#allocation5 + $0x208] sm:$0xff] }
 0x77e   :  { %6503 = vmatprep.subr.bf16.mxu0 %v12371_v10  ;;  %6544 = vmatprep.subr.bf16.mxu1 %v12372_v26  ;;  %v6679_v10 = vld [vmem:[#allocation5 + $0x100] sm:$0xff] }
 0x77f   :  { %v6683_v26 = vld [vmem:[#allocation5 + $0x120] sm:$0xff] }
 0x781   :  { %6504 = vmatpush1.bf16.msra.mxu0 %v12373_v52  ;;  %6545 = vmatpush1.bf16.msra.mxu1 %v12374_v56  ;;  %v6680_v52 = vld [vmem:[#allocation5 + $0x108] sm:$0xff]  ;;  %v11291_v56 = vcombine.high %v6679_v10, %v6683_v26 }
 0x782   :  { %6505 = vmatprep.subr.bf16.mxu0 %v12375_v28  ;;  %6546 = vmatprep.subr.bf16.mxu1 %v12376_v55  ;;  %v6684_v28 = vld [vmem:[#allocation5 + $0x128] sm:$0xff]  ;;  %v11293_v55 = vcombine.low %v6679_v10, %v6683_v26 }
 0x783   :  { %v6716_v10 = vld [vmem:[#allocation5 + $0x228] sm:$0xff] }
 0x785   :  { %6506 = vmatpush1.bf16.msra.mxu0 %v12377_v45  ;;  %6547 = vmatpush1.bf16.msra.mxu1 %v12378_v15  ;;  %v11295_v45 = vcombine.low %v6680_v52, %v6684_v28  ;;  %v11297_v15 = vcombine.high %v6680_v52, %v6684_v28  ;;  %v11343_v52 = vcombine.low %v6712_v29, %v6716_v10 }
 0x786   :  { %6507 = vmatprep.subr.bf16.mxu0 %v12379_v54  ;;  %6548 = vmatprep.subr.bf16.mxu1 %v12380_v35  ;;  %v6687_v54 = vld [vmem:[#allocation5 + $0x140] sm:$0xff]  ;;  %v11345_v28 = vcombine.high %v6712_v29, %v6716_v10 }
 0x787   :  { %v6691_v35 = vld [vmem:[#allocation5 + $0x160] sm:$0xff]  ;;  %12398 = vst [vmem:[#allocation12_spill] sm:$0xff] %v11343_v52 }
 0x788   :  { %12399 = vst [vmem:[#allocation14_spill] sm:$0xff] %v11345_v28 }
 0x789   :  { %6508 = vmatpush1.bf16.msra.mxu0 %v12381_v38  ;;  %6549 = vmatpush1.bf16.msra.mxu1 %v12382_v33  ;;  %v6688_v38 = vld [vmem:[#allocation5 + $0x148] sm:$0xff]  ;;  %v11303_v33 = vcombine.high %v6687_v54, %v6691_v35 }
 0x78a   :  { %6509 = vmatprep.subr.bf16.mxu0 %v12383_v59  ;;  %6550 = vmatprep.subr.bf16.mxu1 %v12384_v39  ;;  %v6692_v59 = vld [vmem:[#allocation5 + $0x168] sm:$0xff]  ;;  %v11305_v39 = vcombine.low %v6687_v54, %v6691_v35  ;;  %v6719_v54 = vld [vmem:[#allocation5 + $0x240] sm:$0xff] }
 0x78b   :  { %v6723_v35 = vld [vmem:[#allocation5 + $0x260] sm:$0xff] }
 0x78d   :  { %6510 = vmatpush1.bf16.msra.mxu0 %v12385_v47  ;;  %6551 = vmatpush1.bf16.msra.mxu1 %v12386_v53  ;;  %v11307_v47 = vcombine.low %v6688_v38, %v6692_v59  ;;  %v11309_v53 = vcombine.high %v6688_v38, %v6692_v59  ;;  %v6720_v38 = vld [vmem:[#allocation5 + $0x248] sm:$0xff]  ;;  %v11351_v59 = vcombine.high %v6719_v54, %v6723_v35 }
 0x78e   :  { %6511 = vmatprep.subr.bf16.mxu0 %v12387_v14  ;;  %6552 = vmatprep.subr.bf16.mxu1 %v12388_v30  ;;  %v6695_v14 = vld [vmem:[#allocation5 + $0x180] sm:$0xff] }
 0x78f   :  { %v6699_v30 = vld [vmem:[#allocation5 + $0x1a0] sm:$0xff]  ;;  %12400 = vst [vmem:[#allocation15_spill] sm:$0xff] %v11351_v59 }
 0x791   :  { %6512 = vmatpush1.bf16.msra.mxu0 %v12389_v4  ;;  %6553 = vmatpush1.bf16.msra.mxu1 %v12390_v11  ;;  %v6696_v4 = vld [vmem:[#allocation5 + $0x188] sm:$0xff]  ;;  %v11315_v11 = vcombine.high %v6695_v14, %v6699_v30 }
 0x792   :  { %6513 = vmatprep.subr.bf16.mxu0 %v12391_v57  ;;  %6554 = vmatprep.subr.bf16.mxu1 %v12392_v31  ;;  %v6700_v57 = vld [vmem:[#allocation5 + $0x1a8] sm:$0xff]  ;;  %v11317_v31 = vcombine.low %v6695_v14, %v6699_v30  ;;  %v11353_v30 = vcombine.low %v6719_v54, %v6723_v35  ;;  %v6735_v54 = vld [vmem:[#allocation5 + $0x2c0] sm:$0xff] }
 0x793   :  { %v6724_v14 = vld [vmem:[#allocation5 + $0x268] sm:$0xff]  ;;  %v6739_v35 = vld [vmem:[#allocation5 + $0x2e0] sm:$0xff] }
 0x794   :  { %12401 = vst [vmem:[#allocation13_spill] sm:$0xff] %v11353_v30 }
 0x795   :  { %6514 = vmatpush1.bf16.msra.mxu0 %v11037_v22  ;;  %6555 = vmatpush1.bf16.msra.mxu1 %v11039_v32  ;;  %v6655_v22 = vld [vmem:[#allocation5 + $0x40] sm:$0xff] }
 0x796   :  { %6515 = vmatprep.subr.bf16.mxu0 %v11043_v42  ;;  %6556 = vmatprep.subr.bf16.mxu1 %v12393_v40  ;;  %v6659_v32 = vld [vmem:[#allocation5 + $0x60] sm:$0xff]  ;;  %v6656_v42 = vld [vmem:[#allocation5 + $0x48] sm:$0xff]  ;;  %v11319_v40 = vcombine.low %v6696_v4, %v6700_v57 }
 0x799   :  { %6516 = vmatpush1.bf16.msra.mxu0 %v12394_v44  ;;  %6557 = vmatpush1.bf16.msra.mxu1 %v11051_v27  ;;  %v11255_v27 = vcombine.high %v6655_v22, %v6659_v32  ;;  %v11321_v44 = vcombine.high %v6696_v4, %v6700_v57  ;;  %v11355_v4 = vcombine.low %v6720_v38, %v6724_v14 }
 0x79a   :  { %6517 = vmatprep.subr.bf16.mxu0 %v11055_v13  ;;  %6558 = vmatprep.subr.bf16.mxu1 %v11057_v12  ;;  %v11257_v13 = vcombine.low %v6655_v22, %v6659_v32  ;;  %v6703_v22 = vld [vmem:[#allocation5 + $0x1c0] sm:$0xff]  ;;  %v11357_v57 = vcombine.high %v6720_v38, %v6724_v14  ;;  %v6736_v38 = vld [vmem:[#allocation5 + $0x2c8] sm:$0xff]  ;;  %v11375_v14 = vcombine.high %v6735_v54, %v6739_v35 }
 0x79b   :  { %v6707_v32 = vld [vmem:[#allocation5 + $0x1e0] sm:$0xff]  ;;  %12402 = vst [vmem:[#allocation16_spill] sm:$0xff] %v11355_v4 }
 0x79c   :  { %12403 = vst [vmem:[#allocation18_spill] sm:$0xff] %v11357_v57  ;;  %12408 = vst [vmem:[#allocation23_spill] sm:$0xff] %v11375_v14 }
 0x79d   :  { %6518 = vmatpush1.bf16.msra.mxu0 %v11061_v49  ;;  %6559 = vmatpush1.bf16.msra.mxu1 %v11063_v1  ;;  %v6663_v49 = vld [vmem:[#allocation5 + $0x80] sm:$0xff] }
 0x79e   :  { %6519 = vmatprep.subr.bf16.mxu0 %v11067_v8  ;;  %6560 = vmatprep.subr.bf16.mxu1 %v11069_v62  ;;  %v6667_v1 = vld [vmem:[#allocation5 + $0xa0] sm:$0xff]  ;;  %v6664_v8 = vld [vmem:[#allocation5 + $0x88] sm:$0xff] }
 0x79f   :  { %v11267_v62 = vcombine.high %v6663_v49, %v6667_v1 }
 0x7a1   :  { %6520 = vmatpush1.bf16.msra.mxu0 %v11073_v23  ;;  %6561 = vmatpush1.bf16.msra.mxu1 %v11075_v21  ;;  %v6660_v23 = vld [vmem:[#allocation5 + $0x68] sm:$0xff] }
 0x7a2   :  { %7440 = vmatprep.subr.bf16.mxu0 %v11085_v50  ;;  %7481 = vmatprep.subr.bf16.mxu1 %v11089_v5  ;;  %v11259_v21 = vcombine.low %v6656_v42, %v6660_v23  ;;  %v11261_v12 = vcombine.high %v6656_v42, %v6660_v23  ;;  %v11269_v50 = vcombine.low %v6663_v49, %v6667_v1  ;;  %v6704_v42 = vld [vmem:[#allocation5 + $0x1c8] sm:$0xff] }
 0x7a3   :  { %v11327_v23 = vcombine.high %v6703_v22, %v6707_v32  ;;  %v6708_v49 = vld [vmem:[#allocation5 + $0x1e8] sm:$0xff]  ;;  %v11329_v1 = vcombine.low %v6703_v22, %v6707_v32  ;;  %v6727_v22 = vld [vmem:[#allocation5 + $0x280] sm:$0xff] }
 0x7a4   :  { %6522 = vmatmul.mubr.bf16.vlgmr.msra.gmra.mrb[44].mxu0 %v11183_v63  ;;  %6563 = vmatmul.mubr.bf16.vlgmr.msra.gmra.mrb[44].mxu1 %v11183_v63  ;;  %v6671_v63 = vld [vmem:[#allocation5 + $0xc0] sm:$0xff] }
 0x7a5   :  { %7441 = vmatpush1.bf16.msra.mxu0 %v11083_v43  ;;  %7482 = vmatpush1.bf16.msra.mxu1 %v11087_v36  ;;  %v6668_v43 = vld [vmem:[#allocation5 + $0xa8] sm:$0xff]  ;;  %v11279_v41 = vcombine.high %v6671_v63, %v6675_v24  ;;  %v11281_v20 = vcombine.low %v6671_v63, %v6675_v24  ;;  %v6711_v63 = vld [vmem:[#allocation5 + $0x200] sm:$0xff] }
 0x7a6   :  { %7442 = vmatprep.subr.bf16.mxu0 %v11255_v27  ;;  %7483 = vmatprep.subr.bf16.mxu1 %v11261_v12  ;;  %v11271_v36 = vcombine.low %v6664_v8, %v6668_v43  ;;  %v11273_v5 = vcombine.high %v6664_v8, %v6668_v43  ;;  %v11331_v8 = vcombine.low %v6704_v42, %v6708_v49  ;;  %v6715_v24 = vld [vmem:[#allocation5 + $0x220] sm:$0xff] }
 0x7a7   :  { %v11333_v43 = vcombine.high %v6704_v42, %v6708_v49  ;;  %v11339_v51 = vcombine.high %v6711_v63, %v6715_v24  ;;  %v11341_v26 = vcombine.low %v6711_v63, %v6715_v24  ;;  %v6731_v32 = vld [vmem:[#allocation5 + $0x2a0] sm:$0xff]  ;;  %v6728_v42 = vld [vmem:[#allocation5 + $0x288] sm:$0xff] }
 0x7a8   :  { %12395 = vst [vmem:[#allocation10_spill] sm:$0xff] %v11331_v8  ;;  %v11363_v49 = vcombine.high %v6727_v22, %v6731_v32  ;;  %v6732_v63 = vld [vmem:[#allocation5 + $0x2a8] sm:$0xff]  ;;  %v11365_v24 = vcombine.low %v6727_v22, %v6731_v32  ;;  %v11377_v22 = vcombine.low %v6735_v54, %v6739_v35 }
 0x7a9   :  { %7443 = vmatpush1.bf16.msra.mxu0 %v11257_v13  ;;  %7484 = vmatpush1.bf16.msra.mxu1 %v11259_v21  ;;  %12396 = vst [vmem:[#allocation11_spill] sm:$0xff] %v11339_v51  ;;  %12397 = vst [vmem:[#allocation9_spill] sm:$0xff] %v11341_v26  ;;  %v11367_v29 = vcombine.low %v6728_v42, %v6732_v63  ;;  %v11369_v10 = vcombine.high %v6728_v42, %v6732_v63  ;;  %v6743_v63 = vld [vmem:[#allocation5 + $0x300] sm:$0xff] }
 0x7aa   :  { %7444 = vmatprep.subr.bf16.mxu0 %v11267_v62  ;;  %7485 = vmatprep.subr.bf16.mxu1 %v11273_v5  ;;  %12404 = vst [vmem:[#allocation19_spill] sm:$0xff] %v11363_v49  ;;  %12405 = vst [vmem:[#allocation17_spill] sm:$0xff] %v11365_v24 }
 0x7ab   :  { %12406 = vst [vmem:[#allocation20_spill] sm:$0xff] %v11367_v29  ;;  %12407 = vst [vmem:[#allocation22_spill] sm:$0xff] %v11369_v10 }
 0x7ac   :  { %12409 = vst [vmem:[#allocation21_spill] sm:$0xff] %v11377_v22 }
 0x7ad   :  { %7445 = vmatpush1.bf16.msra.mxu0 %v11269_v50  ;;  %7486 = vmatpush1.bf16.msra.mxu1 %v11271_v36 }
 0x7ae   :  { %7446 = vmatprep.subr.bf16.mxu0 %v11279_v41  ;;  %7487 = vmatprep.subr.bf16.mxu1 %v11285_v6 }
 0x7b1   :  { %7447 = vmatpush1.bf16.msra.mxu0 %v11281_v20  ;;  %7488 = vmatpush1.bf16.msra.mxu1 %v11283_v46 }
 0x7b2   :  { %7448 = vmatprep.subr.bf16.mxu0 %v11291_v56  ;;  %7489 = vmatprep.subr.bf16.mxu1 %v11297_v15 }
 0x7b5   :  { %7449 = vmatpush1.bf16.msra.mxu0 %v11293_v55  ;;  %7490 = vmatpush1.bf16.msra.mxu1 %v11295_v45 }
 0x7b6   :  { %7450 = vmatprep.subr.bf16.mxu0 %v11303_v33  ;;  %7491 = vmatprep.subr.bf16.mxu1 %v11309_v53 }
 0x7b9   :  { %7451 = vmatpush1.bf16.msra.mxu0 %v11305_v39  ;;  %7492 = vmatpush1.bf16.msra.mxu1 %v11307_v47 }
 0x7ba   :  { %7452 = vmatprep.subr.bf16.mxu0 %v11315_v11  ;;  %7493 = vmatprep.subr.bf16.mxu1 %v11321_v44 }
 0x7bd   :  { %7453 = vmatpush1.bf16.msra.mxu0 %v11317_v31  ;;  %7494 = vmatpush1.bf16.msra.mxu1 %v11319_v40 }
 0x7be   :  { %7454 = vmatprep.subr.bf16.mxu0 %v11327_v23  ;;  %7495 = vmatprep.subr.bf16.mxu1 %v11333_v43 }
 0x7c1   :  { %7455 = vmatpush1.bf16.msra.mxu0 %v11329_v1  ;;  %7496 = vmatpush1.bf16.msra.mxu1 %v11331_v8 }
 0x7c2   :  { %7456 = vmatprep.subr.bf16.mxu0 %v11339_v51  ;;  %7497 = vmatprep.subr.bf16.mxu1 %v11345_v28 }
 0x7c5   :  { %7457 = vmatpush1.bf16.msra.mxu0 %v11341_v26  ;;  %7498 = vmatpush1.bf16.msra.mxu1 %v11343_v52 }
 0x7c6   :  { %7458 = vmatprep.subr.bf16.mxu0 %v11351_v59  ;;  %7499 = vmatprep.subr.bf16.mxu1 %v11357_v57  ;;  %v6767_v57 = vld [vmem:[#allocation5 + $0x3c0] sm:$0xff] }
 0x7c7   :  { %v6771_v59 = vld [vmem:[#allocation5 + $0x3e0] sm:$0xff] }
 0x7c9   :  { %7459 = vmatpush1.bf16.msra.mxu0 %v11353_v30  ;;  %7500 = vmatpush1.bf16.msra.mxu1 %v11355_v4  ;;  %v6740_v4 = vld [vmem:[#allocation5 + $0x2e8] sm:$0xff] }
 0x7ca   :  { %7460 = vmatprep.subr.bf16.mxu0 %v11363_v49  ;;  %7501 = vmatprep.subr.bf16.mxu1 %v11369_v10  ;;  %v11379_v32 = vcombine.low %v6736_v38, %v6740_v4  ;;  %v11381_v42 = vcombine.high %v6736_v38, %v6740_v4  ;;  %v6744_v10 = vld [vmem:[#allocation5 + $0x308] sm:$0xff]  ;;  %v6751_v38 = vld [vmem:[#allocation5 + $0x340] sm:$0xff] }
 0x7cb   :  { %v6748_v49 = vld [vmem:[#allocation5 + $0x328] sm:$0xff] }
 0x7cc   :  { %12410 = vst [vmem:[#allocation24_spill] sm:$0xff] %v11379_v32  ;;  %12411 = vst [vmem:[#allocation26_spill] sm:$0xff] %v11381_v42  ;;  %v11391_v35 = vcombine.low %v6744_v10, %v6748_v49  ;;  %v11393_v4 = vcombine.high %v6744_v10, %v6748_v49  ;;  %v6759_v10 = vld [vmem:[#allocation5 + $0x380] sm:$0xff]  ;;  %v6760_v30 = vld [vmem:[#allocation5 + $0x388] sm:$0xff] }
 0x7cd   :  { %7461 = vmatpush1.bf16.msra.mxu0 %v11365_v24  ;;  %7502 = vmatpush1.bf16.msra.mxu1 %v11367_v29  ;;  %v6747_v24 = vld [vmem:[#allocation5 + $0x320] sm:$0xff] }
 0x7ce   :  { %7462 = vmatprep.subr.bf16.mxu0 %v11375_v14  ;;  %7503 = vmatprep.subr.bf16.mxu1 %v11381_v42  ;;  %v11387_v29 = vcombine.high %v6743_v63, %v6747_v24  ;;  %v11389_v54 = vcombine.low %v6743_v63, %v6747_v24  ;;  %12414 = vst [vmem:[#allocation31_spill] sm:$0xff] %v11391_v35  ;;  %12415 = vst [vmem:[#allocation32_spill] sm:$0xff] %v11393_v4  ;;  %v6752_v42 = vld [vmem:[#allocation5 + $0x348] sm:$0xff] }
 0x7cf   :  { %v6756_v14 = vld [vmem:[#allocation5 + $0x368] sm:$0xff] }
 0x7d0   :  { %12412 = vst [vmem:[#allocation28_spill] sm:$0xff] %v11387_v29  ;;  %12413 = vst [vmem:[#allocation25_spill] sm:$0xff] %v11389_v54  ;;  %v11403_v63 = vcombine.low %v6752_v42, %v6756_v14  ;;  %v11405_v49 = vcombine.high %v6752_v42, %v6756_v14  ;;  %v6768_v14 = vld [vmem:[#allocation5 + $0x3c8] sm:$0xff] }
 0x7d1   :  { %7463 = vmatpush1.bf16.msra.mxu0 %v11377_v22  ;;  %7504 = vmatpush1.bf16.msra.mxu1 %v11379_v32  ;;  %v6755_v22 = vld [vmem:[#allocation5 + $0x360] sm:$0xff]  ;;  %v6772_v42 = vld [vmem:[#allocation5 + $0x3e8] sm:$0xff] }
 0x7d2   :  { %7464 = vmatprep.subr.bf16.mxu0 %v11387_v29  ;;  %7505 = vmatprep.subr.bf16.mxu1 %v11393_v4  ;;  %v11399_v32 = vcombine.high %v6751_v38, %v6755_v22  ;;  %v11401_v24 = vcombine.low %v6751_v38, %v6755_v22  ;;  %12418 = vst [vmem:[#allocation34_spill] sm:$0xff] %v11403_v63  ;;  %12419 = vst [vmem:[#allocation36_spill] sm:$0xff] %v11405_v49  ;;  %v6763_v29 = vld [vmem:[#allocation5 + $0x3a0] sm:$0xff]  ;;  %v6764_v4 = vld [vmem:[#allocation5 + $0x3a8] sm:$0xff] }
 0x7d3   :  { %v11412_v22 = vcombine.low %v6759_v10, %v6763_v29  ;;  %v11414_v38 = vcombine.high %v6760_v30, %v6764_v4  ;;  %v11423_v52 = vcombine.high %v6768_v14, %v6772_v42 }
 0x7d4   :  { %12416 = vst [vmem:[#allocation33_spill] sm:$0xff] %v11399_v32  ;;  %12417 = vst [vmem:[#allocation29_spill] sm:$0xff] %v11401_v24 }
 0x7d5   :  { %7465 = vmatpush1.bf16.msra.mxu0 %v11389_v54  ;;  %7506 = vmatpush1.bf16.msra.mxu1 %v11391_v35  ;;  %v11408_v54 = vcombine.high %v6759_v10, %v6763_v29  ;;  %12421 = vst [vmem:[#allocation37_spill] sm:$0xff] %v11412_v22  ;;  %12422 = vst [vmem:[#allocation38_spill] sm:$0xff] %v11414_v38  ;;  %v11420_v35 = vcombine.high %v6767_v57, %v6771_v59 }
 0x7d6   :  { %7466 = vmatprep.subr.bf16.mxu0 %v11399_v32  ;;  %7507 = vmatprep.subr.bf16.mxu1 %v11405_v49  ;;  %v11418_v32 = vcombine.low %v6760_v30, %v6764_v4  ;;  %12425 = vst [vmem:[#allocation27_spill] sm:$0xff] %v11423_v52  ;;  %v11426_v29 = vcombine.low %v6767_v57, %v6771_v59  ;;  %v11434_v30 = vld [vmem:[#allocation5 + $0x10] sm:$0xff]  ;;  %v11443_v57 = vld [vmem:[#allocation5 + $0x38] sm:$0xff] }
 0x7d7   :  { %12420 = vst [vmem:[#allocation35_spill] sm:$0xff] %v11408_v54  ;;  %12424 = vst [vmem:[#allocation42_spill] sm:$0xff] %v11420_v35  ;;  %v11430_v10 = vcombine.low %v6768_v14, %v6772_v42  ;;  %v11436_v4 = vld [vmem:[#allocation5 + $0x30] sm:$0xff] }
 0x7d8   :  { %12423 = vst [vmem:[#allocation39_spill] sm:$0xff] %v11418_v32  ;;  %12426 = vst [vmem:[#allocation30_spill] sm:$0xff] %v11426_v29  ;;  %v9007_v59 = vcombine.high %v11434_v30, %v11436_v4 }
 0x7d9   :  { %7467 = vmatpush1.bf16.msra.mxu0 %v11401_v24  ;;  %7508 = vmatpush1.bf16.msra.mxu1 %v11403_v63  ;;  %12427 = vst [vmem:[#allocation46_spill] sm:$0xff] %v11430_v10 }
 0x7da   :  { %7468 = vmatprep.subr.bf16.mxu0 %v11408_v54  ;;  %7509 = vmatprep.subr.bf16.mxu1 %v11414_v38  ;;  %v11438_v38 = vld [vmem:[#allocation5 + $0x18] sm:$0xff] }
 0x7dd   :  { %7469 = vmatpush1.bf16.msra.mxu0 %v11412_v22  ;;  %7510 = vmatpush1.bf16.msra.mxu1 %v11418_v32 }
 0x7de   :  { %7470 = vmatprep.subr.bf16.mxu0 %v11420_v35  ;;  %7511 = vmatprep.subr.bf16.mxu1 %v11423_v52 }
 0x7e1   :  { %7471 = vmatpush1.bf16.msra.mxu0 %v11426_v29  ;;  %7512 = vmatpush1.bf16.msra.mxu1 %v11430_v10  ;;  %v9009_v29 = vcombine.high %v11438_v38, %v11443_v57 }
 0x7e2   :  { %7522 = vmatprep.subr.bf16.mxu0 %v9007_v59 }
 0x7e3   :  { %7563 = vmatprep.subr.bf16.mxu1 %v9009_v29 }
 0x837   :  { %v6441_v52 = vpop.f32.mrb[40].mxu0  ;;  %v6482_v35 = vpop.f32.mrb[40].mxu1 }
 0x838   :  { %v6571_v10 = vadd.f32 %v6441_v52, %v12343_v25  ;;  %v6443_v32 = vpop.f32.mrb[41].mxu0  ;;  %v6484_v22 = vpop.f32.mrb[41].mxu1  ;;  %v6573_v42 = vadd.f32 %v6482_v35, %v9990_v19 }
 0x839   :  { %v6572_v54 = vadd.f32 %v6443_v32, %v9986_v9  ;;  %v6445_v63 = vpop.f32.mrb[42].mxu0  ;;  %v6486_v24 = vpop.f32.mrb[42].mxu1  ;;  %v6574_v29 = vadd.f32 %v6484_v22, %v9995_v17 }
 0x83a   :  { %v6575_v49 = vmul.f32 0.5, %v6571_v10  ;;  %v6446_v14 = vpop.f32.mrb[43].mxu0  ;;  %v6487_v26 = vpop.f32.mrb[43].mxu1 }
 0x83b   :  { %v6579_v28 = vmul.f32 0.5, %v6572_v54  ;;  %v6584_v59 = vmul.f32 0.5, %v6574_v29 }
 0x83c   :  { %9315 = vtanh.f32 %v6575_v49 }
 0x83d   :  { %9317 = vtanh.f32 %v6579_v28 }
 0x83e   :  { %9319 = vtanh.f32 %v6573_v42 }
 0x83f   :  { %9321 = vtanh.f32 %v6584_v59 }
 0x846   :  { %v9316_v51 = vpop.eup %9315 }
 0x847   :  { %v9318_v52 = vpop.eup %9317  ;;  %v6577_v25 = vmul.f32 0.5, %v9316_v51  ;;  %v324_v51 = vpop.permute.xlu0 %323 }
 0x848   :  { %v6581_v8 = vmul.f32 0.5, %v9318_v52  ;;  %v9320_v63 = vpop.eup %9319  ;;  %v326_v29 = vmul.f32 %v324_v51, %v12007_v58 }
 0x849   :  { %v6578_v32 = vadd.f32 0.5, %v6577_v25  ;;  %v9322_v28 = vpop.eup %9321  ;;  %v327_v25 = vmul.f32 %v324_v51, %v12008_v0 }
 0x84a   :  { %v6582_v24 = vadd.f32 0.5, %v6581_v8  ;;  %v6586_v35 = vmul.f32 0.5, %v9322_v28  ;;  %v328_v8 = vmul.f32 %v324_v51, %v12009_v2  ;;  %v330_v59 = vadd.f32 %v326_v29, %v12345_v61 }
 0x84b   :  { %v6589_v10 = vmul.f32 %v9320_v63, %v6578_v32  ;;  %v331_v52 = vadd.f32 %v327_v25, %v12011_v18 }
 0x84c   :  { %v6588_v26 = vmul.f32 %v6582_v24, %v11162_v48  ;;  %v6587_v49 = vadd.f32 0.5, %v6586_v35  ;;  %v329_v48 = vmul.f32 %v324_v51, %v12344_v16  ;;  %v332_v32 = vadd.f32 %v328_v8, %v12180_v7 }
 0x84d   :  { %v338_v24 = vcombine.low %v330_v59, %v331_v52 }
 0x84e   :  { %v11456_v54 = vadd.f32 %v6589_v10, %v6588_v26  ;;  %v333_v63 = vadd.f32 %v329_v48, %v12346_v3 }
 0x850   :  { %9323 = vtanh.f32 %v11456_v54  ;;  %v339_v10 = vcombine.low %v332_v32, %v333_v63 }
 0x85a   :  { %v9324_v22 = vpop.eup %9323 }
 0x85b   :  { %v6592_v14 = vmul.f32 %v9324_v22, %v6587_v49 }
 0x85d   :  { %v6593_v42 = vpack.c.bf16 %v6592_v14, %v6592_v14  ;;  %v346_v14 = vrot.slane %v338_v24, %v9701_v60 }
 0x85f   :  { %6594 = vst [vmem:[#allocation3 + $0x1] sm:$0x1] %v6593_v42  ;;  %v353_v42 = vrot.slane %v339_v10, %v9701_v60 }
 0x861   :  { %v354_v59 = vcombine.low %v346_v14, %v353_v42 }
 0x877   :  { %v6523_v26 = vpop.f32.mrb[44].mxu0  ;;  %v6564_v28 = vpop.f32.mrb[44].mxu1 }
 0x878   :  { %v6525_v35 = vpop.f32.mrb[45].mxu0  ;;  %v6566_v49 = vpop.f32.mrb[45].mxu1 }
 0x879   :  { %v6600_v22 = vcombine.low %v6523_v26, %v6525_v35  ;;  %v6601_v51 = vcombine.low %v6564_v28, %v6566_v49  ;;  %v6527_v16 = vpop.f32.mrb[46].mxu0  ;;  %v6568_v29 = vpop.f32.mrb[46].mxu1 }
 0x87a   :  { %v6528_v61 = vpop.f32.mrb[47].mxu0  ;;  %v6569_v25 = vpop.f32.mrb[47].mxu1 }
 0x87b   :  { %v6608_v8 = vrot.slane %v6600_v22, %v9701_v60  ;;  %v6615_v48 = vrot.slane %v6601_v51, %v9701_v60 }
 0x87d   :  { %v6616_v52 = vcombine.low %v6608_v8, %v6615_v48 }
 0x87f   :  { %v6618_v32 = vadd.f32 %v6616_v52, %v354_v59 }
 0x881   :  { %v6619_v63 = vmul.f32 0.5, %v6618_v32  ;;  %v6624_v3 = vrot.slane %v6618_v32, 2  ;;  %v6630_v24 = vrot.slane %v6618_v32, 4  ;;  %v6633_v35 = vrot.slane %v6618_v32, 6 }
 0x883   :  { %9325 = vtanh.f32 %v6619_v63  ;;  %v6626_v26 = vmul.f32 0.5, %v6624_v3  ;;  %v6635_v10 = vmul.f32 0.5, %v6633_v35  ;;  %v6661_v35 = vld [vmem:[#allocation5 + $0x70] sm:$0xff] }
 0x885   :  { %9327 = vtanh.f32 %v6626_v26 }
 0x886   :  { %9329 = vtanh.f32 %v6630_v24  ;;  %v6657_v24 = vld [vmem:[#allocation5 + $0x50] sm:$0xff] }
 0x887   :  { %9331 = vtanh.f32 %v6635_v10  ;;  %v6658_v10 = vld [vmem:[#allocation5 + $0x58] sm:$0xff] }
 0x88d   :  { %v9326_v16 = vpop.eup %9325 }
 0x88e   :  { %v6621_v28 = vmul.f32 0.5, %v9326_v16  ;;  %v6662_v16 = vld [vmem:[#allocation5 + $0x78] sm:$0xff] }
 0x88f   :  { %v9328_v61 = vpop.eup %9327 }
 0x890   :  { %v6622_v49 = vadd.f32 0.5, %v6621_v28  ;;  %v6628_v29 = vmul.f32 0.5, %v9328_v61  ;;  %v9330_v51 = vpop.eup %9329  ;;  %v6665_v61 = vld [vmem:[#allocation5 + $0x90] sm:$0xff] }
 0x891   :  { %v9332_v3 = vpop.eup %9331 }
 0x892   :  { %v6629_v22 = vadd.f32 0.5, %v6628_v29  ;;  %v6640_v42 = vmul.f32 %v9330_v51, %v6622_v49  ;;  %v6637_v8 = vmul.f32 0.5, %v9332_v3  ;;  %v9015_v49 = vcombine.high %v6657_v24, %v6661_v35  ;;  %v6666_v51 = vld [vmem:[#allocation5 + $0x98] sm:$0xff] }
 0x893   :  { %v9017_v29 = vcombine.high %v6658_v10, %v6662_v16  ;;  %v12429_v3 = vcombine.low %v11438_v38, %v11443_v57 }
 0x894   :  { %v6639_v14 = vmul.f32 %v6629_v22, %v11178_v37  ;;  %v6638_v48 = vadd.f32 0.5, %v6637_v8  ;;  %v6669_v22 = vld [vmem:[#allocation5 + $0xb0] sm:$0xff]  ;;  %v9014_v8 = vcombine.low %v6657_v24, %v6661_v35 }
 0x895   :  { %v6681_v24 = vld [vmem:[#allocation5 + $0x110] sm:$0xff] }
 0x896   :  { %v11472_v25 = vadd.f32 %v6640_v42, %v6639_v14  ;;  %v6670_v14 = vld [vmem:[#allocation5 + $0xb8] sm:$0xff]  ;;  %v12428_v42 = vcombine.low %v11434_v30, %v11436_v4  ;;  %v9022_v30 = vcombine.low %v6665_v61, %v6669_v22  ;;  %v6685_v35 = vld [vmem:[#allocation5 + $0x130] sm:$0xff] }
 0x897   :  { %v9024_v4 = vcombine.low %v6666_v51, %v6670_v14 }
 0x898   :  { %9333 = vtanh.f32 %v11472_v25 }
 0x8a2   :  { %v9334_v59 = vpop.eup %9333 }
 0x8a3   :  { %v6643_v52 = vmul.f32 %v9334_v59, %v6638_v48  ;;  %v9016_v48 = vcombine.low %v6658_v10, %v6662_v16  ;;  %v9023_v59 = vcombine.high %v6665_v61, %v6669_v22  ;;  %v6682_v10 = vld [vmem:[#allocation5 + $0x118] sm:$0xff] }
 0x8a4   :  { %v6686_v16 = vld [vmem:[#allocation5 + $0x138] sm:$0xff] }
 0x8a5   :  { %v6644_v32 = vpack.c.bf16 %v6643_v52, %v6643_v52  ;;  %v9025_v52 = vcombine.high %v6666_v51, %v6670_v14  ;;  %v6690_v61 = vld [vmem:[#allocation5 + $0x158] sm:$0xff]  ;;  %v9038_v51 = vcombine.low %v6681_v24, %v6685_v35  ;;  %v9040_v14 = vcombine.low %v6682_v10, %v6686_v16 }
 0x8a6   :  { %v6694_v22 = vld [vmem:[#allocation5 + $0x178] sm:$0xff] }
 0x8a7   :  { %6645 = vst [vmem:[#allocation3] sm:$0x1] %v6644_v32  ;;  %v6673_v32 = vld [vmem:[#allocation5 + $0xd0] sm:$0xff] }
 0x8ae   :  { %v9001_v63 = vld.sshfl [vmem:[#allocation3] sm:$0x11 pattern:$0x75316420] }
 0x8af   :  { %v6783_v26 = vcombine.high %v9001_v63, %v9001_v63  ;;  %v11477_v28 = vrot.slane %v9001_v63, %v12013_v34  ;;  %v6677_v63 = vld [vmem:[#allocation5 + $0xf0] sm:$0xff] }
 0x8b0   :  { %v9031_v38 = vcombine.high %v6673_v32, %v6677_v63 }
 0x8b1   :  { %v6797_v37 = vrot.slane %v6783_v26, %v12013_v34  ;;  %v6674_v26 = vld [vmem:[#allocation5 + $0xd8] sm:$0xff] }
 0x8b2   :  { %v6678_v34 = vld [vmem:[#allocation5 + $0xf8] sm:$0xff] }
 0x8b3   :  { %7472 = vmatprep.mubr.bf16.mxu0 %v6797_v37  ;;  %7513 = vmatprep.mubr.bf16.mxu1 %v6797_v37  ;;  %v9033_v57 = vcombine.high %v6674_v26, %v6678_v34 }
 0x8b4   :  { %7473 = vmatmul.mubr.bf16.vlgmr.msra.gmra.mrb[48].mxu0 %v11477_v28  ;;  %7514 = vmatmul.mubr.bf16.vlgmr.msra.gmra.mrb[48].mxu1 %v11477_v28 }
 0x8b5   :  { %7523 = vmatpush1.bf16.msra.mxu0 %v12428_v42  ;;  %7564 = vmatpush1.bf16.msra.mxu1 %v12429_v3  ;;  %v9041_v42 = vcombine.high %v6682_v10, %v6686_v16  ;;  %v6689_v3 = vld [vmem:[#allocation5 + $0x150] sm:$0xff] }
 0x8b6   :  { %7554 = vmatprep.mubr.bf16.mxu0 %v6797_v37  ;;  %7595 = vmatprep.mubr.bf16.mxu1 %v6797_v37  ;;  %v9030_v37 = vcombine.low %v6673_v32, %v6677_v63  ;;  %v6698_v32 = vld [vmem:[#allocation5 + $0x198] sm:$0xff] }
 0x8b7   :  { %7524 = vmatprep.subr.bf16.mxu0 %v9015_v49  ;;  %7565 = vmatprep.subr.bf16.mxu1 %v9017_v29  ;;  %v9032_v49 = vcombine.low %v6674_v26, %v6678_v34  ;;  %v9039_v29 = vcombine.high %v6681_v24, %v6685_v35  ;;  %v6702_v34 = vld [vmem:[#allocation5 + $0x1b8] sm:$0xff]  ;;  %v9048_v26 = vcombine.low %v6690_v61, %v6694_v22 }
 0x8b8   :  { %v6706_v24 = vld [vmem:[#allocation5 + $0x1d8] sm:$0xff]  ;;  %v9056_v16 = vcombine.low %v6698_v32, %v6702_v34 }
 0x8b9   :  { %7525 = vmatpush1.bf16.msra.mxu0 %v9014_v8  ;;  %7566 = vmatpush1.bf16.msra.mxu1 %v9016_v48  ;;  %v6693_v8 = vld [vmem:[#allocation5 + $0x170] sm:$0xff]  ;;  %v6710_v35 = vld [vmem:[#allocation5 + $0x1f8] sm:$0xff] }
 0x8ba   :  { %7526 = vmatprep.subr.bf16.mxu0 %v9023_v59  ;;  %7567 = vmatprep.subr.bf16.mxu1 %v9025_v52  ;;  %v9047_v48 = vcombine.high %v6689_v3, %v6693_v8  ;;  %v9049_v59 = vcombine.high %v6690_v61, %v6694_v22  ;;  %v6697_v52 = vld [vmem:[#allocation5 + $0x190] sm:$0xff]  ;;  %v9046_v63 = vcombine.low %v6689_v3, %v6693_v8  ;;  %v6714_v3 = vld [vmem:[#allocation5 + $0x218] sm:$0xff] }
 0x8bb   :  { %v6718_v8 = vld [vmem:[#allocation5 + $0x238] sm:$0xff]  ;;  %v9064_v22 = vcombine.low %v6706_v24, %v6710_v35 }
 0x8bd   :  { %7527 = vmatpush1.bf16.msra.mxu0 %v9022_v30  ;;  %7568 = vmatpush1.bf16.msra.mxu1 %v9024_v4  ;;  %v6701_v30 = vld [vmem:[#allocation5 + $0x1b0] sm:$0xff] }
 0x8be   :  { %7528 = vmatprep.subr.bf16.mxu0 %v9031_v38  ;;  %7569 = vmatprep.subr.bf16.mxu1 %v9033_v57  ;;  %v9055_v4 = vcombine.high %v6697_v52, %v6701_v30  ;;  %v9057_v38 = vcombine.high %v6698_v32, %v6702_v34  ;;  %v6705_v57 = vld [vmem:[#allocation5 + $0x1d0] sm:$0xff]  ;;  %v9054_v10 = vcombine.low %v6697_v52, %v6701_v30  ;;  %v6722_v52 = vld [vmem:[#allocation5 + $0x258] sm:$0xff] }
 0x8bf   :  { %v6726_v30 = vld [vmem:[#allocation5 + $0x278] sm:$0xff]  ;;  %v9072_v34 = vcombine.low %v6714_v3, %v6718_v8 }
 0x8c1   :  { %7529 = vmatpush1.bf16.msra.mxu0 %v9030_v37  ;;  %7570 = vmatpush1.bf16.msra.mxu1 %v9032_v49  ;;  %v6709_v37 = vld [vmem:[#allocation5 + $0x1f0] sm:$0xff] }
 0x8c2   :  { %7530 = vmatprep.subr.bf16.mxu0 %v9039_v29  ;;  %7571 = vmatprep.subr.bf16.mxu1 %v9041_v42  ;;  %v9063_v49 = vcombine.high %v6705_v57, %v6709_v37  ;;  %v9065_v29 = vcombine.high %v6706_v24, %v6710_v35  ;;  %v6713_v42 = vld [vmem:[#allocation5 + $0x210] sm:$0xff]  ;;  %v9062_v61 = vcombine.low %v6705_v57, %v6709_v37  ;;  %v6730_v57 = vld [vmem:[#allocation5 + $0x298] sm:$0xff] }
 0x8c3   :  { %v6734_v37 = vld [vmem:[#allocation5 + $0x2b8] sm:$0xff]  ;;  %v9080_v35 = vcombine.low %v6722_v52, %v6726_v30 }
 0x8c5   :  { %7531 = vmatpush1.bf16.msra.mxu0 %v9038_v51  ;;  %7572 = vmatpush1.bf16.msra.mxu1 %v9040_v14  ;;  %v6717_v51 = vld [vmem:[#allocation5 + $0x230] sm:$0xff] }
 0x8c6   :  { %7532 = vmatprep.subr.bf16.mxu0 %v9047_v48  ;;  %7573 = vmatprep.subr.bf16.mxu1 %v9049_v59  ;;  %v9071_v14 = vcombine.high %v6713_v42, %v6717_v51  ;;  %v9073_v48 = vcombine.high %v6714_v3, %v6718_v8  ;;  %v6721_v59 = vld [vmem:[#allocation5 + $0x250] sm:$0xff]  ;;  %v9070_v32 = vcombine.low %v6713_v42, %v6717_v51  ;;  %v6738_v42 = vld [vmem:[#allocation5 + $0x2d8] sm:$0xff] }
 0x8c7   :  { %v6742_v51 = vld [vmem:[#allocation5 + $0x2f8] sm:$0xff]  ;;  %v9088_v8 = vcombine.low %v6730_v57, %v6734_v37 }
 0x8c9   :  { %7533 = vmatpush1.bf16.msra.mxu0 %v9046_v63  ;;  %7574 = vmatpush1.bf16.msra.mxu1 %v9048_v26  ;;  %v6725_v63 = vld [vmem:[#allocation5 + $0x270] sm:$0xff] }
 0x8ca   :  { %7534 = vmatprep.subr.bf16.mxu0 %v9055_v4  ;;  %7575 = vmatprep.subr.bf16.mxu1 %v9057_v38  ;;  %v9079_v26 = vcombine.high %v6721_v59, %v6725_v63  ;;  %v9081_v4 = vcombine.high %v6722_v52, %v6726_v30  ;;  %v6729_v38 = vld [vmem:[#allocation5 + $0x290] sm:$0xff]  ;;  %v9078_v24 = vcombine.low %v6721_v59, %v6725_v63  ;;  %v6746_v59 = vld [vmem:[#allocation5 + $0x318] sm:$0xff] }
 0x8cb   :  { %v6750_v63 = vld [vmem:[#allocation5 + $0x338] sm:$0xff]  ;;  %v9096_v30 = vcombine.low %v6738_v42, %v6742_v51 }
 0x8cd   :  { %7535 = vmatpush1.bf16.msra.mxu0 %v9054_v10  ;;  %7576 = vmatpush1.bf16.msra.mxu1 %v9056_v16  ;;  %v6733_v10 = vld [vmem:[#allocation5 + $0x2b0] sm:$0xff] }
 0x8ce   :  { %7536 = vmatprep.subr.bf16.mxu0 %v9063_v49  ;;  %7577 = vmatprep.subr.bf16.mxu1 %v9065_v29  ;;  %v9087_v16 = vcombine.high %v6729_v38, %v6733_v10  ;;  %v9089_v49 = vcombine.high %v6730_v57, %v6734_v37  ;;  %v6737_v29 = vld [vmem:[#allocation5 + $0x2d0] sm:$0xff]  ;;  %v9086_v3 = vcombine.low %v6729_v38, %v6733_v10  ;;  %v6754_v38 = vld [vmem:[#allocation5 + $0x358] sm:$0xff] }
 0x8cf   :  { %v6758_v10 = vld [vmem:[#allocation5 + $0x378] sm:$0xff]  ;;  %v9104_v37 = vcombine.low %v6746_v59, %v6750_v63 }
 0x8d1   :  { %7537 = vmatpush1.bf16.msra.mxu0 %v9062_v61  ;;  %7578 = vmatpush1.bf16.msra.mxu1 %v9064_v22  ;;  %v6741_v61 = vld [vmem:[#allocation5 + $0x2f0] sm:$0xff] }
 0x8d2   :  { %7538 = vmatprep.subr.bf16.mxu0 %v9071_v14  ;;  %7579 = vmatprep.subr.bf16.mxu1 %v9073_v48  ;;  %v9095_v22 = vcombine.high %v6737_v29, %v6741_v61  ;;  %v9097_v14 = vcombine.high %v6738_v42, %v6742_v51  ;;  %v6745_v48 = vld [vmem:[#allocation5 + $0x310] sm:$0xff]  ;;  %v9094_v52 = vcombine.low %v6737_v29, %v6741_v61  ;;  %v6762_v29 = vld [vmem:[#allocation5 + $0x398] sm:$0xff] }
 0x8d3   :  { %v6766_v61 = vld [vmem:[#allocation5 + $0x3b8] sm:$0xff]  ;;  %v9112_v51 = vcombine.low %v6754_v38, %v6758_v10 }
 0x8d5   :  { %7539 = vmatpush1.bf16.msra.mxu0 %v9070_v32  ;;  %7580 = vmatpush1.bf16.msra.mxu1 %v9072_v34  ;;  %v6749_v32 = vld [vmem:[#allocation5 + $0x330] sm:$0xff] }
 0x8d6   :  { %7540 = vmatprep.subr.bf16.mxu0 %v9079_v26  ;;  %7581 = vmatprep.subr.bf16.mxu1 %v9081_v4  ;;  %v9103_v34 = vcombine.high %v6745_v48, %v6749_v32  ;;  %v9105_v26 = vcombine.high %v6746_v59, %v6750_v63  ;;  %v6753_v4 = vld [vmem:[#allocation5 + $0x350] sm:$0xff]  ;;  %v9102_v57 = vcombine.low %v6745_v48, %v6749_v32  ;;  %v6770_v48 = vld [vmem:[#allocation5 + $0x3d8] sm:$0xff] }
 0x8d7   :  { %v6774_v32 = vld [vmem:[#allocation5 + $0x3f8] sm:$0xff]  ;;  %v9120_v63 = vcombine.low %v6762_v29, %v6766_v61 }
 0x8d9   :  { %7541 = vmatpush1.bf16.msra.mxu0 %v9078_v24  ;;  %7582 = vmatpush1.bf16.msra.mxu1 %v9080_v35  ;;  %v6757_v24 = vld [vmem:[#allocation5 + $0x370] sm:$0xff] }
 0x8da   :  { %7542 = vmatprep.subr.bf16.mxu0 %v9087_v16  ;;  %7583 = vmatprep.subr.bf16.mxu1 %v9089_v49  ;;  %v9111_v35 = vcombine.high %v6753_v4, %v6757_v24  ;;  %v9113_v16 = vcombine.high %v6754_v38, %v6758_v10  ;;  %v6761_v49 = vld [vmem:[#allocation5 + $0x390] sm:$0xff]  ;;  %v9110_v42 = vcombine.low %v6753_v4, %v6757_v24  ;;  %v7680_v24 = vld [vmem:[#allocation5] sm:$0xff]  ;;  %v7681_v10 = vld [vmem:[#allocation5 + $0x8] sm:$0xff] }
 0x8db   :  { %v9128_v4 = vcombine.low %v6770_v48, %v6774_v32  ;;  %v7682_v38 = vld [vmem:[#allocation5 + $0x20] sm:$0xff] }
 0x8dd   :  { %7543 = vmatpush1.bf16.msra.mxu0 %v9086_v3  ;;  %7584 = vmatpush1.bf16.msra.mxu1 %v9088_v8  ;;  %v6765_v3 = vld [vmem:[#allocation5 + $0x3b0] sm:$0xff] }
 0x8de   :  { %7544 = vmatprep.subr.bf16.mxu0 %v9095_v22  ;;  %7585 = vmatprep.subr.bf16.mxu1 %v9097_v14  ;;  %v9119_v8 = vcombine.high %v6761_v49, %v6765_v3  ;;  %v9121_v22 = vcombine.high %v6762_v29, %v6766_v61  ;;  %v6769_v14 = vld [vmem:[#allocation5 + $0x3d0] sm:$0xff]  ;;  %v9118_v59 = vcombine.low %v6761_v49, %v6765_v3  ;;  %v12458_v3 = vld [vmem:[#allocation39_spill] sm:$0xff] }
 0x8df   :  { %v12459_v29 = vld [vmem:[#allocation42_spill] sm:$0xff]  ;;  %v12460_v61 = vld [vmem:[#allocation27_spill] sm:$0xff] }
 0x8e1   :  { %7545 = vmatpush1.bf16.msra.mxu0 %v9094_v52  ;;  %7586 = vmatpush1.bf16.msra.mxu1 %v9096_v30  ;;  %v6773_v52 = vld [vmem:[#allocation5 + $0x3f0] sm:$0xff] }
 0x8e2   :  { %7546 = vmatprep.subr.bf16.mxu0 %v9103_v34  ;;  %7587 = vmatprep.subr.bf16.mxu1 %v9105_v26  ;;  %v9127_v30 = vcombine.high %v6769_v14, %v6773_v52  ;;  %v9129_v34 = vcombine.high %v6770_v48, %v6774_v32  ;;  %v9126_v26 = vcombine.low %v6769_v14, %v6773_v52  ;;  %v12463_v14 = vld [vmem:[#allocation8_spill] sm:$0xff] }
 0x8e5   :  { %7547 = vmatpush1.bf16.msra.mxu0 %v9102_v57  ;;  %7588 = vmatpush1.bf16.msra.mxu1 %v9104_v37  ;;  %v9131_v57 = vcombine.low %v7680_v24, %v7682_v38  ;;  %v9132_v37 = vcombine.high %v7680_v24, %v7682_v38 }
 0x8e6   :  { %7548 = vmatprep.subr.bf16.mxu0 %v9111_v35  ;;  %7589 = vmatprep.subr.bf16.mxu1 %v9113_v16  ;;  %v7683_v35 = vld [vmem:[#allocation5 + $0x28] sm:$0xff] }
 0x8e7   :  { %v9133_v16 = vcombine.low %v7681_v10, %v7683_v35  ;;  %v9134_v49 = vcombine.high %v7681_v10, %v7683_v35 }
 0x8e9   :  { %7549 = vmatpush1.bf16.msra.mxu0 %v9110_v42  ;;  %7590 = vmatpush1.bf16.msra.mxu1 %v9112_v51  ;;  %v12461_v42 = vld [vmem:[#allocation30_spill] sm:$0xff] }
 0x8ea   :  { %7550 = vmatprep.subr.bf16.mxu0 %v9119_v8  ;;  %7591 = vmatprep.subr.bf16.mxu1 %v9121_v22  ;;  %v12462_v51 = vld [vmem:[#allocation46_spill] sm:$0xff] }
 0x8ed   :  { %7551 = vmatpush1.bf16.msra.mxu0 %v9118_v59  ;;  %7592 = vmatpush1.bf16.msra.mxu1 %v9120_v63 }
 0x8ee   :  { %7552 = vmatprep.subr.bf16.mxu0 %v9127_v30  ;;  %7593 = vmatprep.subr.bf16.mxu1 %v9129_v34 }
 0x8f1   :  { %7553 = vmatpush1.bf16.msra.mxu0 %v9126_v26  ;;  %7594 = vmatpush1.bf16.msra.mxu1 %v9128_v4 }
 0x8f2   :  { %8089 = vmatprep.subr.bf16.mxu0 %v9132_v37  ;;  %8130 = vmatprep.subr.bf16.mxu1 %v9134_v49 }
 0x8f4   :  { %7555 = vmatmul.mubr.bf16.vlgmr.msra.gmra.mrb[52].mxu0 %v11477_v28  ;;  %7596 = vmatmul.mubr.bf16.vlgmr.msra.gmra.mrb[52].mxu1 %v11477_v28  ;;  %v12457_v28 = vld [vmem:[#allocation37_spill] sm:$0xff] }
 0x8f5   :  { %8090 = vmatpush1.bf16.msra.mxu0 %v9131_v57  ;;  %8131 = vmatpush1.bf16.msra.mxu1 %v9133_v16 }
 0x8f6   :  { %8091 = vmatprep.subr.bf16.mxu0 %v11255_v27  ;;  %8132 = vmatprep.subr.bf16.mxu1 %v11261_v12  ;;  %v12430_v27 = vld [vmem:[#allocation10_spill] sm:$0xff]  ;;  %v12433_v12 = vld [vmem:[#allocation9_spill] sm:$0xff] }
 0x8f9   :  { %8092 = vmatpush1.bf16.msra.mxu0 %v11257_v13  ;;  %8133 = vmatpush1.bf16.msra.mxu1 %v11259_v21  ;;  %v12431_v13 = vld [vmem:[#allocation11_spill] sm:$0xff]  ;;  %v12432_v21 = vld [vmem:[#allocation14_spill] sm:$0xff] }
 0x8fa   :  { %8093 = vmatprep.subr.bf16.mxu0 %v11267_v62  ;;  %8134 = vmatprep.subr.bf16.mxu1 %v11273_v5  ;;  %v12434_v62 = vld [vmem:[#allocation12_spill] sm:$0xff]  ;;  %v12437_v5 = vld [vmem:[#allocation13_spill] sm:$0xff] }
 0x8fd   :  { %8094 = vmatpush1.bf16.msra.mxu0 %v11269_v50  ;;  %8135 = vmatpush1.bf16.msra.mxu1 %v11271_v36  ;;  %v12435_v50 = vld [vmem:[#allocation15_spill] sm:$0xff]  ;;  %v12436_v36 = vld [vmem:[#allocation18_spill] sm:$0xff] }
 0x8fe   :  { %8095 = vmatprep.subr.bf16.mxu0 %v11279_v41  ;;  %8136 = vmatprep.subr.bf16.mxu1 %v11285_v6  ;;  %v12438_v41 = vld [vmem:[#allocation16_spill] sm:$0xff]  ;;  %v12441_v6 = vld [vmem:[#allocation17_spill] sm:$0xff] }
 0x901   :  { %8096 = vmatpush1.bf16.msra.mxu0 %v11281_v20  ;;  %8137 = vmatpush1.bf16.msra.mxu1 %v11283_v46  ;;  %v12439_v20 = vld [vmem:[#allocation19_spill] sm:$0xff]  ;;  %v12440_v46 = vld [vmem:[#allocation22_spill] sm:$0xff] }
 0x902   :  { %8097 = vmatprep.subr.bf16.mxu0 %v11291_v56  ;;  %8138 = vmatprep.subr.bf16.mxu1 %v11297_v15  ;;  %v12442_v56 = vld [vmem:[#allocation20_spill] sm:$0xff]  ;;  %v12445_v15 = vld [vmem:[#allocation21_spill] sm:$0xff] }
 0x905   :  { %8098 = vmatpush1.bf16.msra.mxu0 %v11293_v55  ;;  %8139 = vmatpush1.bf16.msra.mxu1 %v11295_v45  ;;  %v12443_v55 = vld [vmem:[#allocation23_spill] sm:$0xff]  ;;  %v12444_v45 = vld [vmem:[#allocation26_spill] sm:$0xff] }
 0x906   :  { %8099 = vmatprep.subr.bf16.mxu0 %v11303_v33  ;;  %8140 = vmatprep.subr.bf16.mxu1 %v11309_v53  ;;  %v12446_v33 = vld [vmem:[#allocation24_spill] sm:$0xff]  ;;  %v12449_v53 = vld [vmem:[#allocation25_spill] sm:$0xff] }
 0x909   :  { %8100 = vmatpush1.bf16.msra.mxu0 %v11305_v39  ;;  %8141 = vmatpush1.bf16.msra.mxu1 %v11307_v47  ;;  %v12447_v39 = vld [vmem:[#allocation28_spill] sm:$0xff] }
 0x90a   :  { %8101 = vmatprep.subr.bf16.mxu0 %v11315_v11  ;;  %8142 = vmatprep.subr.bf16.mxu1 %v11321_v44  ;;  %v12448_v47 = vld [vmem:[#allocation32_spill] sm:$0xff]  ;;  %v12450_v11 = vld [vmem:[#allocation31_spill] sm:$0xff]  ;;  %v12453_v44 = vld [vmem:[#allocation29_spill] sm:$0xff] }
 0x90d   :  { %8102 = vmatpush1.bf16.msra.mxu0 %v11317_v31  ;;  %8143 = vmatpush1.bf16.msra.mxu1 %v11319_v40  ;;  %v12451_v31 = vld [vmem:[#allocation33_spill] sm:$0xff]  ;;  %v12452_v40 = vld [vmem:[#allocation36_spill] sm:$0xff] }
 0x90e   :  { %8103 = vmatprep.subr.bf16.mxu0 %v11327_v23  ;;  %8144 = vmatprep.subr.bf16.mxu1 %v11333_v43  ;;  %v12454_v23 = vld [vmem:[#allocation34_spill] sm:$0xff] }
 0x90f   :  { %v12456_v43 = vld [vmem:[#allocation38_spill] sm:$0xff] }
 0x911   :  { %8104 = vmatpush1.bf16.msra.mxu0 %v11329_v1  ;;  %8145 = vmatpush1.bf16.msra.mxu1 %v12430_v27  ;;  %v12455_v1 = vld [vmem:[#allocation35_spill] sm:$0xff] }
 0x912   :  { %8105 = vmatprep.subr.bf16.mxu0 %v12431_v13  ;;  %8146 = vmatprep.subr.bf16.mxu1 %v12432_v21 }
 0x915   :  { %8106 = vmatpush1.bf16.msra.mxu0 %v12433_v12  ;;  %8147 = vmatpush1.bf16.msra.mxu1 %v12434_v62 }
 0x916   :  { %8107 = vmatprep.subr.bf16.mxu0 %v12435_v50  ;;  %8148 = vmatprep.subr.bf16.mxu1 %v12436_v36 }
 0x919   :  { %8108 = vmatpush1.bf16.msra.mxu0 %v12437_v5  ;;  %8149 = vmatpush1.bf16.msra.mxu1 %v12438_v41 }
 0x91a   :  { %8109 = vmatprep.subr.bf16.mxu0 %v12439_v20  ;;  %8150 = vmatprep.subr.bf16.mxu1 %v12440_v46 }
 0x91d   :  { %8110 = vmatpush1.bf16.msra.mxu0 %v12441_v6  ;;  %8151 = vmatpush1.bf16.msra.mxu1 %v12442_v56  ;;  %v363_v56 = vpop.permute.xlu1 %362 }
 0x91e   :  { %8111 = vmatprep.subr.bf16.mxu0 %v12443_v55  ;;  %8152 = vmatprep.subr.bf16.mxu1 %v12444_v45  ;;  %v365_v55 = vmul.f32 %v363_v56, %v12007_v58  ;;  %v366_v45 = vmul.f32 %v363_v56, %v12008_v0 }
 0x921   :  { %8112 = vmatpush1.bf16.msra.mxu0 %v12445_v15  ;;  %8153 = vmatpush1.bf16.msra.mxu1 %v12446_v33  ;;  %v367_v15 = vmul.f32 %v363_v56, %v12009_v2  ;;  %v12464_v33 = vld [vmem:[#allocation40_spill] sm:$0xff] }
 0x922   :  { %8113 = vmatprep.subr.bf16.mxu0 %v12447_v39  ;;  %8154 = vmatprep.subr.bf16.mxu1 %v12448_v47  ;;  %v12465_v39 = vld [vmem:[#allocation41_spill] sm:$0xff] }
 0x923   :  { %v369_v47 = vadd.f32 %v365_v55, %v12465_v39 }
 0x925   :  { %8114 = vmatpush1.bf16.msra.mxu0 %v12449_v53  ;;  %8155 = vmatpush1.bf16.msra.mxu1 %v12450_v11  ;;  %v370_v53 = vadd.f32 %v366_v45, %v12011_v18  ;;  %v371_v11 = vadd.f32 %v367_v15, %v12180_v7 }
 0x926   :  { %8115 = vmatprep.subr.bf16.mxu0 %v12451_v31  ;;  %8156 = vmatprep.subr.bf16.mxu1 %v12452_v40  ;;  %v12466_v31 = vld [vmem:[#allocation44_spill] sm:$0xff] }
 0x929   :  { %8116 = vmatpush1.bf16.msra.mxu0 %v12453_v44  ;;  %8157 = vmatpush1.bf16.msra.mxu1 %v12454_v23  ;;  %v377_v44 = vcombine.low %v369_v47, %v370_v53 }
 0x92a   :  { %8117 = vmatprep.subr.bf16.mxu0 %v12455_v1  ;;  %8158 = vmatprep.subr.bf16.mxu1 %v12456_v43 }
 0x92b   :  { %v385_v0 = vrot.slane %v377_v44, %v9701_v60 }
 0x92d   :  { %8118 = vmatpush1.bf16.msra.mxu0 %v12457_v28  ;;  %8159 = vmatpush1.bf16.msra.mxu1 %v12458_v3 }
 0x92e   :  { %8119 = vmatprep.subr.bf16.mxu0 %v12459_v29  ;;  %8160 = vmatprep.subr.bf16.mxu1 %v12460_v61 }
 0x931   :  { %8120 = vmatpush1.bf16.msra.mxu0 %v12461_v42  ;;  %8161 = vmatpush1.bf16.msra.mxu1 %v12462_v51 }
 0x987   :  { %v7474_v8 = vpop.f32.mrb[48].mxu0  ;;  %v7515_v22 = vpop.f32.mrb[48].mxu1 }
 0x988   :  { %v7604_v52 = vadd.f32 %v7474_v8, %v12463_v14  ;;  %v7476_v48 = vpop.f32.mrb[49].mxu0  ;;  %v7517_v32 = vpop.f32.mrb[49].mxu1  ;;  %v7606_v38 = vadd.f32 %v7515_v22, %v9990_v19 }
 0x989   :  { %v7605_v59 = vadd.f32 %v7476_v48, %v9986_v9  ;;  %v7478_v63 = vpop.f32.mrb[50].mxu0  ;;  %v7519_v30 = vpop.f32.mrb[50].mxu1  ;;  %v7607_v10 = vadd.f32 %v7517_v32, %v9995_v17 }
 0x98a   :  { %v7608_v34 = vmul.f32 0.5, %v7604_v52  ;;  %v7479_v26 = vpop.f32.mrb[51].mxu0  ;;  %v7520_v4 = vpop.f32.mrb[51].mxu1 }
 0x98b   :  { %v7612_v24 = vmul.f32 0.5, %v7605_v59  ;;  %v7617_v57 = vmul.f32 0.5, %v7607_v10 }
 0x98c   :  { %9335 = vtanh.f32 %v7608_v34 }
 0x98d   :  { %9337 = vtanh.f32 %v7612_v24 }
 0x98e   :  { %9339 = vtanh.f32 %v7606_v38 }
 0x98f   :  { %9341 = vtanh.f32 %v7617_v57 }
 0x996   :  { %v9336_v37 = vpop.eup %9335 }
 0x997   :  { %v9338_v35 = vpop.eup %9337  ;;  %v7610_v16 = vmul.f32 0.5, %v9336_v37 }
 0x998   :  { %v7614_v49 = vmul.f32 0.5, %v9338_v35  ;;  %v9340_v13 = vpop.eup %9339 }
 0x999   :  { %v7611_v27 = vadd.f32 0.5, %v7610_v16  ;;  %v9342_v36 = vpop.eup %9341 }
 0x99a   :  { %v7615_v21 = vadd.f32 0.5, %v7614_v49  ;;  %v7619_v5 = vmul.f32 0.5, %v9342_v36 }
 0x99b   :  { %v7622_v12 = vmul.f32 %v9340_v13, %v7611_v27 }
 0x99c   :  { %v7621_v62 = vmul.f32 %v7615_v21, %v11456_v54  ;;  %v7620_v41 = vadd.f32 0.5, %v7619_v5  ;;  %v368_v54 = vmul.f32 %v363_v56, %v12464_v33 }
 0x99e   :  { %v11554_v50 = vadd.f32 %v7622_v12, %v7621_v62  ;;  %v372_v40 = vadd.f32 %v368_v54, %v12466_v31 }
 0x9a0   :  { %9343 = vtanh.f32 %v11554_v50  ;;  %v378_v23 = vcombine.low %v371_v11, %v372_v40 }
 0x9a2   :  { %v392_v2 = vrot.slane %v378_v23, %v9701_v60 }
 0x9a4   :  { %v393_v22 = vcombine.low %v385_v0, %v392_v2 }
 0x9aa   :  { %v9344_v20 = vpop.eup %9343 }
 0x9ab   :  { %v7625_v46 = vmul.f32 %v9344_v20, %v7620_v41  ;;  %v12467_v20 = vld [vmem:[#allocation45_spill] sm:$0xff] }
 0x9ad   :  { %v7626_v6 = vpack.c.bf16 %v7625_v46, %v7625_v46 }
 0x9af   :  { %7627 = vst [vmem:[#allocation3 + $0x1] sm:$0x1] %v7626_v6 }
 0x9c7   :  { %v7556_v1 = vpop.f32.mrb[52].mxu0  ;;  %v7597_v43 = vpop.f32.mrb[52].mxu1 }
 0x9c8   :  { %v7558_v28 = vpop.f32.mrb[53].mxu0  ;;  %v7599_v58 = vpop.f32.mrb[53].mxu1 }
 0x9c9   :  { %v7633_v3 = vcombine.low %v7556_v1, %v7558_v28  ;;  %v7634_v29 = vcombine.low %v7597_v43, %v7599_v58  ;;  %v7560_v61 = vpop.f32.mrb[54].mxu0  ;;  %v7601_v42 = vpop.f32.mrb[54].mxu1 }
 0x9ca   :  { %v7561_v51 = vpop.f32.mrb[55].mxu0  ;;  %v7602_v18 = vpop.f32.mrb[55].mxu1 }
 0x9cb   :  { %v7641_v7 = vrot.slane %v7633_v3, %v9701_v60  ;;  %v7648_v8 = vrot.slane %v7634_v29, %v9701_v60 }
 0x9cd   :  { %v7649_v52 = vcombine.low %v7641_v7, %v7648_v8 }
 0x9cf   :  { %v7651_v48 = vadd.f32 %v7649_v52, %v393_v22  ;;  %v9196_v22 = vld [vmem:[#allocation4] ss:$0 sm:$0xff] }
 0x9d1   :  { %v7652_v32 = vmul.f32 0.5, %v7651_v48  ;;  %v7657_v59 = vrot.slane %v7651_v48, 2  ;;  %v7663_v30 = vrot.slane %v7651_v48, 4  ;;  %v7666_v34 = vrot.slane %v7651_v48, 6 }
 0x9d3   :  { %9345 = vtanh.f32 %v7652_v32  ;;  %v7659_v63 = vmul.f32 0.5, %v7657_v59  ;;  %v7668_v26 = vmul.f32 0.5, %v7666_v34 }
 0x9d5   :  { %9347 = vtanh.f32 %v7659_v63 }
 0x9d6   :  { %9349 = vtanh.f32 %v7663_v30 }
 0x9d7   :  { %9351 = vtanh.f32 %v7668_v26 }
 0x9dd   :  { %v9346_v4 = vpop.eup %9345 }
 0x9de   :  { %v7654_v24 = vmul.f32 0.5, %v9346_v4 }
 0x9df   :  { %v9348_v38 = vpop.eup %9347 }
 0x9e0   :  { %v7655_v10 = vadd.f32 0.5, %v7654_v24  ;;  %v7661_v57 = vmul.f32 0.5, %v9348_v38  ;;  %v9350_v60 = vpop.eup %9349 }
 0x9e1   :  { %v9352_v27 = vpop.eup %9351 }
 0x9e2   :  { %v7662_v37 = vadd.f32 0.5, %v7661_v57  ;;  %v7673_v16 = vmul.f32 %v9350_v60, %v7655_v10  ;;  %v7670_v13 = vmul.f32 0.5, %v9352_v27 }
 0x9e4   :  { %v7672_v35 = vmul.f32 %v7662_v37, %v11472_v25  ;;  %v7671_v21 = vadd.f32 0.5, %v7670_v13 }
 0x9e6   :  { %v7674_v49 = vadd.f32 %v7673_v16, %v7672_v35 }
 0x9e8   :  { %9353 = vtanh.f32 %v7674_v49 }
 0x9f2   :  { %v9354_v12 = vpop.eup %9353 }
 0x9f3   :  { %v7676_v62 = vmul.f32 %v9354_v12, %v7671_v21 }
 0x9f5   :  { %v7677_v36 = vpack.c.bf16 %v7676_v62, %v7676_v62 }
 0x9f7   :  { %7678 = vst [vmem:[#allocation3] sm:$0x1] %v7677_v36 }
 0x9fe   :  { %v9130_v5 = vld.sshfl [vmem:[#allocation3] sm:$0x11 pattern:$0x75316420] }
 0x9ff   :  { %v7752_v41 = vcombine.high %v9130_v5, %v9130_v5  ;;  %v7759_v6 = vrot.slane %v9130_v5, %v12467_v20 }
 0xa01   :  { %v7766_v46 = vrot.slane %v7752_v41, %v12467_v20 }
 0xa03   :  { %8121 = vmatprep.mubr.bf16.mxu0 %v7766_v46  ;;  %8162 = vmatprep.mubr.bf16.mxu1 %v7766_v46 }
 0xa04   :  { %8122 = vmatmul.mubr.bf16.vlgmr.msra.gmra.mrb[56].mxu0 %v7759_v6  ;;  %8163 = vmatmul.mubr.bf16.vlgmr.msra.gmra.mrb[56].mxu1 %v7759_v6 }
 0xad7   :  { %v8123_v25 = vpop.f32.mrb[56].mxu0  ;;  %v8164_v56 = vpop.f32.mrb[56].mxu1 }
 0xad8   :  { %v8171_v55 = vadd.f32 %v8123_v25, %v12463_v14  ;;  %v8125_v45 = vpop.f32.mrb[57].mxu0  ;;  %v8166_v15 = vpop.f32.mrb[57].mxu1  ;;  %v8173_v40 = vadd.f32 %v8164_v56, %v9990_v19 }
 0xad9   :  { %v8172_v33 = vadd.f32 %v8125_v45, %v9986_v9  ;;  %v8127_v54 = vpop.f32.mrb[58].mxu0  ;;  %v8168_v39 = vpop.f32.mrb[58].mxu1  ;;  %v8174_v44 = vadd.f32 %v8166_v15, %v9995_v17  ;;  %v9195_v17 = vld [vmem:[%s11588_s5] ss:$0 sm:$0xff] }
 0xada   :  { %v8175_v47 = vmul.f32 0.5, %v8171_v55  ;;  %v8128_v53 = vpop.f32.mrb[59].mxu0  ;;  %v8169_v11 = vpop.f32.mrb[59].mxu1 }
 0xadb   :  { %v8179_v31 = vmul.f32 0.5, %v8172_v33  ;;  %v8184_v23 = vmul.f32 0.5, %v8174_v44 }
 0xadc   :  { %9355 = vtanh.f32 %v8175_v47 }
 0xadd   :  { %9357 = vtanh.f32 %v8179_v31 }
 0xade   :  { %9359 = vtanh.f32 %v8173_v40 }
 0xadf   :  { %9361 = vtanh.f32 %v8184_v23 }
 0xae6   :  { %v9356_v1 = vpop.eup %9355 }
 0xae7   :  { %v9358_v14 = vpop.eup %9357  ;;  %v8177_v43 = vmul.f32 0.5, %v9356_v1 }
 0xae8   :  { %v8181_v28 = vmul.f32 0.5, %v9358_v14  ;;  %v9360_v58 = vpop.eup %9359 }
 0xae9   :  { %v8178_v9 = vadd.f32 0.5, %v8177_v43  ;;  %v9362_v61 = vpop.eup %9361 }
 0xaea   :  { %v8182_v0 = vadd.f32 0.5, %v8181_v28  ;;  %v8186_v19 = vmul.f32 0.5, %v9362_v61 }
 0xaeb   :  { %v8189_v2 = vmul.f32 %v9360_v58, %v8178_v9 }
 0xaec   :  { %v8188_v3 = vmul.f32 %v8182_v0, %v11554_v50  ;;  %v8187_v42 = vadd.f32 0.5, %v8186_v19 }
 0xaee   :  { %v8190_v29 = vadd.f32 %v8189_v2, %v8188_v3 }
 0xaf0   :  { %9363 = vtanh.f32 %v8190_v29 }
 0xafa   :  { %v9364_v51 = vpop.eup %9363 }
 0xafb   :  { %v8192_v18 = vmul.f32 %v9364_v51, %v8187_v42 }
 0xafd   :  { %v8200_v7 = vmul.f32 %v9195_v17, %v8192_v18 }
 0xaff   :  { %v8202_v8 = vsel %vm8201_vm0, %v8200_v7, 0.0 }
 0xb00   :  { %8203 = vadd.xlane.f32.xlu0 %v8202_v8 }
 0xb8d   :  { %v8204_v52 = vpop.xlane.xlu0 %8203 }
 0xb8e   :  { %v8212_v48 = vadd.f32 %v9196_v22, %v8204_v52 }
 0xb90   :  { %8214 = vst.msk [vmem:[%s11590_s7] sm:$0x3] %vm8213_vm1, %v8212_v48 }
 0xb91   :  { %8219 = vsyncpa [#allocation6], 1 }

</bundles_post_ra>
